<compile_context>
chip_gen: v7x
topology: tpu7x:2x2x1
jax: 0.10.0
libtpu: 0.0.40
codegen_flags: <defaults>
</compile_context>

<pallas_src>
import jax
import jax.numpy as jnp
from jax.experimental import pallas as pl
from jax.experimental.pallas import tpu as pltpu


def _round_up(n, m):
    return ((n + m - 1) // m) * m


def _num_tensorcores():
    """v7x has 2 TensorCores per chip; earlier generations have 1."""
    try:
        kind = jax.devices()[0].device_kind.lower()
        return 2 if ("v7" in kind or "tpu7" in kind) else 1
    except Exception:
        return 1


def _choose_batch_tile(batch, num_tensorcores):
    if num_tensorcores >= 2:
        # v7x: split the batch across the two TensorCores (grid = 2*k).
        half = _round_up(pl.cdiv(batch, 2), 32)
        return max(32, min(512, half))
    # Single-TC chips (v5e/v6e): the grid is a serial loop -> one big tile
    # (grid of 1 for B <= 512), tile capped at 512 for larger batches.
    return max(32, min(512, _round_up(batch, 32)))


# ----------------------------- Pallas kernel ------------------------------- #
def _make_enc_dec_kernel(batch_tile, n_sub):
    sub = batch_tile // n_sub

    def enc_dec_kernel(x_ref,
                       we1, be1, we2, be2,      # rtf2hidden_model
                       wp1, bp1, wp2, bp2,      # rtf_project
                       wd1, bd1, wd2, bd2,      # rtf_deproj
                       wf1, bf1, wf2, bf2,      # rtf2fft_model
                       out_ref):
        f32, bf16 = jnp.float32, jnp.bfloat16

        def dense(a, w_ref, b_ref):
            # bf16 x bf16 MXU matmul, f32 accumulation; (1, N) f32 bias.
            return jnp.dot(a.astype(bf16), w_ref[...],
                           preferred_element_type=f32) + b_ref[...]

        def chain(x):
            # ----- rtf2hidden_model (encoder MLP: Linear -> GELU -> Linear)
            h = jax.nn.gelu(dense(x, we1, be1))
            rtf_features = dense(h, we2, be2)
            # ----- rtf_project (Linear -> ReLU -> Linear)
            p = jnp.maximum(dense(rtf_features, wp1, bp1), 0.0)
            proj_h = dense(p, wp2, bp2)
            # ----- rtf_deproj (Linear -> ReLU -> Linear)
            d = jnp.maximum(dense(proj_h, wd1, bd1), 0.0)
            deproj_h = dense(d, wd2, bd2)
            # ----- rtf2fft_model (decoder MLP: Linear -> GELU -> Linear)
            g = jax.nn.gelu(dense(deproj_h, wf1, bf1))
            return dense(g, wf2, bf2)

        # n_sub independent row-chains emitted into one basic block: the LLO
        # scheduler can interleave the matmuls of one half with the VPU/EUP
        # (gelu/relu/bias/cast) work of the other, hiding MXU fill/drain.
        for s in range(n_sub):
            rows = pl.ds(s * sub, sub)
            out_ref[rows, :] = chain(x_ref[rows, :]).astype(out_ref.dtype)

    return enc_dec_kernel


# --------------------------- one-time weight prep --------------------------- #
def prepare_params(params):
    """One-time preparation: pad feature dims to multiples of 128 and cast
    weights to bf16 (biases stay f32, shape (1, N)).  Call once, reuse the
    result across encoder_decoder() calls so the per-call path has zero
    pad/convert overhead."""
    RTF = params["we1"].shape[0]
    HID = params["we1"].shape[1]
    PROJ = params["wp1"].shape[1]
    RTF_p, HID_p, PROJ_p = (_round_up(d, 128) for d in (RTF, HID, PROJ))

    layer_dims = [
        ("we1", "be1", RTF_p, HID_p),
        ("we2", "be2", HID_p, HID_p),
        ("wp1", "bp1", HID_p, PROJ_p),
        ("wp2", "bp2", PROJ_p, PROJ_p),
        ("wd1", "bd1", PROJ_p, HID_p),
        ("wd2", "bd2", HID_p, HID_p),
        ("wf1", "bf1", HID_p, HID_p),
        ("wf2", "bf2", HID_p, RTF_p),
    ]

    weight_args = []
    for wn, bn, r, c in layer_dims:
        w, b = params[wn], params[bn]
        w = jnp.pad(w, ((0, r - w.shape[0]), (0, c - w.shape[1])))
        b = jnp.pad(b, ((0, 0), (0, c - b.shape[1])))
        weight_args += [w.astype(jnp.bfloat16), b.astype(jnp.float32)]

    return {
        "weights": tuple(weight_args),
        "rtf_dim": RTF,
        "padded_dims": (RTF_p, HID_p, PROJ_p),
        "layer_dims": tuple((r, c) for _, _, r, c in layer_dims),
    }


# ------------------------------- wrapper ------------------------------------ #
def encoder_decoder(x, prepared, *, batch_tile=None, out_dtype=jnp.float32,
                    num_tensorcores=None):
    """x: (B, RTF) float32; prepared: output of prepare_params (a raw params
    dict is also accepted and prepared on the fly).

    Returns {'rtf_features': (B, RTF)} -- the rtf2fft decoder output dict,
    matching what the PyTorch forward returns (`return rtf_fft`)."""
    if "weights" not in prepared:
        prepared = prepare_params(prepared)

    weight_args = list(prepared["weights"])
    RTF = prepared["rtf_dim"]
    RTF_p, HID_p, _ = prepared["padded_dims"]
    layer_dims = prepared["layer_dims"]

    B, RTF_in = x.shape
    assert RTF_in == RTF, "input feature dim does not match prepared params"

    if num_tensorcores is None:
        num_tensorcores = _num_tensorcores()
    if batch_tile is None:
        batch_tile = _choose_batch_tile(B, num_tensorcores)

    # On 2-TC chips keep the grid an exact multiple of the core count.
    grid_quantum = batch_tile * (2 if num_tensorcores >= 2 else 1)
    B_p = _round_up(B, grid_quantum)
    x_p = jnp.pad(x, ((0, B_p - B), (0, RTF_p - RTF))).astype(jnp.bfloat16)

    grid = (B_p // batch_tile,)
    # Split each tile into two interleaved half-chains only when the tile is
    # large enough that each half still feeds the MXU well (>= 256 rows).
    n_sub = 2 if batch_tile >= 512 else 1

    # Weights/biases: whole-array, single-buffered, resident in VMEM for the
    # entire grid (no per-step re-DMA, no double buffering).
    resident_spec = pl.BlockSpec(memory_space=pltpu.MemorySpace.VMEM)
    in_specs = [pl.BlockSpec((batch_tile, RTF_p), lambda i: (i, 0))]
    in_specs += [resident_spec] * len(weight_args)

    out_itemsize = jnp.dtype(out_dtype).itemsize
    weight_bytes = sum(int(a.size) * a.dtype.itemsize for a in weight_args)
    io_tile_bytes = batch_tile * RTF_p * (2 + out_itemsize)        # x + out tile
    act_bytes = batch_tile * max(RTF_p, HID_p) * 4 * 4             # f32 intermediates
    footprint = weight_bytes + 2 * io_tile_bytes + act_bytes       # 2x: double buffer
    vmem_limit = int(min(32 << 20, max(16 << 20, 4 * footprint)))

    flops = 2 * B_p * sum(r * c for r, c in layer_dims)
    transcendentals = 2 * B_p * HID_p                               # two GELU layers
    bytes_accessed = (x_p.size * 2 + B_p * RTF_p * out_itemsize + weight_bytes)

    out = pl.pallas_call(
        _make_enc_dec_kernel(batch_tile, n_sub),
        out_shape=jax.ShapeDtypeStruct((B_p, RTF_p), out_dtype),
        grid=grid,
        in_specs=in_specs,
        out_specs=pl.BlockSpec((batch_tile, RTF_p), lambda i: (i, 0)),
        compiler_params=pltpu.CompilerParams(
            dimension_semantics=("parallel",),
            vmem_limit_bytes=vmem_limit),
        cost_estimate=pl.CostEstimate(
            flops=int(flops),
            transcendentals=int(transcendentals),
            bytes_accessed=int(bytes_accessed)),
    )(x_p, *weight_args)

    return {"rtf_features": out[:B, :RTF]}


# ------------------------- deterministic params ----------------------------- #
def init_params(key, rtf_dim, hidden_dim, proj_dim):
    def linear(k, fan_in, fan_out):
        kw, kb = jax.random.split(k)
        scale = 1.0 / jnp.sqrt(fan_in)
        w = jax.random.uniform(kw, (fan_in, fan_out), jnp.float32, -scale, scale)
        b = jax.random.uniform(kb, (1, fan_out), jnp.float32, -scale, scale)
        return w, b

    keys = jax.random.split(key, 8)
    p = {}
    # encoder RtfModel: rtf -> hidden -> hidden
    p["we1"], p["be1"] = linear(keys[0], rtf_dim, hidden_dim)
    p["we2"], p["be2"] = linear(keys[1], hidden_dim, hidden_dim)
    # rtf_project: hidden -> proj -> proj
    p["wp1"], p["bp1"] = linear(keys[2], hidden_dim, proj_dim)
    p["wp2"], p["bp2"] = linear(keys[3], proj_dim, proj_dim)
    # rtf_deproj (decoder config): proj -> hidden -> hidden
    p["wd1"], p["bd1"] = linear(keys[4], proj_dim, hidden_dim)
    p["wd2"], p["bd2"] = linear(keys[5], hidden_dim, hidden_dim)
    # decoder RtfModel (rtf2fft): hidden -> hidden -> rtf
    p["wf1"], p["bf1"] = linear(keys[6], hidden_dim, hidden_dim)
    p["wf2"], p["bf2"] = linear(keys[7], hidden_dim, rtf_dim)
    return p


# --------------------------- pure-JAX reference ----------------------------- #
def reference(x, p):
    """Mirrors the kernel numerics: bf16 matmul inputs, f32 accumulation."""
    bf16, f32 = jnp.bfloat16, jnp.float32

    def dense(a, w, b):
        return jnp.dot(a.astype(bf16), w.astype(bf16),
                       preferred_element_type=f32) + b

    h = jax.nn.gelu(dense(x, p["we1"], p["be1"]))
    rtf_features = dense(h, p["we2"], p["be2"])
    q = jnp.maximum(dense(rtf_features, p["wp1"], p["bp1"]), 0.0)
    proj_h = dense(q, p["wp2"], p["bp2"])
    d = jnp.maximum(dense(proj_h, p["wd1"], p["bd1"]), 0.0)
    deproj_h = dense(d, p["wd2"], p["bd2"])
    g = jax.nn.gelu(dense(deproj_h, p["wf1"], p["bf1"]))
    return dense(g, p["wf2"], p["bf2"])


if __name__ == "__main__":
    # RTF = 257 (512-pt FFT bins, deliberately NOT a multiple of 128 to
    # exercise lane padding), hidden/proj = 256 (MXU friendly).
    RTF, HID, PROJ = 257, 256, 256

    key = jax.random.PRNGKey(0)
    k_x, k_p, k_x2 = jax.random.split(key, 3)
    params = init_params(k_p, RTF, HID, PROJ)
    prepared = prepare_params(params)          # one-time pad + bf16 cast

    # --- case 1: moderate batch, f32 output -------------------------------- #
    B = 256
    x = jax.random.normal(k_x, (B, RTF), dtype=jnp.float32)
    out = encoder_decoder(x, prepared)
    rtf_fft = jax.block_until_ready(out["rtf_features"])
    ref = reference(x, params)
    assert rtf_fft.shape == (B, RTF)
    assert jnp.allclose(rtf_fft, ref, atol=3e-2, rtol=3e-2), "mismatch (B=256)"

    # --- case 2: large batch, bf16 output ---------------------------------- #
    # Exercises the 512-row tile with two interleaved half-chains and the
    # halved (bf16) output writeback.
    B2 = 1024
    x2 = jax.random.normal(k_x2, (B2, RTF), dtype=jnp.float32)
    out2 = encoder_decoder(x2, prepared, out_dtype=jnp.bfloat16)
    rtf_fft2 = jax.block_until_ready(out2["rtf_features"])
    ref2 = reference(x2, params)
    assert rtf_fft2.shape == (B2, RTF)
    assert jnp.allclose(rtf_fft2.astype(jnp.float32), ref2,
                        atol=5e-2, rtol=5e-2), "mismatch (B=1024, bf16 out)"

    print("KERNEL_OK")
</pallas_src>

<mosaic_0001>
module attributes {stable_mosaic.version = 11 : i64} {
  func.func @enc_dec_kernel(%arg0: i32, %arg1: memref<256x384xbf16, #tpu.memory_space<vmem>>, %arg2: memref<384x256xbf16, #tpu.memory_space<vmem>>, %arg3: memref<1x256xf32, #tpu.memory_space<vmem>>, %arg4: memref<256x256xbf16, #tpu.memory_space<vmem>>, %arg5: memref<1x256xf32, #tpu.memory_space<vmem>>, %arg6: memref<256x256xbf16, #tpu.memory_space<vmem>>, %arg7: memref<1x256xf32, #tpu.memory_space<vmem>>, %arg8: memref<256x256xbf16, #tpu.memory_space<vmem>>, %arg9: memref<1x256xf32, #tpu.memory_space<vmem>>, %arg10: memref<256x256xbf16, #tpu.memory_space<vmem>>, %arg11: memref<1x256xf32, #tpu.memory_space<vmem>>, %arg12: memref<256x256xbf16, #tpu.memory_space<vmem>>, %arg13: memref<1x256xf32, #tpu.memory_space<vmem>>, %arg14: memref<256x256xbf16, #tpu.memory_space<vmem>>, %arg15: memref<1x256xf32, #tpu.memory_space<vmem>>, %arg16: memref<256x384xbf16, #tpu.memory_space<vmem>>, %arg17: memref<1x384xf32, #tpu.memory_space<vmem>>, %arg18: memref<256x384xf32, #tpu.memory_space<vmem>>) attributes {dimension_semantics = [#tpu.dimension_semantics<parallel>], iteration_bounds = array<i64: 1>, scalar_prefetch = 0 : i64, scratch_operands = 0 : i64, tpu.core_type = #tpu.core_type<tc>, window_params = [{transform_indices = @transform_0, window_bounds = array<i64: 256, 384>}, {pipeline_mode = #tpu.pipeline_mode<synchronous>, transform_indices = @transform_1, window_bounds = array<i64: 384, 256>}, {pipeline_mode = #tpu.pipeline_mode<synchronous>, transform_indices = @transform_2, window_bounds = array<i64: 1, 256>}, {pipeline_mode = #tpu.pipeline_mode<synchronous>, transform_indices = @transform_3, window_bounds = array<i64: 256, 256>}, {pipeline_mode = #tpu.pipeline_mode<synchronous>, transform_indices = @transform_4, window_bounds = array<i64: 1, 256>}, {pipeline_mode = #tpu.pipeline_mode<synchronous>, transform_indices = @transform_5, window_bounds = array<i64: 256, 256>}, {pipeline_mode = #tpu.pipeline_mode<synchronous>, transform_indices = @transform_6, window_bounds = array<i64: 1, 256>}, {pipeline_mode = #tpu.pipeline_mode<synchronous>, transform_indices = @transform_7, window_bounds = array<i64: 256, 256>}, {pipeline_mode = #tpu.pipeline_mode<synchronous>, transform_indices = @transform_8, window_bounds = array<i64: 1, 256>}, {pipeline_mode = #tpu.pipeline_mode<synchronous>, transform_indices = @transform_9, window_bounds = array<i64: 256, 256>}, {pipeline_mode = #tpu.pipeline_mode<synchronous>, transform_indices = @transform_10, window_bounds = array<i64: 1, 256>}, {pipeline_mode = #tpu.pipeline_mode<synchronous>, transform_indices = @transform_11, window_bounds = array<i64: 256, 256>}, {pipeline_mode = #tpu.pipeline_mode<synchronous>, transform_indices = @transform_12, window_bounds = array<i64: 1, 256>}, {pipeline_mode = #tpu.pipeline_mode<synchronous>, transform_indices = @transform_13, window_bounds = array<i64: 256, 256>}, {pipeline_mode = #tpu.pipeline_mode<synchronous>, transform_indices = @transform_14, window_bounds = array<i64: 1, 256>}, {pipeline_mode = #tpu.pipeline_mode<synchronous>, transform_indices = @transform_15, window_bounds = array<i64: 256, 384>}, {pipeline_mode = #tpu.pipeline_mode<synchronous>, transform_indices = @transform_16, window_bounds = array<i64: 1, 384>}, {transform_indices = @transform_17, window_bounds = array<i64: 256, 384>}]} {
    %c0 = arith.constant 0 : index
    %c0_0 = arith.constant 0 : index
    %0 = vector.load %arg1[%c0, %c0_0] : memref<256x384xbf16, #tpu.memory_space<vmem>>, vector<256x384xbf16>
    %c0_1 = arith.constant 0 : index
    %c0_2 = arith.constant 0 : index
    %1 = vector.load %arg2[%c0_1, %c0_2] : memref<384x256xbf16, #tpu.memory_space<vmem>>, vector<384x256xbf16>
    %cst = arith.constant dense<0.000000e+00> : vector<256x256xf32>
    %2 = tpu.matmul %0, %1, %cst {dimension_numbers = #tpu.dot_dimension_numbers<[1], [0], [0], [1], [0, 0, 1, 1], [], []>} : vector<256x384xbf16>, vector<384x256xbf16>, vector<256x256xf32> -> vector<256x256xf32>
    %c0_3 = arith.constant 0 : index
    %c0_4 = arith.constant 0 : index
    %3 = vector.load %arg3[%c0_3, %c0_4] : memref<1x256xf32, #tpu.memory_space<vmem>>, vector<1x256xf32>
    %4 = vector.broadcast %3 : vector<1x256xf32> to vector<256x256xf32>
    %5 = arith.addf %2, %4 : vector<256x256xf32>
    %6 = arith.mulf %5, %5 : vector<256x256xf32>
    %7 = arith.mulf %5, %6 : vector<256x256xf32>
    %cst_5 = arith.constant 4.471500e-02 : f32
    %8 = vector.broadcast %cst_5 : f32 to vector<256x256xf32>
    %9 = arith.mulf %8, %7 : vector<256x256xf32>
    %10 = arith.addf %5, %9 : vector<256x256xf32>
    %cst_6 = arith.constant 0.797884583 : f32
    %11 = vector.broadcast %cst_6 : f32 to vector<256x256xf32>
    %12 = arith.mulf %11, %10 : vector<256x256xf32>
    %13 = math.tanh %12 : vector<256x256xf32>
    %cst_7 = arith.constant 1.000000e+00 : f32
    %14 = vector.broadcast %cst_7 : f32 to vector<256x256xf32>
    %15 = arith.addf %14, %13 : vector<256x256xf32>
    %cst_8 = arith.constant 5.000000e-01 : f32
    %16 = vector.broadcast %cst_8 : f32 to vector<256x256xf32>
    %17 = arith.mulf %16, %15 : vector<256x256xf32>
    %18 = arith.mulf %5, %17 : vector<256x256xf32>
    %19 = arith.truncf %18 : vector<256x256xf32> to vector<256x256xbf16>
    %c0_9 = arith.constant 0 : index
    %c0_10 = arith.constant 0 : index
    %20 = vector.load %arg4[%c0_9, %c0_10] : memref<256x256xbf16, #tpu.memory_space<vmem>>, vector<256x256xbf16>
    %cst_11 = arith.constant dense<0.000000e+00> : vector<256x256xf32>
    %21 = tpu.matmul %19, %20, %cst_11 {dimension_numbers = #tpu.dot_dimension_numbers<[1], [0], [0], [1], [0, 0, 1, 1], [], []>} : vector<256x256xbf16>, vector<256x256xbf16>, vector<256x256xf32> -> vector<256x256xf32>
    %c0_12 = arith.constant 0 : index
    %c0_13 = arith.constant 0 : index
    %22 = vector.load %arg5[%c0_12, %c0_13] : memref<1x256xf32, #tpu.memory_space<vmem>>, vector<1x256xf32>
    %23 = vector.broadcast %22 : vector<1x256xf32> to vector<256x256xf32>
    %24 = arith.addf %21, %23 : vector<256x256xf32>
    %25 = arith.truncf %24 : vector<256x256xf32> to vector<256x256xbf16>
    %c0_14 = arith.constant 0 : index
    %c0_15 = arith.constant 0 : index
    %26 = vector.load %arg6[%c0_14, %c0_15] : memref<256x256xbf16, #tpu.memory_space<vmem>>, vector<256x256xbf16>
    %cst_16 = arith.constant dense<0.000000e+00> : vector<256x256xf32>
    %27 = tpu.matmul %25, %26, %cst_16 {dimension_numbers = #tpu.dot_dimension_numbers<[1], [0], [0], [1], [0, 0, 1, 1], [], []>} : vector<256x256xbf16>, vector<256x256xbf16>, vector<256x256xf32> -> vector<256x256xf32>
    %c0_17 = arith.constant 0 : index
    %c0_18 = arith.constant 0 : index
    %28 = vector.load %arg7[%c0_17, %c0_18] : memref<1x256xf32, #tpu.memory_space<vmem>>, vector<1x256xf32>
    %29 = vector.broadcast %28 : vector<1x256xf32> to vector<256x256xf32>
    %30 = arith.addf %27, %29 : vector<256x256xf32>
    %cst_19 = arith.constant 0.000000e+00 : f32
    %31 = vector.broadcast %cst_19 : f32 to vector<256x256xf32>
    %32 = arith.maximumf %30, %31 : vector<256x256xf32>
    %33 = arith.truncf %32 : vector<256x256xf32> to vector<256x256xbf16>
    %c0_20 = arith.constant 0 : index
    %c0_21 = arith.constant 0 : index
    %34 = vector.load %arg8[%c0_20, %c0_21] : memref<256x256xbf16, #tpu.memory_space<vmem>>, vector<256x256xbf16>
    %cst_22 = arith.constant dense<0.000000e+00> : vector<256x256xf32>
    %35 = tpu.matmul %33, %34, %cst_22 {dimension_numbers = #tpu.dot_dimension_numbers<[1], [0], [0], [1], [0, 0, 1, 1], [], []>} : vector<256x256xbf16>, vector<256x256xbf16>, vector<256x256xf32> -> vector<256x256xf32>
    %c0_23 = arith.constant 0 : index
    %c0_24 = arith.constant 0 : index
    %36 = vector.load %arg9[%c0_23, %c0_24] : memref<1x256xf32, #tpu.memory_space<vmem>>, vector<1x256xf32>
    %37 = vector.broadcast %36 : vector<1x256xf32> to vector<256x256xf32>
    %38 = arith.addf %35, %37 : vector<256x256xf32>
    %39 = arith.truncf %38 : vector<256x256xf32> to vector<256x256xbf16>
    %c0_25 = arith.constant 0 : index
    %c0_26 = arith.constant 0 : index
    %40 = vector.load %arg10[%c0_25, %c0_26] : memref<256x256xbf16, #tpu.memory_space<vmem>>, vector<256x256xbf16>
    %cst_27 = arith.constant dense<0.000000e+00> : vector<256x256xf32>
    %41 = tpu.matmul %39, %40, %cst_27 {dimension_numbers = #tpu.dot_dimension_numbers<[1], [0], [0], [1], [0, 0, 1, 1], [], []>} : vector<256x256xbf16>, vector<256x256xbf16>, vector<256x256xf32> -> vector<256x256xf32>
    %c0_28 = arith.constant 0 : index
    %c0_29 = arith.constant 0 : index
    %42 = vector.load %arg11[%c0_28, %c0_29] : memref<1x256xf32, #tpu.memory_space<vmem>>, vector<1x256xf32>
    %43 = vector.broadcast %42 : vector<1x256xf32> to vector<256x256xf32>
    %44 = arith.addf %41, %43 : vector<256x256xf32>
    %cst_30 = arith.constant 0.000000e+00 : f32
    %45 = vector.broadcast %cst_30 : f32 to vector<256x256xf32>
    %46 = arith.maximumf %44, %45 : vector<256x256xf32>
    %47 = arith.truncf %46 : vector<256x256xf32> to vector<256x256xbf16>
    %c0_31 = arith.constant 0 : index
    %c0_32 = arith.constant 0 : index
    %48 = vector.load %arg12[%c0_31, %c0_32] : memref<256x256xbf16, #tpu.memory_space<vmem>>, vector<256x256xbf16>
    %cst_33 = arith.constant dense<0.000000e+00> : vector<256x256xf32>
    %49 = tpu.matmul %47, %48, %cst_33 {dimension_numbers = #tpu.dot_dimension_numbers<[1], [0], [0], [1], [0, 0, 1, 1], [], []>} : vector<256x256xbf16>, vector<256x256xbf16>, vector<256x256xf32> -> vector<256x256xf32>
    %c0_34 = arith.constant 0 : index
    %c0_35 = arith.constant 0 : index
    %50 = vector.load %arg13[%c0_34, %c0_35] : memref<1x256xf32, #tpu.memory_space<vmem>>, vector<1x256xf32>
    %51 = vector.broadcast %50 : vector<1x256xf32> to vector<256x256xf32>
    %52 = arith.addf %49, %51 : vector<256x256xf32>
    %53 = arith.truncf %52 : vector<256x256xf32> to vector<256x256xbf16>
    %c0_36 = arith.constant 0 : index
    %c0_37 = arith.constant 0 : index
    %54 = vector.load %arg14[%c0_36, %c0_37] : memref<256x256xbf16, #tpu.memory_space<vmem>>, vector<256x256xbf16>
    %cst_38 = arith.constant dense<0.000000e+00> : vector<256x256xf32>
    %55 = tpu.matmul %53, %54, %cst_38 {dimension_numbers = #tpu.dot_dimension_numbers<[1], [0], [0], [1], [0, 0, 1, 1], [], []>} : vector<256x256xbf16>, vector<256x256xbf16>, vector<256x256xf32> -> vector<256x256xf32>
    %c0_39 = arith.constant 0 : index
    %c0_40 = arith.constant 0 : index
    %56 = vector.load %arg15[%c0_39, %c0_40] : memref<1x256xf32, #tpu.memory_space<vmem>>, vector<1x256xf32>
    %57 = vector.broadcast %56 : vector<1x256xf32> to vector<256x256xf32>
    %58 = arith.addf %55, %57 : vector<256x256xf32>
    %59 = arith.mulf %58, %58 : vector<256x256xf32>
    %60 = arith.mulf %58, %59 : vector<256x256xf32>
    %cst_41 = arith.constant 4.471500e-02 : f32
    %61 = vector.broadcast %cst_41 : f32 to vector<256x256xf32>
    %62 = arith.mulf %61, %60 : vector<256x256xf32>
    %63 = arith.addf %58, %62 : vector<256x256xf32>
    %cst_42 = arith.constant 0.797884583 : f32
    %64 = vector.broadcast %cst_42 : f32 to vector<256x256xf32>
    %65 = arith.mulf %64, %63 : vector<256x256xf32>
    %66 = math.tanh %65 : vector<256x256xf32>
    %cst_43 = arith.constant 1.000000e+00 : f32
    %67 = vector.broadcast %cst_43 : f32 to vector<256x256xf32>
    %68 = arith.addf %67, %66 : vector<256x256xf32>
    %cst_44 = arith.constant 5.000000e-01 : f32
    %69 = vector.broadcast %cst_44 : f32 to vector<256x256xf32>
    %70 = arith.mulf %69, %68 : vector<256x256xf32>
    %71 = arith.mulf %58, %70 : vector<256x256xf32>
    %72 = arith.truncf %71 : vector<256x256xf32> to vector<256x256xbf16>
    %c0_45 = arith.constant 0 : index
    %c0_46 = arith.constant 0 : index
    %73 = vector.load %arg16[%c0_45, %c0_46] : memref<256x384xbf16, #tpu.memory_space<vmem>>, vector<256x384xbf16>
    %cst_47 = arith.constant dense<0.000000e+00> : vector<256x384xf32>
    %74 = tpu.matmul %72, %73, %cst_47 {dimension_numbers = #tpu.dot_dimension_numbers<[1], [0], [0], [1], [0, 0, 1, 1], [], []>} : vector<256x256xbf16>, vector<256x384xbf16>, vector<256x384xf32> -> vector<256x384xf32>
    %c0_48 = arith.constant 0 : index
    %c0_49 = arith.constant 0 : index
    %75 = vector.load %arg17[%c0_48, %c0_49] : memref<1x384xf32, #tpu.memory_space<vmem>>, vector<1x384xf32>
    %76 = vector.broadcast %75 : vector<1x384xf32> to vector<256x384xf32>
    %77 = arith.addf %74, %76 : vector<256x384xf32>
    %c0_50 = arith.constant 0 : index
    %c0_51 = arith.constant 0 : index
    %78 = vector.load %arg18[%c0_50, %c0_51] : memref<256x384xf32, #tpu.memory_space<vmem>>, vector<256x384xf32>
    tpu.vector_store %arg18[%c0_50, %c0_51], %77 {strides = array<i32>} : memref<256x384xf32, #tpu.memory_space<vmem>>, vector<256x384xf32>,
    return
  }
  func.func @transform_0(%arg0: i32) -> (i32, i32) {
    %c0_i32 = arith.constant 0 : i32
    %c0_i32_0 = arith.constant 0 : i32
    return %arg0, %c0_i32 : i32, i32
  }
  func.func @transform_1(%arg0: i32) -> (i32, i32) {
    %c0_i32 = arith.constant 0 : i32
    %c0_i32_0 = arith.constant 0 : i32
    %c0_i32_1 = arith.constant 0 : i32
    return %c0_i32, %c0_i32_0 : i32, i32
  }
  func.func @transform_2(%arg0: i32) -> (i32, i32) {
    %c0_i32 = arith.constant 0 : i32
    %c0_i32_0 = arith.constant 0 : i32
    %c0_i32_1 = arith.constant 0 : i32
    return %c0_i32, %c0_i32_0 : i32, i32
  }
  func.func @transform_3(%arg0: i32) -> (i32, i32) {
    %c0_i32 = arith.constant 0 : i32
    %c0_i32_0 = arith.constant 0 : i32
    %c0_i32_1 = arith.constant 0 : i32
    return %c0_i32, %c0_i32_0 : i32, i32
  }
  func.func @transform_4(%arg0: i32) -> (i32, i32) {
    %c0_i32 = arith.constant 0 : i32
    %c0_i32_0 = arith.constant 0 : i32
    %c0_i32_1 = arith.constant 0 : i32
    return %c0_i32, %c0_i32_0 : i32, i32
  }
  func.func @transform_5(%arg0: i32) -> (i32, i32) {
    %c0_i32 = arith.constant 0 : i32
    %c0_i32_0 = arith.constant 0 : i32
    %c0_i32_1 = arith.constant 0 : i32
    return %c0_i32, %c0_i32_0 : i32, i32
  }
  func.func @transform_6(%arg0: i32) -> (i32, i32) {
    %c0_i32 = arith.constant 0 : i32
    %c0_i32_0 = arith.constant 0 : i32
    %c0_i32_1 = arith.constant 0 : i32
    return %c0_i32, %c0_i32_0 : i32, i32
  }
  func.func @transform_7(%arg0: i32) -> (i32, i32) {
    %c0_i32 = arith.constant 0 : i32
    %c0_i32_0 = arith.constant 0 : i32
    %c0_i32_1 = arith.constant 0 : i32
    return %c0_i32, %c0_i32_0 : i32, i32
  }
  func.func @transform_8(%arg0: i32) -> (i32, i32) {
    %c0_i32 = arith.constant 0 : i32
    %c0_i32_0 = arith.constant 0 : i32
    %c0_i32_1 = arith.constant 0 : i32
    return %c0_i32, %c0_i32_0 : i32, i32
  }
  func.func @transform_9(%arg0: i32) -> (i32, i32) {
    %c0_i32 = arith.constant 0 : i32
    %c0_i32_0 = arith.constant 0 : i32
    %c0_i32_1 = arith.constant 0 : i32
    return %c0_i32, %c0_i32_0 : i32, i32
  }
  func.func @transform_10(%arg0: i32) -> (i32, i32) {
    %c0_i32 = arith.constant 0 : i32
    %c0_i32_0 = arith.constant 0 : i32
    %c0_i32_1 = arith.constant 0 : i32
    return %c0_i32, %c0_i32_0 : i32, i32
  }
  func.func @transform_11(%arg0: i32) -> (i32, i32) {
    %c0_i32 = arith.constant 0 : i32
    %c0_i32_0 = arith.constant 0 : i32
    %c0_i32_1 = arith.constant 0 : i32
    return %c0_i32, %c0_i32_0 : i32, i32
  }
  func.func @transform_12(%arg0: i32) -> (i32, i32) {
    %c0_i32 = arith.constant 0 : i32
    %c0_i32_0 = arith.constant 0 : i32
    %c0_i32_1 = arith.constant 0 : i32
    return %c0_i32, %c0_i32_0 : i32, i32
  }
  func.func @transform_13(%arg0: i32) -> (i32, i32) {
    %c0_i32 = arith.constant 0 : i32
    %c0_i32_0 = arith.constant 0 : i32
    %c0_i32_1 = arith.constant 0 : i32
    return %c0_i32, %c0_i32_0 : i32, i32
  }
  func.func @transform_14(%arg0: i32) -> (i32, i32) {
    %c0_i32 = arith.constant 0 : i32
    %c0_i32_0 = arith.constant 0 : i32
    %c0_i32_1 = arith.constant 0 : i32
    return %c0_i32, %c0_i32_0 : i32, i32
  }
  func.func @transform_15(%arg0: i32) -> (i32, i32) {
    %c0_i32 = arith.constant 0 : i32
    %c0_i32_0 = arith.constant 0 : i32
    %c0_i32_1 = arith.constant 0 : i32
    return %c0_i32, %c0_i32_0 : i32, i32
  }
  func.func @transform_16(%arg0: i32) -> (i32, i32) {
    %c0_i32 = arith.constant 0 : i32
    %c0_i32_0 = arith.constant 0 : i32
    %c0_i32_1 = arith.constant 0 : i32
    return %c0_i32, %c0_i32_0 : i32, i32
  }
  func.func @transform_17(%arg0: i32) -> (i32, i32) {
    %c0_i32 = arith.constant 0 : i32
    %c0_i32_0 = arith.constant 0 : i32
    return %arg0, %c0_i32 : i32, i32
  }
}

</mosaic_0001>

<bundles_post_ra>
// kernel: tpu_custom_call.1
= control target key start
LH: loop header
LB: loop body
LE: loop exit
PB: predicated region body
PF: predicated region fallthrough
CT: control target
= control target key end

     0   :  { %s9527_s0 = inlined_call_operand.hbm [shape: bf16[256,384], index: 0, kind: input, shape index: {}]   ;;  %s9528_s1 = inlined_call_operand.hbm [shape: bf16[384,256], index: 1, kind: input, shape index: {}]   ;;  %s9529_s2 = inlined_call_operand.vmem [shape: f32[1,256], index: 2, kind: input, shape index: {}]   ;;  %s9530_s3 = inlined_call_operand.hbm [shape: bf16[256,256], index: 3, kind: input, shape index: {}]   ;;  %s9531_s4 = inlined_call_operand.vmem [shape: f32[1,256], index: 4, kind: input, shape index: {}]   ;;  %s9532_s5 = inlined_call_operand.hbm [shape: bf16[256,256], index: 5, kind: input, shape index: {}]   ;;  %s9533_s6 = inlined_call_operand.vmem [shape: f32[1,256], index: 6, kind: input, shape index: {}]   ;;  %s9534_s7 = inlined_call_operand.hbm [shape: bf16[256,256], index: 7, kind: input, shape index: {}]   ;;  %s9535_s8 = inlined_call_operand.vmem [shape: f32[1,256], index: 8, kind: input, shape index: {}]   ;;  %s9536_s9 = inlined_call_operand.hbm [shape: bf16[256,256], index: 9, kind: input, shape index: {}]   ;;  %s9537_s10 = inlined_call_operand.vmem [shape: f32[1,256], index: 10, kind: input, shape index: {}]   ;;  %s9538_s11 = inlined_call_operand.hbm [shape: bf16[256,256], index: 11, kind: input, shape index: {}]   ;;  %s9539_s12 = inlined_call_operand.vmem [shape: f32[1,256], index: 12, kind: input, shape index: {}]   ;;  %s9540_s13 = inlined_call_operand.hbm [shape: bf16[256,256], index: 13, kind: input, shape index: {}]   ;;  %s9541_s14 = inlined_call_operand.vmem [shape: f32[1,256], index: 14, kind: input, shape index: {}]   ;;  %s9542_s15 = inlined_call_operand.hbm [shape: bf16[256,384], index: 15, kind: input, shape index: {}]   ;;  %s9543_s16 = inlined_call_operand.vmem [shape: f32[1,384], index: 16, kind: input, shape index: {}]   ;;  %s9544_s17 = inlined_call_operand.hbm [shape: f32[256,384], index: 17, kind: output, shape index: {}]  }
   0x1   :  { %9551 = sst [smem:[#allocation26_spill]] %s9527_s0 }
   0x2   :  { %9552 = sst [smem:[#allocation27_spill]] %s9528_s1 }
   0x3   :  { %9553 = sst [smem:[#allocation28_spill]] %s9543_s16 }
   0x4   :  { %9554 = sst [smem:[#allocation29_spill]] %s9544_s17 }
   0x5   :  { %22 = vsyncpa [#allocation3], 0 }
   0x6   :  { %23 = vsyncpa [#allocation6], 0 }
   0x7   :  { %24 = vsyncpa [#allocation9], 0 }
   0x8   :  { %25 = vsyncpa [#allocation12], 0 }
   0x9   :  { %26 = vsyncpa [#allocation15], 0 }
   0xa   :  { %27 = vsyncpa [#allocation4], 0  ;;  %s7449_s24 = smov [#allocation5]   ;;  %s9555_s28 = sld [smem:[#allocation27_spill]] }
   0xb   :  { %s45_s25 = sshll.u32 %s7449_s24, 4  ;;  %s46_s25 = int_to_ptr.vmem [resolvable:$true] %s45_s25 }
  0x10   :  { %s7217_s29 = scalar_lea.hbm %s9555_s28, 6144 }
  0x11   :  { %p7218_p0 = scmp.ne.s32.totalorder %s9555_s28, %s7217_s29  ;;  %p7221_p1 = scmp.lt.u32.totalorder %s7217_s29, %s9555_s28 }
  0x13   :  { %p7223_p2 = pnand %p7221_p1, %p7218_p0 }
  0x15   :  { %7226 = shalt.err (!%p7223_p2)
}
  0x16   :  { %s7227_s1 = scalar_lea.vmem %s46_s25, 6144  ;;  %p7232_p4 = scmp.lt.s32.totalorder %s46_s25, %s46_s25 }
  0x17   :  { %p7228_p3 = scmp.ne.s32.totalorder %s46_s25, %s7227_s1  ;;  %p7233_p5 = scmp.lt.s32.totalorder %s7227_s1, %s7227_s1 }
  0x19   :  { %p7234_p6 = por %p7233_p5, %p7232_p4 }
  0x1b   :  { %p7235_p7 = pnand %p7234_p6, %p7228_p3 }
  0x1d   :  { %7238 = shalt.err (!%p7235_p7)
}
  0x1e   :  { %s7450_s20 = smov 128   ;;  %s7451_s21 = smov 8  }
  0x1f   :  { %51 = dma.hbm_to_vmem [thread:$0]  %s9555_s28, 6144, %s46_s25, [#allocation6], %s7450_s20, %s7450_s20, %s7451_s21  }
  0x20   :  { %s7452_s24 = smov [#allocation8]   ;;  %s7453_s27 = smov [#allocation11]  }
  0x21   :  { %s73_s26 = sshll.u32 %s7452_s24, 4  ;;  %s101_s29 = sshll.u32 %s7453_s27, 4  ;;  %s74_s26 = int_to_ptr.vmem [resolvable:$true] %s73_s26  ;;  %s102_s29 = int_to_ptr.vmem [resolvable:$true] %s101_s29 }
  0x22   :  { %s7239_s18 = scalar_lea.hbm %s9532_s5, 4096 }
  0x23   :  { %p7240_p8 = scmp.ne.s32.totalorder %s9532_s5, %s7239_s18  ;;  %p7243_p9 = scmp.lt.u32.totalorder %s7239_s18, %s9532_s5 }
  0x25   :  { %p7245_p10 = pnand %p7243_p9, %p7240_p8 }
  0x27   :  { %7248 = shalt.err (!%p7245_p10)
}
  0x28   :  { %s7249_s25 = scalar_lea.vmem %s74_s26, 4096  ;;  %p7254_p12 = scmp.lt.s32.totalorder %s74_s26, %s74_s26 }
  0x29   :  { %p7250_p11 = scmp.ne.s32.totalorder %s74_s26, %s7249_s25  ;;  %p7255_p13 = scmp.lt.s32.totalorder %s7249_s25, %s7249_s25 }
  0x2b   :  { %p7256_p0 = por %p7255_p13, %p7254_p12 }
  0x2d   :  { %p7257_p1 = pnand %p7256_p0, %p7250_p11 }
  0x2f   :  { %7260 = shalt.err (!%p7257_p1)
}
  0x30   :  { %79 = dma.hbm_to_vmem [thread:$0]  %s9532_s5, 4096, %s74_s26, [#allocation9], %s7450_s20, %s7450_s20, %s7451_s21  }
  0x31   :  { %s7261_s17 = scalar_lea.hbm %s9536_s9, 4096 }
  0x32   :  { %p7262_p2 = scmp.ne.s32.totalorder %s9536_s9, %s7261_s17  ;;  %p7265_p3 = scmp.lt.u32.totalorder %s7261_s17, %s9536_s9 }
  0x34   :  { %p7267_p4 = pnand %p7265_p3, %p7262_p2 }
  0x36   :  { %7270 = shalt.err (!%p7267_p4)
}
  0x37   :  { %s7271_s18 = scalar_lea.vmem %s102_s29, 4096  ;;  %p7276_p6 = scmp.lt.s32.totalorder %s102_s29, %s102_s29 }
  0x38   :  { %p7272_p5 = scmp.ne.s32.totalorder %s102_s29, %s7271_s18  ;;  %p7277_p7 = scmp.lt.s32.totalorder %s7271_s18, %s7271_s18 }
  0x3a   :  { %p7278_p8 = por %p7277_p7, %p7276_p6 }
  0x3c   :  { %p7279_p9 = pnand %p7278_p8, %p7272_p5 }
  0x3e   :  { %7282 = shalt.err (!%p7279_p9)
}
  0x3f   :  { %107 = dma.hbm_to_vmem [thread:$0]  %s9536_s9, 4096, %s102_s29, [#allocation12], %s7450_s20, %s7450_s20, %s7451_s21  }
  0x40   :  { %s7454_s19 = smov [#allocation14]   ;;  %s7455_s25 = smov [#allocation2]  }
  0x41   :  { %s129_s1 = sshll.u32 %s7454_s19, 4  ;;  %s33_s28 = sshll.u32 %s7455_s25, 4  ;;  %s130_s1 = int_to_ptr.vmem [resolvable:$true] %s129_s1  ;;  %s34_s28 = int_to_ptr.vmem [resolvable:$true] %s33_s28 }
  0x42   :  { %s7283_s16 = scalar_lea.hbm %s9540_s13, 4096 }
  0x43   :  { %p7284_p10 = scmp.ne.s32.totalorder %s9540_s13, %s7283_s16  ;;  %p7287_p11 = scmp.lt.u32.totalorder %s7283_s16, %s9540_s13 }
  0x45   :  { %p7289_p12 = pnand %p7287_p11, %p7284_p10 }
  0x47   :  { %7292 = shalt.err (!%p7289_p12)
}
  0x48   :  { %s7293_s9 = scalar_lea.vmem %s130_s1, 4096  ;;  %p7298_p0 = scmp.lt.s32.totalorder %s130_s1, %s130_s1 }
  0x49   :  { %p7294_p13 = scmp.ne.s32.totalorder %s130_s1, %s7293_s9  ;;  %p7299_p1 = scmp.lt.s32.totalorder %s7293_s9, %s7293_s9 }
  0x4b   :  { %p7300_p2 = por %p7299_p1, %p7298_p0 }
  0x4d   :  { %p7301_p3 = pnand %p7300_p2, %p7294_p13 }
  0x4f   :  { %7304 = shalt.err (!%p7301_p3)
}
  0x50   :  { %135 = dma.hbm_to_vmem [thread:$0]  %s9540_s13, 4096, %s130_s1, [#allocation15], %s7450_s20, %s7450_s20, %s7451_s21  }
  0x51   :  { %s9556_s26 = sld [smem:[#allocation26_spill]] }
  0x57   :  { %s7305_s19 = scalar_lea.hbm %s9556_s26, 6144 }
  0x58   :  { %p7306_p4 = scmp.ne.s32.totalorder %s9556_s26, %s7305_s19  ;;  %p7309_p5 = scmp.lt.u32.totalorder %s7305_s19, %s9556_s26 }
  0x5a   :  { %p7311_p6 = pnand %p7309_p5, %p7306_p4 }
  0x5c   :  { %7314 = shalt.err (!%p7311_p6)
}
  0x5d   :  { %s7315_s17 = scalar_lea.vmem %s34_s28, 6144  ;;  %p7320_p8 = scmp.lt.s32.totalorder %s34_s28, %s34_s28 }
  0x5e   :  { %p7316_p7 = scmp.ne.s32.totalorder %s34_s28, %s7315_s17  ;;  %p7321_p9 = scmp.lt.s32.totalorder %s7315_s17, %s7315_s17 }
  0x60   :  { %p7322_p10 = por %p7321_p9, %p7320_p8 }
  0x62   :  { %p7323_p11 = pnand %p7322_p10, %p7316_p7 }
  0x64   :  { %7326 = shalt.err (!%p7323_p11)
}
  0x65   :  { %s7456_s13 = smov 192   ;;  %s7457_s1 = smov 12  }
  0x66   :  { %39 = dma.hbm_to_vmem [thread:$0]  %s9556_s26, 6144, %s34_s28, [#allocation3], %s7456_s13, %s7456_s13, %s7457_s1  }
  0x67   :  { %s7458_s0 = smov [#allocation7]   ;;  %s7459_s29 = smov [#allocation10]  }
  0x68   :  { %s59_s9 = sshll.u32 %s7458_s0, 4  ;;  %s87_s30 = sshll.u32 %s7459_s29, 4  ;;  %s60_s9 = int_to_ptr.vmem [resolvable:$true] %s59_s9  ;;  %s88_s30 = int_to_ptr.vmem [resolvable:$true] %s87_s30 }
  0x69   :  { %s7327_s19 = scalar_lea.hbm %s9530_s3, 4096 }
  0x6a   :  { %p7328_p12 = scmp.ne.s32.totalorder %s9530_s3, %s7327_s19  ;;  %p7331_p13 = scmp.lt.u32.totalorder %s7327_s19, %s9530_s3 }
  0x6c   :  { %p7333_p0 = pnand %p7331_p13, %p7328_p12 }
  0x6e   :  { %7336 = shalt.err (!%p7333_p0)
}
  0x6f   :  { %s7337_s28 = scalar_lea.vmem %s60_s9, 4096  ;;  %p7342_p2 = scmp.lt.s32.totalorder %s60_s9, %s60_s9 }
  0x70   :  { %p7338_p1 = scmp.ne.s32.totalorder %s60_s9, %s7337_s28  ;;  %p7343_p3 = scmp.lt.s32.totalorder %s7337_s28, %s7337_s28 }
  0x72   :  { %p7344_p4 = por %p7343_p3, %p7342_p2 }
  0x74   :  { %p7345_p5 = pnand %p7344_p4, %p7338_p1 }
  0x76   :  { %7348 = shalt.err (!%p7345_p5)
}
  0x77   :  { %65 = dma.hbm_to_vmem [thread:$0]  %s9530_s3, 4096, %s60_s9, [#allocation6], %s7450_s20, %s7450_s20, %s7451_s21  }
  0x78   :  { %s7349_s0 = scalar_lea.hbm %s9534_s7, 4096 }
  0x79   :  { %p7350_p6 = scmp.ne.s32.totalorder %s9534_s7, %s7349_s0  ;;  %p7353_p7 = scmp.lt.u32.totalorder %s7349_s0, %s9534_s7 }
  0x7b   :  { %p7355_p8 = pnand %p7353_p7, %p7350_p6 }
  0x7d   :  { %7358 = shalt.err (!%p7355_p8)
}
  0x7e   :  { %s7359_s25 = scalar_lea.vmem %s88_s30, 4096  ;;  %p7364_p10 = scmp.lt.s32.totalorder %s88_s30, %s88_s30 }
  0x7f   :  { %p7360_p9 = scmp.ne.s32.totalorder %s88_s30, %s7359_s25  ;;  %p7365_p11 = scmp.lt.s32.totalorder %s7359_s25, %s7359_s25 }
  0x81   :  { %p7366_p12 = por %p7365_p11, %p7364_p10 }
  0x83   :  { %p7367_p13 = pnand %p7366_p12, %p7360_p9 }
  0x85   :  { %7370 = shalt.err (!%p7367_p13)
}
  0x86   :  { %93 = dma.hbm_to_vmem [thread:$0]  %s9534_s7, 4096, %s88_s30, [#allocation9], %s7450_s20, %s7450_s20, %s7451_s21  }
  0x87   :  { %s7460_s22 = smov [#allocation13]   ;;  %s7461_s16 = smov [#allocation16]  }
  0x88   :  { %s115_s23 = sshll.u32 %s7460_s22, 4  ;;  %s143_s28 = sshll.u32 %s7461_s16, 4  ;;  %s116_s23 = int_to_ptr.vmem [resolvable:$true] %s115_s23  ;;  %s144_s28 = int_to_ptr.vmem [resolvable:$true] %s143_s28 }
  0x89   :  { %s7371_s24 = scalar_lea.hbm %s9538_s11, 4096 }
  0x8a   :  { %p7372_p0 = scmp.ne.s32.totalorder %s9538_s11, %s7371_s24  ;;  %p7375_p1 = scmp.lt.u32.totalorder %s7371_s24, %s9538_s11 }
  0x8c   :  { %p7377_p2 = pnand %p7375_p1, %p7372_p0 }
  0x8e   :  { %7380 = shalt.err (!%p7377_p2)
}
  0x8f   :  { %s7381_s7 = scalar_lea.vmem %s116_s23, 4096  ;;  %p7386_p4 = scmp.lt.s32.totalorder %s116_s23, %s116_s23 }
  0x90   :  { %p7382_p3 = scmp.ne.s32.totalorder %s116_s23, %s7381_s7  ;;  %p7387_p5 = scmp.lt.s32.totalorder %s7381_s7, %s7381_s7 }
  0x92   :  { %p7388_p6 = por %p7387_p5, %p7386_p4 }
  0x94   :  { %p7389_p7 = pnand %p7388_p6, %p7382_p3 }
  0x96   :  { %7392 = shalt.err (!%p7389_p7)
}
  0x97   :  { %121 = dma.hbm_to_vmem [thread:$0]  %s9538_s11, 4096, %s116_s23, [#allocation12], %s7450_s20, %s7450_s20, %s7451_s21  }
  0x98   :  { %s7393_s3 = scalar_lea.hbm %s9542_s15, 6144 }
  0x99   :  { %p7394_p8 = scmp.ne.s32.totalorder %s9542_s15, %s7393_s3  ;;  %p7397_p9 = scmp.lt.u32.totalorder %s7393_s3, %s9542_s15 }
  0x9b   :  { %p7399_p10 = pnand %p7397_p9, %p7394_p8 }
  0x9d   :  { %7402 = shalt.err (!%p7399_p10)
}
  0x9e   :  { %s7403_s17 = scalar_lea.vmem %s144_s28, 6144  ;;  %p7408_p12 = scmp.lt.s32.totalorder %s144_s28, %s144_s28 }
  0x9f   :  { %p7404_p11 = scmp.ne.s32.totalorder %s144_s28, %s7403_s17  ;;  %p7409_p13 = scmp.lt.s32.totalorder %s7403_s17, %s7403_s17 }
  0xa1   :  { %p7410_p0 = por %p7409_p13, %p7408_p12 }
  0xa3   :  { %p7411_p1 = pnand %p7410_p0, %p7404_p11 }
  0xa5   :  { %7414 = shalt.err (!%p7411_p1)
}
  0xa6   :  { %149 = dma.hbm_to_vmem [thread:$0]  %s9542_s15, 6144, %s144_s28, [#allocation15], %s7456_s13, %s7456_s13, %s7457_s1  }
  0xa7   :  { %7437 = dma.done.wait [#allocation3], 6144  }
  0xa8   :  { %7438 = vsyncadd [#allocation3], 4294961152 }
  0xa9   :  { %7439 = dma.done.wait [#allocation6], 10240  }
  0xaa   :  { %7440 = vsyncadd [#allocation6], 4294957056 }
  0xab   :  { %7441 = dma.done.wait [#allocation9], 8192  }
  0xac   :  { %7442 = vsyncadd [#allocation9], 4294959104 }
  0xad   :  { %7443 = dma.done.wait [#allocation12], 8192  }
  0xae   :  { %7444 = vsyncadd [#allocation12], 4294959104 }
  0xaf   :  { %7445 = dma.done.wait [#allocation15], 10240  }
  0xb0   :  { %7446 = vsyncadd [#allocation15], 4294957056  ;;  %v6473_v0 = vld [vmem:[#allocation5 + $0x4] ss:$8 sps:$4 sm:$0xff]   ;;  %v6475_v1 = vld [vmem:[#allocation5] ss:$8 sps:$4 sm:$0xff]  }
  0xb1   :  { %800 = vmatprep.subr.bf16.mxu0 %v6473_v0  ;;  %v6476_v2 = vld [vmem:[#allocation5 + $0x14] ss:$8 sps:$4 sm:$0xff]   ;;  %v6478_v3 = vld [vmem:[#allocation5 + $0x10] ss:$8 sps:$4 sm:$0xff]   ;;  %v6479_v4 = vld [vmem:[#allocation5 + $0x24] ss:$8 sps:$4 sm:$0xff]  }
  0xb2   :  { %801 = vmatpush1.bf16.msra.mxu0 %v6475_v1  ;;  %v6481_v5 = vld [vmem:[#allocation5 + $0x20] ss:$8 sps:$4 sm:$0xff]   ;;  %v6482_v6 = vld [vmem:[#allocation5 + $0x34] ss:$8 sps:$4 sm:$0xff]   ;;  %v6484_v7 = vld [vmem:[#allocation5 + $0x30] ss:$8 sps:$4 sm:$0xff]  }
  0xb3   :  { %802 = vmatprep.subr.bf16.mxu0 %v6476_v2  ;;  %v6485_v8 = vld [vmem:[#allocation5 + $0x44] ss:$8 sps:$4 sm:$0xff]   ;;  %v6487_v9 = vld [vmem:[#allocation5 + $0x40] ss:$8 sps:$4 sm:$0xff]   ;;  %v6488_v10 = vld [vmem:[#allocation5 + $0x54] ss:$8 sps:$4 sm:$0xff]  }
  0xb4   :  { %v6490_v11 = vld [vmem:[#allocation5 + $0x50] ss:$8 sps:$4 sm:$0xff]   ;;  %v6491_v12 = vld [vmem:[#allocation5 + $0x64] ss:$8 sps:$4 sm:$0xff]   ;;  %v6493_v14 = vld [vmem:[#allocation5 + $0x60] ss:$8 sps:$4 sm:$0xff]  }
  0xb5   :  { %v6523_v13 = vld [vmem:[#allocation2 + $0x4] ss:$12 sps:$4 sm:$0xff]   ;;  %v6494_v15 = vld [vmem:[#allocation5 + $0x74] ss:$8 sps:$4 sm:$0xff]   ;;  %v6499_v18 = vld [vmem:[#allocation5 + $0x80] ss:$8 sps:$4 sm:$0xff]  }
  0xb6   :  { %803 = vmatpush1.bf16.msra.mxu0 %v6478_v3  ;;  %832 = vmatprep.mubr.bf16.mxu0 %v6523_v13  ;;  %v6496_v16 = vld [vmem:[#allocation5 + $0x70] ss:$8 sps:$4 sm:$0xff]   ;;  %v6497_v17 = vld [vmem:[#allocation5 + $0x84] ss:$8 sps:$4 sm:$0xff]   ;;  %v6500_v19 = vld [vmem:[#allocation5 + $0x94] ss:$8 sps:$4 sm:$0xff]  }
  0xb7   :  { %804 = vmatprep.subr.bf16.mxu0 %v6479_v4  ;;  %v6502_v20 = vld [vmem:[#allocation5 + $0x90] ss:$8 sps:$4 sm:$0xff]   ;;  %v6503_v21 = vld [vmem:[#allocation5 + $0xa4] ss:$8 sps:$4 sm:$0xff]   ;;  %v6505_v22 = vld [vmem:[#allocation5 + $0xa0] ss:$8 sps:$4 sm:$0xff]  }
  0xb8   :  { %v6506_v23 = vld [vmem:[#allocation5 + $0xb4] ss:$8 sps:$4 sm:$0xff]   ;;  %v6508_v24 = vld [vmem:[#allocation5 + $0xb0] ss:$8 sps:$4 sm:$0xff]   ;;  %v6509_v25 = vld [vmem:[#allocation5 + $0xc4] ss:$8 sps:$4 sm:$0xff]  }
  0xb9   :  { %v6511_v26 = vld [vmem:[#allocation5 + $0xc0] ss:$8 sps:$4 sm:$0xff]   ;;  %v6512_v27 = vld [vmem:[#allocation5 + $0xd4] ss:$8 sps:$4 sm:$0xff]   ;;  %v6514_v28 = vld [vmem:[#allocation5 + $0xd0] ss:$8 sps:$4 sm:$0xff]  }
  0xba   :  { %805 = vmatpush1.bf16.msra.mxu0 %v6481_v5  ;;  %v6515_v29 = vld [vmem:[#allocation5 + $0xe4] ss:$8 sps:$4 sm:$0xff]   ;;  %v6517_v30 = vld [vmem:[#allocation5 + $0xe0] ss:$8 sps:$4 sm:$0xff]   ;;  %v6518_v31 = vld [vmem:[#allocation5 + $0xf4] ss:$8 sps:$4 sm:$0xff]  }
  0xbb   :  { %806 = vmatprep.subr.bf16.mxu0 %v6482_v6  ;;  %v6520_v32 = vld [vmem:[#allocation5 + $0xf0] ss:$8 sps:$4 sm:$0xff]   ;;  %v6526_v33 = vld [vmem:[#allocation5 + $0x104] ss:$8 sps:$4 sm:$0xff]   ;;  %v6524_v35 = vld [vmem:[#allocation5 + $0x100] ss:$8 sps:$4 sm:$0xff]  }
  0xbc   :  { %v6521_v34 = vld [vmem:[#allocation2] ss:$12 sps:$4 sm:$0xff]   ;;  %v6527_v36 = vld [vmem:[#allocation2 + $0x1c] ss:$12 sps:$4 sm:$0xff]   ;;  %v6533_v38 = vld [vmem:[#allocation5 + $0x110] ss:$8 sps:$4 sm:$0xff]  }
  0xbd   :  { %v6535_v37 = vld [vmem:[#allocation5 + $0x114] ss:$8 sps:$4 sm:$0xff]   ;;  %v6544_v39 = vld [vmem:[#allocation5 + $0x124] ss:$8 sps:$4 sm:$0xff]   ;;  %v6542_v42 = vld [vmem:[#allocation5 + $0x120] ss:$8 sps:$4 sm:$0xff]  }
  0xbe   :  { %807 = vmatpush1.bf16.msra.mxu0 %v6484_v7  ;;  %v6529_v40 = vld [vmem:[#allocation2 + $0x18] ss:$12 sps:$4 sm:$0xff]   ;;  %v6530_v41 = vld [vmem:[#allocation2 + $0x34] ss:$12 sps:$4 sm:$0xff]   ;;  %v6532_v46 = vld [vmem:[#allocation2 + $0x30] ss:$12 sps:$4 sm:$0xff]  }
  0xbf   :  { %808 = vmatprep.subr.bf16.mxu0 %v6485_v8  ;;  %v6553_v43 = vld [vmem:[#allocation5 + $0x134] ss:$8 sps:$4 sm:$0xff]   ;;  %v6551_v44 = vld [vmem:[#allocation5 + $0x130] ss:$8 sps:$4 sm:$0xff]   ;;  %v6562_v45 = vld [vmem:[#allocation5 + $0x144] ss:$8 sps:$4 sm:$0xff]  }
  0xc0   :  { %v6536_v47 = vld [vmem:[#allocation2 + $0x4c] ss:$12 sps:$4 sm:$0xff]   ;;  %v6560_v48 = vld [vmem:[#allocation5 + $0x140] ss:$8 sps:$4 sm:$0xff]   ;;  %v6571_v49 = vld [vmem:[#allocation5 + $0x154] ss:$8 sps:$4 sm:$0xff]  }
  0xc1   :  { %v6569_v50 = vld [vmem:[#allocation5 + $0x150] ss:$8 sps:$4 sm:$0xff]   ;;  %v6580_v51 = vld [vmem:[#allocation5 + $0x164] ss:$8 sps:$4 sm:$0xff]   ;;  %v6538_v52 = vld [vmem:[#allocation2 + $0x48] ss:$12 sps:$4 sm:$0xff]  }
  0xc2   :  { %809 = vmatpush1.bf16.msra.mxu0 %v6487_v9  ;;  %v6539_v53 = vld [vmem:[#allocation2 + $0x64] ss:$12 sps:$4 sm:$0xff]   ;;  %v6578_v54 = vld [vmem:[#allocation5 + $0x160] ss:$8 sps:$4 sm:$0xff]   ;;  %v6589_v55 = vld [vmem:[#allocation5 + $0x174] ss:$8 sps:$4 sm:$0xff]  }
  0xc3   :  { %810 = vmatprep.subr.bf16.mxu0 %v6488_v10  ;;  %v6587_v56 = vld [vmem:[#allocation5 + $0x170] ss:$8 sps:$4 sm:$0xff]   ;;  %v6541_v57 = vld [vmem:[#allocation2 + $0x60] ss:$12 sps:$4 sm:$0xff]   ;;  %v6545_v58 = vld [vmem:[#allocation2 + $0x7c] ss:$12 sps:$4 sm:$0xff]  }
  0xc4   :  { %v6547_v59 = vld [vmem:[#allocation2 + $0x78] ss:$12 sps:$4 sm:$0xff]   ;;  %v6548_v60 = vld [vmem:[#allocation2 + $0x94] ss:$12 sps:$4 sm:$0xff]   ;;  %v6550_v61 = vld [vmem:[#allocation2 + $0x90] ss:$12 sps:$4 sm:$0xff]  }
  0xc5   :  { %v6554_v62 = vld [vmem:[#allocation2 + $0xac] ss:$12 sps:$4 sm:$0xff]   ;;  %v6556_v63 = vld [vmem:[#allocation2 + $0xa8] ss:$12 sps:$4 sm:$0xff]   ;;  %v6557_v0 = vld [vmem:[#allocation2 + $0xc4] ss:$12 sps:$4 sm:$0xff]  }
  0xc6   :  { %811 = vmatpush1.bf16.msra.mxu0 %v6490_v11  ;;  %v6559_v1 = vld [vmem:[#allocation2 + $0xc0] ss:$12 sps:$4 sm:$0xff]   ;;  %v6563_v2 = vld [vmem:[#allocation2 + $0xdc] ss:$12 sps:$4 sm:$0xff]   ;;  %v6565_v3 = vld [vmem:[#allocation2 + $0xd8] ss:$12 sps:$4 sm:$0xff]  }
  0xc7   :  { %812 = vmatprep.subr.bf16.mxu0 %v6491_v12  ;;  %v6566_v4 = vld [vmem:[#allocation2 + $0xf4] ss:$12 sps:$4 sm:$0xff]   ;;  %v6568_v5 = vld [vmem:[#allocation2 + $0xf0] ss:$12 sps:$4 sm:$0xff]   ;;  %v6572_v6 = vld [vmem:[#allocation2 + $0x10c] ss:$12 sps:$4 sm:$0xff]  }
  0xc8   :  { %v6574_v7 = vld [vmem:[#allocation2 + $0x108] ss:$12 sps:$4 sm:$0xff]   ;;  %v6575_v8 = vld [vmem:[#allocation2 + $0x124] ss:$12 sps:$4 sm:$0xff]   ;;  %v6577_v9 = vld [vmem:[#allocation2 + $0x120] ss:$12 sps:$4 sm:$0xff]  }
  0xc9   :  { %v6581_v10 = vld [vmem:[#allocation2 + $0x13c] ss:$12 sps:$4 sm:$0xff]   ;;  %v6583_v11 = vld [vmem:[#allocation2 + $0x138] ss:$12 sps:$4 sm:$0xff]   ;;  %v6584_v12 = vld [vmem:[#allocation2 + $0x154] ss:$12 sps:$4 sm:$0xff]  }
  0xca   :  { %813 = vmatpush1.bf16.msra.mxu0 %v6493_v14  ;;  %v6586_v13 = vld [vmem:[#allocation2 + $0x150] ss:$12 sps:$4 sm:$0xff]   ;;  %v6590_v14 = vld [vmem:[#allocation2 + $0x16c] ss:$12 sps:$4 sm:$0xff]   ;;  %s9560_s29 = sld [smem:[#allocation28_spill]]  ;;  %s7463_s18 = smov [#allocation17]  }
  0xcb   :  { %814 = vmatprep.subr.bf16.mxu0 %v6494_v15  ;;  %v6592_v15 = vld [vmem:[#allocation2 + $0x168] ss:$12 sps:$4 sm:$0xff]   ;;  %s5864_s7 = sshll.u32 %s7463_s18, 4  ;;  %s5865_s7 = int_to_ptr.vmem [resolvable:$true] %s5864_s7 }
  0xcc   :  { %s7415_s30 = scalar_lea.vmem %s5865_s7, 12288  ;;  %p7420_p3 = scmp.lt.s32.totalorder %s5865_s7, %s5865_s7 }
  0xcd   :  { %p7416_p2 = scmp.ne.s32.totalorder %s5865_s7, %s7415_s30  ;;  %p7421_p4 = scmp.lt.s32.totalorder %s7415_s30, %s7415_s30 }
  0xce   :  { %815 = vmatpush1.bf16.msra.mxu0 %v6496_v16  ;;  %v6609_v16 = vld [vmem:[#allocation7 + $0x4] ss:$8 sps:$4 sm:$0xff]  }
  0xcf   :  { %816 = vmatprep.subr.bf16.mxu0 %v6497_v17  ;;  %v6611_v17 = vld [vmem:[#allocation7] ss:$8 sps:$4 sm:$0xff]   ;;  %1998 = vmatprep.subr.bf16.mxu1 %v6609_v16  ;;  %p7422_p5 = por %p7421_p4, %p7420_p3 }
  0xd0   :  { %1999 = vmatpush1.bf16.msra.mxu1 %v6611_v17 }
  0xd1   :  { %p7423_p6 = pnand %p7422_p5, %p7416_p2 }
  0xd2   :  { %817 = vmatpush1.bf16.msra.mxu0 %v6499_v18  ;;  %v6612_v18 = vld [vmem:[#allocation7 + $0x14] ss:$8 sps:$4 sm:$0xff]  }
  0xd3   :  { %818 = vmatprep.subr.bf16.mxu0 %v6500_v19  ;;  %v7462_v19 = vmov 0   ;;  %2000 = vmatprep.subr.bf16.mxu1 %v6612_v18 }
  0xd6   :  { %819 = vmatpush1.bf16.msra.mxu0 %v6502_v20  ;;  %v6614_v20 = vld [vmem:[#allocation7 + $0x10] ss:$8 sps:$4 sm:$0xff]  }
  0xd7   :  { %820 = vmatprep.subr.bf16.mxu0 %v6503_v21  ;;  %v6593_v21 = vld [vmem:[#allocation2 + $0x8] ss:$12 sps:$4 sm:$0xff]   ;;  %2001 = vmatpush1.bf16.msra.mxu1 %v6614_v20 }
  0xda   :  { %821 = vmatpush1.bf16.msra.mxu0 %v6505_v22  ;;  %v6615_v22 = vld [vmem:[#allocation7 + $0x24] ss:$8 sps:$4 sm:$0xff]  }
  0xdb   :  { %822 = vmatprep.subr.bf16.mxu0 %v6506_v23  ;;  %v6617_v23 = vld [vmem:[#allocation7 + $0x20] ss:$8 sps:$4 sm:$0xff]   ;;  %2002 = vmatprep.subr.bf16.mxu1 %v6615_v22 }
  0xdc   :  { %2003 = vmatpush1.bf16.msra.mxu1 %v6617_v23 }
  0xde   :  { %823 = vmatpush1.bf16.msra.mxu0 %v6508_v24  ;;  %v6618_v24 = vld [vmem:[#allocation7 + $0x34] ss:$8 sps:$4 sm:$0xff]  }
  0xdf   :  { %824 = vmatprep.subr.bf16.mxu0 %v6509_v25  ;;  %v6620_v25 = vld [vmem:[#allocation7 + $0x30] ss:$8 sps:$4 sm:$0xff]   ;;  %2004 = vmatprep.subr.bf16.mxu1 %v6618_v24 }
  0xe0   :  { %2005 = vmatpush1.bf16.msra.mxu1 %v6620_v25 }
  0xe2   :  { %825 = vmatpush1.bf16.msra.mxu0 %v6511_v26  ;;  %v6594_v26 = vld [vmem:[#allocation2 + $0x20] ss:$12 sps:$4 sm:$0xff]  }
  0xe3   :  { %826 = vmatprep.subr.bf16.mxu0 %v6512_v27  ;;  %v6621_v27 = vld [vmem:[#allocation7 + $0x44] ss:$8 sps:$4 sm:$0xff]  }
  0xe4   :  { %2006 = vmatprep.subr.bf16.mxu1 %v6621_v27 }
  0xe6   :  { %827 = vmatpush1.bf16.msra.mxu0 %v6514_v28  ;;  %v6623_v28 = vld [vmem:[#allocation7 + $0x40] ss:$8 sps:$4 sm:$0xff]  }
  0xe7   :  { %828 = vmatprep.subr.bf16.mxu0 %v6515_v29  ;;  %v6624_v29 = vld [vmem:[#allocation7 + $0x54] ss:$8 sps:$4 sm:$0xff]   ;;  %2007 = vmatpush1.bf16.msra.mxu1 %v6623_v28 }
  0xe8   :  { %2008 = vmatprep.subr.bf16.mxu1 %v6624_v29 }
  0xea   :  { %829 = vmatpush1.bf16.msra.mxu0 %v6517_v30  ;;  %v6626_v30 = vld [vmem:[#allocation7 + $0x50] ss:$8 sps:$4 sm:$0xff]  }
  0xeb   :  { %830 = vmatprep.subr.bf16.mxu0 %v6518_v31  ;;  %v6595_v31 = vld [vmem:[#allocation2 + $0x38] ss:$12 sps:$4 sm:$0xff]   ;;  %2009 = vmatpush1.bf16.msra.mxu1 %v6626_v30 }
  0xee   :  { %831 = vmatpush1.bf16.msra.mxu0 %v6520_v32  ;;  %v6627_v32 = vld [vmem:[#allocation7 + $0x64] ss:$8 sps:$4 sm:$0xff]  }
  0xef   :  { %993 = vmatprep.subr.bf16.mxu0 %v6526_v33  ;;  %v6629_v33 = vld [vmem:[#allocation7 + $0x60] ss:$8 sps:$4 sm:$0xff]   ;;  %2010 = vmatprep.subr.bf16.mxu1 %v6627_v32 }
  0xf0   :  { %2011 = vmatpush1.bf16.msra.mxu1 %v6629_v33 }
  0xf1   :  { %833 = vmatmul.mubr.bf16.vlgmr.msra.gmra.mrb[0].mxu0 %v6521_v34  ;;  %v6596_v34 = vld [vmem:[#allocation2 + $0x50] ss:$12 sps:$4 sm:$0xff]  }
  0xf2   :  { %994 = vmatpush1.bf16.msra.mxu0 %v6524_v35  ;;  %842 = vmatprep.mubr.bf16.mxu0 %v6527_v36  ;;  %v6597_v35 = vld [vmem:[#allocation2 + $0x68] ss:$12 sps:$4 sm:$0xff]   ;;  %v6598_v36 = vld [vmem:[#allocation2 + $0x80] ss:$12 sps:$4 sm:$0xff]  }
  0xf3   :  { %995 = vmatprep.subr.bf16.mxu0 %v6535_v37  ;;  %v6599_v37 = vld [vmem:[#allocation2 + $0x98] ss:$12 sps:$4 sm:$0xff]  }
  0xf6   :  { %996 = vmatpush1.bf16.msra.mxu0 %v6533_v38  ;;  %v6600_v38 = vld [vmem:[#allocation2 + $0xb0] ss:$12 sps:$4 sm:$0xff]  }
  0xf7   :  { %997 = vmatprep.subr.bf16.mxu0 %v6544_v39  ;;  %v6601_v39 = vld [vmem:[#allocation2 + $0xc8] ss:$12 sps:$4 sm:$0xff]  }
  0xf9   :  { %843 = vmatmul.mubr.bf16.gmra.mrb[4].mxu0 %v6529_v40  ;;  %v6602_v40 = vld [vmem:[#allocation2 + $0xe0] ss:$12 sps:$4 sm:$0xff]  }
  0xfa   :  { %852 = vmatprep.mubr.bf16.mxu0 %v6530_v41  ;;  %998 = vmatpush1.bf16.msra.mxu0 %v6542_v42  ;;  %v6603_v41 = vld [vmem:[#allocation2 + $0xf8] ss:$12 sps:$4 sm:$0xff]   ;;  %v6630_v42 = vld [vmem:[#allocation7 + $0x74] ss:$8 sps:$4 sm:$0xff]  }
  0xfb   :  { %999 = vmatprep.subr.bf16.mxu0 %v6553_v43  ;;  %v6632_v43 = vld [vmem:[#allocation7 + $0x70] ss:$8 sps:$4 sm:$0xff]   ;;  %2012 = vmatprep.subr.bf16.mxu1 %v6630_v42 }
  0xfc   :  { %2013 = vmatpush1.bf16.msra.mxu1 %v6632_v43 }
  0xfe   :  { %1000 = vmatpush1.bf16.msra.mxu0 %v6551_v44  ;;  %v6604_v44 = vld [vmem:[#allocation2 + $0x110] ss:$12 sps:$4 sm:$0xff]  }
  0xff   :  { %1001 = vmatprep.subr.bf16.mxu0 %v6562_v45  ;;  %v6633_v45 = vld [vmem:[#allocation7 + $0x84] ss:$8 sps:$4 sm:$0xff]  }
 0x100   :  { %2014 = vmatprep.subr.bf16.mxu1 %v6633_v45 }
 0x101   :  { %853 = vmatmul.mubr.bf16.gmra.mrb[8].mxu0 %v6532_v46  ;;  %v6635_v46 = vld [vmem:[#allocation7 + $0x80] ss:$8 sps:$4 sm:$0xff]  }
 0x102   :  { %862 = vmatprep.mubr.bf16.mxu0 %v6536_v47  ;;  %1002 = vmatpush1.bf16.msra.mxu0 %v6560_v48  ;;  %v6636_v47 = vld [vmem:[#allocation7 + $0x94] ss:$8 sps:$4 sm:$0xff]   ;;  %v6638_v48 = vld [vmem:[#allocation7 + $0x90] ss:$8 sps:$4 sm:$0xff]  }
 0x103   :  { %1003 = vmatprep.subr.bf16.mxu0 %v6571_v49  ;;  %2015 = vmatpush1.bf16.msra.mxu1 %v6635_v46  ;;  %v6605_v49 = vld [vmem:[#allocation2 + $0x128] ss:$12 sps:$4 sm:$0xff]  }
 0x104   :  { %2016 = vmatprep.subr.bf16.mxu1 %v6636_v47 }
 0x106   :  { %1004 = vmatpush1.bf16.msra.mxu0 %v6569_v50  ;;  %v6639_v50 = vld [vmem:[#allocation7 + $0xa4] ss:$8 sps:$4 sm:$0xff]  }
 0x107   :  { %1005 = vmatprep.subr.bf16.mxu0 %v6580_v51  ;;  %2017 = vmatpush1.bf16.msra.mxu1 %v6638_v48  ;;  %v6641_v51 = vld [vmem:[#allocation7 + $0xa0] ss:$8 sps:$4 sm:$0xff]  }
 0x108   :  { %2018 = vmatprep.subr.bf16.mxu1 %v6639_v50 }
 0x109   :  { %863 = vmatmul.mubr.bf16.gmra.mrb[12].mxu0 %v6538_v52  ;;  %v6642_v52 = vld [vmem:[#allocation7 + $0xb4] ss:$8 sps:$4 sm:$0xff]  }
 0x10a   :  { %872 = vmatprep.mubr.bf16.mxu0 %v6539_v53  ;;  %1006 = vmatpush1.bf16.msra.mxu0 %v6578_v54  ;;  %v6644_v53 = vld [vmem:[#allocation7 + $0xb0] ss:$8 sps:$4 sm:$0xff]   ;;  %v6606_v54 = vld [vmem:[#allocation2 + $0x140] ss:$12 sps:$4 sm:$0xff]  }
 0x10b   :  { %1007 = vmatprep.subr.bf16.mxu0 %v6589_v55  ;;  %2019 = vmatpush1.bf16.msra.mxu1 %v6641_v51  ;;  %v6645_v55 = vld [vmem:[#allocation7 + $0xc4] ss:$8 sps:$4 sm:$0xff]  }
 0x10c   :  { %2020 = vmatprep.subr.bf16.mxu1 %v6642_v52 }
 0x10e   :  { %1008 = vmatpush1.bf16.msra.mxu0 %v6587_v56  ;;  %v6647_v56 = vld [vmem:[#allocation7 + $0xc0] ss:$8 sps:$4 sm:$0xff]  }
 0x10f   :  { %2021 = vmatpush1.bf16.msra.mxu1 %v6644_v53 }
 0x110   :  { %2022 = vmatprep.subr.bf16.mxu1 %v6645_v55 }
 0x111   :  { %873 = vmatmul.mubr.bf16.gmra.mrb[16].mxu0 %v6541_v57  ;;  %v6648_v57 = vld [vmem:[#allocation7 + $0xd4] ss:$8 sps:$4 sm:$0xff]  }
 0x112   :  { %882 = vmatprep.mubr.bf16.mxu0 %v6545_v58  ;;  %v6650_v58 = vld [vmem:[#allocation7 + $0xd0] ss:$8 sps:$4 sm:$0xff]  }
 0x113   :  { %2023 = vmatpush1.bf16.msra.mxu1 %v6647_v56 }
 0x114   :  { %2024 = vmatprep.subr.bf16.mxu1 %v6648_v57 }
 0x117   :  { %2025 = vmatpush1.bf16.msra.mxu1 %v6650_v58 }
 0x119   :  { %883 = vmatmul.mubr.bf16.gmra.mrb[20].mxu0 %v6547_v59  ;;  %v6607_v59 = vld [vmem:[#allocation2 + $0x158] ss:$12 sps:$4 sm:$0xff]  }
 0x11a   :  { %892 = vmatprep.mubr.bf16.mxu0 %v6548_v60  ;;  %v6651_v60 = vld [vmem:[#allocation7 + $0xe4] ss:$8 sps:$4 sm:$0xff]  }
 0x11b   :  { %2026 = vmatprep.subr.bf16.mxu1 %v6651_v60 }
 0x121   :  { %893 = vmatmul.mubr.bf16.gmra.mrb[24].mxu0 %v6550_v61  ;;  %v6653_v61 = vld [vmem:[#allocation7 + $0xe0] ss:$8 sps:$4 sm:$0xff]  }
 0x122   :  { %902 = vmatprep.mubr.bf16.mxu0 %v6554_v62  ;;  %2027 = vmatpush1.bf16.msra.mxu1 %v6653_v61  ;;  %v6654_v62 = vld [vmem:[#allocation7 + $0xf4] ss:$8 sps:$4 sm:$0xff]  }
 0x123   :  { %2028 = vmatprep.subr.bf16.mxu1 %v6654_v62 }
 0x129   :  { %903 = vmatmul.mubr.bf16.gmra.mrb[28].mxu0 %v6556_v63  ;;  %v6656_v63 = vld [vmem:[#allocation7 + $0xf0] ss:$8 sps:$4 sm:$0xff]  }
 0x12a   :  { %912 = vmatprep.mubr.bf16.mxu0 %v6557_v0  ;;  %v6608_v0 = vld [vmem:[#allocation2 + $0x170] ss:$12 sps:$4 sm:$0xff]   ;;  %2029 = vmatpush1.bf16.msra.mxu1 %v6656_v63 }
 0x131   :  { %913 = vmatmul.mubr.bf16.gmra.mrb[32].mxu0 %v6559_v1  ;;  %v294_v1 = vlaneseq }
 0x132   :  { %922 = vmatprep.mubr.bf16.mxu0 %v6563_v2 }
 0x133   :  { %v7707_v2 = vshrl.u32 %v294_v1, 7 }
 0x135   :  { %9557 = vst [vmem:[#allocation24_spill] sm:$0xff] %v7707_v2 }
 0x139   :  { %923 = vmatmul.mubr.bf16.gmra.mrb[36].mxu0 %v6565_v3  ;;  %v7710_v3 = vsub.s32 0, %v7707_v2 }
 0x13a   :  { %932 = vmatprep.mubr.bf16.mxu0 %v6566_v4  ;;  %v292_v4 = vld [vmem:[%s9529_s2] sm:$0x3] }
 0x141   :  { %933 = vmatmul.mubr.bf16.gmra.mrb[40].mxu0 %v6568_v5  ;;  %v7716_v5 = vsub.s32 1, %v7707_v2 }
 0x142   :  { %942 = vmatprep.mubr.bf16.mxu0 %v6572_v6  ;;  %v7719_v6 = vrot.slane %v292_v4, %v7710_v3 }
 0x143   :  { %9558 = vst [vmem:[#allocation25_spill] sm:$0xff] %v7716_v5 }
 0x149   :  { %943 = vmatmul.mubr.bf16.gmra.mrb[44].mxu0 %v6574_v7  ;;  %v7722_v7 = vrot.slane %v292_v4, %v7716_v5 }
 0x14a   :  { %952 = vmatprep.mubr.bf16.mxu0 %v6575_v8 }
 0x151   :  { %953 = vmatmul.mubr.bf16.gmra.mrb[48].mxu0 %v6577_v9 }
 0x152   :  { %962 = vmatprep.mubr.bf16.mxu0 %v6581_v10 }
 0x159   :  { %963 = vmatmul.mubr.bf16.gmra.mrb[52].mxu0 %v6583_v11 }
 0x15a   :  { %972 = vmatprep.mubr.bf16.mxu0 %v6584_v12 }
 0x161   :  { %973 = vmatmul.mubr.bf16.gmra.mrb[56].mxu0 %v6586_v13 }
 0x162   :  { %982 = vmatprep.mubr.bf16.mxu0 %v6590_v14 }
 0x169   :  { %983 = vmatmul.mubr.bf16.gmra.mrb[60].mxu0 %v6592_v15 }
 0x16a   :  { %1025 = vmatprep.mubr.bf16.mxu0 %v7462_v19 }
 0x171   :  { %1026 = vmatmul.mubr.bf16.vlgmr.msra.gmra.mrb[0].mxu0 %v6593_v21 }
 0x172   :  { %1035 = vmatprep.mubr.bf16.mxu0 %v7462_v19 }
 0x179   :  { %1036 = vmatmul.mubr.bf16.gmra.mrb[4].mxu0 %v6594_v26 }
 0x17a   :  { %1045 = vmatprep.mubr.bf16.mxu0 %v7462_v19 }
 0x181   :  { %1046 = vmatmul.mubr.bf16.gmra.mrb[8].mxu0 %v6595_v31 }
 0x182   :  { %1055 = vmatprep.mubr.bf16.mxu0 %v7462_v19 }
 0x189   :  { %1056 = vmatmul.mubr.bf16.gmra.mrb[12].mxu0 %v6596_v34 }
 0x18a   :  { %1065 = vmatprep.mubr.bf16.mxu0 %v7462_v19 }
 0x191   :  { %1066 = vmatmul.mubr.bf16.gmra.mrb[16].mxu0 %v6597_v35 }
 0x192   :  { %1075 = vmatprep.mubr.bf16.mxu0 %v7462_v19 }
 0x199   :  { %1076 = vmatmul.mubr.bf16.gmra.mrb[20].mxu0 %v6598_v36 }
 0x19a   :  { %1085 = vmatprep.mubr.bf16.mxu0 %v7462_v19 }
 0x1a1   :  { %1086 = vmatmul.mubr.bf16.gmra.mrb[24].mxu0 %v6599_v37 }
 0x1a2   :  { %1095 = vmatprep.mubr.bf16.mxu0 %v7462_v19 }
 0x1a9   :  { %1096 = vmatmul.mubr.bf16.gmra.mrb[28].mxu0 %v6600_v38 }
 0x1aa   :  { %1105 = vmatprep.mubr.bf16.mxu0 %v7462_v19 }
 0x1b1   :  { %1106 = vmatmul.mubr.bf16.gmra.mrb[32].mxu0 %v6601_v39 }
 0x1b2   :  { %1115 = vmatprep.mubr.bf16.mxu0 %v7462_v19 }
 0x1b9   :  { %1116 = vmatmul.mubr.bf16.gmra.mrb[36].mxu0 %v6602_v40 }
 0x1ba   :  { %1125 = vmatprep.mubr.bf16.mxu0 %v7462_v19 }
 0x1c1   :  { %1126 = vmatmul.mubr.bf16.gmra.mrb[40].mxu0 %v6603_v41 }
 0x1c2   :  { %1135 = vmatprep.mubr.bf16.mxu0 %v7462_v19 }
 0x1c9   :  { %1136 = vmatmul.mubr.bf16.gmra.mrb[44].mxu0 %v6604_v44 }
 0x1ca   :  { %1145 = vmatprep.mubr.bf16.mxu0 %v7462_v19 }
 0x1d1   :  { %1146 = vmatmul.mubr.bf16.gmra.mrb[48].mxu0 %v6605_v49 }
 0x1d2   :  { %1155 = vmatprep.mubr.bf16.mxu0 %v7462_v19 }
 0x1d9   :  { %1156 = vmatmul.mubr.bf16.gmra.mrb[52].mxu0 %v6606_v54 }
 0x1da   :  { %1165 = vmatprep.mubr.bf16.mxu0 %v7462_v19 }
 0x1e1   :  { %1166 = vmatmul.mubr.bf16.gmra.mrb[56].mxu0 %v6607_v59 }
 0x1e2   :  { %1175 = vmatprep.mubr.bf16.mxu0 %v7462_v19 }
 0x1e9   :  { %1176 = vmatmul.mubr.bf16.gmra.mrb[60].mxu0 %v6608_v0 }
 0x244   :  { %v1027_v8 = vpop.f32.mrb[0].mxu0 }
 0x245   :  { %v7725_v9 = vadd.f32 %v1027_v8, %v7719_v6  ;;  %v1029_v10 = vpop.f32.mrb[1].mxu0 }
 0x246   :  { %v7728_v11 = vadd.f32 %v1029_v10, %v7722_v7  ;;  %v1031_v12 = vpop.f32.mrb[2].mxu0 }
 0x247   :  { %v1186_v13 = vmul.f32 %v7725_v9, %v7725_v9  ;;  %v7733_v14 = vadd.f32 %v1031_v12, %v7719_v6  ;;  %v1033_v15 = vpop.f32.mrb[3].mxu0 }
 0x248   :  { %v1187_v16 = vmul.f32 %v7728_v11, %v7728_v11  ;;  %v7738_v17 = vadd.f32 %v1033_v15, %v7722_v7 }
 0x249   :  { %v1250_v18 = vmul.f32 %v7725_v9, %v1186_v13  ;;  %v1188_v19 = vmul.f32 %v7733_v14, %v7733_v14 }
 0x24a   :  { %v1251_v20 = vmul.f32 %v7728_v11, %v1187_v16  ;;  %v1189_v21 = vmul.f32 %v7738_v17, %v7738_v17 }
 0x24b   :  { %v1314_v22 = vmul.f32 0.044715, %v1250_v18  ;;  %v1252_v23 = vmul.f32 %v7733_v14, %v1188_v19 }
 0x24c   :  { %v1315_v24 = vmul.f32 0.044715, %v1251_v20  ;;  %v1253_v25 = vmul.f32 %v7738_v17, %v1189_v21  ;;  %v1037_v26 = vpop.f32.mrb[4].mxu0 }
 0x24d   :  { %v1378_v27 = vadd.f32 %v7725_v9, %v1314_v22  ;;  %v1316_v28 = vmul.f32 0.044715, %v1252_v23  ;;  %v7750_v29 = vadd.f32 %v1037_v26, %v7719_v6  ;;  %v1039_v30 = vpop.f32.mrb[5].mxu0 }
 0x24e   :  { %v1317_v31 = vmul.f32 0.044715, %v1253_v25  ;;  %v7753_v32 = vadd.f32 %v1039_v30, %v7722_v7  ;;  %v1041_v33 = vpop.f32.mrb[6].mxu0  ;;  %v1379_v34 = vadd.f32 %v7728_v11, %v1315_v24 }
 0x24f   :  { %v1442_v35 = vmul.f32 0.7978846, %v1378_v27  ;;  %v1380_v36 = vadd.f32 %v7733_v14, %v1316_v28  ;;  %v1190_v37 = vmul.f32 %v7750_v29, %v7750_v29  ;;  %v7760_v38 = vadd.f32 %v1041_v33, %v7719_v6  ;;  %v1043_v39 = vpop.f32.mrb[7].mxu0 }
 0x250   :  { %v1191_v40 = vmul.f32 %v7753_v32, %v7753_v32  ;;  %v7765_v41 = vadd.f32 %v1043_v39, %v7722_v7  ;;  %v1381_v42 = vadd.f32 %v7738_v17, %v1317_v31  ;;  %v1443_v43 = vmul.f32 0.7978846, %v1379_v34 }
 0x251   :  { %6961 = vtanh.f32 %v1442_v35  ;;  %v1444_v44 = vmul.f32 0.7978846, %v1380_v36  ;;  %v1254_v45 = vmul.f32 %v7750_v29, %v1190_v37  ;;  %v1192_v46 = vmul.f32 %v7760_v38, %v7760_v38 }
 0x252   :  { %v1255_v47 = vmul.f32 %v7753_v32, %v1191_v40  ;;  %v1193_v48 = vmul.f32 %v7765_v41, %v7765_v41  ;;  %v1445_v49 = vmul.f32 0.7978846, %v1381_v42  ;;  %6963 = vtanh.f32 %v1443_v43 }
 0x253   :  { %6965 = vtanh.f32 %v1444_v44  ;;  %v1318_v50 = vmul.f32 0.044715, %v1254_v45  ;;  %v1256_v51 = vmul.f32 %v7760_v38, %v1192_v46 }
 0x254   :  { %v1319_v52 = vmul.f32 0.044715, %v1255_v47  ;;  %v1257_v53 = vmul.f32 %v7765_v41, %v1193_v48  ;;  %v1047_v54 = vpop.f32.mrb[8].mxu0  ;;  %6967 = vtanh.f32 %v1445_v49 }
 0x255   :  { %v1382_v55 = vadd.f32 %v7750_v29, %v1318_v50  ;;  %v1320_v56 = vmul.f32 0.044715, %v1256_v51  ;;  %v7778_v57 = vadd.f32 %v1047_v54, %v7719_v6  ;;  %v1049_v58 = vpop.f32.mrb[9].mxu0 }
 0x256   :  { %v1383_v59 = vadd.f32 %v7753_v32, %v1319_v52  ;;  %v1321_v60 = vmul.f32 0.044715, %v1257_v53  ;;  %v7782_v61 = vadd.f32 %v1049_v58, %v7722_v7  ;;  %v1051_v62 = vpop.f32.mrb[10].mxu0 }
 0x257   :  { %v1446_v63 = vmul.f32 0.7978846, %v1382_v55  ;;  %v1384_v0 = vadd.f32 %v7760_v38, %v1320_v56  ;;  %v1194_v1 = vmul.f32 %v7778_v57, %v7778_v57  ;;  %v7788_v4 = vadd.f32 %v1051_v62, %v7719_v6  ;;  %v1053_v8 = vpop.f32.mrb[11].mxu0 }
 0x258   :  { %v1447_v10 = vmul.f32 0.7978846, %v1383_v59  ;;  %v1385_v12 = vadd.f32 %v7765_v41, %v1321_v60  ;;  %v1195_v13 = vmul.f32 %v7782_v61, %v7782_v61  ;;  %v7794_v15 = vadd.f32 %v1053_v8, %v7722_v7 }
 0x259   :  { %6969 = vtanh.f32 %v1446_v63  ;;  %v1448_v16 = vmul.f32 0.7978846, %v1384_v0  ;;  %v1258_v18 = vmul.f32 %v7778_v57, %v1194_v1  ;;  %v1196_v19 = vmul.f32 %v7788_v4, %v7788_v4 }
 0x25a   :  { %6971 = vtanh.f32 %v1447_v10  ;;  %v1449_v20 = vmul.f32 0.7978846, %v1385_v12  ;;  %v1259_v21 = vmul.f32 %v7782_v61, %v1195_v13  ;;  %v1197_v22 = vmul.f32 %v7794_v15, %v7794_v15 }
 0x25b   :  { %v6962_v23 = vpop.eup %6961  ;;  %6973 = vtanh.f32 %v1448_v16  ;;  %v1322_v24 = vmul.f32 0.044715, %v1258_v18  ;;  %v1260_v25 = vmul.f32 %v7788_v4, %v1196_v19 }
 0x25c   :  { %v6964_v26 = vpop.eup %6963  ;;  %6975 = vtanh.f32 %v1449_v20  ;;  %v1323_v27 = vmul.f32 0.044715, %v1259_v21  ;;  %v1261_v28 = vmul.f32 %v7794_v15, %v1197_v22  ;;  %v1057_v30 = vpop.f32.mrb[12].mxu0  ;;  %v7804_v31 = vadd.f32 1.0, %v6962_v23 }
 0x25d   :  { %v6966_v33 = vpop.eup %6965  ;;  %v1386_v34 = vadd.f32 %v7778_v57, %v1322_v24  ;;  %v1324_v35 = vmul.f32 0.044715, %v1260_v25  ;;  %v7808_v36 = vadd.f32 %v1057_v30, %v7719_v6  ;;  %v1059_v37 = vpop.f32.mrb[13].mxu0  ;;  %v1571_v39 = vadd.f32 1.0, %v6964_v26 }
 0x25e   :  { %v1387_v40 = vadd.f32 %v7782_v61, %v1323_v27  ;;  %v1325_v42 = vmul.f32 0.044715, %v1261_v28  ;;  %v7812_v43 = vadd.f32 %v1059_v37, %v7722_v7  ;;  %v1061_v44 = vpop.f32.mrb[14].mxu0  ;;  %v7814_v45 = vadd.f32 1.0, %v6966_v33  ;;  %v6968_v51 = vpop.eup %6967 }
 0x25f   :  { %v1450_v46 = vmul.f32 0.7978846, %v1386_v34  ;;  %v1388_v47 = vadd.f32 %v7788_v4, %v1324_v35  ;;  %v1198_v48 = vmul.f32 %v7808_v36, %v7808_v36  ;;  %v7820_v49 = vadd.f32 %v1061_v44, %v7719_v6  ;;  %v1063_v50 = vpop.f32.mrb[15].mxu0 }
 0x260   :  { %v1451_v52 = vmul.f32 0.7978846, %v1387_v40  ;;  %v1389_v53 = vadd.f32 %v7794_v15, %v1325_v42  ;;  %v1199_v54 = vmul.f32 %v7812_v43, %v7812_v43  ;;  %v7826_v55 = vadd.f32 %v1063_v50, %v7722_v7 }
 0x261   :  { %6977 = vtanh.f32 %v1450_v46  ;;  %v1452_v56 = vmul.f32 0.7978846, %v1388_v47  ;;  %v1262_v58 = vmul.f32 %v7808_v36, %v1198_v48  ;;  %v1200_v59 = vmul.f32 %v7820_v49, %v7820_v49 }
 0x262   :  { %6979 = vtanh.f32 %v1451_v52  ;;  %v1453_v60 = vmul.f32 0.7978846, %v1389_v53  ;;  %v1263_v62 = vmul.f32 %v7812_v43, %v1199_v54  ;;  %v1201_v63 = vmul.f32 %v7826_v55, %v7826_v55 }
 0x263   :  { %v7834_v0 = vpop.eup %6969  ;;  %6981 = vtanh.f32 %v1452_v56  ;;  %v1326_v1 = vmul.f32 0.044715, %v1262_v58  ;;  %v1264_v8 = vmul.f32 %v7820_v49, %v1200_v59  ;;  %v1573_v10 = vadd.f32 1.0, %v6968_v51 }
 0x264   :  { %v7837_v12 = vpop.eup %6971  ;;  %6983 = vtanh.f32 %v1453_v60  ;;  %v1327_v13 = vmul.f32 0.044715, %v1263_v62  ;;  %v1265_v16 = vmul.f32 %v7826_v55, %v1201_v63  ;;  %v1067_v18 = vpop.f32.mrb[16].mxu0  ;;  %v1635_v19 = vmul.f32 0.5, %v1571_v39 }
 0x265   :  { %v7840_v20 = vpop.eup %6973  ;;  %v1390_v21 = vadd.f32 %v7808_v36, %v1326_v1  ;;  %v1328_v22 = vmul.f32 0.044715, %v1264_v8  ;;  %v7844_v23 = vadd.f32 %v1067_v18, %v7719_v6  ;;  %v1069_v24 = vpop.f32.mrb[17].mxu0  ;;  %v1637_v25 = vmul.f32 0.5, %v1573_v10 }
 0x266   :  { %v7846_v26 = vpop.eup %6975  ;;  %v1391_v27 = vadd.f32 %v7812_v43, %v1327_v13  ;;  %v1329_v28 = vmul.f32 0.044715, %v1265_v16  ;;  %v7850_v30 = vadd.f32 %v1069_v24, %v7722_v7  ;;  %v1071_v33 = vpop.f32.mrb[18].mxu0  ;;  %v1699_v34 = vmul.f32 %v7728_v11, %v1635_v19  ;;  %v6659_v11 = vld [vmem:[#allocation8 + $0x4] ss:$8 sps:$4 sm:$0xff]  }
 0x267   :  { %v1454_v35 = vmul.f32 0.7978846, %v1390_v21  ;;  %v1392_v37 = vadd.f32 %v7820_v49, %v1328_v22  ;;  %v1202_v39 = vmul.f32 %v7844_v23, %v7844_v23  ;;  %v7857_v40 = vadd.f32 %v1071_v33, %v7719_v6  ;;  %v1073_v42 = vpop.f32.mrb[19].mxu0  ;;  %2427 = vmatprep.subr.bf16.mxu1 %v6659_v11 }
 0x268   :  { %v1455_v44 = vmul.f32 0.7978846, %v1391_v27  ;;  %v1393_v46 = vadd.f32 %v7826_v55, %v1329_v28  ;;  %v1203_v47 = vmul.f32 %v7850_v30, %v7850_v30  ;;  %v7863_v48 = vadd.f32 %v1073_v42, %v7722_v7 }
 0x269   :  { %6985 = vtanh.f32 %v1454_v35  ;;  %v1456_v50 = vmul.f32 0.7978846, %v1392_v37  ;;  %v1266_v51 = vmul.f32 %v7844_v23, %v1202_v39  ;;  %v1204_v52 = vmul.f32 %v7857_v40, %v7857_v40 }
 0x26a   :  { %6987 = vtanh.f32 %v1455_v44  ;;  %v1457_v53 = vmul.f32 0.7978846, %v1393_v46  ;;  %v1267_v54 = vmul.f32 %v7850_v30, %v1203_v47  ;;  %v1205_v56 = vmul.f32 %v7863_v48, %v7863_v48  ;;  %v6657_v47 = vld [vmem:[#allocation8] ss:$8 sps:$4 sm:$0xff]  }
 0x26b   :  { %v7871_v58 = vpop.eup %6977  ;;  %6989 = vtanh.f32 %v1456_v50  ;;  %v1330_v59 = vmul.f32 0.044715, %v1266_v51  ;;  %v1268_v60 = vmul.f32 %v7857_v40, %v1204_v52  ;;  %v1701_v62 = vmul.f32 %v7738_v17, %v1637_v25  ;;  %v6662_v51 = vld [vmem:[#allocation8 + $0x14] ss:$8 sps:$4 sm:$0xff]  }
 0x26c   :  { %v7875_v63 = vpop.eup %6979  ;;  %6991 = vtanh.f32 %v1457_v53  ;;  %v1331_v1 = vmul.f32 0.044715, %v1267_v54  ;;  %v1269_v8 = vmul.f32 %v7863_v48, %v1205_v56  ;;  %v1634_v10 = vmul.f32 0.5, %v7804_v31  ;;  %v1077_v13 = vpop.f32.mrb[20].mxu0 }
 0x26d   :  { %v7879_v16 = vpop.eup %6981  ;;  %v1394_v18 = vadd.f32 %v7844_v23, %v1330_v59  ;;  %v1332_v19 = vmul.f32 0.044715, %v1268_v60  ;;  %v1763_v21 = vpack.c.bf16 %v1701_v62, %v1699_v34  ;;  %v1636_v22 = vmul.f32 0.5, %v7814_v45  ;;  %v1079_v24 = vpop.f32.mrb[21].mxu0 }
 0x26e   :  { %v7883_v27 = vpop.eup %6983  ;;  %v1395_v17 = vadd.f32 %v7850_v30, %v1331_v1  ;;  %v1333_v25 = vmul.f32 0.044715, %v1269_v8  ;;  %v1698_v28 = vmul.f32 %v7725_v9, %v1634_v10  ;;  %v7888_v33 = vadd.f32 %v1077_v13, %v7719_v6  ;;  %v1081_v31 = vpop.f32.mrb[22].mxu0 }
 0x26f   :  { %v1458_v35 = vmul.f32 0.7978846, %v1394_v18  ;;  %v1396_v37 = vadd.f32 %v7857_v40, %v1332_v19  ;;  %2030 = vmatprep.mubr.bf16.mxu1 %v1763_v21  ;;  %v1700_v34 = vmul.f32 %v7733_v14, %v1636_v22  ;;  %v7893_v45 = vadd.f32 %v1079_v24, %v7722_v7  ;;  %v1083_v39 = vpop.f32.mrb[23].mxu0  ;;  %v6660_v19 = vld [vmem:[#allocation8 + $0x10] ss:$8 sps:$4 sm:$0xff]  }
 0x270   :  { %v1459_v42 = vmul.f32 0.7978846, %v1395_v17  ;;  %v1397_v44 = vadd.f32 %v7863_v48, %v1333_v25  ;;  %v1206_v9 = vmul.f32 %v7888_v33, %v7888_v33  ;;  %v7899_v46 = vadd.f32 %v1081_v31, %v7719_v6 }
 0x271   :  { %6993 = vtanh.f32 %v1458_v35  ;;  %v1460_v11 = vmul.f32 0.7978846, %v1396_v37  ;;  %v1762_v50 = vpack.c.bf16 %v1700_v34, %v1698_v28  ;;  %v1207_v14 = vmul.f32 %v7893_v45, %v7893_v45 }
 0x272   :  { %6995 = vtanh.f32 %v1459_v42  ;;  %v1461_v52 = vmul.f32 0.7978846, %v1397_v44  ;;  %v1270_v53 = vmul.f32 %v7888_v33, %v1206_v9  ;;  %v1208_v54 = vmul.f32 %v7899_v46, %v7899_v46 }
 0x273   :  { %v7906_v56 = vpop.eup %6985  ;;  %6997 = vtanh.f32 %v1460_v11  ;;  %2031 = vmatmul.mubr.bf16.vlgmr.msra.gmra.mrb[0].mxu1 %v1762_v50  ;;  %v1271_v59 = vmul.f32 %v7893_v45, %v1207_v14  ;;  %v7910_v60 = vadd.f32 %v1083_v39, %v7722_v7  ;;  %v1575_v62 = vadd.f32 1.0, %v7837_v12 }
 0x274   :  { %v7913_v1 = vpop.eup %6987  ;;  %6999 = vtanh.f32 %v1461_v52  ;;  %v1334_v8 = vmul.f32 0.044715, %v1270_v53  ;;  %v1272_v10 = vmul.f32 %v7899_v46, %v1208_v54  ;;  %v1577_v13 = vadd.f32 1.0, %v7846_v26  ;;  %v1087_v18 = vpop.f32.mrb[24].mxu0  ;;  %2428 = vmatpush1.bf16.msra.mxu1 %v6657_v47  ;;  %v6663_v52 = vld [vmem:[#allocation8 + $0x20] ss:$8 sps:$4 sm:$0xff]  }
 0x275   :  { %v7917_v21 = vpop.eup %6989  ;;  %v1335_v22 = vmul.f32 0.044715, %v1271_v59  ;;  %v1209_v24 = vmul.f32 %v7910_v60, %v7910_v60  ;;  %v1639_v17 = vmul.f32 0.5, %v1575_v62  ;;  %v1574_v12 = vadd.f32 1.0, %v7834_v0  ;;  %v1089_v25 = vpop.f32.mrb[25].mxu0  ;;  %2429 = vmatprep.subr.bf16.mxu1 %v6662_v51 }
 0x276   :  { %v7922_v28 = vpop.eup %6991  ;;  %v1398_v31 = vadd.f32 %v7888_v33, %v1334_v8  ;;  %v1336_v35 = vmul.f32 0.044715, %v1272_v10  ;;  %v1641_v26 = vmul.f32 0.5, %v1577_v13  ;;  %v1576_v37 = vadd.f32 1.0, %v7840_v20  ;;  %v1091_v34 = vpop.f32.mrb[26].mxu0 }
 0x277   :  { %v1399_v39 = vadd.f32 %v7893_v45, %v1335_v22  ;;  %v1273_v42 = vmul.f32 %v7910_v60, %v1209_v24  ;;  %v1703_v44 = vmul.f32 %v7753_v32, %v1639_v17  ;;  %v1638_v9 = vmul.f32 0.5, %v1574_v12  ;;  %v1093_v47 = vpop.f32.mrb[27].mxu0  ;;  %v6665_v0 = vld [vmem:[#allocation8 + $0x24] ss:$8 sps:$4 sm:$0xff]  }
 0x278   :  { %v1462_v11 = vmul.f32 0.7978846, %v1398_v31  ;;  %v1400_v50 = vadd.f32 %v7899_v46, %v1336_v35  ;;  %v1705_v14 = vmul.f32 %v7765_v41, %v1641_v26  ;;  %v1640_v51 = vmul.f32 0.5, %v1576_v37  ;;  %2430 = vmatpush1.bf16.msra.mxu1 %v6660_v19 }
 0x279   :  { %v1463_v53 = vmul.f32 0.7978846, %v1399_v39  ;;  %v1337_v20 = vmul.f32 0.044715, %v1273_v42  ;;  %v1702_v54 = vmul.f32 %v7750_v29, %v1638_v9  ;;  %v7933_v59 = vadd.f32 %v1087_v18, %v7719_v6  ;;  %2431 = vmatprep.subr.bf16.mxu1 %v6665_v0 }
 0x27a   :  { %7001 = vtanh.f32 %v1462_v11  ;;  %v1464_v32 = vmul.f32 0.7978846, %v1400_v50  ;;  %v1765_v62 = vpack.c.bf16 %v1705_v14, %v1703_v44  ;;  %v1704_v8 = vmul.f32 %v7760_v38, %v1640_v51  ;;  %v6666_v50 = vld [vmem:[#allocation8 + $0x30] ss:$8 sps:$4 sm:$0xff]  }
 0x27b   :  { %v7936_v10 = vpop.eup %6993  ;;  %7003 = vtanh.f32 %v1463_v53  ;;  %v1401_v41 = vadd.f32 %v7910_v60, %v1337_v20  ;;  %v1210_v13 = vmul.f32 %v7933_v59, %v7933_v59  ;;  %v7942_v19 = vadd.f32 %v1089_v25, %v7722_v7  ;;  %v6668_v20 = vld [vmem:[#allocation8 + $0x34] ss:$8 sps:$4 sm:$0xff]  }
 0x27c   :  { %v7944_v29 = vpop.eup %6995  ;;  %7005 = vtanh.f32 %v1464_v32  ;;  %2040 = vmatprep.mubr.bf16.mxu1 %v1765_v62  ;;  %v1764_v18 = vpack.c.bf16 %v1704_v8, %v1702_v54  ;;  %v7947_v22 = vadd.f32 %v1091_v34, %v7719_v6  ;;  %v7950_v38 = vadd.f32 %v1093_v47, %v7722_v7  ;;  %v1097_v24 = vpop.f32.mrb[28].mxu0  ;;  %2432 = vmatpush1.bf16.msra.mxu1 %v6663_v52 }
 0x27d   :  { %v7952_v17 = vpop.eup %6997  ;;  %v1465_v12 = vmul.f32 0.7978846, %v1401_v41  ;;  %v1274_v31 = vmul.f32 %v7933_v59, %v1210_v13  ;;  %v1211_v25 = vmul.f32 %v7942_v19, %v7942_v19  ;;  %v1579_v35 = vadd.f32 1.0, %v7875_v63  ;;  %v1099_v26 = vpop.f32.mrb[29].mxu0  ;;  %2433 = vmatprep.subr.bf16.mxu1 %v6668_v20 }
 0x27e   :  { %v7958_v37 = vpop.eup %6999  ;;  %2041 = vmatmul.mubr.bf16.gmra.mrb[4].mxu1 %v1764_v18  ;;  %v1212_v34 = vmul.f32 %v7947_v22, %v7947_v22  ;;  %v1213_v39 = vmul.f32 %v7950_v38, %v7950_v38  ;;  %v1581_v42 = vadd.f32 1.0, %v7883_v27  ;;  %v1578_v44 = vadd.f32 1.0, %v7871_v58  ;;  %v1101_v9 = vpop.f32.mrb[30].mxu0 }
 0x27f   :  { %7007 = vtanh.f32 %v1465_v12  ;;  %v1338_v47 = vmul.f32 0.044715, %v1274_v31  ;;  %v1275_v0 = vmul.f32 %v7942_v19, %v1211_v25  ;;  %v1643_v63 = vmul.f32 0.5, %v1579_v35  ;;  %v1103_v11 = vpop.f32.mrb[31].mxu0 }
 0x280   :  { %v1276_v14 = vmul.f32 %v7947_v22, %v1212_v34  ;;  %v1277_v51 = vmul.f32 %v7950_v38, %v1213_v39  ;;  %v1645_v52 = vmul.f32 0.5, %v1581_v42  ;;  %v1580_v53 = vadd.f32 1.0, %v7879_v16  ;;  %2434 = vmatpush1.bf16.msra.mxu1 %v6666_v50 }
 0x281   :  { %v1402_v27 = vadd.f32 %v7933_v59, %v1338_v47  ;;  %v1339_v54 = vmul.f32 0.044715, %v1275_v0  ;;  %v1707_v58 = vmul.f32 %v7782_v61, %v1643_v63  ;;  %v1642_v32 = vmul.f32 0.5, %v1578_v44 }
 0x282   :  { %v1340_v62 = vmul.f32 0.044715, %v1276_v14  ;;  %v1341_v8 = vmul.f32 0.044715, %v1277_v51  ;;  %v1709_v41 = vmul.f32 %v7794_v15, %v1645_v52  ;;  %v1644_v13 = vmul.f32 0.5, %v1580_v53 }
 0x283   :  { %v1466_v18 = vmul.f32 0.7978846, %v1402_v27  ;;  %v1403_v12 = vadd.f32 %v7942_v19, %v1339_v54  ;;  %v1706_v31 = vmul.f32 %v7778_v57, %v1642_v32  ;;  %v7976_v16 = vadd.f32 %v1097_v24, %v7719_v6  ;;  %v6669_v27 = vld [vmem:[#allocation8 + $0x40] ss:$8 sps:$4 sm:$0xff]   ;;  %v6671_v54 = vld [vmem:[#allocation8 + $0x44] ss:$8 sps:$4 sm:$0xff]  }
 0x284   :  { %v7978_v25 = vpop.eup %7001  ;;  %v1404_v61 = vadd.f32 %v7947_v22, %v1340_v62  ;;  %v1405_v35 = vadd.f32 %v7950_v38, %v1341_v8  ;;  %v1767_v34 = vpack.c.bf16 %v1709_v41, %v1707_v58  ;;  %v1708_v15 = vmul.f32 %v7788_v4, %v1644_v13  ;;  %v1107_v39 = vpop.f32.mrb[32].mxu0  ;;  %v6674_v62 = vld [vmem:[#allocation8 + $0x54] ss:$8 sps:$4 sm:$0xff]   ;;  %2435 = vmatprep.subr.bf16.mxu1 %v6671_v54 }
 0x285   :  { %v7983_v42 = vpop.eup %7003  ;;  %7009 = vtanh.f32 %v1466_v18  ;;  %v1467_v44 = vmul.f32 0.7978846, %v1403_v12  ;;  %v1214_v57 = vmul.f32 %v7976_v16, %v7976_v16  ;;  %v7988_v24 = vadd.f32 %v1099_v26, %v7722_v7  ;;  %v7990_v47 = vpop.f32.mrb[33].mxu0  ;;  %2436 = vmatpush1.bf16.msra.mxu1 %v6669_v27 }
 0x286   :  { %v7992_v0 = vpop.eup %7005  ;;  %v1468_v63 = vmul.f32 0.7978846, %v1404_v61  ;;  %v1469_v50 = vmul.f32 0.7978846, %v1405_v35  ;;  %2050 = vmatprep.mubr.bf16.mxu1 %v1767_v34  ;;  %v1766_v14 = vpack.c.bf16 %v1708_v15, %v1706_v31  ;;  %v7995_v4 = vadd.f32 %v1101_v9, %v7719_v6  ;;  %v1111_v51 = vpop.f32.mrb[34].mxu0  ;;  %2437 = vmatprep.subr.bf16.mxu1 %v6674_v62 }
 0x287   :  { %7011 = vtanh.f32 %v1467_v44  ;;  %v1278_v52 = vmul.f32 %v7976_v16, %v1214_v57  ;;  %v1215_v53 = vmul.f32 %v7988_v24, %v7988_v24  ;;  %v8001_v26 = vadd.f32 %v1103_v11, %v7722_v7  ;;  %v1113_v20 = vpop.f32.mrb[35].mxu0  ;;  %v6677_v44 = vld [vmem:[#allocation8 + $0x64] ss:$8 sps:$4 sm:$0xff]  }
 0x288   :  { %7013 = vtanh.f32 %v1468_v63  ;;  %2051 = vmatmul.mubr.bf16.gmra.mrb[8].mxu1 %v1766_v14  ;;  %v1216_v58 = vmul.f32 %v7995_v4, %v7995_v4  ;;  %v1583_v9 = vadd.f32 1.0, %v7913_v1  ;;  %v1585_v32 = vadd.f32 1.0, %v7922_v28  ;;  %v6672_v1 = vld [vmem:[#allocation8 + $0x50] ss:$8 sps:$4 sm:$0xff]  }
 0x289   :  { %v8007_v8 = vpop.eup %7007  ;;  %7015 = vtanh.f32 %v1469_v50  ;;  %v1342_v41 = vmul.f32 0.044715, %v1278_v52  ;;  %v1279_v11 = vmul.f32 %v7988_v24, %v1215_v53  ;;  %v1217_v13 = vmul.f32 %v8001_v26, %v8001_v26  ;;  %2438 = vmatpush1.bf16.msra.mxu1 %v6672_v1 }
 0x28a   :  { %v1280_v18 = vmul.f32 %v7995_v4, %v1216_v58  ;;  %v1647_v12 = vmul.f32 0.5, %v1583_v9  ;;  %v1649_v31 = vmul.f32 0.5, %v1585_v32  ;;  %v1582_v61 = vadd.f32 1.0, %v7906_v56  ;;  %2439 = vmatprep.subr.bf16.mxu1 %v6677_v44 }
 0x28b   :  { %v1406_v28 = vadd.f32 %v7976_v16, %v1342_v41  ;;  %v1343_v35 = vmul.f32 0.044715, %v1279_v11  ;;  %v1281_v34 = vmul.f32 %v8001_v26, %v1217_v13  ;;  %v1584_v15 = vadd.f32 1.0, %v7917_v21 }
 0x28c   :  { %v1344_v57 = vmul.f32 0.044715, %v1280_v18  ;;  %v1711_v63 = vmul.f32 %v7812_v43, %v1647_v12  ;;  %v1713_v50 = vmul.f32 %v7826_v55, %v1649_v31  ;;  %v1646_v14 = vmul.f32 0.5, %v1582_v61  ;;  %v8019_v52 = vpop.f32.mrb[36].mxu0  ;;  %v6675_v55 = vld [vmem:[#allocation8 + $0x60] ss:$8 sps:$4 sm:$0xff]  }
 0x28d   :  { %v1470_v56 = vmul.f32 0.7978846, %v1406_v28  ;;  %v1407_v53 = vadd.f32 %v7988_v24, %v1343_v35  ;;  %v1345_v27 = vmul.f32 0.044715, %v1281_v34  ;;  %v1648_v54 = vmul.f32 0.5, %v1584_v15  ;;  %v8022_v58 = vpop.f32.mrb[37].mxu0  ;;  %2440 = vmatpush1.bf16.msra.mxu1 %v6675_v55 }
 0x28e   :  { %v1408_v9 = vadd.f32 %v7995_v4, %v1344_v57  ;;  %v1769_v21 = vpack.c.bf16 %v1713_v50, %v1711_v63  ;;  %v1710_v32 = vmul.f32 %v7808_v36, %v1646_v14  ;;  %v8027_v62 = vadd.f32 %v1107_v39, %v7719_v6  ;;  %v8029_v43 = vpop.f32.mrb[38].mxu0  ;;  %v6680_v31 = vld [vmem:[#allocation8 + $0x74] ss:$8 sps:$4 sm:$0xff]   ;;  %v6678_v57 = vld [vmem:[#allocation8 + $0x70] ss:$8 sps:$4 sm:$0xff]  }
 0x28f   :  { %v8031_v41 = vpop.eup %7009  ;;  %7017 = vtanh.f32 %v1470_v56  ;;  %v1471_v11 = vmul.f32 0.7978846, %v1407_v53  ;;  %v1409_v13 = vadd.f32 %v8001_v26, %v1345_v27  ;;  %v1712_v18 = vmul.f32 %v7820_v49, %v1648_v54  ;;  %v8035_v12 = vpop.f32.mrb[39].mxu0  ;;  %2441 = vmatprep.subr.bf16.mxu1 %v6680_v31  ;;  %v6683_v56 = vld [vmem:[#allocation8 + $0x84] ss:$8 sps:$4 sm:$0xff]  }
 0x290   :  { %v1472_v36 = vmul.f32 0.7978846, %v1408_v9  ;;  %2060 = vmatprep.mubr.bf16.mxu1 %v1769_v21  ;;  %v1218_v39 = vmul.f32 %v8027_v62, %v8027_v62  ;;  %v8041_v61 = vadd.f32 %v7990_v47, %v7722_v7  ;;  %v8044_v1 = vadd.f32 %v1111_v51, %v7719_v6 }
 0x291   :  { %v8046_v28 = vpop.eup %7011  ;;  %7019 = vtanh.f32 %v1471_v11  ;;  %v1473_v49 = vmul.f32 0.7978846, %v1409_v13  ;;  %v1768_v35 = vpack.c.bf16 %v1712_v18, %v1710_v32  ;;  %v8049_v34 = vadd.f32 %v1113_v20, %v7722_v7  ;;  %2442 = vmatpush1.bf16.msra.mxu1 %v6678_v57 }
 0x292   :  { %v8051_v15 = vpop.eup %7013  ;;  %7021 = vtanh.f32 %v1472_v36  ;;  %v1282_v44 = vmul.f32 %v8027_v62, %v1218_v39  ;;  %v1219_v47 = vmul.f32 %v8041_v61, %v8041_v61  ;;  %v1220_v51 = vmul.f32 %v8044_v1, %v8044_v1  ;;  %2443 = vmatprep.subr.bf16.mxu1 %v6683_v56 }
 0x293   :  { %v8058_v63 = vpop.eup %7015  ;;  %7023 = vtanh.f32 %v1473_v49  ;;  %2061 = vmatmul.mubr.bf16.gmra.mrb[12].mxu1 %v1768_v35  ;;  %v1221_v20 = vmul.f32 %v8049_v34, %v8049_v34  ;;  %v1587_v50 = vadd.f32 1.0, %v7944_v29  ;;  %v1589_v14 = vadd.f32 1.0, %v7958_v37  ;;  %v6681_v37 = vld [vmem:[#allocation8 + $0x80] ss:$8 sps:$4 sm:$0xff]  }
 0x294   :  { %v1346_v53 = vmul.f32 0.044715, %v1282_v44  ;;  %v1283_v27 = vmul.f32 %v8041_v61, %v1219_v47  ;;  %v1284_v54 = vmul.f32 %v8044_v1, %v1220_v51  ;;  %v1586_v9 = vadd.f32 1.0, %v7936_v10  ;;  %v8067_v21 = vpop.f32.mrb[40].mxu0 }
 0x295   :  { %v1285_v32 = vmul.f32 %v8049_v34, %v1221_v20  ;;  %v1651_v55 = vmul.f32 0.5, %v1587_v50  ;;  %v1653_v11 = vmul.f32 0.5, %v1589_v14  ;;  %v1588_v13 = vadd.f32 1.0, %v7952_v17  ;;  %v8071_v29 = vpop.f32.mrb[41].mxu0  ;;  %v6686_v17 = vld [vmem:[#allocation8 + $0x94] ss:$8 sps:$4 sm:$0xff]   ;;  %2444 = vmatpush1.bf16.msra.mxu1 %v6681_v37 }
 0x296   :  { %v1410_v18 = vadd.f32 %v8027_v62, %v1346_v53  ;;  %v1347_v31 = vmul.f32 0.044715, %v1283_v27  ;;  %v1348_v36 = vmul.f32 0.044715, %v1284_v54  ;;  %v1650_v39 = vmul.f32 0.5, %v1586_v9  ;;  %v8074_v49 = vpop.f32.mrb[42].mxu0  ;;  %2445 = vmatprep.subr.bf16.mxu1 %v6686_v17 }
 0x297   :  { %v1349_v10 = vmul.f32 0.044715, %v1285_v32  ;;  %v1715_v35 = vmul.f32 %v7850_v30, %v1651_v55  ;;  %v1717_v44 = vmul.f32 %v7863_v48, %v1653_v11  ;;  %v1652_v47 = vmul.f32 0.5, %v1588_v13  ;;  %v8078_v51 = vpop.f32.mrb[43].mxu0 }
 0x298   :  { %v1474_v20 = vmul.f32 0.7978846, %v1410_v18  ;;  %v1411_v50 = vadd.f32 %v8041_v61, %v1347_v31  ;;  %v1412_v14 = vadd.f32 %v8044_v1, %v1348_v36  ;;  %v1714_v53 = vmul.f32 %v7844_v23, %v1650_v39  ;;  %v6684_v23 = vld [vmem:[#allocation8 + $0x90] ss:$8 sps:$4 sm:$0xff]   ;;  %v6689_v18 = vld [vmem:[#allocation8 + $0xa4] ss:$8 sps:$4 sm:$0xff]  }
 0x299   :  { %v8083_v27 = vpop.eup %7017  ;;  %v1413_v57 = vadd.f32 %v8049_v34, %v1349_v10  ;;  %v1771_v54 = vpack.c.bf16 %v1717_v44, %v1715_v35  ;;  %v1716_v30 = vmul.f32 %v7857_v40, %v1652_v47  ;;  %v8089_v48 = vadd.f32 %v8019_v52, %v7719_v6  ;;  %2446 = vmatpush1.bf16.msra.mxu1 %v6684_v23 }
 0x29a   :  { %7025 = vtanh.f32 %v1474_v20  ;;  %v1475_v56 = vmul.f32 0.7978846, %v1411_v50  ;;  %v1476_v9 = vmul.f32 0.7978846, %v1412_v14  ;;  %v8093_v32 = vadd.f32 %v8022_v58, %v7722_v7  ;;  %v6687_v50 = vld [vmem:[#allocation8 + $0xa0] ss:$8 sps:$4 sm:$0xff]   ;;  %2447 = vmatprep.subr.bf16.mxu1 %v6689_v18 }
 0x29b   :  { %v8095_v55 = vpop.eup %7019  ;;  %v1477_v11 = vmul.f32 0.7978846, %v1413_v57  ;;  %2070 = vmatprep.mubr.bf16.mxu1 %v1771_v54  ;;  %v1770_v13 = vpack.c.bf16 %v1716_v30, %v1714_v53  ;;  %v1222_v40 = vmul.f32 %v8089_v48, %v8089_v48  ;;  %v8101_v52 = vadd.f32 %v8029_v43, %v7719_v6  ;;  %v6692_v14 = vld [vmem:[#allocation8 + $0xb4] ss:$8 sps:$4 sm:$0xff]  }
 0x29c   :  { %v8103_v31 = vpop.eup %7021  ;;  %7027 = vtanh.f32 %v1475_v56  ;;  %v1223_v58 = vmul.f32 %v8093_v32, %v8093_v32  ;;  %v8109_v37 = vadd.f32 %v8035_v12, %v7722_v7  ;;  %v1591_v36 = vadd.f32 1.0, %v7983_v42  ;;  %v8112_v39 = vpop.f32.mrb[44].mxu0 }
 0x29d   :  { %v8114_v10 = vpop.eup %7023  ;;  %7029 = vtanh.f32 %v1476_v9  ;;  %2071 = vmatmul.mubr.bf16.gmra.mrb[16].mxu1 %v1770_v13  ;;  %v1286_v43 = vmul.f32 %v8089_v48, %v1222_v40  ;;  %v1224_v35 = vmul.f32 %v8101_v52, %v8101_v52  ;;  %v1593_v44 = vadd.f32 1.0, %v8007_v8  ;;  %v8120_v47 = vpop.f32.mrb[45].mxu0 }
 0x29e   :  { %7031 = vtanh.f32 %v1477_v11  ;;  %v1287_v12 = vmul.f32 %v8093_v32, %v1223_v58  ;;  %v1225_v42 = vmul.f32 %v8109_v37, %v8109_v37  ;;  %v1655_v17 = vmul.f32 0.5, %v1591_v36  ;;  %v8125_v20 = vpop.f32.mrb[46].mxu0  ;;  %2448 = vmatpush1.bf16.msra.mxu1 %v6687_v50 }
 0x29f   :  { %v1350_v53 = vmul.f32 0.044715, %v1286_v43  ;;  %v1288_v57 = vmul.f32 %v8101_v52, %v1224_v35  ;;  %v1657_v54 = vmul.f32 0.5, %v1593_v44  ;;  %v1590_v8 = vadd.f32 1.0, %v7978_v25  ;;  %v8129_v30 = vpop.f32.mrb[47].mxu0  ;;  %2449 = vmatprep.subr.bf16.mxu1 %v6692_v14 }
 0x2a0   :  { %v1351_v56 = vmul.f32 0.044715, %v1287_v12  ;;  %v1289_v9 = vmul.f32 %v8109_v37, %v1225_v42  ;;  %v1719_v11 = vmul.f32 %v7893_v45, %v1655_v17  ;;  %v1592_v13 = vadd.f32 1.0, %v7992_v0  ;;  %v6690_v44 = vld [vmem:[#allocation8 + $0xb0] ss:$8 sps:$4 sm:$0xff]  }
 0x2a1   :  { %v1414_v23 = vadd.f32 %v8089_v48, %v1350_v53  ;;  %v1352_v40 = vmul.f32 0.044715, %v1288_v57  ;;  %v1721_v58 = vmul.f32 %v7910_v60, %v1657_v54  ;;  %v1654_v36 = vmul.f32 0.5, %v1590_v8  ;;  %v6695_v17 = vld [vmem:[#allocation8 + $0xc4] ss:$8 sps:$4 sm:$0xff]  }
 0x2a2   :  { %v1415_v43 = vadd.f32 %v8093_v32, %v1351_v56  ;;  %v1353_v35 = vmul.f32 0.044715, %v1289_v9  ;;  %v1656_v25 = vmul.f32 0.5, %v1592_v13  ;;  %v8139_v18 = vadd.f32 %v8067_v21, %v7719_v6  ;;  %2450 = vmatpush1.bf16.msra.mxu1 %v6690_v44 }
 0x2a3   :  { %v1478_v12 = vmul.f32 0.7978846, %v1414_v23  ;;  %v1416_v45 = vadd.f32 %v8101_v52, %v1352_v40  ;;  %v1773_v0 = vpack.c.bf16 %v1721_v58, %v1719_v11  ;;  %v1718_v42 = vmul.f32 %v7888_v33, %v1654_v36  ;;  %v6693_v40 = vld [vmem:[#allocation8 + $0xc0] ss:$8 sps:$4 sm:$0xff]   ;;  %2451 = vmatprep.subr.bf16.mxu1 %v6695_v17  ;;  %v6696_v17 = vld [vmem:[#allocation8 + $0xd0] ss:$8 sps:$4 sm:$0xff]  }
 0x2a4   :  { %v8143_v60 = vpop.eup %7025  ;;  %v1479_v53 = vmul.f32 0.7978846, %v1415_v43  ;;  %v1417_v57 = vadd.f32 %v8109_v37, %v1353_v35  ;;  %v1720_v54 = vmul.f32 %v7899_v46, %v1656_v25  ;;  %v1226_v21 = vmul.f32 %v8139_v18, %v8139_v18  ;;  %v8149_v50 = vpop.f32.mrb[48].mxu0  ;;  %v6698_v35 = vld [vmem:[#allocation8 + $0xd4] ss:$8 sps:$4 sm:$0xff]  }
 0x2a5   :  { %7033 = vtanh.f32 %v1478_v12  ;;  %v1480_v8 = vmul.f32 0.7978846, %v1416_v45  ;;  %2080 = vmatprep.mubr.bf16.mxu1 %v1773_v0  ;;  %v8153_v33 = vadd.f32 %v8071_v29, %v7722_v7  ;;  %v8157_v14 = vadd.f32 %v8074_v49, %v7719_v6  ;;  %v8159_v56 = vpop.f32.mrb[49].mxu0 }
 0x2a6   :  { %v8161_v9 = vpop.eup %7027  ;;  %7035 = vtanh.f32 %v1479_v53  ;;  %v1481_v46 = vmul.f32 0.7978846, %v1417_v57  ;;  %v1772_v11 = vpack.c.bf16 %v1720_v54, %v1718_v42  ;;  %v1290_v13 = vmul.f32 %v8139_v18, %v1226_v21  ;;  %v8164_v23 = vpop.f32.mrb[50].mxu0  ;;  %2452 = vmatpush1.bf16.msra.mxu1 %v6693_v40 }
 0x2a7   :  { %v8166_v58 = vpop.eup %7029  ;;  %7037 = vtanh.f32 %v1480_v8  ;;  %v1227_v29 = vmul.f32 %v8153_v33, %v8153_v33  ;;  %v1228_v49 = vmul.f32 %v8157_v14, %v8157_v14  ;;  %v8174_v36 = vadd.f32 %v8078_v51, %v7722_v7  ;;  %v8176_v43 = vpop.f32.mrb[51].mxu0  ;;  %2453 = vmatprep.subr.bf16.mxu1 %v6698_v35 }
 0x2a8   :  { %v8178_v25 = vpop.eup %7031  ;;  %7039 = vtanh.f32 %v1481_v46  ;;  %2081 = vmatmul.mubr.bf16.gmra.mrb[20].mxu1 %v1772_v11  ;;  %v1354_v44 = vmul.f32 0.044715, %v1290_v13  ;;  %v1595_v12 = vadd.f32 1.0, %v8046_v28  ;;  %v1597_v45 = vadd.f32 1.0, %v8058_v63  ;;  %v6701_v28 = vld [vmem:[#allocation8 + $0xe4] ss:$8 sps:$4 sm:$0xff]  }
 0x2a9   :  { %v1291_v0 = vmul.f32 %v8153_v33, %v1227_v29  ;;  %v1292_v42 = vmul.f32 %v8157_v14, %v1228_v49  ;;  %v1229_v51 = vmul.f32 %v8174_v36, %v8174_v36  ;;  %v1594_v53 = vadd.f32 1.0, %v8031_v41 }
 0x2aa   :  { %v1418_v57 = vadd.f32 %v8139_v18, %v1354_v44  ;;  %v1659_v54 = vmul.f32 0.5, %v1595_v12  ;;  %v1661_v21 = vmul.f32 0.5, %v1597_v45  ;;  %v1596_v8 = vadd.f32 1.0, %v8051_v15  ;;  %2454 = vmatpush1.bf16.msra.mxu1 %v6696_v17 }
 0x2ab   :  { %v1355_v46 = vmul.f32 0.044715, %v1291_v0  ;;  %v1356_v63 = vmul.f32 0.044715, %v1292_v42  ;;  %v1293_v11 = vmul.f32 %v8174_v36, %v1229_v51  ;;  %v1658_v13 = vmul.f32 0.5, %v1594_v53  ;;  %2455 = vmatprep.subr.bf16.mxu1 %v6701_v28 }
 0x2ac   :  { %v1482_v29 = vmul.f32 0.7978846, %v1418_v57  ;;  %v1723_v49 = vmul.f32 %v7942_v19, %v1659_v54  ;;  %v1725_v41 = vmul.f32 %v7950_v38, %v1661_v21  ;;  %v1660_v2 = vmul.f32 0.5, %v1596_v8  ;;  %v8192_v5 = vpop.f32.mrb[52].mxu0  ;;  %v6699_v42 = vld [vmem:[#allocation8 + $0xe0] ss:$8 sps:$4 sm:$0xff]  }
 0x2ad   :  { %v1419_v44 = vadd.f32 %v8153_v33, %v1355_v46  ;;  %v1420_v15 = vadd.f32 %v8157_v14, %v1356_v63  ;;  %v1357_v40 = vmul.f32 0.044715, %v1293_v11  ;;  %v1722_v12 = vmul.f32 %v7933_v59, %v1658_v13  ;;  %v8197_v45 = vpop.f32.mrb[53].mxu0 }
 0x2ae   :  { %7041 = vtanh.f32 %v1482_v29  ;;  %v1775_v0 = vpack.c.bf16 %v1725_v41, %v1723_v49  ;;  %v1724_v35 = vmul.f32 %v7947_v22, %v1660_v2  ;;  %v8202_v19 = vadd.f32 %v8112_v39, %v7719_v6  ;;  %v8204_v38 = vpop.f32.mrb[54].mxu0  ;;  %2456 = vmatpush1.bf16.msra.mxu1 %v6699_v42 }
 0x2af   :  { %v8206_v51 = vpop.eup %7033  ;;  %v1483_v53 = vmul.f32 0.7978846, %v1419_v44  ;;  %v1484_v57 = vmul.f32 0.7978846, %v1420_v15  ;;  %v1421_v59 = vadd.f32 %v8174_v36, %v1357_v40  ;;  %v8211_v54 = vadd.f32 %v8120_v47, %v7722_v7  ;;  %v8213_v21 = vpop.f32.mrb[55].mxu0 }
 0x2b0   :  { %v8215_v2 = vpop.eup %7035  ;;  %2090 = vmatprep.mubr.bf16.mxu1 %v1775_v0  ;;  %v1774_v22 = vpack.c.bf16 %v1724_v35, %v1722_v12  ;;  %v1230_v39 = vmul.f32 %v8202_v19, %v8202_v19  ;;  %v8221_v17 = vadd.f32 %v8125_v20, %v7719_v6  ;;  %v8225_v8 = vadd.f32 %v8129_v30, %v7722_v7 }
 0x2b1   :  { %v8227_v47 = vpop.eup %7037  ;;  %7043 = vtanh.f32 %v1483_v53  ;;  %v1485_v46 = vmul.f32 0.7978846, %v1421_v59  ;;  %v1231_v28 = vmul.f32 %v8211_v54, %v8211_v54  ;;  %v1599_v63 = vadd.f32 1.0, %v8095_v55 }
 0x2b2   :  { %v8232_v11 = vpop.eup %7039  ;;  %7045 = vtanh.f32 %v1484_v57  ;;  %2091 = vmatmul.mubr.bf16.gmra.mrb[24].mxu1 %v1774_v22  ;;  %v1294_v20 = vmul.f32 %v8202_v19, %v1230_v39  ;;  %v1232_v13 = vmul.f32 %v8221_v17, %v8221_v17  ;;  %v1233_v30 = vmul.f32 %v8225_v8, %v8225_v8 }
 0x2b3   :  { %7047 = vtanh.f32 %v1485_v46  ;;  %v1295_v29 = vmul.f32 %v8211_v54, %v1231_v28  ;;  %v1601_v49 = vadd.f32 1.0, %v8114_v10  ;;  %v1663_v41 = vmul.f32 0.5, %v1599_v63 }
 0x2b4   :  { %v1358_v55 = vmul.f32 0.044715, %v1294_v20  ;;  %v1296_v44 = vmul.f32 %v8221_v17, %v1232_v13  ;;  %v1297_v15 = vmul.f32 %v8225_v8, %v1233_v30  ;;  %v1598_v40 = vadd.f32 1.0, %v8083_v27  ;;  %v8244_v12 = vpop.f32.mrb[56].mxu0 }
 0x2b5   :  { %v1359_v0 = vmul.f32 0.044715, %v1295_v29  ;;  %v1665_v35 = vmul.f32 0.5, %v1601_v49  ;;  %v1727_v53 = vmul.f32 %v7988_v24, %v1663_v41  ;;  %v1600_v57 = vadd.f32 1.0, %v8103_v31  ;;  %v8248_v59 = vpop.f32.mrb[57].mxu0 }
 0x2b6   :  { %v1422_v10 = vadd.f32 %v8202_v19, %v1358_v55  ;;  %v1360_v42 = vmul.f32 0.044715, %v1296_v44  ;;  %v1361_v22 = vmul.f32 0.044715, %v1297_v15  ;;  %v1662_v39 = vmul.f32 0.5, %v1598_v40  ;;  %v8251_v46 = vpop.f32.mrb[58].mxu0 }
 0x2b7   :  { %v1423_v28 = vadd.f32 %v8211_v54, %v1359_v0  ;;  %v1729_v27 = vmul.f32 %v8001_v26, %v1665_v35  ;;  %v1664_v63 = vmul.f32 0.5, %v1600_v57  ;;  %v8257_v20 = vadd.f32 %v8149_v50, %v7719_v6  ;;  %v8259_v24 = vpop.f32.mrb[59].mxu0 }
 0x2b8   :  { %v8261_v31 = vpop.eup %7041  ;;  %v1486_v13 = vmul.f32 0.7978846, %v1422_v10  ;;  %v1424_v30 = vadd.f32 %v8221_v17, %v1360_v42  ;;  %v1425_v29 = vadd.f32 %v8225_v8, %v1361_v22  ;;  %v1726_v49 = vmul.f32 %v7976_v16, %v1662_v39 }
 0x2b9   :  { %v1487_v41 = vmul.f32 0.7978846, %v1423_v28  ;;  %v1777_v55 = vpack.c.bf16 %v1729_v27, %v1727_v53  ;;  %v1728_v26 = vmul.f32 %v7995_v4, %v1664_v63  ;;  %v1234_v44 = vmul.f32 %v8257_v20, %v8257_v20 }
 0x2ba   :  { %7049 = vtanh.f32 %v1486_v13  ;;  %v1488_v50 = vmul.f32 0.7978846, %v1424_v30  ;;  %v1489_v15 = vmul.f32 0.7978846, %v1425_v29  ;;  %v8271_v40 = vadd.f32 %v8159_v56, %v7722_v7 }
 0x2bb   :  { %v8273_v0 = vpop.eup %7043  ;;  %7051 = vtanh.f32 %v1487_v41  ;;  %2100 = vmatprep.mubr.bf16.mxu1 %v1777_v55  ;;  %v1776_v35 = vpack.c.bf16 %v1728_v26, %v1726_v49  ;;  %v1298_v16 = vmul.f32 %v8257_v20, %v1234_v44  ;;  %v8278_v4 = vadd.f32 %v8164_v23, %v7719_v6 }
 0x2bc   :  { %v8280_v53 = vpop.eup %7045  ;;  %7053 = vtanh.f32 %v1488_v50  ;;  %v1235_v57 = vmul.f32 %v8271_v40, %v8271_v40  ;;  %v8286_v56 = vadd.f32 %v8176_v43, %v7722_v7  ;;  %v1603_v10 = vadd.f32 1.0, %v8161_v9  ;;  %v8289_v42 = vpop.f32.mrb[60].mxu0 }
 0x2bd   :  { %v8291_v22 = vpop.eup %7047  ;;  %7055 = vtanh.f32 %v1489_v15  ;;  %2101 = vmatmul.mubr.bf16.gmra.mrb[28].mxu1 %v1776_v35  ;;  %v1362_v23 = vmul.f32 0.044715, %v1298_v16  ;;  %v1236_v39 = vmul.f32 %v8278_v4, %v8278_v4  ;;  %v1605_v28 = vadd.f32 1.0, %v8178_v25  ;;  %v8296_v27 = vpop.f32.mrb[61].mxu0 }
 0x2be   :  { %v1299_v63 = vmul.f32 %v8271_v40, %v1235_v57  ;;  %v1237_v43 = vmul.f32 %v8286_v56, %v8286_v56  ;;  %v1667_v9 = vmul.f32 0.5, %v1603_v10  ;;  %v1602_v13 = vadd.f32 1.0, %v8143_v60  ;;  %v8302_v30 = vpop.f32.mrb[62].mxu0 }
 0x2bf   :  { %v1426_v29 = vadd.f32 %v8257_v20, %v1362_v23  ;;  %v1300_v49 = vmul.f32 %v8278_v4, %v1236_v39  ;;  %v1669_v41 = vmul.f32 0.5, %v1605_v28  ;;  %v1604_v55 = vadd.f32 1.0, %v8166_v58  ;;  %v8307_v25 = vpop.f32.mrb[63].mxu0 }
 0x2c0   :  { %v1363_v26 = vmul.f32 0.044715, %v1299_v63  ;;  %v1301_v44 = vmul.f32 %v8286_v56, %v1237_v43  ;;  %v1731_v50 = vmul.f32 %v8041_v61, %v1667_v9  ;;  %v1666_v15 = vmul.f32 0.5, %v1602_v13 }
 0x2c1   :  { %v1490_v35 = vmul.f32 0.7978846, %v1426_v29  ;;  %v1364_v16 = vmul.f32 0.044715, %v1300_v49  ;;  %v1733_v60 = vmul.f32 %v8049_v34, %v1669_v41  ;;  %v1668_v57 = vmul.f32 0.5, %v1604_v55 }
 0x2c2   :  { %v1427_v10 = vadd.f32 %v8271_v40, %v1363_v26  ;;  %v1365_v23 = vmul.f32 0.044715, %v1301_v44  ;;  %v1730_v39 = vmul.f32 %v8027_v62, %v1666_v15  ;;  %v8316_v58 = vadd.f32 %v8192_v5, %v7719_v6 }
 0x2c3   :  { %7057 = vtanh.f32 %v1490_v35  ;;  %v1428_v28 = vadd.f32 %v8278_v4, %v1364_v16  ;;  %v1779_v63 = vpack.c.bf16 %v1733_v60, %v1731_v50  ;;  %v1732_v61 = vmul.f32 %v8044_v1, %v1668_v57  ;;  %v6702_v57 = vld [vmem:[#allocation8 + $0xf0] ss:$8 sps:$4 sm:$0xff]  }
 0x2c4   :  { %v8320_v43 = vpop.eup %7049  ;;  %v1491_v9 = vmul.f32 0.7978846, %v1427_v10  ;;  %v1429_v34 = vadd.f32 %v8286_v56, %v1365_v23  ;;  %v1238_v13 = vmul.f32 %v8316_v58, %v8316_v58  ;;  %v8327_v62 = vadd.f32 %v8197_v45, %v7722_v7 }
 0x2c5   :  { %v8329_v5 = vpop.eup %7051  ;;  %v1492_v29 = vmul.f32 0.7978846, %v1428_v28  ;;  %2110 = vmatprep.mubr.bf16.mxu1 %v1779_v63  ;;  %v1778_v49 = vpack.c.bf16 %v1732_v61, %v1730_v39  ;;  %v8333_v1 = vadd.f32 %v8204_v38, %v7719_v6  ;;  %v8337_v41 = vadd.f32 %v8213_v21, %v7722_v7  ;;  %v6704_v63 = vld [vmem:[#allocation8 + $0xf4] ss:$8 sps:$4 sm:$0xff]  }
 0x2c6   :  { %v8339_v55 = vpop.eup %7053  ;;  %7059 = vtanh.f32 %v1491_v9  ;;  %v1493_v26 = vmul.f32 0.7978846, %v1429_v34  ;;  %v1302_v45 = vmul.f32 %v8316_v58, %v1238_v13  ;;  %v1239_v44 = vmul.f32 %v8327_v62, %v8327_v62  ;;  %2457 = vmatprep.subr.bf16.mxu1 %v6704_v63 }
 0x2c7   :  { %v8344_v50 = vpop.eup %7055  ;;  %7061 = vtanh.f32 %v1492_v29  ;;  %2111 = vmatmul.mubr.bf16.gmra.mrb[32].mxu1 %v1778_v49  ;;  %v1240_v38 = vmul.f32 %v8333_v1, %v8333_v1  ;;  %v1241_v21 = vmul.f32 %v8337_v41, %v8337_v41  ;;  %v1607_v15 = vadd.f32 1.0, %v8215_v2 }
 0x2c8   :  { %7063 = vtanh.f32 %v1493_v26  ;;  %v1366_v35 = vmul.f32 0.044715, %v1302_v45  ;;  %v1303_v16 = vmul.f32 %v8327_v62, %v1239_v44  ;;  %v1609_v60 = vadd.f32 1.0, %v8232_v11  ;;  %2458 = vmatpush1.bf16.msra.mxu1 %v6702_v57 }
 0x2c9   :  { %v1304_v10 = vmul.f32 %v8333_v1, %v1240_v38  ;;  %v1305_v23 = vmul.f32 %v8337_v41, %v1241_v21  ;;  %v1671_v39 = vmul.f32 0.5, %v1607_v15  ;;  %v1606_v28 = vadd.f32 1.0, %v8206_v51 }
 0x2ca   :  { %v1430_v61 = vadd.f32 %v8316_v58, %v1366_v35  ;;  %v1367_v9 = vmul.f32 0.044715, %v1303_v16  ;;  %v1673_v34 = vmul.f32 0.5, %v1609_v60  ;;  %v1608_v2 = vadd.f32 1.0, %v8227_v47 }
 0x2cb   :  { %v1368_v13 = vmul.f32 0.044715, %v1304_v10  ;;  %v1369_v29 = vmul.f32 0.044715, %v1305_v23  ;;  %v1735_v49 = vmul.f32 %v8093_v32, %v1671_v39  ;;  %v1670_v11 = vmul.f32 0.5, %v1606_v28 }
 0x2cc   :  { %v1494_v26 = vmul.f32 0.7978846, %v1430_v61  ;;  %v1431_v45 = vadd.f32 %v8327_v62, %v1367_v9  ;;  %v1737_v44 = vmul.f32 %v8109_v37, %v1673_v34  ;;  %v1672_v38 = vmul.f32 0.5, %v1608_v2 }
 0x2cd   :  { %v8361_v51 = vpop.eup %7057  ;;  %v1432_v21 = vadd.f32 %v8333_v1, %v1368_v13  ;;  %v1433_v15 = vadd.f32 %v8337_v41, %v1369_v29  ;;  %v1734_v47 = vmul.f32 %v8089_v48, %v1670_v11  ;;  %v8368_v32 = vadd.f32 %v8244_v12, %v7719_v6 }
 0x2ce   :  { %7065 = vtanh.f32 %v1494_v26  ;;  %v1495_v35 = vmul.f32 0.7978846, %v1431_v45  ;;  %v1781_v16 = vpack.c.bf16 %v1737_v44, %v1735_v49  ;;  %v1736_v60 = vmul.f32 %v8101_v52, %v1672_v38 }
 0x2cf   :  { %v1496_v37 = vmul.f32 0.7978846, %v1432_v21  ;;  %v1497_v10 = vmul.f32 0.7978846, %v1433_v15  ;;  %v1242_v57 = vmul.f32 %v8368_v32, %v8368_v32  ;;  %v8375_v23 = vadd.f32 %v8248_v59, %v7722_v7 }
 0x2d0   :  { %v8377_v39 = vpop.eup %7059  ;;  %7067 = vtanh.f32 %v1495_v35  ;;  %2120 = vmatprep.mubr.bf16.mxu1 %v1781_v16  ;;  %v1780_v48 = vpack.c.bf16 %v1736_v60, %v1734_v47  ;;  %v8381_v12 = vadd.f32 %v8251_v46, %v7719_v6  ;;  %v8385_v52 = vadd.f32 %v8259_v24, %v7722_v7 }
 0x2d1   :  { %v8387_v28 = vpop.eup %7061  ;;  %7069 = vtanh.f32 %v1496_v37  ;;  %v1306_v63 = vmul.f32 %v8368_v32, %v1242_v57  ;;  %v1243_v59 = vmul.f32 %v8375_v23, %v8375_v23  ;;  %v1611_v61 = vadd.f32 1.0, %v8273_v0 }
 0x2d2   :  { %v8393_v9 = vpop.eup %7063  ;;  %7071 = vtanh.f32 %v1497_v10  ;;  %2121 = vmatmul.mubr.bf16.gmra.mrb[36].mxu1 %v1780_v48  ;;  %v1244_v46 = vmul.f32 %v8381_v12, %v8381_v12  ;;  %v1245_v24 = vmul.f32 %v8385_v52, %v8385_v52  ;;  %v1613_v34 = vadd.f32 1.0, %v8291_v22 }
 0x2d3   :  { %v1370_v2 = vmul.f32 0.044715, %v1306_v63  ;;  %v1307_v13 = vmul.f32 %v8375_v23, %v1243_v59  ;;  %v1675_v29 = vmul.f32 0.5, %v1611_v61  ;;  %v1610_v49 = vadd.f32 1.0, %v8261_v31 }
 0x2d4   :  { %v1308_v0 = vmul.f32 %v8381_v12, %v1244_v46  ;;  %v1309_v11 = vmul.f32 %v8385_v52, %v1245_v24  ;;  %v1677_v26 = vmul.f32 0.5, %v1613_v34  ;;  %v1612_v45 = vadd.f32 1.0, %v8280_v53 }
 0x2d5   :  { %v1434_v44 = vadd.f32 %v8368_v32, %v1370_v2  ;;  %v1371_v38 = vmul.f32 0.044715, %v1307_v13  ;;  %v1739_v21 = vmul.f32 %v8153_v33, %v1675_v29  ;;  %v1674_v15 = vmul.f32 0.5, %v1610_v49 }
 0x2d6   :  { %v1372_v22 = vmul.f32 0.044715, %v1308_v0  ;;  %v1373_v47 = vmul.f32 0.044715, %v1309_v11  ;;  %v1741_v35 = vmul.f32 %v8174_v36, %v1677_v26  ;;  %v1676_v16 = vmul.f32 0.5, %v1612_v45 }
 0x2d7   :  { %v1498_v60 = vmul.f32 0.7978846, %v1434_v44  ;;  %v1435_v31 = vadd.f32 %v8375_v23, %v1371_v38  ;;  %v1738_v37 = vmul.f32 %v8139_v18, %v1674_v15  ;;  %v8412_v10 = vadd.f32 %v8289_v42, %v7719_v6 }
 0x2d8   :  { %v8414_v53 = vpop.eup %7065  ;;  %v1436_v57 = vadd.f32 %v8381_v12, %v1372_v22  ;;  %v1437_v33 = vadd.f32 %v8385_v52, %v1373_v47  ;;  %v1783_v48 = vpack.c.bf16 %v1741_v35, %v1739_v21  ;;  %v1740_v63 = vmul.f32 %v8157_v14, %v1676_v16 }
 0x2d9   :  { %7073 = vtanh.f32 %v1498_v60  ;;  %v1499_v36 = vmul.f32 0.7978846, %v1435_v31  ;;  %v1246_v59 = vmul.f32 %v8412_v10, %v8412_v10  ;;  %v8423_v18 = vadd.f32 %v8296_v27, %v7722_v7 }
 0x2da   :  { %v8425_v42 = vpop.eup %7067  ;;  %v1500_v61 = vmul.f32 0.7978846, %v1436_v57  ;;  %v1501_v46 = vmul.f32 0.7978846, %v1437_v33  ;;  %2130 = vmatprep.mubr.bf16.mxu1 %v1783_v48  ;;  %v1782_v24 = vpack.c.bf16 %v1740_v63, %v1738_v37  ;;  %v8429_v34 = vadd.f32 %v8302_v30, %v7719_v6 }
 0x2db   :  { %v8431_v14 = vpop.eup %7069  ;;  %7075 = vtanh.f32 %v1499_v36  ;;  %v1310_v2 = vmul.f32 %v8412_v10, %v1246_v59  ;;  %v1247_v13 = vmul.f32 %v8423_v18, %v8423_v18  ;;  %v8438_v27 = vadd.f32 %v8307_v25, %v7722_v7 }
 0x2dc   :  { %v7072_v29 = vpop.eup %7071  ;;  %7077 = vtanh.f32 %v1500_v61  ;;  %2131 = vmatmul.mubr.bf16.gmra.mrb[40].mxu1 %v1782_v24  ;;  %v1248_v49 = vmul.f32 %v8429_v34, %v8429_v34  ;;  %v1615_v6 = vadd.f32 1.0, %v8329_v5  ;;  %v1617_v30 = vadd.f32 1.0, %v8344_v50 }
 0x2dd   :  { %7079 = vtanh.f32 %v1501_v46  ;;  %v1374_v0 = vmul.f32 0.044715, %v1310_v2  ;;  %v1311_v11 = vmul.f32 %v8423_v18, %v1247_v13  ;;  %v1249_v26 = vmul.f32 %v8438_v27, %v8438_v27 }
 0x2de   :  { %v1312_v7 = vmul.f32 %v8429_v34, %v1248_v49  ;;  %v1679_v25 = vmul.f32 0.5, %v1615_v6  ;;  %v1681_v45 = vmul.f32 0.5, %v1617_v30  ;;  %v1614_v44 = vadd.f32 1.0, %v8320_v43 }
 0x2df   :  { %v1438_v38 = vadd.f32 %v8412_v10, %v1374_v0  ;;  %v1375_v21 = vmul.f32 0.044715, %v1311_v11  ;;  %v1313_v5 = vmul.f32 %v8438_v27, %v1249_v26  ;;  %v1616_v50 = vadd.f32 1.0, %v8339_v55 }
 0x2e0   :  { %v1376_v15 = vmul.f32 0.044715, %v1312_v7  ;;  %v1743_v22 = vmul.f32 %v8211_v54, %v1679_v25  ;;  %v1745_v47 = vmul.f32 %v8225_v8, %v1681_v45  ;;  %v1678_v35 = vmul.f32 0.5, %v1614_v44 }
 0x2e1   :  { %v1502_v16 = vmul.f32 0.7978846, %v1438_v38  ;;  %v1439_v60 = vadd.f32 %v8423_v18, %v1375_v21  ;;  %v1377_v31 = vmul.f32 0.044715, %v1313_v5  ;;  %v1680_v37 = vmul.f32 0.5, %v1616_v50 }
 0x2e2   :  { %v1440_v43 = vadd.f32 %v8429_v34, %v1376_v15  ;;  %v1785_v57 = vpack.c.bf16 %v1745_v47, %v1743_v22  ;;  %v1742_v33 = vmul.f32 %v8202_v19, %v1678_v35  ;;  %v1619_v48 = vadd.f32 1.0, %v8377_v39 }
 0x2e3   :  { %v7074_v63 = vpop.eup %7073  ;;  %7081 = vtanh.f32 %v1502_v16  ;;  %v1503_v55 = vmul.f32 0.7978846, %v1439_v60  ;;  %v1441_v54 = vadd.f32 %v8438_v27, %v1377_v31  ;;  %v1744_v8 = vmul.f32 %v8221_v17, %v1680_v37 }
 0x2e4   :  { %v1504_v36 = vmul.f32 0.7978846, %v1440_v43  ;;  %2140 = vmatprep.mubr.bf16.mxu1 %v1785_v57  ;;  %v1621_v59 = vadd.f32 1.0, %v8393_v9  ;;  %v1683_v61 = vmul.f32 0.5, %v1619_v48  ;;  %v1618_v46 = vadd.f32 1.0, %v8361_v51 }
 0x2e5   :  { %v7076_v24 = vpop.eup %7075  ;;  %7083 = vtanh.f32 %v1503_v55  ;;  %v1505_v2 = vmul.f32 0.7978846, %v1441_v54  ;;  %v1784_v19 = vpack.c.bf16 %v1744_v8, %v1742_v33  ;;  %v1620_v39 = vadd.f32 1.0, %v8387_v28 }
 0x2e6   :  { %v7078_v13 = vpop.eup %7077  ;;  %7085 = vtanh.f32 %v1504_v36  ;;  %v1685_v49 = vmul.f32 0.5, %v1621_v59  ;;  %v1747_v6 = vmul.f32 %v8271_v40, %v1683_v61  ;;  %v1682_v30 = vmul.f32 0.5, %v1618_v46 }
 0x2e7   :  { %v7080_v17 = vpop.eup %7079  ;;  %7087 = vtanh.f32 %v1505_v2  ;;  %2141 = vmatmul.mubr.bf16.gmra.mrb[44].mxu1 %v1784_v19  ;;  %v1684_v0 = vmul.f32 0.5, %v1620_v39  ;;  %v1623_v9 = vadd.f32 1.0, %v8425_v42  ;;  %v1625_v11 = vadd.f32 1.0, %v7072_v29 }
 0x2e8   :  { %v1749_v51 = vmul.f32 %v8286_v56, %v1685_v49  ;;  %v1746_v26 = vmul.f32 %v8257_v20, %v1682_v30  ;;  %v1622_v7 = vadd.f32 1.0, %v8414_v53  ;;  %v1624_v28 = vadd.f32 1.0, %v8431_v14 }
 0x2e9   :  { %v1748_v25 = vmul.f32 %v8278_v4, %v1684_v0  ;;  %v1687_v45 = vmul.f32 0.5, %v1623_v9  ;;  %v1689_v40 = vmul.f32 0.5, %v1625_v11  ;;  %v1627_v44 = vadd.f32 1.0, %v7076_v24 }
 0x2ea   :  { %v1787_v38 = vpack.c.bf16 %v1749_v51, %v1747_v6  ;;  %v1686_v21 = vmul.f32 0.5, %v1622_v7  ;;  %v1688_v5 = vmul.f32 0.5, %v1624_v28  ;;  %v1629_v50 = vadd.f32 1.0, %v7080_v17  ;;  %v6708_v7 = vld [vmem:[#allocation10 + $0x10] ss:$8 sps:$4 sm:$0xff]  }
 0x2eb   :  { %v1786_v15 = vpack.c.bf16 %v1748_v25, %v1746_v26  ;;  %v1751_v42 = vmul.f32 %v8327_v62, %v1687_v45  ;;  %v1753_v56 = vmul.f32 %v8337_v41, %v1689_v40  ;;  %v1691_v29 = vmul.f32 0.5, %v1627_v44  ;;  %v6710_v28 = vld [vmem:[#allocation10 + $0x14] ss:$8 sps:$4 sm:$0xff]  }
 0x2ec   :  { %2150 = vmatprep.mubr.bf16.mxu1 %v1787_v38  ;;  %v1750_v20 = vmul.f32 %v8316_v58, %v1686_v21  ;;  %v1752_v53 = vmul.f32 %v8333_v1, %v1688_v5  ;;  %v1693_v14 = vmul.f32 0.5, %v1629_v50  ;;  %v1626_v4 = vadd.f32 1.0, %v7074_v63 }
 0x2ed   :  { %v7082_v22 = vpop.eup %7081  ;;  %v1789_v47 = vpack.c.bf16 %v1753_v56, %v1751_v42  ;;  %v1755_v35 = vmul.f32 %v8375_v23, %v1691_v29  ;;  %v1628_v16 = vadd.f32 1.0, %v7078_v13  ;;  %v6711_v42 = vld [vmem:[#allocation10 + $0x20] ss:$8 sps:$4 sm:$0xff]   ;;  %v6713_v56 = vld [vmem:[#allocation10 + $0x24] ss:$8 sps:$4 sm:$0xff]  }
 0x2ee   :  { %v1788_v60 = vpack.c.bf16 %v1752_v53, %v1750_v20  ;;  %v1757_v31 = vmul.f32 %v8385_v52, %v1693_v14  ;;  %v1690_v37 = vmul.f32 0.5, %v1626_v4  ;;  %v1630_v62 = vadd.f32 1.0, %v7082_v22 }
 0x2ef   :  { %v7084_v43 = vpop.eup %7083  ;;  %2151 = vmatmul.mubr.bf16.gmra.mrb[48].mxu1 %v1786_v15  ;;  %v1692_v41 = vmul.f32 0.5, %v1628_v16  ;;  %v6716_v16 = vld [vmem:[#allocation10 + $0x34] ss:$8 sps:$4 sm:$0xff]  }
 0x2f0   :  { %v7086_v57 = vpop.eup %7085  ;;  %2160 = vmatprep.mubr.bf16.mxu1 %v1789_v47  ;;  %v1791_v58 = vpack.c.bf16 %v1757_v31, %v1755_v35  ;;  %v1631_v33 = vadd.f32 1.0, %v7084_v43  ;;  %v1754_v48 = vmul.f32 %v8368_v32, %v1690_v37  ;;  %v1694_v23 = vmul.f32 0.5, %v1630_v62  ;;  %v6714_v35 = vld [vmem:[#allocation10 + $0x30] ss:$8 sps:$4 sm:$0xff]   ;;  %v6717_v43 = vld [vmem:[#allocation10 + $0x40] ss:$8 sps:$4 sm:$0xff]  }
 0x2f1   :  { %v7088_v1 = vpop.eup %7087  ;;  %v1756_v63 = vmul.f32 %v8381_v12, %v1692_v41  ;;  %v1632_v55 = vadd.f32 1.0, %v7086_v57  ;;  %v1826_v12 = vld [vmem:[%s9531_s4] sm:$0x3]  ;;  %v6719_v41 = vld [vmem:[#allocation10 + $0x44] ss:$8 sps:$4 sm:$0xff]  }
 0x2f2   :  { %v1633_v54 = vadd.f32 1.0, %v7088_v1  ;;  %v1695_v8 = vmul.f32 0.5, %v1631_v33  ;;  %v1758_v61 = vmul.f32 %v8412_v10, %v1694_v23  ;;  %v8486_v39 = vrot.slane %v1826_v12, %v7710_v3  ;;  %v6722_v57 = vld [vmem:[#allocation10 + $0x54] ss:$8 sps:$4 sm:$0xff]   ;;  %v6720_v33 = vld [vmem:[#allocation10 + $0x50] ss:$8 sps:$4 sm:$0xff]  }
 0x2f3   :  { %v1790_v36 = vpack.c.bf16 %v1756_v63, %v1754_v48  ;;  %v1696_v52 = vmul.f32 0.5, %v1632_v55  ;;  %v6725_v48 = vld [vmem:[#allocation10 + $0x64] ss:$8 sps:$4 sm:$0xff]  }
 0x2f4   :  { %v1697_v59 = vmul.f32 0.5, %v1633_v54  ;;  %v1759_v24 = vmul.f32 %v8423_v18, %v1695_v8  ;;  %v6705_v18 = vld [vmem:[#allocation10] ss:$8 sps:$4 sm:$0xff]  }
 0x2f5   :  { %v1760_v46 = vmul.f32 %v8429_v34, %v1696_v52  ;;  %v9559_v34 = vld [vmem:[#allocation25_spill] sm:$0xff] }
 0x2f6   :  { %v1761_v2 = vmul.f32 %v8438_v27, %v1697_v59  ;;  %v8489_v13 = vrot.slane %v1826_v12, %v9559_v34  ;;  %v6707_v27 = vld [vmem:[#allocation10 + $0x4] ss:$8 sps:$4 sm:$0xff]   ;;  %v6723_v52 = vld [vmem:[#allocation10 + $0x60] ss:$8 sps:$4 sm:$0xff]  }
 0x2f7   :  { %2161 = vmatmul.mubr.bf16.gmra.mrb[52].mxu1 %v1788_v60  ;;  %v1792_v19 = vpack.c.bf16 %v1760_v46, %v1758_v61  ;;  %2920 = vmatprep.subr.bf16.mxu0 %v6707_v27  ;;  %v6728_v61 = vld [vmem:[#allocation10 + $0x74] ss:$8 sps:$4 sm:$0xff]  }
 0x2f8   :  { %2170 = vmatprep.mubr.bf16.mxu1 %v1791_v58  ;;  %v1793_v32 = vpack.c.bf16 %v1761_v2, %v1759_v24  ;;  %2921 = vmatpush1.bf16.msra.mxu0 %v6705_v18  ;;  %v6726_v24 = vld [vmem:[#allocation10 + $0x70] ss:$8 sps:$4 sm:$0xff]   ;;  %v6731_v2 = vld [vmem:[#allocation10 + $0x84] ss:$8 sps:$4 sm:$0xff]  }
 0x2f9   :  { %2922 = vmatprep.subr.bf16.mxu0 %v6710_v28  ;;  %v6740_v28 = vld [vmem:[#allocation10 + $0xb4] ss:$8 sps:$4 sm:$0xff]  }
 0x2fc   :  { %2923 = vmatpush1.bf16.msra.mxu0 %v6708_v7 }
 0x2fd   :  { %2924 = vmatprep.subr.bf16.mxu0 %v6713_v56 }
 0x2ff   :  { %2171 = vmatmul.mubr.bf16.gmra.mrb[56].mxu1 %v1790_v36 }
 0x300   :  { %2180 = vmatprep.mubr.bf16.mxu1 %v1793_v32  ;;  %2925 = vmatpush1.bf16.msra.mxu0 %v6711_v42 }
 0x301   :  { %2926 = vmatprep.subr.bf16.mxu0 %v6716_v16 }
 0x304   :  { %2927 = vmatpush1.bf16.msra.mxu0 %v6714_v35 }
 0x305   :  { %2928 = vmatprep.subr.bf16.mxu0 %v6719_v41 }
 0x307   :  { %2181 = vmatmul.mubr.bf16.gmra.mrb[60].mxu1 %v1792_v19 }
 0x308   :  { %2929 = vmatpush1.bf16.msra.mxu0 %v6717_v43  ;;  %v6747_v43 = vld [vmem:[#allocation10 + $0xe0] ss:$8 sps:$4 sm:$0xff]  }
 0x309   :  { %2930 = vmatprep.subr.bf16.mxu0 %v6722_v57 }
 0x30c   :  { %2931 = vmatpush1.bf16.msra.mxu0 %v6720_v33 }
 0x30d   :  { %2932 = vmatprep.subr.bf16.mxu0 %v6725_v48 }
 0x310   :  { %2933 = vmatpush1.bf16.msra.mxu0 %v6723_v52 }
 0x311   :  { %2934 = vmatprep.subr.bf16.mxu0 %v6728_v61 }
 0x314   :  { %2935 = vmatpush1.bf16.msra.mxu0 %v6726_v24 }
 0x315   :  { %2936 = vmatprep.subr.bf16.mxu0 %v6731_v2 }
 0x346   :  { %v2032_v10 = vpop.f32.mrb[0].mxu1 }
 0x347   :  { %v2034_v49 = vpop.f32.mrb[1].mxu1  ;;  %v2033_v30 = vadd.f32 %v2032_v10, %v8486_v39  ;;  %v6729_v10 = vld [vmem:[#allocation10 + $0x80] ss:$8 sps:$4 sm:$0xff]  }
 0x348   :  { %v2036_v6 = vpop.f32.mrb[2].mxu1  ;;  %v2035_v9 = vadd.f32 %v2034_v49, %v8489_v13  ;;  %2937 = vmatpush1.bf16.msra.mxu0 %v6729_v10 }
 0x349   :  { %v2037_v17 = vadd.f32 %v2036_v6, %v8486_v39  ;;  %v2038_v0 = vpop.f32.mrb[3].mxu1  ;;  %v6734_v6 = vld [vmem:[#allocation10 + $0x94] ss:$8 sps:$4 sm:$0xff]  }
 0x34a   :  { %v2039_v11 = vadd.f32 %v2038_v0, %v8489_v13  ;;  %2938 = vmatprep.subr.bf16.mxu0 %v6734_v6 }
 0x34b   :  { %v2191_v51 = vpack.c.bf16 %v2037_v17, %v2033_v30 }
 0x34c   :  { %v2192_v26 = vpack.c.bf16 %v2039_v11, %v2035_v9  ;;  %v6732_v11 = vld [vmem:[#allocation10 + $0x90] ss:$8 sps:$4 sm:$0xff]  }
 0x34d   :  { %2939 = vmatpush1.bf16.msra.mxu0 %v6732_v11  ;;  %v6750_v11 = vld [vmem:[#allocation10 + $0xf0] ss:$8 sps:$4 sm:$0xff]  }
 0x34e   :  { %2459 = vmatprep.mubr.bf16.mxu1 %v2192_v26  ;;  %v6735_v26 = vld [vmem:[#allocation10 + $0xa0] ss:$8 sps:$4 sm:$0xff]  }
 0x34f   :  { %2460 = vmatmul.mubr.bf16.vlgmr.msra.gmra.mrb[64].mxu1 %v2191_v51  ;;  %v6737_v51 = vld [vmem:[#allocation10 + $0xa4] ss:$8 sps:$4 sm:$0xff]  }
 0x350   :  { %2940 = vmatprep.subr.bf16.mxu0 %v6737_v51  ;;  %v6752_v51 = vld [vmem:[#allocation10 + $0xf4] ss:$8 sps:$4 sm:$0xff]  }
 0x351   :  { %v2042_v25 = vpop.f32.mrb[4].mxu1  ;;  %2941 = vmatpush1.bf16.msra.mxu0 %v6735_v26 }
 0x352   :  { %v2044_v45 = vpop.f32.mrb[5].mxu1  ;;  %v2043_v44 = vadd.f32 %v2042_v25, %v8486_v39  ;;  %2942 = vmatprep.subr.bf16.mxu0 %v6740_v28 }
 0x353   :  { %v2046_v40 = vpop.f32.mrb[6].mxu1  ;;  %v2045_v5 = vadd.f32 %v2044_v45, %v8489_v13 }
 0x354   :  { %v2047_v38 = vadd.f32 %v2046_v40, %v8486_v39  ;;  %v2048_v21 = vpop.f32.mrb[7].mxu1 }
 0x355   :  { %v2049_v50 = vadd.f32 %v2048_v21, %v8489_v13  ;;  %v6738_v21 = vld [vmem:[#allocation10 + $0xb0] ss:$8 sps:$4 sm:$0xff]  }
 0x356   :  { %v2193_v15 = vpack.c.bf16 %v2047_v38, %v2043_v44  ;;  %2943 = vmatpush1.bf16.msra.mxu0 %v6738_v21 }
 0x357   :  { %v2194_v29 = vpack.c.bf16 %v2049_v50, %v2045_v5 }
 0x359   :  { %2469 = vmatprep.mubr.bf16.mxu1 %v2194_v29  ;;  %v6741_v29 = vld [vmem:[#allocation10 + $0xc0] ss:$8 sps:$4 sm:$0xff]  }
 0x35a   :  { %2470 = vmatmul.mubr.bf16.gmra.mrb[68].mxu1 %v2193_v15  ;;  %v6743_v15 = vld [vmem:[#allocation10 + $0xc4] ss:$8 sps:$4 sm:$0xff]  }
 0x35b   :  { %v2052_v20 = vpop.f32.mrb[8].mxu1  ;;  %2944 = vmatprep.subr.bf16.mxu0 %v6743_v15 }
 0x35c   :  { %v2054_v53 = vpop.f32.mrb[9].mxu1  ;;  %v2053_v4 = vadd.f32 %v2052_v20, %v8486_v39  ;;  %v6746_v20 = vld [vmem:[#allocation10 + $0xd4] ss:$8 sps:$4 sm:$0xff]   ;;  %2945 = vmatpush1.bf16.msra.mxu0 %v6741_v29 }
 0x35d   :  { %v2056_v14 = vpop.f32.mrb[10].mxu1  ;;  %v2055_v60 = vadd.f32 %v2054_v53, %v8489_v13  ;;  %2946 = vmatprep.subr.bf16.mxu0 %v6746_v20 }
 0x35e   :  { %v2057_v22 = vadd.f32 %v2056_v14, %v8486_v39  ;;  %v2058_v47 = vpop.f32.mrb[11].mxu1 }
 0x35f   :  { %v2059_v31 = vadd.f32 %v2058_v47, %v8489_v13  ;;  %v6749_v47 = vld [vmem:[#allocation10 + $0xe4] ss:$8 sps:$4 sm:$0xff]  }
 0x360   :  { %v2195_v37 = vpack.c.bf16 %v2057_v22, %v2053_v4  ;;  %v6744_v4 = vld [vmem:[#allocation10 + $0xd0] ss:$8 sps:$4 sm:$0xff]  }
 0x361   :  { %v2196_v62 = vpack.c.bf16 %v2059_v31, %v2055_v60  ;;  %2947 = vmatpush1.bf16.msra.mxu0 %v6744_v4 }
 0x362   :  { %2948 = vmatprep.subr.bf16.mxu0 %v6749_v47 }
 0x363   :  { %2479 = vmatprep.mubr.bf16.mxu1 %v2196_v62 }
 0x364   :  { %2480 = vmatmul.mubr.bf16.gmra.mrb[72].mxu1 %v2195_v37 }
 0x365   :  { %2949 = vmatpush1.bf16.msra.mxu0 %v6747_v43 }
 0x366   :  { %v2062_v58 = vpop.f32.mrb[12].mxu1  ;;  %2950 = vmatprep.subr.bf16.mxu0 %v6752_v51 }
 0x367   :  { %v2064_v1 = vpop.f32.mrb[13].mxu1  ;;  %v2063_v55 = vadd.f32 %v2062_v58, %v8486_v39 }
 0x368   :  { %v2066_v63 = vpop.f32.mrb[14].mxu1  ;;  %v2065_v8 = vadd.f32 %v2064_v1, %v8489_v13 }
 0x369   :  { %v2067_v23 = vadd.f32 %v2066_v63, %v8486_v39  ;;  %v2068_v54 = vpop.f32.mrb[15].mxu1  ;;  %2951 = vmatpush1.bf16.msra.mxu0 %v6750_v11 }
 0x36a   :  { %v2069_v36 = vadd.f32 %v2068_v54, %v8489_v13 }
 0x36b   :  { %v2197_v59 = vpack.c.bf16 %v2067_v23, %v2063_v55 }
 0x36c   :  { %v2198_v46 = vpack.c.bf16 %v2069_v36, %v2065_v8 }
 0x36e   :  { %2489 = vmatprep.mubr.bf16.mxu1 %v2198_v46 }
 0x36f   :  { %2490 = vmatmul.mubr.bf16.gmra.mrb[76].mxu1 %v2197_v59 }
 0x370   :  { %v2072_v19 = vpop.f32.mrb[16].mxu1 }
 0x371   :  { %v2074_v32 = vpop.f32.mrb[17].mxu1  ;;  %v2073_v18 = vadd.f32 %v2072_v19, %v8486_v39 }
 0x372   :  { %v2076_v12 = vpop.f32.mrb[18].mxu1  ;;  %v2075_v30 = vadd.f32 %v2074_v32, %v8489_v13 }
 0x373   :  { %v2077_v27 = vadd.f32 %v2076_v12, %v8486_v39  ;;  %v2078_v49 = vpop.f32.mrb[19].mxu1 }
 0x374   :  { %v2079_v17 = vadd.f32 %v2078_v49, %v8489_v13 }
 0x375   :  { %v2199_v0 = vpack.c.bf16 %v2077_v27, %v2073_v18 }
 0x376   :  { %v2200_v9 = vpack.c.bf16 %v2079_v17, %v2075_v30 }
 0x378   :  { %2499 = vmatprep.mubr.bf16.mxu1 %v2200_v9 }
 0x379   :  { %2500 = vmatmul.mubr.bf16.gmra.mrb[80].mxu1 %v2199_v0 }
 0x37b   :  { %v2082_v7 = vpop.f32.mrb[20].mxu1 }
 0x37c   :  { %v2084_v25 = vpop.f32.mrb[21].mxu1  ;;  %v2083_v40 = vadd.f32 %v2082_v7, %v8486_v39 }
 0x37d   :  { %v2086_v45 = vpop.f32.mrb[22].mxu1  ;;  %v2085_v5 = vadd.f32 %v2084_v25, %v8489_v13 }
 0x37e   :  { %v2087_v44 = vadd.f32 %v2086_v45, %v8486_v39  ;;  %v2088_v38 = vpop.f32.mrb[23].mxu1 }
 0x37f   :  { %v2089_v50 = vadd.f32 %v2088_v38, %v8489_v13 }
 0x380   :  { %v2201_v42 = vpack.c.bf16 %v2087_v44, %v2083_v40 }
 0x381   :  { %v2202_v56 = vpack.c.bf16 %v2089_v50, %v2085_v5 }
 0x383   :  { %2509 = vmatprep.mubr.bf16.mxu1 %v2202_v56 }
 0x384   :  { %2510 = vmatmul.mubr.bf16.gmra.mrb[84].mxu1 %v2201_v42 }
 0x385   :  { %v2092_v53 = vpop.f32.mrb[24].mxu1 }
 0x386   :  { %v2094_v14 = vpop.f32.mrb[25].mxu1  ;;  %v2093_v35 = vadd.f32 %v2092_v53, %v8486_v39 }
 0x387   :  { %v2096_v22 = vpop.f32.mrb[26].mxu1  ;;  %v2095_v31 = vadd.f32 %v2094_v14, %v8489_v13 }
 0x388   :  { %v2097_v16 = vadd.f32 %v2096_v22, %v8486_v39  ;;  %v2098_v60 = vpop.f32.mrb[27].mxu1 }
 0x389   :  { %v2099_v37 = vadd.f32 %v2098_v60, %v8489_v13 }
 0x38a   :  { %v2203_v62 = vpack.c.bf16 %v2097_v16, %v2093_v35 }
 0x38b   :  { %v2204_v41 = vpack.c.bf16 %v2099_v37, %v2095_v31 }
 0x38d   :  { %2519 = vmatprep.mubr.bf16.mxu1 %v2204_v41 }
 0x38e   :  { %2520 = vmatmul.mubr.bf16.gmra.mrb[88].mxu1 %v2203_v62 }
 0x390   :  { %v2102_v57 = vpop.f32.mrb[28].mxu1 }
 0x391   :  { %v2104_v58 = vpop.f32.mrb[29].mxu1  ;;  %v2103_v1 = vadd.f32 %v2102_v57, %v8486_v39 }
 0x392   :  { %v2106_v33 = vpop.f32.mrb[30].mxu1  ;;  %v2105_v55 = vadd.f32 %v2104_v58, %v8489_v13 }
 0x393   :  { %v2107_v48 = vadd.f32 %v2106_v33, %v8486_v39  ;;  %v2108_v63 = vpop.f32.mrb[31].mxu1 }
 0x394   :  { %v2109_v23 = vadd.f32 %v2108_v63, %v8489_v13 }
 0x395   :  { %v2205_v54 = vpack.c.bf16 %v2107_v48, %v2103_v1 }
 0x396   :  { %v2206_v8 = vpack.c.bf16 %v2109_v23, %v2105_v55 }
 0x398   :  { %2529 = vmatprep.mubr.bf16.mxu1 %v2206_v8 }
 0x399   :  { %2530 = vmatmul.mubr.bf16.gmra.mrb[92].mxu1 %v2205_v54 }
 0x39a   :  { %v2112_v36 = vpop.f32.mrb[32].mxu1 }
 0x39b   :  { %v2114_v52 = vpop.f32.mrb[33].mxu1  ;;  %v2113_v61 = vadd.f32 %v2112_v36, %v8486_v39 }
 0x39c   :  { %v2116_v59 = vpop.f32.mrb[34].mxu1  ;;  %v2115_v2 = vadd.f32 %v2114_v52, %v8489_v13 }
 0x39d   :  { %v2117_v46 = vadd.f32 %v2116_v59, %v8486_v39  ;;  %v2118_v24 = vpop.f32.mrb[35].mxu1 }
 0x39e   :  { %v2119_v19 = vadd.f32 %v2118_v24, %v8489_v13 }
 0x39f   :  { %v2207_v32 = vpack.c.bf16 %v2117_v46, %v2113_v61 }
 0x3a0   :  { %v2208_v12 = vpack.c.bf16 %v2119_v19, %v2115_v2 }
 0x3a2   :  { %2539 = vmatprep.mubr.bf16.mxu1 %v2208_v12 }
 0x3a3   :  { %2540 = vmatmul.mubr.bf16.gmra.mrb[96].mxu1 %v2207_v32 }
 0x3a5   :  { %v2122_v10 = vpop.f32.mrb[36].mxu1 }
 0x3a6   :  { %v2124_v18 = vpop.f32.mrb[37].mxu1  ;;  %v2123_v49 = vadd.f32 %v2122_v10, %v8486_v39 }
 0x3a7   :  { %v2126_v27 = vpop.f32.mrb[38].mxu1  ;;  %v2125_v17 = vadd.f32 %v2124_v18, %v8489_v13 }
 0x3a8   :  { %v2127_v6 = vadd.f32 %v2126_v27, %v8486_v39  ;;  %v2128_v30 = vpop.f32.mrb[39].mxu1 }
 0x3a9   :  { %v2129_v0 = vadd.f32 %v2128_v30, %v8489_v13 }
 0x3aa   :  { %v2209_v9 = vpack.c.bf16 %v2127_v6, %v2123_v49 }
 0x3ab   :  { %v2210_v26 = vpack.c.bf16 %v2129_v0, %v2125_v17 }
 0x3ad   :  { %2549 = vmatprep.mubr.bf16.mxu1 %v2210_v26 }
 0x3ae   :  { %2550 = vmatmul.mubr.bf16.gmra.mrb[100].mxu1 %v2209_v9 }
 0x3af   :  { %v2132_v7 = vpop.f32.mrb[40].mxu1 }
 0x3b0   :  { %v2134_v28 = vpop.f32.mrb[41].mxu1  ;;  %v2133_v45 = vadd.f32 %v2132_v7, %v8486_v39  ;;  %v2255_v7 = vld [vmem:[%s9533_s6] sm:$0x3] }
 0x3b1   :  { %v2136_v25 = vpop.f32.mrb[42].mxu1  ;;  %v2135_v38 = vadd.f32 %v2134_v28, %v8489_v13  ;;  %v8559_v28 = vrot.slane %v2255_v7, %v7710_v3 }
 0x3b2   :  { %v2137_v40 = vadd.f32 %v2136_v25, %v8486_v39  ;;  %v2138_v44 = vpop.f32.mrb[43].mxu1  ;;  %v8562_v25 = vrot.slane %v2255_v7, %v9559_v34 }
 0x3b3   :  { %v2139_v21 = vadd.f32 %v2138_v44, %v8489_v13 }
 0x3b4   :  { %v2211_v5 = vpack.c.bf16 %v2137_v40, %v2133_v45 }
 0x3b5   :  { %v2212_v50 = vpack.c.bf16 %v2139_v21, %v2135_v38 }
 0x3b7   :  { %2559 = vmatprep.mubr.bf16.mxu1 %v2212_v50  ;;  %v6753_v50 = vld [vmem:[#allocation11] ss:$8 sps:$4 sm:$0xff]  }
 0x3b8   :  { %2560 = vmatmul.mubr.bf16.gmra.mrb[104].mxu1 %v2211_v5 }
 0x3ba   :  { %v2142_v15 = vpop.f32.mrb[44].mxu1 }
 0x3bb   :  { %v2144_v42 = vpop.f32.mrb[45].mxu1  ;;  %v2143_v29 = vadd.f32 %v2142_v15, %v8486_v39  ;;  %v6755_v15 = vld [vmem:[#allocation11 + $0x4] ss:$8 sps:$4 sm:$0xff]  }
 0x3bc   :  { %v2146_v56 = vpop.f32.mrb[46].mxu1  ;;  %v2145_v14 = vadd.f32 %v2144_v42, %v8489_v13  ;;  %3349 = vmatprep.subr.bf16.mxu1 %v6755_v15 }
 0x3bd   :  { %v2147_v20 = vadd.f32 %v2146_v56, %v8486_v39  ;;  %v2148_v53 = vpop.f32.mrb[47].mxu1  ;;  %3350 = vmatpush1.bf16.msra.mxu1 %v6753_v50  ;;  %v6771_v50 = vld [vmem:[#allocation11 + $0x60] ss:$8 sps:$4 sm:$0xff]  }
 0x3be   :  { %v2149_v4 = vadd.f32 %v2148_v53, %v8489_v13 }
 0x3bf   :  { %v2213_v22 = vpack.c.bf16 %v2147_v20, %v2143_v29 }
 0x3c0   :  { %v2214_v47 = vpack.c.bf16 %v2149_v4, %v2145_v14 }
 0x3c2   :  { %v2152_v35 = vpop.f32.mrb[48].mxu1  ;;  %2569 = vmatprep.mubr.bf16.mxu1 %v2214_v47 }
 0x3c3   :  { %v2154_v16 = vpop.f32.mrb[49].mxu1  ;;  %2570 = vmatmul.mubr.bf16.gmra.mrb[108].mxu1 %v2213_v22  ;;  %v2153_v31 = vadd.f32 %v2152_v35, %v8486_v39  ;;  %v6756_v35 = vld [vmem:[#allocation11 + $0x10] ss:$8 sps:$4 sm:$0xff]  }
 0x3c4   :  { %v2156_v60 = vpop.f32.mrb[50].mxu1  ;;  %v2155_v43 = vadd.f32 %v2154_v16, %v8489_v13  ;;  %v6758_v16 = vld [vmem:[#allocation11 + $0x14] ss:$8 sps:$4 sm:$0xff]  }
 0x3c5   :  { %v2157_v37 = vadd.f32 %v2156_v60, %v8486_v39  ;;  %v2158_v62 = vpop.f32.mrb[51].mxu1  ;;  %3351 = vmatprep.subr.bf16.mxu1 %v6758_v16 }
 0x3c6   :  { %v2159_v41 = vadd.f32 %v2158_v62, %v8489_v13  ;;  %3352 = vmatpush1.bf16.msra.mxu1 %v6756_v35 }
 0x3c7   :  { %v2215_v57 = vpack.c.bf16 %v2157_v37, %v2153_v31 }
 0x3c8   :  { %v2216_v58 = vpack.c.bf16 %v2159_v41, %v2155_v43 }
 0x3ca   :  { %v2162_v33 = vpop.f32.mrb[52].mxu1  ;;  %2579 = vmatprep.mubr.bf16.mxu1 %v2216_v58 }
 0x3cb   :  { %v2164_v1 = vpop.f32.mrb[53].mxu1  ;;  %2580 = vmatmul.mubr.bf16.gmra.mrb[112].mxu1 %v2215_v57  ;;  %v2163_v63 = vadd.f32 %v2162_v33, %v8486_v39 }
 0x3cc   :  { %v2166_v48 = vpop.f32.mrb[54].mxu1  ;;  %v2165_v54 = vadd.f32 %v2164_v1, %v8489_v13 }
 0x3cd   :  { %v2167_v55 = vadd.f32 %v2166_v48, %v8486_v39  ;;  %v2168_v23 = vpop.f32.mrb[55].mxu1 }
 0x3ce   :  { %v2169_v8 = vadd.f32 %v2168_v23, %v8489_v13 }
 0x3cf   :  { %v2217_v36 = vpack.c.bf16 %v2167_v55, %v2163_v63  ;;  %v6759_v63 = vld [vmem:[#allocation11 + $0x20] ss:$8 sps:$4 sm:$0xff]   ;;  %v6761_v55 = vld [vmem:[#allocation11 + $0x24] ss:$8 sps:$4 sm:$0xff]  }
 0x3d0   :  { %v2218_v52 = vpack.c.bf16 %v2169_v8, %v2165_v54  ;;  %3353 = vmatprep.subr.bf16.mxu1 %v6761_v55 }
 0x3d1   :  { %3354 = vmatpush1.bf16.msra.mxu1 %v6759_v63 }
 0x3d2   :  { %v2172_v59 = vpop.f32.mrb[56].mxu1  ;;  %2589 = vmatprep.mubr.bf16.mxu1 %v2218_v52 }
 0x3d3   :  { %v2174_v61 = vpop.f32.mrb[57].mxu1  ;;  %2590 = vmatmul.mubr.bf16.gmra.mrb[116].mxu1 %v2217_v36  ;;  %v2173_v24 = vadd.f32 %v2172_v59, %v8486_v39 }
 0x3d4   :  { %v2176_v46 = vpop.f32.mrb[58].mxu1  ;;  %v2175_v32 = vadd.f32 %v2174_v61, %v8489_v13 }
 0x3d5   :  { %v2177_v2 = vadd.f32 %v2176_v46, %v8486_v39  ;;  %v2178_v19 = vpop.f32.mrb[59].mxu1 }
 0x3d6   :  { %v2179_v12 = vadd.f32 %v2178_v19, %v8489_v13 }
 0x3d7   :  { %v2219_v10 = vpack.c.bf16 %v2177_v2, %v2173_v24 }
 0x3d8   :  { %v2220_v18 = vpack.c.bf16 %v2179_v12, %v2175_v32 }
 0x3da   :  { %v2182_v27 = vpop.f32.mrb[60].mxu1  ;;  %2599 = vmatprep.mubr.bf16.mxu1 %v2220_v18  ;;  %v6764_v18 = vld [vmem:[#allocation11 + $0x34] ss:$8 sps:$4 sm:$0xff]  }
 0x3db   :  { %v2184_v49 = vpop.f32.mrb[61].mxu1  ;;  %2600 = vmatmul.mubr.bf16.gmra.mrb[120].mxu1 %v2219_v10  ;;  %v2183_v30 = vadd.f32 %v2182_v27, %v8486_v39  ;;  %v6762_v10 = vld [vmem:[#allocation11 + $0x30] ss:$8 sps:$4 sm:$0xff]   ;;  %3355 = vmatprep.subr.bf16.mxu1 %v6764_v18 }
 0x3dc   :  { %v2186_v6 = vpop.f32.mrb[62].mxu1  ;;  %v2185_v9 = vadd.f32 %v2184_v49, %v8489_v13  ;;  %3356 = vmatpush1.bf16.msra.mxu1 %v6762_v10  ;;  %v6765_v49 = vld [vmem:[#allocation11 + $0x40] ss:$8 sps:$4 sm:$0xff]   ;;  %v6791_v10 = vld [vmem:[#allocation11 + $0xc4] ss:$8 sps:$4 sm:$0xff]  }
 0x3dd   :  { %v2187_v17 = vadd.f32 %v2186_v6, %v8486_v39  ;;  %v2188_v0 = vpop.f32.mrb[63].mxu1  ;;  %v6767_v6 = vld [vmem:[#allocation11 + $0x44] ss:$8 sps:$4 sm:$0xff]  }
 0x3de   :  { %v2189_v11 = vadd.f32 %v2188_v0, %v8489_v13  ;;  %3357 = vmatprep.subr.bf16.mxu1 %v6767_v6 }
 0x3df   :  { %v2221_v51 = vpack.c.bf16 %v2187_v17, %v2183_v30  ;;  %v6770_v17 = vld [vmem:[#allocation11 + $0x54] ss:$8 sps:$4 sm:$0xff]  }
 0x3e0   :  { %v2222_v26 = vpack.c.bf16 %v2189_v11, %v2185_v9  ;;  %3358 = vmatpush1.bf16.msra.mxu1 %v6765_v49  ;;  %v6789_v49 = vld [vmem:[#allocation11 + $0xc0] ss:$8 sps:$4 sm:$0xff]  }
 0x3e1   :  { %3359 = vmatprep.subr.bf16.mxu1 %v6770_v17  ;;  %v6794_v17 = vld [vmem:[#allocation11 + $0xd4] ss:$8 sps:$4 sm:$0xff]  }
 0x3e2   :  { %2609 = vmatprep.mubr.bf16.mxu1 %v2222_v26 }
 0x3e3   :  { %2610 = vmatmul.mubr.bf16.gmra.mrb[124].mxu1 %v2221_v51 }
 0x422   :  { %v2461_v39 = vpop.f32.mrb[64].mxu1 }
 0x423   :  { %v2462_v45 = vadd.f32 %v2461_v39, %v8559_v28  ;;  %v2463_v40 = vpop.f32.mrb[65].mxu1  ;;  %v6768_v39 = vld [vmem:[#allocation11 + $0x50] ss:$8 sps:$4 sm:$0xff]  }
 0x424   :  { %v2464_v13 = vadd.f32 %v2463_v40, %v8562_v25  ;;  %v2465_v44 = vpop.f32.mrb[66].mxu1  ;;  %v6773_v40 = vld [vmem:[#allocation11 + $0x64] ss:$8 sps:$4 sm:$0xff]   ;;  %3360 = vmatpush1.bf16.msra.mxu1 %v6768_v39 }
 0x425   :  { %v2466_v38 = vadd.f32 %v2465_v44, %v8559_v28  ;;  %v2467_v21 = vpop.f32.mrb[67].mxu1  ;;  %v2620_v42 = vmax.f32 %v2462_v45, 0.0  ;;  %3361 = vmatprep.subr.bf16.mxu1 %v6773_v40  ;;  %v6797_v40 = vld [vmem:[#allocation11 + $0xe4] ss:$8 sps:$4 sm:$0xff]  }
 0x426   :  { %v2468_v5 = vadd.f32 %v2467_v21, %v8562_v25  ;;  %v2621_v29 = vmax.f32 %v2464_v13, 0.0 }
 0x427   :  { %v2622_v56 = vmax.f32 %v2466_v38, 0.0 }
 0x428   :  { %v2623_v20 = vmax.f32 %v2468_v5, 0.0  ;;  %3362 = vmatpush1.bf16.msra.mxu1 %v6771_v50 }
 0x429   :  { %v2684_v53 = vpack.c.bf16 %v2622_v56, %v2620_v42  ;;  %v6776_v42 = vld [vmem:[#allocation11 + $0x74] ss:$8 sps:$4 sm:$0xff]  }
 0x42a   :  { %v2685_v14 = vpack.c.bf16 %v2623_v20, %v2621_v29  ;;  %3363 = vmatprep.subr.bf16.mxu1 %v6776_v42 }
 0x42c   :  { %2952 = vmatprep.mubr.bf16.mxu0 %v2685_v14 }
 0x42d   :  { %v2471_v4 = vpop.f32.mrb[68].mxu1  ;;  %2953 = vmatmul.mubr.bf16.vlgmr.msra.gmra.mrb[64].mxu0 %v2684_v53  ;;  %v6774_v53 = vld [vmem:[#allocation11 + $0x70] ss:$8 sps:$4 sm:$0xff]  }
 0x42e   :  { %v2472_v22 = vadd.f32 %v2471_v4, %v8559_v28  ;;  %v2473_v47 = vpop.f32.mrb[69].mxu1  ;;  %3364 = vmatpush1.bf16.msra.mxu1 %v6774_v53 }
 0x42f   :  { %v2474_v60 = vadd.f32 %v2473_v47, %v8562_v25  ;;  %v2475_v31 = vpop.f32.mrb[70].mxu1 }
 0x430   :  { %v2476_v37 = vadd.f32 %v2475_v31, %v8559_v28  ;;  %v2477_v62 = vpop.f32.mrb[71].mxu1  ;;  %v2624_v41 = vmax.f32 %v2472_v22, 0.0  ;;  %v6779_v22 = vld [vmem:[#allocation11 + $0x84] ss:$8 sps:$4 sm:$0xff]  }
 0x431   :  { %v2478_v43 = vadd.f32 %v2477_v62, %v8562_v25  ;;  %v2625_v58 = vmax.f32 %v2474_v60, 0.0  ;;  %3365 = vmatprep.subr.bf16.mxu1 %v6779_v22 }
 0x432   :  { %v2626_v57 = vmax.f32 %v2476_v37, 0.0  ;;  %v6777_v37 = vld [vmem:[#allocation11 + $0x80] ss:$8 sps:$4 sm:$0xff]  }
 0x433   :  { %v2627_v33 = vmax.f32 %v2478_v43, 0.0  ;;  %3366 = vmatpush1.bf16.msra.mxu1 %v6777_v37 }
 0x434   :  { %v2686_v1 = vpack.c.bf16 %v2626_v57, %v2624_v41  ;;  %v6782_v41 = vld [vmem:[#allocation11 + $0x94] ss:$8 sps:$4 sm:$0xff]  }
 0x435   :  { %v2687_v48 = vpack.c.bf16 %v2627_v33, %v2625_v58  ;;  %v6780_v33 = vld [vmem:[#allocation11 + $0x90] ss:$8 sps:$4 sm:$0xff]   ;;  %3367 = vmatprep.subr.bf16.mxu1 %v6782_v41 }
 0x437   :  { %v2481_v23 = vpop.f32.mrb[72].mxu1  ;;  %2962 = vmatprep.mubr.bf16.mxu0 %v2687_v48  ;;  %3368 = vmatpush1.bf16.msra.mxu1 %v6780_v33 }
 0x438   :  { %v2482_v54 = vadd.f32 %v2481_v23, %v8559_v28  ;;  %v2483_v8 = vpop.f32.mrb[73].mxu1  ;;  %2963 = vmatmul.mubr.bf16.gmra.mrb[68].mxu0 %v2686_v1  ;;  %v6785_v1 = vld [vmem:[#allocation11 + $0xa4] ss:$8 sps:$4 sm:$0xff]  }
 0x439   :  { %v2484_v36 = vadd.f32 %v2483_v8, %v8562_v25  ;;  %v2485_v52 = vpop.f32.mrb[74].mxu1  ;;  %v6783_v8 = vld [vmem:[#allocation11 + $0xa0] ss:$8 sps:$4 sm:$0xff]   ;;  %3369 = vmatprep.subr.bf16.mxu1 %v6785_v1 }
 0x43a   :  { %v2486_v59 = vadd.f32 %v2485_v52, %v8559_v28  ;;  %v2487_v61 = vpop.f32.mrb[75].mxu1  ;;  %v2628_v24 = vmax.f32 %v2482_v54, 0.0 }
 0x43b   :  { %v2488_v46 = vadd.f32 %v2487_v61, %v8562_v25  ;;  %v2629_v19 = vmax.f32 %v2484_v36, 0.0  ;;  %3370 = vmatpush1.bf16.msra.mxu1 %v6783_v8 }
 0x43c   :  { %v2630_v2 = vmax.f32 %v2486_v59, 0.0  ;;  %v6788_v59 = vld [vmem:[#allocation11 + $0xb4] ss:$8 sps:$4 sm:$0xff]  }
 0x43d   :  { %v2631_v32 = vmax.f32 %v2488_v46, 0.0  ;;  %3371 = vmatprep.subr.bf16.mxu1 %v6788_v59  ;;  %v6798_v59 = vld [vmem:[#allocation11 + $0xf0] ss:$8 sps:$4 sm:$0xff]  }
 0x43e   :  { %v2688_v12 = vpack.c.bf16 %v2630_v2, %v2628_v24 }
 0x43f   :  { %v2689_v27 = vpack.c.bf16 %v2631_v32, %v2629_v19  ;;  %v6786_v32 = vld [vmem:[#allocation11 + $0xb0] ss:$8 sps:$4 sm:$0xff]  }
 0x440   :  { %3372 = vmatpush1.bf16.msra.mxu1 %v6786_v32 }
 0x441   :  { %2972 = vmatprep.mubr.bf16.mxu0 %v2689_v27  ;;  %3373 = vmatprep.subr.bf16.mxu1 %v6791_v10 }
 0x442   :  { %v2491_v30 = vpop.f32.mrb[76].mxu1  ;;  %2973 = vmatmul.mubr.bf16.gmra.mrb[72].mxu0 %v2688_v12 }
 0x443   :  { %v2492_v0 = vadd.f32 %v2491_v30, %v8559_v28  ;;  %v2493_v9 = vpop.f32.mrb[77].mxu1 }
 0x444   :  { %v2494_v11 = vadd.f32 %v2493_v9, %v8562_v25  ;;  %v2495_v51 = vpop.f32.mrb[78].mxu1  ;;  %3374 = vmatpush1.bf16.msra.mxu1 %v6789_v49 }
 0x445   :  { %v2496_v26 = vadd.f32 %v2495_v51, %v8559_v28  ;;  %v2497_v7 = vpop.f32.mrb[79].mxu1  ;;  %v2632_v13 = vmax.f32 %v2492_v0, 0.0  ;;  %3375 = vmatprep.subr.bf16.mxu1 %v6794_v17 }
 0x446   :  { %v2498_v45 = vadd.f32 %v2497_v7, %v8562_v25  ;;  %v2633_v38 = vmax.f32 %v2494_v11, 0.0  ;;  %v6792_v7 = vld [vmem:[#allocation11 + $0xd0] ss:$8 sps:$4 sm:$0xff]  }
 0x447   :  { %v2634_v44 = vmax.f32 %v2496_v26, 0.0 }
 0x448   :  { %v2635_v21 = vmax.f32 %v2498_v45, 0.0  ;;  %3376 = vmatpush1.bf16.msra.mxu1 %v6792_v7 }
 0x449   :  { %v2690_v5 = vpack.c.bf16 %v2634_v44, %v2632_v13  ;;  %3377 = vmatprep.subr.bf16.mxu1 %v6797_v40 }
 0x44a   :  { %v2691_v15 = vpack.c.bf16 %v2635_v21, %v2633_v38 }
 0x44c   :  { %v2501_v56 = vpop.f32.mrb[80].mxu1  ;;  %2982 = vmatprep.mubr.bf16.mxu0 %v2691_v15 }
 0x44d   :  { %v2502_v29 = vadd.f32 %v2501_v56, %v8559_v28  ;;  %v2503_v20 = vpop.f32.mrb[81].mxu1  ;;  %2983 = vmatmul.mubr.bf16.gmra.mrb[76].mxu0 %v2690_v5  ;;  %v6795_v5 = vld [vmem:[#allocation11 + $0xe0] ss:$8 sps:$4 sm:$0xff]  }
 0x44e   :  { %v2504_v14 = vadd.f32 %v2503_v20, %v8562_v25  ;;  %v2505_v4 = vpop.f32.mrb[82].mxu1  ;;  %3378 = vmatpush1.bf16.msra.mxu1 %v6795_v5 }
 0x44f   :  { %v2506_v47 = vadd.f32 %v2505_v4, %v8559_v28  ;;  %v2507_v35 = vpop.f32.mrb[83].mxu1  ;;  %v2636_v60 = vmax.f32 %v2502_v29, 0.0 }
 0x450   :  { %v2508_v16 = vadd.f32 %v2507_v35, %v8562_v25  ;;  %v2637_v62 = vmax.f32 %v2504_v14, 0.0 }
 0x451   :  { %v2638_v31 = vmax.f32 %v2506_v47, 0.0 }
 0x452   :  { %v2639_v43 = vmax.f32 %v2508_v16, 0.0 }
 0x453   :  { %v2692_v57 = vpack.c.bf16 %v2638_v31, %v2636_v60 }
 0x454   :  { %v2693_v58 = vpack.c.bf16 %v2639_v43, %v2637_v62 }
 0x456   :  { %2992 = vmatprep.mubr.bf16.mxu0 %v2693_v58 }
 0x457   :  { %v2511_v48 = vpop.f32.mrb[84].mxu1  ;;  %2993 = vmatmul.mubr.bf16.gmra.mrb[80].mxu0 %v2692_v57 }
 0x458   :  { %v2512_v63 = vadd.f32 %v2511_v48, %v8559_v28  ;;  %v2513_v55 = vpop.f32.mrb[85].mxu1 }
 0x459   :  { %v2514_v23 = vadd.f32 %v2513_v55, %v8562_v25  ;;  %v2515_v54 = vpop.f32.mrb[86].mxu1 }
 0x45a   :  { %v2516_v36 = vadd.f32 %v2515_v54, %v8559_v28  ;;  %v2517_v52 = vpop.f32.mrb[87].mxu1  ;;  %v2640_v46 = vmax.f32 %v2512_v63, 0.0 }
 0x45b   :  { %v2518_v61 = vadd.f32 %v2517_v52, %v8562_v25  ;;  %v2641_v2 = vmax.f32 %v2514_v23, 0.0 }
 0x45c   :  { %v2642_v24 = vmax.f32 %v2516_v36, 0.0 }
 0x45d   :  { %v2643_v19 = vmax.f32 %v2518_v61, 0.0  ;;  %v6800_v61 = vld [vmem:[#allocation11 + $0xf4] ss:$8 sps:$4 sm:$0xff]  }
 0x45e   :  { %v2694_v12 = vpack.c.bf16 %v2642_v24, %v2640_v46  ;;  %3379 = vmatprep.subr.bf16.mxu1 %v6800_v61 }
 0x45f   :  { %v2695_v18 = vpack.c.bf16 %v2643_v19, %v2641_v2  ;;  %3380 = vmatpush1.bf16.msra.mxu1 %v6798_v59 }
 0x461   :  { %v2521_v27 = vpop.f32.mrb[88].mxu1  ;;  %3002 = vmatprep.mubr.bf16.mxu0 %v2695_v18 }
 0x462   :  { %v2522_v6 = vadd.f32 %v2521_v27, %v8559_v28  ;;  %v2523_v30 = vpop.f32.mrb[89].mxu1  ;;  %3003 = vmatmul.mubr.bf16.gmra.mrb[84].mxu0 %v2694_v12 }
 0x463   :  { %v2524_v0 = vadd.f32 %v2523_v30, %v8562_v25  ;;  %v2525_v9 = vpop.f32.mrb[90].mxu1 }
 0x464   :  { %v2526_v11 = vadd.f32 %v2525_v9, %v8559_v28  ;;  %v2527_v51 = vpop.f32.mrb[91].mxu1  ;;  %v2644_v39 = vmax.f32 %v2522_v6, 0.0 }
 0x465   :  { %v2528_v26 = vadd.f32 %v2527_v51, %v8562_v25  ;;  %v2645_v13 = vmax.f32 %v2524_v0, 0.0 }
 0x466   :  { %v2646_v45 = vmax.f32 %v2526_v11, 0.0 }
 0x467   :  { %v2647_v44 = vmax.f32 %v2528_v26, 0.0 }
 0x468   :  { %v2696_v38 = vpack.c.bf16 %v2646_v45, %v2644_v39 }
 0x469   :  { %v2697_v21 = vpack.c.bf16 %v2647_v44, %v2645_v13 }
 0x46b   :  { %3012 = vmatprep.mubr.bf16.mxu0 %v2697_v21 }
 0x46c   :  { %v2531_v50 = vpop.f32.mrb[92].mxu1  ;;  %3013 = vmatmul.mubr.bf16.gmra.mrb[88].mxu0 %v2696_v38 }
 0x46d   :  { %v2532_v15 = vadd.f32 %v2531_v50, %v8559_v28  ;;  %v2533_v42 = vpop.f32.mrb[93].mxu1 }
 0x46e   :  { %v2534_v56 = vadd.f32 %v2533_v42, %v8562_v25  ;;  %v2535_v29 = vpop.f32.mrb[94].mxu1 }
 0x46f   :  { %v2536_v20 = vadd.f32 %v2535_v29, %v8559_v28  ;;  %v2537_v53 = vpop.f32.mrb[95].mxu1  ;;  %v2648_v4 = vmax.f32 %v2532_v15, 0.0 }
 0x470   :  { %v2538_v14 = vadd.f32 %v2537_v53, %v8562_v25  ;;  %v2649_v47 = vmax.f32 %v2534_v56, 0.0 }
 0x471   :  { %v2650_v22 = vmax.f32 %v2536_v20, 0.0 }
 0x472   :  { %v2651_v35 = vmax.f32 %v2538_v14, 0.0 }
 0x473   :  { %v2698_v16 = vpack.c.bf16 %v2650_v22, %v2648_v4 }
 0x474   :  { %v2699_v60 = vpack.c.bf16 %v2651_v35, %v2649_v47 }
 0x476   :  { %v2541_v31 = vpop.f32.mrb[96].mxu1  ;;  %3022 = vmatprep.mubr.bf16.mxu0 %v2699_v60 }
 0x477   :  { %v2542_v37 = vadd.f32 %v2541_v31, %v8559_v28  ;;  %v2543_v62 = vpop.f32.mrb[97].mxu1  ;;  %3023 = vmatmul.mubr.bf16.gmra.mrb[92].mxu0 %v2698_v16 }
 0x478   :  { %v2544_v43 = vadd.f32 %v2543_v62, %v8562_v25  ;;  %v2545_v41 = vpop.f32.mrb[98].mxu1 }
 0x479   :  { %v2546_v57 = vadd.f32 %v2545_v41, %v8559_v28  ;;  %v2547_v58 = vpop.f32.mrb[99].mxu1  ;;  %v2652_v1 = vmax.f32 %v2542_v37, 0.0 }
 0x47a   :  { %v2548_v33 = vadd.f32 %v2547_v58, %v8562_v25  ;;  %v2653_v63 = vmax.f32 %v2544_v43, 0.0 }
 0x47b   :  { %v2654_v48 = vmax.f32 %v2546_v57, 0.0 }
 0x47c   :  { %v2655_v55 = vmax.f32 %v2548_v33, 0.0 }
 0x47d   :  { %v2700_v23 = vpack.c.bf16 %v2654_v48, %v2652_v1 }
 0x47e   :  { %v2701_v54 = vpack.c.bf16 %v2655_v55, %v2653_v63 }
 0x480   :  { %3032 = vmatprep.mubr.bf16.mxu0 %v2701_v54 }
 0x481   :  { %v2551_v8 = vpop.f32.mrb[100].mxu1  ;;  %3033 = vmatmul.mubr.bf16.gmra.mrb[96].mxu0 %v2700_v23 }
 0x482   :  { %v2552_v36 = vadd.f32 %v2551_v8, %v8559_v28  ;;  %v2553_v52 = vpop.f32.mrb[101].mxu1 }
 0x483   :  { %v2554_v46 = vadd.f32 %v2553_v52, %v8562_v25  ;;  %v2555_v24 = vpop.f32.mrb[102].mxu1 }
 0x484   :  { %v2556_v2 = vadd.f32 %v2555_v24, %v8559_v28  ;;  %v2557_v19 = vpop.f32.mrb[103].mxu1  ;;  %v2656_v12 = vmax.f32 %v2552_v36, 0.0 }
 0x485   :  { %v2558_v32 = vadd.f32 %v2557_v19, %v8562_v25  ;;  %v2657_v18 = vmax.f32 %v2554_v46, 0.0 }
 0x486   :  { %v2658_v10 = vmax.f32 %v2556_v2, 0.0 }
 0x487   :  { %v2659_v27 = vmax.f32 %v2558_v32, 0.0 }
 0x488   :  { %v2702_v49 = vpack.c.bf16 %v2658_v10, %v2656_v12 }
 0x489   :  { %v2703_v6 = vpack.c.bf16 %v2659_v27, %v2657_v18 }
 0x48b   :  { %v2561_v30 = vpop.f32.mrb[104].mxu1  ;;  %3042 = vmatprep.mubr.bf16.mxu0 %v2703_v6 }
 0x48c   :  { %v2562_v17 = vadd.f32 %v2561_v30, %v8559_v28  ;;  %v2563_v0 = vpop.f32.mrb[105].mxu1  ;;  %3043 = vmatmul.mubr.bf16.gmra.mrb[100].mxu0 %v2702_v49 }
 0x48d   :  { %v2564_v9 = vadd.f32 %v2563_v0, %v8562_v25  ;;  %v2565_v11 = vpop.f32.mrb[106].mxu1 }
 0x48e   :  { %v2566_v51 = vadd.f32 %v2565_v11, %v8559_v28  ;;  %v2567_v26 = vpop.f32.mrb[107].mxu1  ;;  %v2660_v39 = vmax.f32 %v2562_v17, 0.0 }
 0x48f   :  { %v2568_v7 = vadd.f32 %v2567_v26, %v8562_v25  ;;  %v2661_v40 = vmax.f32 %v2564_v9, 0.0 }
 0x490   :  { %v2662_v45 = vmax.f32 %v2566_v51, 0.0 }
 0x491   :  { %v2663_v13 = vmax.f32 %v2568_v7, 0.0 }
 0x492   :  { %v2704_v44 = vpack.c.bf16 %v2662_v45, %v2660_v39 }
 0x493   :  { %v2705_v38 = vpack.c.bf16 %v2663_v13, %v2661_v40 }
 0x495   :  { %3052 = vmatprep.mubr.bf16.mxu0 %v2705_v38 }
 0x496   :  { %v2571_v21 = vpop.f32.mrb[108].mxu1  ;;  %3053 = vmatmul.mubr.bf16.gmra.mrb[104].mxu0 %v2704_v44 }
 0x497   :  { %v2572_v5 = vadd.f32 %v2571_v21, %v8559_v28  ;;  %v2573_v50 = vpop.f32.mrb[109].mxu1 }
 0x498   :  { %v2574_v15 = vadd.f32 %v2573_v50, %v8562_v25  ;;  %v2575_v42 = vpop.f32.mrb[110].mxu1 }
 0x499   :  { %v2576_v56 = vadd.f32 %v2575_v42, %v8559_v28  ;;  %v2577_v29 = vpop.f32.mrb[111].mxu1  ;;  %v2664_v53 = vmax.f32 %v2572_v5, 0.0 }
 0x49a   :  { %v2578_v20 = vadd.f32 %v2577_v29, %v8562_v25  ;;  %v2665_v4 = vmax.f32 %v2574_v15, 0.0 }
 0x49b   :  { %v2666_v14 = vmax.f32 %v2576_v56, 0.0 }
 0x49c   :  { %v2667_v22 = vmax.f32 %v2578_v20, 0.0 }
 0x49d   :  { %v2706_v47 = vpack.c.bf16 %v2666_v14, %v2664_v53 }
 0x49e   :  { %v2707_v35 = vpack.c.bf16 %v2667_v22, %v2665_v4  ;;  %v2581_v16 = vpop.f32.mrb[112].mxu1  ;;  %v2748_v4 = vld [vmem:[%s9535_s8] sm:$0x3] }
 0x49f   :  { %v2582_v60 = vadd.f32 %v2581_v16, %v8559_v28  ;;  %v2583_v31 = vpop.f32.mrb[113].mxu1  ;;  %v8632_v22 = vrot.slane %v2748_v4, %v7710_v3  ;;  %v6801_v16 = vld [vmem:[#allocation13] ss:$8 sps:$4 sm:$0xff]  }
 0x4a0   :  { %v2584_v37 = vadd.f32 %v2583_v31, %v8562_v25  ;;  %v2585_v62 = vpop.f32.mrb[114].mxu1  ;;  %3062 = vmatprep.mubr.bf16.mxu0 %v2707_v35 }
 0x4a1   :  { %v2586_v43 = vadd.f32 %v2585_v62, %v8559_v28  ;;  %v2587_v41 = vpop.f32.mrb[115].mxu1  ;;  %3063 = vmatmul.mubr.bf16.gmra.mrb[108].mxu0 %v2706_v47  ;;  %v2668_v58 = vmax.f32 %v2582_v60, 0.0  ;;  %v8635_v47 = vrot.slane %v2748_v4, %v9559_v34  ;;  %v6803_v60 = vld [vmem:[#allocation13 + $0x4] ss:$8 sps:$4 sm:$0xff]  }
 0x4a2   :  { %v2588_v57 = vadd.f32 %v2587_v41, %v8562_v25  ;;  %v2669_v1 = vmax.f32 %v2584_v37, 0.0  ;;  %3842 = vmatprep.subr.bf16.mxu0 %v6803_v60 }
 0x4a3   :  { %v2670_v33 = vmax.f32 %v2586_v43, 0.0  ;;  %3843 = vmatpush1.bf16.msra.mxu0 %v6801_v16  ;;  %v6825_v16 = vld [vmem:[#allocation13 + $0x80] ss:$8 sps:$4 sm:$0xff]  }
 0x4a4   :  { %v2671_v48 = vmax.f32 %v2588_v57, 0.0 }
 0x4a5   :  { %v2708_v63 = vpack.c.bf16 %v2670_v33, %v2668_v58  ;;  %v6804_v33 = vld [vmem:[#allocation13 + $0x10] ss:$8 sps:$4 sm:$0xff]  }
 0x4a6   :  { %v2709_v55 = vpack.c.bf16 %v2671_v48, %v2669_v1  ;;  %v2591_v23 = vpop.f32.mrb[116].mxu1  ;;  %v6806_v1 = vld [vmem:[#allocation13 + $0x14] ss:$8 sps:$4 sm:$0xff]  }
 0x4a7   :  { %v2592_v54 = vadd.f32 %v2591_v23, %v8559_v28  ;;  %v2593_v8 = vpop.f32.mrb[117].mxu1  ;;  %3844 = vmatprep.subr.bf16.mxu0 %v6806_v1 }
 0x4a8   :  { %v2594_v36 = vadd.f32 %v2593_v8, %v8562_v25  ;;  %v2595_v52 = vpop.f32.mrb[118].mxu1  ;;  %3072 = vmatprep.mubr.bf16.mxu0 %v2709_v55  ;;  %3845 = vmatpush1.bf16.msra.mxu0 %v6804_v33  ;;  %v6831_v33 = vld [vmem:[#allocation13 + $0xa0] ss:$8 sps:$4 sm:$0xff]  }
 0x4a9   :  { %v2596_v59 = vadd.f32 %v2595_v52, %v8559_v28  ;;  %v2597_v61 = vpop.f32.mrb[119].mxu1  ;;  %3073 = vmatmul.mubr.bf16.gmra.mrb[112].mxu0 %v2708_v63  ;;  %v2672_v24 = vmax.f32 %v2592_v54, 0.0 }
 0x4aa   :  { %v2598_v46 = vadd.f32 %v2597_v61, %v8562_v25  ;;  %v2673_v19 = vmax.f32 %v2594_v36, 0.0 }
 0x4ab   :  { %v2674_v2 = vmax.f32 %v2596_v59, 0.0 }
 0x4ac   :  { %v2675_v32 = vmax.f32 %v2598_v46, 0.0  ;;  %v6807_v46 = vld [vmem:[#allocation13 + $0x20] ss:$8 sps:$4 sm:$0xff]  }
 0x4ad   :  { %v2710_v12 = vpack.c.bf16 %v2674_v2, %v2672_v24  ;;  %v6809_v24 = vld [vmem:[#allocation13 + $0x24] ss:$8 sps:$4 sm:$0xff]  }
 0x4ae   :  { %v2711_v10 = vpack.c.bf16 %v2675_v32, %v2673_v19  ;;  %v2601_v18 = vpop.f32.mrb[120].mxu1  ;;  %3846 = vmatprep.subr.bf16.mxu0 %v6809_v24  ;;  %v6837_v24 = vld [vmem:[#allocation13 + $0xc0] ss:$8 sps:$4 sm:$0xff]  }
 0x4af   :  { %v2602_v27 = vadd.f32 %v2601_v18, %v8559_v28  ;;  %v2603_v49 = vpop.f32.mrb[121].mxu1  ;;  %3847 = vmatpush1.bf16.msra.mxu0 %v6807_v46 }
 0x4b0   :  { %v2604_v6 = vadd.f32 %v2603_v49, %v8562_v25  ;;  %v2605_v30 = vpop.f32.mrb[122].mxu1  ;;  %3082 = vmatprep.mubr.bf16.mxu0 %v2711_v10 }
 0x4b1   :  { %v2606_v17 = vadd.f32 %v2605_v30, %v8559_v28  ;;  %v2607_v0 = vpop.f32.mrb[123].mxu1  ;;  %3083 = vmatmul.mubr.bf16.gmra.mrb[116].mxu0 %v2710_v12  ;;  %v2676_v11 = vmax.f32 %v2602_v27, 0.0  ;;  %v6810_v30 = vld [vmem:[#allocation13 + $0x30] ss:$8 sps:$4 sm:$0xff]  }
 0x4b2   :  { %v2608_v9 = vadd.f32 %v2607_v0, %v8562_v25  ;;  %v2677_v26 = vmax.f32 %v2604_v6, 0.0 }
 0x4b3   :  { %v2678_v51 = vmax.f32 %v2606_v17, 0.0  ;;  %v6812_v17 = vld [vmem:[#allocation13 + $0x34] ss:$8 sps:$4 sm:$0xff]  }
 0x4b4   :  { %v2679_v7 = vmax.f32 %v2608_v9, 0.0  ;;  %3848 = vmatprep.subr.bf16.mxu0 %v6812_v17  ;;  %v6813_v9 = vld [vmem:[#allocation13 + $0x40] ss:$8 sps:$4 sm:$0xff]  }
 0x4b5   :  { %v2712_v39 = vpack.c.bf16 %v2678_v51, %v2676_v11  ;;  %3849 = vmatpush1.bf16.msra.mxu0 %v6810_v30  ;;  %v6815_v11 = vld [vmem:[#allocation13 + $0x44] ss:$8 sps:$4 sm:$0xff]   ;;  %v6818_v51 = vld [vmem:[#allocation13 + $0x54] ss:$8 sps:$4 sm:$0xff]  }
 0x4b6   :  { %v2713_v45 = vpack.c.bf16 %v2679_v7, %v2677_v26  ;;  %v2611_v40 = vpop.f32.mrb[124].mxu1  ;;  %3850 = vmatprep.subr.bf16.mxu0 %v6815_v11  ;;  %v6843_v11 = vld [vmem:[#allocation13 + $0xe0] ss:$8 sps:$4 sm:$0xff]  }
 0x4b7   :  { %v2612_v13 = vadd.f32 %v2611_v40, %v8559_v28  ;;  %v2613_v44 = vpop.f32.mrb[125].mxu1  ;;  %v6821_v40 = vld [vmem:[#allocation13 + $0x64] ss:$8 sps:$4 sm:$0xff]  }
 0x4b8   :  { %v2614_v38 = vadd.f32 %v2613_v44, %v8562_v25  ;;  %v2615_v21 = vpop.f32.mrb[126].mxu1  ;;  %3092 = vmatprep.mubr.bf16.mxu0 %v2713_v45 }
 0x4b9   :  { %v2616_v5 = vadd.f32 %v2615_v21, %v8559_v28  ;;  %v2617_v50 = vpop.f32.mrb[127].mxu1  ;;  %3093 = vmatmul.mubr.bf16.gmra.mrb[120].mxu0 %v2712_v39  ;;  %v2680_v42 = vmax.f32 %v2612_v13, 0.0  ;;  %v6816_v39 = vld [vmem:[#allocation13 + $0x50] ss:$8 sps:$4 sm:$0xff]  }
 0x4ba   :  { %v2618_v15 = vadd.f32 %v2617_v50, %v8562_v25  ;;  %v2681_v29 = vmax.f32 %v2614_v38, 0.0  ;;  %3851 = vmatpush1.bf16.msra.mxu0 %v6813_v9 }
 0x4bb   :  { %v2682_v56 = vmax.f32 %v2616_v5, 0.0  ;;  %3852 = vmatprep.subr.bf16.mxu0 %v6818_v51 }
 0x4bc   :  { %v2683_v20 = vmax.f32 %v2618_v15, 0.0  ;;  %v6819_v15 = vld [vmem:[#allocation13 + $0x60] ss:$8 sps:$4 sm:$0xff]  }
 0x4bd   :  { %v2714_v53 = vpack.c.bf16 %v2682_v56, %v2680_v42  ;;  %v6824_v56 = vld [vmem:[#allocation13 + $0x74] ss:$8 sps:$4 sm:$0xff]  }
 0x4be   :  { %v2715_v14 = vpack.c.bf16 %v2683_v20, %v2681_v29  ;;  %3853 = vmatpush1.bf16.msra.mxu0 %v6816_v39  ;;  %v6822_v29 = vld [vmem:[#allocation13 + $0x70] ss:$8 sps:$4 sm:$0xff]  }
 0x4bf   :  { %3854 = vmatprep.subr.bf16.mxu0 %v6821_v40 }
 0x4c0   :  { %3102 = vmatprep.mubr.bf16.mxu0 %v2715_v14 }
 0x4c1   :  { %3103 = vmatmul.mubr.bf16.gmra.mrb[124].mxu0 %v2714_v53  ;;  %v6827_v53 = vld [vmem:[#allocation13 + $0x84] ss:$8 sps:$4 sm:$0xff]  }
 0x4c2   :  { %3855 = vmatpush1.bf16.msra.mxu0 %v6819_v15 }
 0x4c3   :  { %3856 = vmatprep.subr.bf16.mxu0 %v6824_v56 }
 0x4c6   :  { %3857 = vmatpush1.bf16.msra.mxu0 %v6822_v29 }
 0x4c7   :  { %3858 = vmatprep.subr.bf16.mxu0 %v6827_v53 }
 0x4ca   :  { %3859 = vmatpush1.bf16.msra.mxu0 %v6825_v16 }
 0x500   :  { %v2954_v28 = vpop.f32.mrb[64].mxu0 }
 0x501   :  { %v2956_v25 = vpop.f32.mrb[65].mxu0  ;;  %v2955_v31 = vadd.f32 %v2954_v28, %v8632_v22 }
 0x502   :  { %v2958_v35 = vpop.f32.mrb[66].mxu0  ;;  %v2957_v43 = vadd.f32 %v2956_v25, %v8635_v47 }
 0x503   :  { %v2959_v37 = vadd.f32 %v2958_v35, %v8632_v22  ;;  %v2960_v62 = vpop.f32.mrb[67].mxu0 }
 0x504   :  { %v2961_v41 = vadd.f32 %v2960_v62, %v8635_v47 }
 0x505   :  { %v3113_v57 = vpack.c.bf16 %v2959_v37, %v2955_v31  ;;  %v6830_v37 = vld [vmem:[#allocation13 + $0x94] ss:$8 sps:$4 sm:$0xff]  }
 0x506   :  { %v3114_v58 = vpack.c.bf16 %v2961_v41, %v2957_v43  ;;  %v6828_v41 = vld [vmem:[#allocation13 + $0x90] ss:$8 sps:$4 sm:$0xff]   ;;  %3860 = vmatprep.subr.bf16.mxu0 %v6830_v37 }
 0x507   :  { %3861 = vmatpush1.bf16.msra.mxu0 %v6828_v41  ;;  %v6846_v41 = vld [vmem:[#allocation13 + $0xf0] ss:$8 sps:$4 sm:$0xff]  }
 0x508   :  { %3381 = vmatprep.mubr.bf16.mxu1 %v3114_v58 }
 0x509   :  { %3382 = vmatmul.mubr.bf16.vlgmr.msra.gmra.mrb[128].mxu1 %v3113_v57  ;;  %v6833_v57 = vld [vmem:[#allocation13 + $0xa4] ss:$8 sps:$4 sm:$0xff]  }
 0x50a   :  { %3862 = vmatprep.subr.bf16.mxu0 %v6833_v57  ;;  %v6848_v57 = vld [vmem:[#allocation13 + $0xf4] ss:$8 sps:$4 sm:$0xff]  }
 0x50b   :  { %v2964_v48 = vpop.f32.mrb[68].mxu0  ;;  %3863 = vmatpush1.bf16.msra.mxu0 %v6831_v33 }
 0x50c   :  { %v2966_v63 = vpop.f32.mrb[69].mxu0  ;;  %v2965_v23 = vadd.f32 %v2964_v48, %v8632_v22  ;;  %v6836_v48 = vld [vmem:[#allocation13 + $0xb4] ss:$8 sps:$4 sm:$0xff]  }
 0x50d   :  { %v2968_v55 = vpop.f32.mrb[70].mxu0  ;;  %v2967_v36 = vadd.f32 %v2966_v63, %v8635_v47  ;;  %3864 = vmatprep.subr.bf16.mxu0 %v6836_v48 }
 0x50e   :  { %v2969_v54 = vadd.f32 %v2968_v55, %v8632_v22  ;;  %v2970_v8 = vpop.f32.mrb[71].mxu0 }
 0x50f   :  { %v2971_v52 = vadd.f32 %v2970_v8, %v8635_v47 }
 0x510   :  { %v3115_v59 = vpack.c.bf16 %v2969_v54, %v2965_v23 }
 0x511   :  { %v3116_v61 = vpack.c.bf16 %v2971_v52, %v2967_v36  ;;  %v6834_v52 = vld [vmem:[#allocation13 + $0xb0] ss:$8 sps:$4 sm:$0xff]  }
 0x512   :  { %3865 = vmatpush1.bf16.msra.mxu0 %v6834_v52 }
 0x513   :  { %3391 = vmatprep.mubr.bf16.mxu1 %v3116_v61  ;;  %v6839_v61 = vld [vmem:[#allocation13 + $0xc4] ss:$8 sps:$4 sm:$0xff]  }
 0x514   :  { %3392 = vmatmul.mubr.bf16.gmra.mrb[132].mxu1 %v3115_v59  ;;  %3866 = vmatprep.subr.bf16.mxu0 %v6839_v61 }
 0x515   :  { %v2974_v2 = vpop.f32.mrb[72].mxu0 }
 0x516   :  { %v2976_v19 = vpop.f32.mrb[73].mxu0  ;;  %v2975_v12 = vadd.f32 %v2974_v2, %v8632_v22  ;;  %v6842_v2 = vld [vmem:[#allocation13 + $0xd4] ss:$8 sps:$4 sm:$0xff]   ;;  %3867 = vmatpush1.bf16.msra.mxu0 %v6837_v24 }
 0x517   :  { %v2978_v32 = vpop.f32.mrb[74].mxu0  ;;  %v2977_v27 = vadd.f32 %v2976_v19, %v8635_v47  ;;  %3868 = vmatprep.subr.bf16.mxu0 %v6842_v2 }
 0x518   :  { %v2979_v10 = vadd.f32 %v2978_v32, %v8632_v22  ;;  %v2980_v18 = vpop.f32.mrb[75].mxu0 }
 0x519   :  { %v2981_v49 = vadd.f32 %v2980_v18, %v8635_v47 }
 0x51a   :  { %v3117_v6 = vpack.c.bf16 %v2979_v10, %v2975_v12  ;;  %v6840_v10 = vld [vmem:[#allocation13 + $0xd0] ss:$8 sps:$4 sm:$0xff]  }
 0x51b   :  { %v3118_v0 = vpack.c.bf16 %v2981_v49, %v2977_v27  ;;  %3869 = vmatpush1.bf16.msra.mxu0 %v6840_v10 }
 0x51d   :  { %3401 = vmatprep.mubr.bf16.mxu1 %v3118_v0 }
 0x51e   :  { %3402 = vmatmul.mubr.bf16.gmra.mrb[136].mxu1 %v3117_v6  ;;  %v6845_v6 = vld [vmem:[#allocation13 + $0xe4] ss:$8 sps:$4 sm:$0xff]  }
 0x51f   :  { %3870 = vmatprep.subr.bf16.mxu0 %v6845_v6 }
 0x520   :  { %v2984_v26 = vpop.f32.mrb[76].mxu0  ;;  %3871 = vmatpush1.bf16.msra.mxu0 %v6843_v11 }
 0x521   :  { %v2986_v7 = vpop.f32.mrb[77].mxu0  ;;  %v2985_v13 = vadd.f32 %v2984_v26, %v8632_v22  ;;  %3872 = vmatprep.subr.bf16.mxu0 %v6848_v57 }
 0x522   :  { %v2988_v45 = vpop.f32.mrb[78].mxu0  ;;  %v2987_v21 = vadd.f32 %v2986_v7, %v8635_v47 }
 0x523   :  { %v2989_v44 = vadd.f32 %v2988_v45, %v8632_v22  ;;  %v2990_v38 = vpop.f32.mrb[79].mxu0 }
 0x524   :  { %v2991_v5 = vadd.f32 %v2990_v38, %v8635_v47  ;;  %3873 = vmatpush1.bf16.msra.mxu0 %v6846_v41 }
 0x525   :  { %v3119_v50 = vpack.c.bf16 %v2989_v44, %v2985_v13 }
 0x526   :  { %v3120_v42 = vpack.c.bf16 %v2991_v5, %v2987_v21 }
 0x528   :  { %3411 = vmatprep.mubr.bf16.mxu1 %v3120_v42 }
 0x529   :  { %3412 = vmatmul.mubr.bf16.gmra.mrb[140].mxu1 %v3119_v50 }
 0x52a   :  { %v2994_v20 = vpop.f32.mrb[80].mxu0 }
 0x52b   :  { %v2996_v14 = vpop.f32.mrb[81].mxu0  ;;  %v2995_v28 = vadd.f32 %v2994_v20, %v8632_v22 }
 0x52c   :  { %v2998_v4 = vpop.f32.mrb[82].mxu0  ;;  %v2997_v60 = vadd.f32 %v2996_v14, %v8635_v47 }
 0x52d   :  { %v2999_v25 = vadd.f32 %v2998_v4, %v8632_v22  ;;  %v3000_v35 = vpop.f32.mrb[83].mxu0 }
 0x52e   :  { %v3001_v31 = vadd.f32 %v3000_v35, %v8635_v47 }
 0x52f   :  { %v3121_v62 = vpack.c.bf16 %v2999_v25, %v2995_v28 }
 0x530   :  { %v3122_v43 = vpack.c.bf16 %v3001_v31, %v2997_v60 }
 0x532   :  { %3421 = vmatprep.mubr.bf16.mxu1 %v3122_v43 }
 0x533   :  { %3422 = vmatmul.mubr.bf16.gmra.mrb[144].mxu1 %v3121_v62 }
 0x535   :  { %v3004_v58 = vpop.f32.mrb[84].mxu0 }
 0x536   :  { %v3006_v1 = vpop.f32.mrb[85].mxu0  ;;  %v3005_v55 = vadd.f32 %v3004_v58, %v8632_v22 }
 0x537   :  { %v3008_v63 = vpop.f32.mrb[86].mxu0  ;;  %v3007_v8 = vadd.f32 %v3006_v1, %v8635_v47 }
 0x538   :  { %v3009_v23 = vadd.f32 %v3008_v63, %v8632_v22  ;;  %v3010_v54 = vpop.f32.mrb[87].mxu0 }
 0x539   :  { %v3011_v36 = vadd.f32 %v3010_v54, %v8635_v47 }
 0x53a   :  { %v3123_v59 = vpack.c.bf16 %v3009_v23, %v3005_v55 }
 0x53b   :  { %v3124_v46 = vpack.c.bf16 %v3011_v36, %v3007_v8 }
 0x53d   :  { %3431 = vmatprep.mubr.bf16.mxu1 %v3124_v46 }
 0x53e   :  { %3432 = vmatmul.mubr.bf16.gmra.mrb[148].mxu1 %v3123_v59 }
 0x53f   :  { %v3014_v19 = vpop.f32.mrb[88].mxu0 }
 0x540   :  { %v3016_v32 = vpop.f32.mrb[89].mxu0  ;;  %v3015_v18 = vadd.f32 %v3014_v19, %v8632_v22 }
 0x541   :  { %v3018_v12 = vpop.f32.mrb[90].mxu0  ;;  %v3017_v30 = vadd.f32 %v3016_v32, %v8635_v47 }
 0x542   :  { %v3019_v27 = vadd.f32 %v3018_v12, %v8632_v22  ;;  %v3020_v49 = vpop.f32.mrb[91].mxu0 }
 0x543   :  { %v3021_v17 = vadd.f32 %v3020_v49, %v8635_v47 }
 0x544   :  { %v3125_v0 = vpack.c.bf16 %v3019_v27, %v3015_v18 }
 0x545   :  { %v3126_v9 = vpack.c.bf16 %v3021_v17, %v3017_v30 }
 0x547   :  { %3441 = vmatprep.mubr.bf16.mxu1 %v3126_v9 }
 0x548   :  { %3442 = vmatmul.mubr.bf16.gmra.mrb[152].mxu1 %v3125_v0 }
 0x54a   :  { %v3024_v51 = vpop.f32.mrb[92].mxu0 }
 0x54b   :  { %v3026_v26 = vpop.f32.mrb[93].mxu0  ;;  %v3025_v39 = vadd.f32 %v3024_v51, %v8632_v22 }
 0x54c   :  { %v3028_v7 = vpop.f32.mrb[94].mxu0  ;;  %v3027_v13 = vadd.f32 %v3026_v26, %v8635_v47 }
 0x54d   :  { %v3029_v45 = vadd.f32 %v3028_v7, %v8632_v22  ;;  %v3030_v40 = vpop.f32.mrb[95].mxu0 }
 0x54e   :  { %v3031_v44 = vadd.f32 %v3030_v40, %v8635_v47 }
 0x54f   :  { %v3127_v38 = vpack.c.bf16 %v3029_v45, %v3025_v39 }
 0x550   :  { %v3128_v21 = vpack.c.bf16 %v3031_v44, %v3027_v13 }
 0x552   :  { %3451 = vmatprep.mubr.bf16.mxu1 %v3128_v21 }
 0x553   :  { %3452 = vmatmul.mubr.bf16.gmra.mrb[156].mxu1 %v3127_v38 }
 0x554   :  { %v3034_v5 = vpop.f32.mrb[96].mxu0 }
 0x555   :  { %v3036_v50 = vpop.f32.mrb[97].mxu0  ;;  %v3035_v42 = vadd.f32 %v3034_v5, %v8632_v22 }
 0x556   :  { %v3038_v15 = vpop.f32.mrb[98].mxu0  ;;  %v3037_v20 = vadd.f32 %v3036_v50, %v8635_v47 }
 0x557   :  { %v3039_v56 = vadd.f32 %v3038_v15, %v8632_v22  ;;  %v3040_v29 = vpop.f32.mrb[99].mxu0 }
 0x558   :  { %v3041_v53 = vadd.f32 %v3040_v29, %v8635_v47 }
 0x559   :  { %v3129_v14 = vpack.c.bf16 %v3039_v56, %v3035_v42 }
 0x55a   :  { %v3130_v4 = vpack.c.bf16 %v3041_v53, %v3037_v20 }
 0x55c   :  { %3461 = vmatprep.mubr.bf16.mxu1 %v3130_v4 }
 0x55d   :  { %3462 = vmatmul.mubr.bf16.gmra.mrb[160].mxu1 %v3129_v14 }
 0x55f   :  { %v3044_v28 = vpop.f32.mrb[100].mxu0 }
 0x560   :  { %v3046_v25 = vpop.f32.mrb[101].mxu0  ;;  %v3045_v16 = vadd.f32 %v3044_v28, %v8632_v22 }
 0x561   :  { %v3048_v35 = vpop.f32.mrb[102].mxu0  ;;  %v3047_v37 = vadd.f32 %v3046_v25, %v8635_v47 }
 0x562   :  { %v3049_v60 = vadd.f32 %v3048_v35, %v8632_v22  ;;  %v3050_v31 = vpop.f32.mrb[103].mxu0 }
 0x563   :  { %v3051_v62 = vadd.f32 %v3050_v31, %v8635_v47 }
 0x564   :  { %v3131_v43 = vpack.c.bf16 %v3049_v60, %v3045_v16 }
 0x565   :  { %v3132_v58 = vpack.c.bf16 %v3051_v62, %v3047_v37 }
 0x567   :  { %3471 = vmatprep.mubr.bf16.mxu1 %v3132_v58 }
 0x568   :  { %3472 = vmatmul.mubr.bf16.gmra.mrb[164].mxu1 %v3131_v43 }
 0x569   :  { %v3054_v33 = vpop.f32.mrb[104].mxu0 }
 0x56a   :  { %v3056_v1 = vpop.f32.mrb[105].mxu0  ;;  %v3055_v63 = vadd.f32 %v3054_v33, %v8632_v22  ;;  %v3177_v33 = vld [vmem:[%s9537_s10] sm:$0x3] }
 0x56b   :  { %v3058_v48 = vpop.f32.mrb[106].mxu0  ;;  %v3057_v54 = vadd.f32 %v3056_v1, %v8635_v47  ;;  %v8705_v1 = vrot.slane %v3177_v33, %v7710_v3 }
 0x56c   :  { %v3059_v55 = vadd.f32 %v3058_v48, %v8632_v22  ;;  %v3060_v23 = vpop.f32.mrb[107].mxu0  ;;  %v8708_v48 = vrot.slane %v3177_v33, %v9559_v34 }
 0x56d   :  { %v3061_v8 = vadd.f32 %v3060_v23, %v8635_v47 }
 0x56e   :  { %v3133_v36 = vpack.c.bf16 %v3059_v55, %v3055_v63 }
 0x56f   :  { %v3134_v52 = vpack.c.bf16 %v3061_v8, %v3057_v54 }
 0x571   :  { %3481 = vmatprep.mubr.bf16.mxu1 %v3134_v52  ;;  %v6849_v52 = vld [vmem:[#allocation14] ss:$8 sps:$4 sm:$0xff]  }
 0x572   :  { %3482 = vmatmul.mubr.bf16.gmra.mrb[168].mxu1 %v3133_v36 }
 0x574   :  { %v3064_v59 = vpop.f32.mrb[108].mxu0 }
 0x575   :  { %v3066_v61 = vpop.f32.mrb[109].mxu0  ;;  %v3065_v24 = vadd.f32 %v3064_v59, %v8632_v22  ;;  %v6851_v59 = vld [vmem:[#allocation14 + $0x4] ss:$8 sps:$4 sm:$0xff]  }
 0x576   :  { %v3068_v46 = vpop.f32.mrb[110].mxu0  ;;  %v3067_v32 = vadd.f32 %v3066_v61, %v8635_v47  ;;  %4271 = vmatprep.subr.bf16.mxu1 %v6851_v59 }
 0x577   :  { %v3069_v2 = vadd.f32 %v3068_v46, %v8632_v22  ;;  %v3070_v19 = vpop.f32.mrb[111].mxu0  ;;  %4272 = vmatpush1.bf16.msra.mxu1 %v6849_v52  ;;  %v6867_v52 = vld [vmem:[#allocation14 + $0x60] ss:$8 sps:$4 sm:$0xff]  }
 0x578   :  { %v3071_v12 = vadd.f32 %v3070_v19, %v8635_v47 }
 0x579   :  { %v3135_v10 = vpack.c.bf16 %v3069_v2, %v3065_v24 }
 0x57a   :  { %v3136_v18 = vpack.c.bf16 %v3071_v12, %v3067_v32 }
 0x57c   :  { %v3074_v27 = vpop.f32.mrb[112].mxu0  ;;  %3491 = vmatprep.mubr.bf16.mxu1 %v3136_v18 }
 0x57d   :  { %v3076_v49 = vpop.f32.mrb[113].mxu0  ;;  %3492 = vmatmul.mubr.bf16.gmra.mrb[172].mxu1 %v3135_v10  ;;  %v3075_v30 = vadd.f32 %v3074_v27, %v8632_v22  ;;  %v6852_v27 = vld [vmem:[#allocation14 + $0x10] ss:$8 sps:$4 sm:$0xff]  }
 0x57e   :  { %v3078_v6 = vpop.f32.mrb[114].mxu0  ;;  %v3077_v9 = vadd.f32 %v3076_v49, %v8635_v47  ;;  %v6854_v49 = vld [vmem:[#allocation14 + $0x14] ss:$8 sps:$4 sm:$0xff]  }
 0x57f   :  { %v3079_v17 = vadd.f32 %v3078_v6, %v8632_v22  ;;  %v3080_v0 = vpop.f32.mrb[115].mxu0  ;;  %4273 = vmatprep.subr.bf16.mxu1 %v6854_v49 }
 0x580   :  { %v3081_v11 = vadd.f32 %v3080_v0, %v8635_v47  ;;  %4274 = vmatpush1.bf16.msra.mxu1 %v6852_v27 }
 0x581   :  { %v3137_v51 = vpack.c.bf16 %v3079_v17, %v3075_v30 }
 0x582   :  { %v3138_v26 = vpack.c.bf16 %v3081_v11, %v3077_v9 }
 0x584   :  { %v3084_v7 = vpop.f32.mrb[116].mxu0  ;;  %3501 = vmatprep.mubr.bf16.mxu1 %v3138_v26 }
 0x585   :  { %v3086_v39 = vpop.f32.mrb[117].mxu0  ;;  %3502 = vmatmul.mubr.bf16.gmra.mrb[176].mxu1 %v3137_v51  ;;  %v3085_v40 = vadd.f32 %v3084_v7, %v8632_v22 }
 0x586   :  { %v3088_v45 = vpop.f32.mrb[118].mxu0  ;;  %v3087_v38 = vadd.f32 %v3086_v39, %v8635_v47 }
 0x587   :  { %v3089_v13 = vadd.f32 %v3088_v45, %v8632_v22  ;;  %v3090_v44 = vpop.f32.mrb[119].mxu0 }
 0x588   :  { %v3091_v21 = vadd.f32 %v3090_v44, %v8635_v47 }
 0x589   :  { %v3139_v5 = vpack.c.bf16 %v3089_v13, %v3085_v40  ;;  %v6855_v40 = vld [vmem:[#allocation14 + $0x20] ss:$8 sps:$4 sm:$0xff]   ;;  %v6857_v13 = vld [vmem:[#allocation14 + $0x24] ss:$8 sps:$4 sm:$0xff]  }
 0x58a   :  { %v3140_v50 = vpack.c.bf16 %v3091_v21, %v3087_v38  ;;  %4275 = vmatprep.subr.bf16.mxu1 %v6857_v13 }
 0x58b   :  { %4276 = vmatpush1.bf16.msra.mxu1 %v6855_v40 }
 0x58c   :  { %v3094_v15 = vpop.f32.mrb[120].mxu0  ;;  %3511 = vmatprep.mubr.bf16.mxu1 %v3140_v50 }
 0x58d   :  { %v3096_v42 = vpop.f32.mrb[121].mxu0  ;;  %3512 = vmatmul.mubr.bf16.gmra.mrb[180].mxu1 %v3139_v5  ;;  %v3095_v29 = vadd.f32 %v3094_v15, %v8632_v22 }
 0x58e   :  { %v3098_v56 = vpop.f32.mrb[122].mxu0  ;;  %v3097_v14 = vadd.f32 %v3096_v42, %v8635_v47 }
 0x58f   :  { %v3099_v20 = vadd.f32 %v3098_v56, %v8632_v22  ;;  %v3100_v53 = vpop.f32.mrb[123].mxu0 }
 0x590   :  { %v3101_v4 = vadd.f32 %v3100_v53, %v8635_v47 }
 0x591   :  { %v3141_v28 = vpack.c.bf16 %v3099_v20, %v3095_v29 }
 0x592   :  { %v3142_v25 = vpack.c.bf16 %v3101_v4, %v3097_v14 }
 0x594   :  { %v3104_v35 = vpop.f32.mrb[124].mxu0  ;;  %3521 = vmatprep.mubr.bf16.mxu1 %v3142_v25  ;;  %v6860_v25 = vld [vmem:[#allocation14 + $0x34] ss:$8 sps:$4 sm:$0xff]  }
 0x595   :  { %v3106_v16 = vpop.f32.mrb[125].mxu0  ;;  %3522 = vmatmul.mubr.bf16.gmra.mrb[184].mxu1 %v3141_v28  ;;  %v3105_v31 = vadd.f32 %v3104_v35, %v8632_v22  ;;  %v6858_v28 = vld [vmem:[#allocation14 + $0x30] ss:$8 sps:$4 sm:$0xff]   ;;  %4277 = vmatprep.subr.bf16.mxu1 %v6860_v25 }
 0x596   :  { %v3108_v60 = vpop.f32.mrb[126].mxu0  ;;  %v3107_v43 = vadd.f32 %v3106_v16, %v8635_v47  ;;  %4278 = vmatpush1.bf16.msra.mxu1 %v6858_v28  ;;  %v6861_v16 = vld [vmem:[#allocation14 + $0x40] ss:$8 sps:$4 sm:$0xff]   ;;  %v6887_v28 = vld [vmem:[#allocation14 + $0xc4] ss:$8 sps:$4 sm:$0xff]  }
 0x597   :  { %v3109_v37 = vadd.f32 %v3108_v60, %v8632_v22  ;;  %v3110_v62 = vpop.f32.mrb[127].mxu0  ;;  %v6863_v60 = vld [vmem:[#allocation14 + $0x44] ss:$8 sps:$4 sm:$0xff]  }
 0x598   :  { %v3111_v41 = vadd.f32 %v3110_v62, %v8635_v47  ;;  %4279 = vmatprep.subr.bf16.mxu1 %v6863_v60 }
 0x599   :  { %v3143_v57 = vpack.c.bf16 %v3109_v37, %v3105_v31  ;;  %v6866_v37 = vld [vmem:[#allocation14 + $0x54] ss:$8 sps:$4 sm:$0xff]  }
 0x59a   :  { %v3144_v58 = vpack.c.bf16 %v3111_v41, %v3107_v43  ;;  %4280 = vmatpush1.bf16.msra.mxu1 %v6861_v16  ;;  %v6885_v16 = vld [vmem:[#allocation14 + $0xc0] ss:$8 sps:$4 sm:$0xff]  }
 0x59b   :  { %4281 = vmatprep.subr.bf16.mxu1 %v6866_v37  ;;  %v6890_v37 = vld [vmem:[#allocation14 + $0xd4] ss:$8 sps:$4 sm:$0xff]  }
 0x59c   :  { %3531 = vmatprep.mubr.bf16.mxu1 %v3144_v58 }
 0x59d   :  { %3532 = vmatmul.mubr.bf16.gmra.mrb[188].mxu1 %v3143_v57 }
 0x5dc   :  { %v3383_v22 = vpop.f32.mrb[128].mxu1 }
 0x5dd   :  { %v3384_v63 = vadd.f32 %v3383_v22, %v8705_v1  ;;  %v3385_v55 = vpop.f32.mrb[129].mxu1  ;;  %v6864_v22 = vld [vmem:[#allocation14 + $0x50] ss:$8 sps:$4 sm:$0xff]  }
 0x5de   :  { %v3386_v47 = vadd.f32 %v3385_v55, %v8708_v48  ;;  %v3387_v23 = vpop.f32.mrb[130].mxu1  ;;  %v6869_v55 = vld [vmem:[#allocation14 + $0x64] ss:$8 sps:$4 sm:$0xff]   ;;  %4282 = vmatpush1.bf16.msra.mxu1 %v6864_v22 }
 0x5df   :  { %v3388_v54 = vadd.f32 %v3387_v23, %v8705_v1  ;;  %v3389_v8 = vpop.f32.mrb[131].mxu1  ;;  %v3542_v61 = vmax.f32 %v3384_v63, 0.0  ;;  %4283 = vmatprep.subr.bf16.mxu1 %v6869_v55  ;;  %v6893_v55 = vld [vmem:[#allocation14 + $0xe4] ss:$8 sps:$4 sm:$0xff]  }
 0x5e0   :  { %v3390_v36 = vadd.f32 %v3389_v8, %v8708_v48  ;;  %v3543_v24 = vmax.f32 %v3386_v47, 0.0 }
 0x5e1   :  { %v3544_v46 = vmax.f32 %v3388_v54, 0.0 }
 0x5e2   :  { %v3545_v2 = vmax.f32 %v3390_v36, 0.0  ;;  %4284 = vmatpush1.bf16.msra.mxu1 %v6867_v52 }
 0x5e3   :  { %v3606_v19 = vpack.c.bf16 %v3544_v46, %v3542_v61  ;;  %v6872_v61 = vld [vmem:[#allocation14 + $0x74] ss:$8 sps:$4 sm:$0xff]  }
 0x5e4   :  { %v3607_v32 = vpack.c.bf16 %v3545_v2, %v3543_v24  ;;  %4285 = vmatprep.subr.bf16.mxu1 %v6872_v61 }
 0x5e6   :  { %3874 = vmatprep.mubr.bf16.mxu0 %v3607_v32 }
 0x5e7   :  { %v3393_v12 = vpop.f32.mrb[132].mxu1  ;;  %3875 = vmatmul.mubr.bf16.vlgmr.msra.gmra.mrb[128].mxu0 %v3606_v19  ;;  %v6870_v19 = vld [vmem:[#allocation14 + $0x70] ss:$8 sps:$4 sm:$0xff]  }
 0x5e8   :  { %v3394_v10 = vadd.f32 %v3393_v12, %v8705_v1  ;;  %v3395_v18 = vpop.f32.mrb[133].mxu1  ;;  %4286 = vmatpush1.bf16.msra.mxu1 %v6870_v19 }
 0x5e9   :  { %v3396_v6 = vadd.f32 %v3395_v18, %v8708_v48  ;;  %v3397_v30 = vpop.f32.mrb[134].mxu1 }
 0x5ea   :  { %v3398_v17 = vadd.f32 %v3397_v30, %v8705_v1  ;;  %v3399_v0 = vpop.f32.mrb[135].mxu1  ;;  %v3546_v11 = vmax.f32 %v3394_v10, 0.0  ;;  %v6875_v10 = vld [vmem:[#allocation14 + $0x84] ss:$8 sps:$4 sm:$0xff]  }
 0x5eb   :  { %v3400_v9 = vadd.f32 %v3399_v0, %v8708_v48  ;;  %v3547_v26 = vmax.f32 %v3396_v6, 0.0  ;;  %4287 = vmatprep.subr.bf16.mxu1 %v6875_v10 }
 0x5ec   :  { %v3548_v51 = vmax.f32 %v3398_v17, 0.0  ;;  %v6873_v17 = vld [vmem:[#allocation14 + $0x80] ss:$8 sps:$4 sm:$0xff]  }
 0x5ed   :  { %v3549_v7 = vmax.f32 %v3400_v9, 0.0  ;;  %4288 = vmatpush1.bf16.msra.mxu1 %v6873_v17 }
 0x5ee   :  { %v3608_v39 = vpack.c.bf16 %v3548_v51, %v3546_v11  ;;  %v6878_v11 = vld [vmem:[#allocation14 + $0x94] ss:$8 sps:$4 sm:$0xff]  }
 0x5ef   :  { %v3609_v45 = vpack.c.bf16 %v3549_v7, %v3547_v26  ;;  %v6876_v7 = vld [vmem:[#allocation14 + $0x90] ss:$8 sps:$4 sm:$0xff]   ;;  %4289 = vmatprep.subr.bf16.mxu1 %v6878_v11 }
 0x5f1   :  { %v3403_v44 = vpop.f32.mrb[136].mxu1  ;;  %3884 = vmatprep.mubr.bf16.mxu0 %v3609_v45  ;;  %4290 = vmatpush1.bf16.msra.mxu1 %v6876_v7 }
 0x5f2   :  { %v3404_v38 = vadd.f32 %v3403_v44, %v8705_v1  ;;  %v3405_v21 = vpop.f32.mrb[137].mxu1  ;;  %3885 = vmatmul.mubr.bf16.gmra.mrb[132].mxu0 %v3608_v39  ;;  %v6881_v39 = vld [vmem:[#allocation14 + $0xa4] ss:$8 sps:$4 sm:$0xff]  }
 0x5f3   :  { %v3406_v5 = vadd.f32 %v3405_v21, %v8708_v48  ;;  %v3407_v50 = vpop.f32.mrb[138].mxu1  ;;  %v6879_v21 = vld [vmem:[#allocation14 + $0xa0] ss:$8 sps:$4 sm:$0xff]   ;;  %4291 = vmatprep.subr.bf16.mxu1 %v6881_v39 }
 0x5f4   :  { %v3408_v15 = vadd.f32 %v3407_v50, %v8705_v1  ;;  %v3409_v42 = vpop.f32.mrb[139].mxu1  ;;  %v3550_v29 = vmax.f32 %v3404_v38, 0.0 }
 0x5f5   :  { %v3410_v56 = vadd.f32 %v3409_v42, %v8708_v48  ;;  %v3551_v53 = vmax.f32 %v3406_v5, 0.0  ;;  %4292 = vmatpush1.bf16.msra.mxu1 %v6879_v21 }
 0x5f6   :  { %v3552_v20 = vmax.f32 %v3408_v15, 0.0  ;;  %v6884_v15 = vld [vmem:[#allocation14 + $0xb4] ss:$8 sps:$4 sm:$0xff]  }
 0x5f7   :  { %v3553_v14 = vmax.f32 %v3410_v56, 0.0  ;;  %4293 = vmatprep.subr.bf16.mxu1 %v6884_v15  ;;  %v6894_v15 = vld [vmem:[#allocation14 + $0xf0] ss:$8 sps:$4 sm:$0xff]  }
 0x5f8   :  { %v3610_v4 = vpack.c.bf16 %v3552_v20, %v3550_v29 }
 0x5f9   :  { %v3611_v35 = vpack.c.bf16 %v3553_v14, %v3551_v53  ;;  %v6882_v14 = vld [vmem:[#allocation14 + $0xb0] ss:$8 sps:$4 sm:$0xff]  }
 0x5fa   :  { %4294 = vmatpush1.bf16.msra.mxu1 %v6882_v14 }
 0x5fb   :  { %3894 = vmatprep.mubr.bf16.mxu0 %v3611_v35  ;;  %4295 = vmatprep.subr.bf16.mxu1 %v6887_v28 }
 0x5fc   :  { %v3413_v31 = vpop.f32.mrb[140].mxu1  ;;  %3895 = vmatmul.mubr.bf16.gmra.mrb[136].mxu0 %v3610_v4 }
 0x5fd   :  { %v3414_v62 = vadd.f32 %v3413_v31, %v8705_v1  ;;  %v3415_v43 = vpop.f32.mrb[141].mxu1 }
 0x5fe   :  { %v3416_v41 = vadd.f32 %v3415_v43, %v8708_v48  ;;  %v3417_v57 = vpop.f32.mrb[142].mxu1  ;;  %4296 = vmatpush1.bf16.msra.mxu1 %v6885_v16 }
 0x5ff   :  { %v3418_v58 = vadd.f32 %v3417_v57, %v8705_v1  ;;  %v3419_v33 = vpop.f32.mrb[143].mxu1  ;;  %v3554_v47 = vmax.f32 %v3414_v62, 0.0  ;;  %4297 = vmatprep.subr.bf16.mxu1 %v6890_v37 }
 0x600   :  { %v3420_v63 = vadd.f32 %v3419_v33, %v8708_v48  ;;  %v3555_v54 = vmax.f32 %v3416_v41, 0.0  ;;  %v6888_v33 = vld [vmem:[#allocation14 + $0xd0] ss:$8 sps:$4 sm:$0xff]  }
 0x601   :  { %v3556_v23 = vmax.f32 %v3418_v58, 0.0 }
 0x602   :  { %v3557_v8 = vmax.f32 %v3420_v63, 0.0  ;;  %4298 = vmatpush1.bf16.msra.mxu1 %v6888_v33 }
 0x603   :  { %v3612_v36 = vpack.c.bf16 %v3556_v23, %v3554_v47  ;;  %4299 = vmatprep.subr.bf16.mxu1 %v6893_v55 }
 0x604   :  { %v3613_v59 = vpack.c.bf16 %v3557_v8, %v3555_v54 }
 0x606   :  { %v3423_v46 = vpop.f32.mrb[144].mxu1  ;;  %3904 = vmatprep.mubr.bf16.mxu0 %v3613_v59 }
 0x607   :  { %v3424_v24 = vadd.f32 %v3423_v46, %v8705_v1  ;;  %v3425_v2 = vpop.f32.mrb[145].mxu1  ;;  %3905 = vmatmul.mubr.bf16.gmra.mrb[140].mxu0 %v3612_v36  ;;  %v6891_v36 = vld [vmem:[#allocation14 + $0xe0] ss:$8 sps:$4 sm:$0xff]  }
 0x608   :  { %v3426_v32 = vadd.f32 %v3425_v2, %v8708_v48  ;;  %v3427_v12 = vpop.f32.mrb[146].mxu1  ;;  %4300 = vmatpush1.bf16.msra.mxu1 %v6891_v36 }
 0x609   :  { %v3428_v18 = vadd.f32 %v3427_v12, %v8705_v1  ;;  %v3429_v27 = vpop.f32.mrb[147].mxu1  ;;  %v3558_v6 = vmax.f32 %v3424_v24, 0.0 }
 0x60a   :  { %v3430_v49 = vadd.f32 %v3429_v27, %v8708_v48  ;;  %v3559_v0 = vmax.f32 %v3426_v32, 0.0 }
 0x60b   :  { %v3560_v30 = vmax.f32 %v3428_v18, 0.0 }
 0x60c   :  { %v3561_v9 = vmax.f32 %v3430_v49, 0.0 }
 0x60d   :  { %v3614_v51 = vpack.c.bf16 %v3560_v30, %v3558_v6 }
 0x60e   :  { %v3615_v26 = vpack.c.bf16 %v3561_v9, %v3559_v0 }
 0x610   :  { %3914 = vmatprep.mubr.bf16.mxu0 %v3615_v26 }
 0x611   :  { %v3433_v45 = vpop.f32.mrb[148].mxu1  ;;  %3915 = vmatmul.mubr.bf16.gmra.mrb[144].mxu0 %v3614_v51 }
 0x612   :  { %v3434_v40 = vadd.f32 %v3433_v45, %v8705_v1  ;;  %v3435_v13 = vpop.f32.mrb[149].mxu1 }
 0x613   :  { %v3436_v44 = vadd.f32 %v3435_v13, %v8708_v48  ;;  %v3437_v38 = vpop.f32.mrb[150].mxu1 }
 0x614   :  { %v3438_v5 = vadd.f32 %v3437_v38, %v8705_v1  ;;  %v3439_v50 = vpop.f32.mrb[151].mxu1  ;;  %v3562_v56 = vmax.f32 %v3434_v40, 0.0 }
 0x615   :  { %v3440_v42 = vadd.f32 %v3439_v50, %v8708_v48  ;;  %v3563_v20 = vmax.f32 %v3436_v44, 0.0 }
 0x616   :  { %v3564_v29 = vmax.f32 %v3438_v5, 0.0 }
 0x617   :  { %v3565_v53 = vmax.f32 %v3440_v42, 0.0  ;;  %v6896_v42 = vld [vmem:[#allocation14 + $0xf4] ss:$8 sps:$4 sm:$0xff]  }
 0x618   :  { %v3616_v4 = vpack.c.bf16 %v3564_v29, %v3562_v56  ;;  %4301 = vmatprep.subr.bf16.mxu1 %v6896_v42 }
 0x619   :  { %v3617_v25 = vpack.c.bf16 %v3565_v53, %v3563_v20  ;;  %4302 = vmatpush1.bf16.msra.mxu1 %v6894_v15 }
 0x61b   :  { %v3443_v35 = vpop.f32.mrb[152].mxu1  ;;  %3924 = vmatprep.mubr.bf16.mxu0 %v3617_v25 }
 0x61c   :  { %v3444_v60 = vadd.f32 %v3443_v35, %v8705_v1  ;;  %v3445_v31 = vpop.f32.mrb[153].mxu1  ;;  %3925 = vmatmul.mubr.bf16.gmra.mrb[148].mxu0 %v3616_v4 }
 0x61d   :  { %v3446_v62 = vadd.f32 %v3445_v31, %v8708_v48  ;;  %v3447_v43 = vpop.f32.mrb[154].mxu1 }
 0x61e   :  { %v3448_v41 = vadd.f32 %v3447_v43, %v8705_v1  ;;  %v3449_v57 = vpop.f32.mrb[155].mxu1  ;;  %v3566_v22 = vmax.f32 %v3444_v60, 0.0 }
 0x61f   :  { %v3450_v58 = vadd.f32 %v3449_v57, %v8708_v48  ;;  %v3567_v47 = vmax.f32 %v3446_v62, 0.0 }
 0x620   :  { %v3568_v63 = vmax.f32 %v3448_v41, 0.0 }
 0x621   :  { %v3569_v23 = vmax.f32 %v3450_v58, 0.0 }
 0x622   :  { %v3618_v54 = vpack.c.bf16 %v3568_v63, %v3566_v22 }
 0x623   :  { %v3619_v8 = vpack.c.bf16 %v3569_v23, %v3567_v47 }
 0x625   :  { %3934 = vmatprep.mubr.bf16.mxu0 %v3619_v8 }
 0x626   :  { %v3453_v52 = vpop.f32.mrb[156].mxu1  ;;  %3935 = vmatmul.mubr.bf16.gmra.mrb[152].mxu0 %v3618_v54 }
 0x627   :  { %v3454_v59 = vadd.f32 %v3453_v52, %v8705_v1  ;;  %v3455_v61 = vpop.f32.mrb[157].mxu1 }
 0x628   :  { %v3456_v46 = vadd.f32 %v3455_v61, %v8708_v48  ;;  %v3457_v24 = vpop.f32.mrb[158].mxu1 }
 0x629   :  { %v3458_v2 = vadd.f32 %v3457_v24, %v8705_v1  ;;  %v3459_v19 = vpop.f32.mrb[159].mxu1  ;;  %v3570_v12 = vmax.f32 %v3454_v59, 0.0 }
 0x62a   :  { %v3460_v32 = vadd.f32 %v3459_v19, %v8708_v48  ;;  %v3571_v18 = vmax.f32 %v3456_v46, 0.0 }
 0x62b   :  { %v3572_v10 = vmax.f32 %v3458_v2, 0.0 }
 0x62c   :  { %v3573_v27 = vmax.f32 %v3460_v32, 0.0 }
 0x62d   :  { %v3620_v49 = vpack.c.bf16 %v3572_v10, %v3570_v12 }
 0x62e   :  { %v3621_v6 = vpack.c.bf16 %v3573_v27, %v3571_v18 }
 0x630   :  { %v3463_v30 = vpop.f32.mrb[160].mxu1  ;;  %3944 = vmatprep.mubr.bf16.mxu0 %v3621_v6 }
 0x631   :  { %v3464_v17 = vadd.f32 %v3463_v30, %v8705_v1  ;;  %v3465_v0 = vpop.f32.mrb[161].mxu1  ;;  %3945 = vmatmul.mubr.bf16.gmra.mrb[156].mxu0 %v3620_v49 }
 0x632   :  { %v3466_v9 = vadd.f32 %v3465_v0, %v8708_v48  ;;  %v3467_v11 = vpop.f32.mrb[162].mxu1 }
 0x633   :  { %v3468_v51 = vadd.f32 %v3467_v11, %v8705_v1  ;;  %v3469_v26 = vpop.f32.mrb[163].mxu1  ;;  %v3574_v39 = vmax.f32 %v3464_v17, 0.0 }
 0x634   :  { %v3470_v7 = vadd.f32 %v3469_v26, %v8708_v48  ;;  %v3575_v40 = vmax.f32 %v3466_v9, 0.0 }
 0x635   :  { %v3576_v45 = vmax.f32 %v3468_v51, 0.0 }
 0x636   :  { %v3577_v13 = vmax.f32 %v3470_v7, 0.0 }
 0x637   :  { %v3622_v44 = vpack.c.bf16 %v3576_v45, %v3574_v39 }
 0x638   :  { %v3623_v38 = vpack.c.bf16 %v3577_v13, %v3575_v40 }
 0x63a   :  { %3954 = vmatprep.mubr.bf16.mxu0 %v3623_v38 }
 0x63b   :  { %v3473_v21 = vpop.f32.mrb[164].mxu1  ;;  %3955 = vmatmul.mubr.bf16.gmra.mrb[160].mxu0 %v3622_v44 }
 0x63c   :  { %v3474_v5 = vadd.f32 %v3473_v21, %v8705_v1  ;;  %v3475_v50 = vpop.f32.mrb[165].mxu1 }
 0x63d   :  { %v3476_v56 = vadd.f32 %v3475_v50, %v8708_v48  ;;  %v3477_v29 = vpop.f32.mrb[166].mxu1 }
 0x63e   :  { %v3478_v20 = vadd.f32 %v3477_v29, %v8705_v1  ;;  %v3479_v53 = vpop.f32.mrb[167].mxu1  ;;  %v3578_v4 = vmax.f32 %v3474_v5, 0.0 }
 0x63f   :  { %v3480_v14 = vadd.f32 %v3479_v53, %v8708_v48  ;;  %v3579_v25 = vmax.f32 %v3476_v56, 0.0 }
 0x640   :  { %v3580_v28 = vmax.f32 %v3478_v20, 0.0 }
 0x641   :  { %v3581_v35 = vmax.f32 %v3480_v14, 0.0 }
 0x642   :  { %v3624_v16 = vpack.c.bf16 %v3580_v28, %v3578_v4 }
 0x643   :  { %v3625_v60 = vpack.c.bf16 %v3581_v35, %v3579_v25 }
 0x645   :  { %v3483_v31 = vpop.f32.mrb[168].mxu1  ;;  %3964 = vmatprep.mubr.bf16.mxu0 %v3625_v60 }
 0x646   :  { %v3484_v37 = vadd.f32 %v3483_v31, %v8705_v1  ;;  %v3485_v62 = vpop.f32.mrb[169].mxu1  ;;  %3965 = vmatmul.mubr.bf16.gmra.mrb[164].mxu0 %v3624_v16 }
 0x647   :  { %v3486_v43 = vadd.f32 %v3485_v62, %v8708_v48  ;;  %v3487_v41 = vpop.f32.mrb[170].mxu1 }
 0x648   :  { %v3488_v57 = vadd.f32 %v3487_v41, %v8705_v1  ;;  %v3489_v58 = vpop.f32.mrb[171].mxu1  ;;  %v3582_v22 = vmax.f32 %v3484_v37, 0.0 }
 0x649   :  { %v3490_v33 = vadd.f32 %v3489_v58, %v8708_v48  ;;  %v3583_v55 = vmax.f32 %v3486_v43, 0.0 }
 0x64a   :  { %v3584_v63 = vmax.f32 %v3488_v57, 0.0 }
 0x64b   :  { %v3585_v47 = vmax.f32 %v3490_v33, 0.0 }
 0x64c   :  { %v3626_v23 = vpack.c.bf16 %v3584_v63, %v3582_v22 }
 0x64d   :  { %v3627_v54 = vpack.c.bf16 %v3585_v47, %v3583_v55 }
 0x64f   :  { %3974 = vmatprep.mubr.bf16.mxu0 %v3627_v54 }
 0x650   :  { %v3493_v8 = vpop.f32.mrb[172].mxu1  ;;  %3975 = vmatmul.mubr.bf16.gmra.mrb[168].mxu0 %v3626_v23 }
 0x651   :  { %v3494_v36 = vadd.f32 %v3493_v8, %v8705_v1  ;;  %v3495_v52 = vpop.f32.mrb[173].mxu1 }
 0x652   :  { %v3496_v59 = vadd.f32 %v3495_v52, %v8708_v48  ;;  %v3497_v61 = vpop.f32.mrb[174].mxu1 }
 0x653   :  { %v3498_v46 = vadd.f32 %v3497_v61, %v8705_v1  ;;  %v3499_v24 = vpop.f32.mrb[175].mxu1  ;;  %v3586_v19 = vmax.f32 %v3494_v36, 0.0 }
 0x654   :  { %v3500_v2 = vadd.f32 %v3499_v24, %v8708_v48  ;;  %v3587_v12 = vmax.f32 %v3496_v59, 0.0 }
 0x655   :  { %v3588_v32 = vmax.f32 %v3498_v46, 0.0 }
 0x656   :  { %v3589_v10 = vmax.f32 %v3500_v2, 0.0 }
 0x657   :  { %v3628_v18 = vpack.c.bf16 %v3588_v32, %v3586_v19 }
 0x658   :  { %v3629_v27 = vpack.c.bf16 %v3589_v10, %v3587_v12  ;;  %v3503_v49 = vpop.f32.mrb[176].mxu1  ;;  %v3670_v12 = vld [vmem:[%s9539_s12] sm:$0x3] }
 0x659   :  { %v3504_v6 = vadd.f32 %v3503_v49, %v8705_v1  ;;  %v3505_v30 = vpop.f32.mrb[177].mxu1  ;;  %v8778_v10 = vrot.slane %v3670_v12, %v7710_v3 }
 0x65a   :  { %v3506_v17 = vadd.f32 %v3505_v30, %v8708_v48  ;;  %v3507_v0 = vpop.f32.mrb[178].mxu1  ;;  %3984 = vmatprep.mubr.bf16.mxu0 %v3629_v27 }
 0x65b   :  { %v3508_v9 = vadd.f32 %v3507_v0, %v8705_v1  ;;  %v3509_v11 = vpop.f32.mrb[179].mxu1  ;;  %3985 = vmatmul.mubr.bf16.gmra.mrb[172].mxu0 %v3628_v18  ;;  %v3590_v26 = vmax.f32 %v3504_v6, 0.0  ;;  %v8781_v18 = vrot.slane %v3670_v12, %v9559_v34 }
 0x65c   :  { %v3510_v51 = vadd.f32 %v3509_v11, %v8708_v48  ;;  %v3591_v39 = vmax.f32 %v3506_v17, 0.0 }
 0x65d   :  { %v3592_v7 = vmax.f32 %v3508_v9, 0.0 }
 0x65e   :  { %v3593_v45 = vmax.f32 %v3510_v51, 0.0 }
 0x65f   :  { %v3630_v40 = vpack.c.bf16 %v3592_v7, %v3590_v26 }
 0x660   :  { %v3631_v13 = vpack.c.bf16 %v3593_v45, %v3591_v39  ;;  %v3513_v44 = vpop.f32.mrb[180].mxu1 }
 0x661   :  { %v3514_v38 = vadd.f32 %v3513_v44, %v8705_v1  ;;  %v3515_v21 = vpop.f32.mrb[181].mxu1 }
 0x662   :  { %v3516_v5 = vadd.f32 %v3515_v21, %v8708_v48  ;;  %v3517_v50 = vpop.f32.mrb[182].mxu1  ;;  %3994 = vmatprep.mubr.bf16.mxu0 %v3631_v13 }
 0x663   :  { %v3518_v15 = vadd.f32 %v3517_v50, %v8705_v1  ;;  %v3519_v42 = vpop.f32.mrb[183].mxu1  ;;  %3995 = vmatmul.mubr.bf16.gmra.mrb[176].mxu0 %v3630_v40  ;;  %v3594_v29 = vmax.f32 %v3514_v38, 0.0 }
 0x664   :  { %v3520_v56 = vadd.f32 %v3519_v42, %v8708_v48  ;;  %v3595_v53 = vmax.f32 %v3516_v5, 0.0 }
 0x665   :  { %v3596_v20 = vmax.f32 %v3518_v15, 0.0 }
 0x666   :  { %v3597_v14 = vmax.f32 %v3520_v56, 0.0 }
 0x667   :  { %v3632_v4 = vpack.c.bf16 %v3596_v20, %v3594_v29 }
 0x668   :  { %v3633_v28 = vpack.c.bf16 %v3597_v14, %v3595_v53  ;;  %v3523_v25 = vpop.f32.mrb[184].mxu1 }
 0x669   :  { %v3524_v35 = vadd.f32 %v3523_v25, %v8705_v1  ;;  %v3525_v16 = vpop.f32.mrb[185].mxu1  ;;  %v6898_v25 = vld [vmem:[#allocation16 + $0x8] ss:$12 sps:$4 sm:$0xff]  }
 0x66a   :  { %v3526_v60 = vadd.f32 %v3525_v16, %v8708_v48  ;;  %v3527_v31 = vpop.f32.mrb[186].mxu1  ;;  %4004 = vmatprep.mubr.bf16.mxu0 %v3633_v28  ;;  %v6897_v28 = vld [vmem:[#allocation16 + $0xc8] ss:$12 sps:$4 sm:$0xff]   ;;  %v6901_v16 = vld [vmem:[#allocation16 + $0x4] ss:$12 sps:$4 sm:$0xff]  }
 0x66b   :  { %v3528_v37 = vadd.f32 %v3527_v31, %v8705_v1  ;;  %v3529_v62 = vpop.f32.mrb[187].mxu1  ;;  %4005 = vmatmul.mubr.bf16.gmra.mrb[180].mxu0 %v3632_v4  ;;  %v3598_v41 = vmax.f32 %v3524_v35, 0.0  ;;  %v6899_v35 = vld [vmem:[#allocation16] ss:$12 sps:$4 sm:$0xff]   ;;  %6216 = vmatprep.subr.bf16.mxu1 %v6897_v28  ;;  %v6936_v28 = vld [vmem:[#allocation16 + $0xdc] ss:$12 sps:$4 sm:$0xff]  }
 0x66c   :  { %v3530_v43 = vadd.f32 %v3529_v62, %v8708_v48  ;;  %v3599_v58 = vmax.f32 %v3526_v60, 0.0  ;;  %v6904_v60 = vld [vmem:[#allocation16 + $0x1c] ss:$12 sps:$4 sm:$0xff]   ;;  %v6905_v31 = vld [vmem:[#allocation16 + $0xe0] ss:$12 sps:$4 sm:$0xff]   ;;  %5409 = vmatprep.subr.bf16.mxu0 %v6901_v16 }
 0x66d   :  { %v3600_v57 = vmax.f32 %v3528_v37, 0.0  ;;  %v6906_v37 = vld [vmem:[#allocation16 + $0x20] ss:$12 sps:$4 sm:$0xff]   ;;  %5410 = vmatpush1.bf16.msra.mxu0 %v6899_v35  ;;  %v6934_v16 = vld [vmem:[#allocation16 + $0xd8] ss:$12 sps:$4 sm:$0xff]  }
 0x66e   :  { %v3601_v33 = vmax.f32 %v3530_v43, 0.0  ;;  %v6902_v43 = vld [vmem:[#allocation16 + $0x18] ss:$12 sps:$4 sm:$0xff]   ;;  %5411 = vmatprep.subr.bf16.mxu0 %v6904_v60 }
 0x66f   :  { %v3634_v22 = vpack.c.bf16 %v3600_v57, %v3598_v41  ;;  %v6909_v57 = vld [vmem:[#allocation16 + $0x34] ss:$12 sps:$4 sm:$0xff]  }
 0x670   :  { %v3635_v63 = vpack.c.bf16 %v3601_v33, %v3599_v58  ;;  %v3533_v55 = vpop.f32.mrb[188].mxu1  ;;  %v6913_v58 = vld [vmem:[#allocation16 + $0xf8] ss:$12 sps:$4 sm:$0xff]  }
 0x671   :  { %v3534_v47 = vadd.f32 %v3533_v55, %v8705_v1  ;;  %v3535_v23 = vpop.f32.mrb[189].mxu1  ;;  %5412 = vmatpush1.bf16.msra.mxu0 %v6902_v43 }
 0x672   :  { %v3536_v54 = vadd.f32 %v3535_v23, %v8708_v48  ;;  %v3537_v8 = vpop.f32.mrb[190].mxu1  ;;  %4014 = vmatprep.mubr.bf16.mxu0 %v3635_v63  ;;  %5413 = vmatprep.subr.bf16.mxu0 %v6909_v57 }
 0x673   :  { %v3538_v36 = vadd.f32 %v3537_v8, %v8705_v1  ;;  %v3539_v52 = vpop.f32.mrb[191].mxu1  ;;  %4015 = vmatmul.mubr.bf16.gmra.mrb[184].mxu0 %v3634_v22  ;;  %v3602_v61 = vmax.f32 %v3534_v47, 0.0  ;;  %v6914_v47 = vld [vmem:[#allocation16 + $0x38] ss:$12 sps:$4 sm:$0xff]   ;;  %v6907_v8 = vld [vmem:[#allocation16 + $0x30] ss:$12 sps:$4 sm:$0xff]  }
 0x674   :  { %v3540_v59 = vadd.f32 %v3539_v52, %v8708_v48  ;;  %v3603_v24 = vmax.f32 %v3536_v54, 0.0  ;;  %v6912_v52 = vld [vmem:[#allocation16 + $0x4c] ss:$12 sps:$4 sm:$0xff]  }
 0x675   :  { %v3604_v46 = vmax.f32 %v3538_v36, 0.0  ;;  %5414 = vmatpush1.bf16.msra.mxu0 %v6907_v8 }
 0x676   :  { %v3605_v2 = vmax.f32 %v3540_v59, 0.0  ;;  %5415 = vmatprep.subr.bf16.mxu0 %v6912_v52 }
 0x677   :  { %v3636_v19 = vpack.c.bf16 %v3604_v46, %v3602_v61  ;;  %v6921_v61 = vld [vmem:[#allocation16 + $0x110] ss:$12 sps:$4 sm:$0xff]  }
 0x678   :  { %v3637_v32 = vpack.c.bf16 %v3605_v2, %v3603_v24  ;;  %v6922_v46 = vld [vmem:[#allocation16 + $0x50] ss:$12 sps:$4 sm:$0xff]   ;;  %v6910_v24 = vld [vmem:[#allocation16 + $0x48] ss:$12 sps:$4 sm:$0xff]  }
 0x679   :  { %v6929_v2 = vld [vmem:[#allocation16 + $0x128] ss:$12 sps:$4 sm:$0xff]   ;;  %5416 = vmatpush1.bf16.msra.mxu0 %v6910_v24 }
 0x67a   :  { %4024 = vmatprep.mubr.bf16.mxu0 %v3637_v32 }
 0x67b   :  { %4025 = vmatmul.mubr.bf16.gmra.mrb[188].mxu0 %v3636_v19  ;;  %v6917_v19 = vld [vmem:[#allocation16 + $0x64] ss:$12 sps:$4 sm:$0xff]  }
 0x67c   :  { %5417 = vmatprep.subr.bf16.mxu0 %v6917_v19 }
 0x6ba   :  { %v3876_v1 = vpop.f32.mrb[128].mxu0 }
 0x6bb   :  { %v3878_v48 = vpop.f32.mrb[129].mxu0  ;;  %v3877_v49 = vadd.f32 %v3876_v1, %v8778_v10  ;;  %v6930_v1 = vld [vmem:[#allocation16 + $0x68] ss:$12 sps:$4 sm:$0xff]  }
 0x6bc   :  { %v3880_v27 = vpop.f32.mrb[130].mxu0  ;;  %v3879_v17 = vadd.f32 %v3878_v48, %v8781_v18 }
 0x6bd   :  { %v3881_v6 = vadd.f32 %v3880_v27, %v8778_v10  ;;  %v3882_v30 = vpop.f32.mrb[131].mxu0  ;;  %v6915_v27 = vld [vmem:[#allocation16 + $0x60] ss:$12 sps:$4 sm:$0xff]  }
 0x6be   :  { %v3883_v0 = vadd.f32 %v3882_v30, %v8781_v18  ;;  %5418 = vmatpush1.bf16.msra.mxu0 %v6915_v27 }
 0x6bf   :  { %v4035_v9 = vpack.c.bf16 %v3881_v6, %v3877_v49  ;;  %v6937_v49 = vld [vmem:[#allocation16 + $0x140] ss:$12 sps:$4 sm:$0xff]  }
 0x6c0   :  { %v4036_v11 = vpack.c.bf16 %v3883_v0, %v3879_v17  ;;  %v6920_v0 = vld [vmem:[#allocation16 + $0x7c] ss:$12 sps:$4 sm:$0xff]  }
 0x6c1   :  { %5419 = vmatprep.subr.bf16.mxu0 %v6920_v0 }
 0x6c2   :  { %4303 = vmatprep.mubr.bf16.mxu1 %v4036_v11 }
 0x6c3   :  { %4304 = vmatmul.mubr.bf16.vlgmr.msra.gmra.mrb[192].mxu1 %v4035_v9 }
 0x6c4   :  { %6217 = vmatpush3.bf16.msra.mxu1 %v6898_v25 }
 0x6c5   :  { %v3886_v51 = vpop.f32.mrb[132].mxu0  ;;  %6218 = vmatprep.subr.bf16.mxu1 %v6905_v31  ;;  %v6941_v31 = vld [vmem:[#allocation16 + $0xf4] ss:$12 sps:$4 sm:$0xff]  }
 0x6c6   :  { %v3888_v26 = vpop.f32.mrb[133].mxu0  ;;  %v3887_v39 = vadd.f32 %v3886_v51, %v8778_v10 }
 0x6c7   :  { %v3890_v7 = vpop.f32.mrb[134].mxu0  ;;  %v3889_v13 = vadd.f32 %v3888_v26, %v8781_v18 }
 0x6c8   :  { %v3891_v45 = vadd.f32 %v3890_v7, %v8778_v10  ;;  %v3892_v40 = vpop.f32.mrb[135].mxu0  ;;  %6219 = vmatpush3.bf16.msra.mxu1 %v6906_v37  ;;  %v6918_v7 = vld [vmem:[#allocation16 + $0x78] ss:$12 sps:$4 sm:$0xff]  }
 0x6c9   :  { %v3893_v44 = vadd.f32 %v3892_v40, %v8781_v18  ;;  %6220 = vmatprep.subr.bf16.mxu1 %v6913_v58  ;;  %5420 = vmatpush1.bf16.msra.mxu0 %v6918_v7  ;;  %v6923_v40 = vld [vmem:[#allocation16 + $0x90] ss:$12 sps:$4 sm:$0xff]  }
 0x6ca   :  { %v4037_v38 = vpack.c.bf16 %v3891_v45, %v3887_v39  ;;  %v6938_v39 = vld [vmem:[#allocation16 + $0x80] ss:$12 sps:$4 sm:$0xff]  }
 0x6cb   :  { %v4038_v21 = vpack.c.bf16 %v3893_v44, %v3889_v13  ;;  %v6925_v45 = vld [vmem:[#allocation16 + $0x94] ss:$12 sps:$4 sm:$0xff]   ;;  %v6928_v44 = vld [vmem:[#allocation16 + $0xac] ss:$12 sps:$4 sm:$0xff]  }
 0x6cc   :  { %6221 = vmatpush3.bf16.msra.mxu1 %v6914_v47  ;;  %5421 = vmatprep.subr.bf16.mxu0 %v6925_v45 }
 0x6cd   :  { %4313 = vmatprep.mubr.bf16.mxu1 %v4038_v21  ;;  %6222 = vmatprep.subr.bf16.mxu1 %v6921_v61 }
 0x6ce   :  { %4314 = vmatmul.mubr.bf16.gmra.mrb[196].mxu1 %v4037_v38  ;;  %5422 = vmatpush1.bf16.msra.mxu0 %v6923_v40 }
 0x6cf   :  { %v3896_v5 = vpop.f32.mrb[136].mxu0  ;;  %5423 = vmatprep.subr.bf16.mxu0 %v6928_v44 }
 0x6d0   :  { %v3898_v50 = vpop.f32.mrb[137].mxu0  ;;  %v3897_v42 = vadd.f32 %v3896_v5, %v8778_v10  ;;  %6223 = vmatpush3.bf16.msra.mxu1 %v6922_v46 }
 0x6d1   :  { %v3900_v15 = vpop.f32.mrb[138].mxu0  ;;  %v3899_v20 = vadd.f32 %v3898_v50, %v8781_v18  ;;  %6224 = vmatprep.subr.bf16.mxu1 %v6929_v2 }
 0x6d2   :  { %v3901_v56 = vadd.f32 %v3900_v15, %v8778_v10  ;;  %v3902_v29 = vpop.f32.mrb[139].mxu0 }
 0x6d3   :  { %v3903_v53 = vadd.f32 %v3902_v29, %v8781_v18 }
 0x6d4   :  { %v4039_v14 = vpack.c.bf16 %v3901_v56, %v3897_v42  ;;  %6225 = vmatpush3.bf16.msra.mxu1 %v6930_v1  ;;  %v6926_v42 = vld [vmem:[#allocation16 + $0xa8] ss:$12 sps:$4 sm:$0xff]  }
 0x6d5   :  { %v4040_v4 = vpack.c.bf16 %v3903_v53, %v3899_v20  ;;  %6226 = vmatprep.subr.bf16.mxu1 %v6937_v49  ;;  %v6933_v20 = vld [vmem:[#allocation16 + $0xc4] ss:$12 sps:$4 sm:$0xff]   ;;  %5424 = vmatpush1.bf16.msra.mxu0 %v6926_v42 }
 0x6d6   :  { %5425 = vmatprep.subr.bf16.mxu0 %v6933_v20 }
 0x6d7   :  { %4323 = vmatprep.mubr.bf16.mxu1 %v4040_v4  ;;  %v6931_v4 = vld [vmem:[#allocation16 + $0xc0] ss:$12 sps:$4 sm:$0xff]  }
 0x6d8   :  { %4324 = vmatmul.mubr.bf16.gmra.mrb[200].mxu1 %v4039_v14 }
 0x6d9   :  { %6227 = vmatpush3.bf16.msra.mxu1 %v6938_v39  ;;  %5426 = vmatpush1.bf16.msra.mxu0 %v6931_v4 }
 0x6da   :  { %v3906_v62 = vpop.f32.mrb[140].mxu0  ;;  %5427 = vmatprep.subr.bf16.mxu0 %v6936_v28 }
 0x6db   :  { %v3908_v41 = vpop.f32.mrb[141].mxu0  ;;  %v3907_v22 = vadd.f32 %v3906_v62, %v8778_v10 }
 0x6dc   :  { %v3910_v33 = vpop.f32.mrb[142].mxu0  ;;  %v3909_v23 = vadd.f32 %v3908_v41, %v8781_v18 }
 0x6dd   :  { %v3911_v63 = vadd.f32 %v3910_v33, %v8778_v10  ;;  %v3912_v55 = vpop.f32.mrb[143].mxu0  ;;  %5428 = vmatpush1.bf16.msra.mxu0 %v6934_v16  ;;  %v6939_v33 = vld [vmem:[#allocation16 + $0xf0] ss:$12 sps:$4 sm:$0xff]  }
 0x6de   :  { %v3913_v54 = vadd.f32 %v3912_v55, %v8781_v18  ;;  %5429 = vmatprep.subr.bf16.mxu0 %v6941_v31  ;;  %v6942_v55 = vld [vmem:[#allocation16 + $0x108] ss:$12 sps:$4 sm:$0xff]  }
 0x6df   :  { %v4041_v36 = vpack.c.bf16 %v3911_v63, %v3907_v22  ;;  %v6944_v63 = vld [vmem:[#allocation16 + $0x10c] ss:$12 sps:$4 sm:$0xff]  }
 0x6e0   :  { %v4042_v59 = vpack.c.bf16 %v3913_v54, %v3909_v23 }
 0x6e1   :  { %5430 = vmatpush1.bf16.msra.mxu0 %v6939_v33 }
 0x6e2   :  { %4333 = vmatprep.mubr.bf16.mxu1 %v4042_v59  ;;  %5431 = vmatprep.subr.bf16.mxu0 %v6944_v63 }
 0x6e3   :  { %4334 = vmatmul.mubr.bf16.gmra.mrb[204].mxu1 %v4041_v36 }
 0x6e4   :  { %v3916_v32 = vpop.f32.mrb[144].mxu0 }
 0x6e5   :  { %v3918_v12 = vpop.f32.mrb[145].mxu0  ;;  %v3917_v6 = vadd.f32 %v3916_v32, %v8778_v10  ;;  %5432 = vmatpush1.bf16.msra.mxu0 %v6942_v55 }
 0x6e6   :  { %v3920_v48 = vpop.f32.mrb[146].mxu0  ;;  %v3919_v9 = vadd.f32 %v3918_v12, %v8781_v18 }
 0x6e7   :  { %v3921_v30 = vadd.f32 %v3920_v48, %v8778_v10  ;;  %v3922_v17 = vpop.f32.mrb[147].mxu0 }
 0x6e8   :  { %v3923_v11 = vadd.f32 %v3922_v17, %v8781_v18 }
 0x6e9   :  { %v4043_v51 = vpack.c.bf16 %v3921_v30, %v3917_v6 }
 0x6ea   :  { %v4044_v26 = vpack.c.bf16 %v3923_v11, %v3919_v9 }
 0x6ec   :  { %4343 = vmatprep.mubr.bf16.mxu1 %v4044_v26 }
 0x6ed   :  { %4344 = vmatmul.mubr.bf16.gmra.mrb[208].mxu1 %v4043_v51 }
 0x6ef   :  { %v3926_v13 = vpop.f32.mrb[148].mxu0 }
 0x6f0   :  { %v3928_v38 = vpop.f32.mrb[149].mxu0  ;;  %v3927_v5 = vadd.f32 %v3926_v13, %v8778_v10 }
 0x6f1   :  { %v3930_v21 = vpop.f32.mrb[150].mxu0  ;;  %v3929_v56 = vadd.f32 %v3928_v38, %v8781_v18 }
 0x6f2   :  { %v3931_v50 = vadd.f32 %v3930_v21, %v8778_v10  ;;  %v3932_v15 = vpop.f32.mrb[151].mxu0 }
 0x6f3   :  { %v3933_v29 = vadd.f32 %v3932_v15, %v8781_v18 }
 0x6f4   :  { %v4045_v53 = vpack.c.bf16 %v3931_v50, %v3927_v5 }
 0x6f5   :  { %v4046_v14 = vpack.c.bf16 %v3933_v29, %v3929_v56 }
 0x6f7   :  { %4353 = vmatprep.mubr.bf16.mxu1 %v4046_v14 }
 0x6f8   :  { %4354 = vmatmul.mubr.bf16.gmra.mrb[212].mxu1 %v4045_v53 }
 0x6f9   :  { %v3936_v25 = vpop.f32.mrb[152].mxu0 }
 0x6fa   :  { %v3938_v35 = vpop.f32.mrb[153].mxu0  ;;  %v3937_v37 = vadd.f32 %v3936_v25, %v8778_v10 }
 0x6fb   :  { %v3940_v60 = vpop.f32.mrb[154].mxu0  ;;  %v3939_v41 = vadd.f32 %v3938_v35, %v8781_v18 }
 0x6fc   :  { %v3941_v62 = vadd.f32 %v3940_v60, %v8778_v10  ;;  %v3942_v43 = vpop.f32.mrb[155].mxu0 }
 0x6fd   :  { %v3943_v57 = vadd.f32 %v3942_v43, %v8781_v18  ;;  %v6946_v43 = vld [vmem:[#allocation16 + $0x98] ss:$12 sps:$4 sm:$0xff]  }
 0x6fe   :  { %v4047_v58 = vpack.c.bf16 %v3941_v62, %v3937_v37  ;;  %v6945_v62 = vld [vmem:[#allocation16 + $0x158] ss:$12 sps:$4 sm:$0xff]  }
 0x6ff   :  { %v4048_v22 = vpack.c.bf16 %v3943_v57, %v3939_v41  ;;  %v6947_v57 = vld [vmem:[#allocation16 + $0x120] ss:$12 sps:$4 sm:$0xff]   ;;  %6228 = vmatprep.subr.bf16.mxu1 %v6945_v62 }
 0x700   :  { %6229 = vmatpush3.bf16.msra.mxu1 %v6946_v43 }
 0x701   :  { %4363 = vmatprep.mubr.bf16.mxu1 %v4048_v22  ;;  %v6952_v22 = vld [vmem:[#allocation16 + $0x13c] ss:$12 sps:$4 sm:$0xff]  }
 0x702   :  { %4364 = vmatmul.mubr.bf16.gmra.mrb[216].mxu1 %v4047_v58  ;;  %v6949_v58 = vld [vmem:[#allocation16 + $0x124] ss:$12 sps:$4 sm:$0xff]  }
 0x703   :  { %5433 = vmatprep.subr.bf16.mxu0 %v6949_v58 }
 0x704   :  { %v3946_v47 = vpop.f32.mrb[156].mxu0  ;;  %5434 = vmatpush1.bf16.msra.mxu0 %v6947_v57 }
 0x705   :  { %v3948_v23 = vpop.f32.mrb[157].mxu0  ;;  %v3947_v8 = vadd.f32 %v3946_v47, %v8778_v10  ;;  %5435 = vmatprep.subr.bf16.mxu0 %v6952_v22 }
 0x706   :  { %v3950_v54 = vpop.f32.mrb[158].mxu0  ;;  %v3949_v59 = vadd.f32 %v3948_v23, %v8781_v18 }
 0x707   :  { %v3951_v36 = vadd.f32 %v3950_v54, %v8778_v10  ;;  %v3952_v52 = vpop.f32.mrb[159].mxu0 }
 0x708   :  { %v3953_v61 = vadd.f32 %v3952_v52, %v8781_v18 }
 0x709   :  { %v4049_v46 = vpack.c.bf16 %v3951_v36, %v3947_v8  ;;  %v6950_v8 = vld [vmem:[#allocation16 + $0x138] ss:$12 sps:$4 sm:$0xff]  }
 0x70a   :  { %v4050_v24 = vpack.c.bf16 %v3953_v61, %v3949_v59  ;;  %v6953_v59 = vld [vmem:[#allocation16 + $0x170] ss:$12 sps:$4 sm:$0xff]   ;;  %5436 = vmatpush1.bf16.msra.mxu0 %v6950_v8 }
 0x70b   :  { %v6954_v61 = vld [vmem:[#allocation16 + $0xb0] ss:$12 sps:$4 sm:$0xff]   ;;  %6230 = vmatprep.subr.bf16.mxu1 %v6953_v59 }
 0x70c   :  { %4373 = vmatprep.mubr.bf16.mxu1 %v4050_v24  ;;  %v6955_v24 = vld [vmem:[#allocation16 + $0x150] ss:$12 sps:$4 sm:$0xff]   ;;  %6231 = vmatpush3.bf16.msra.mxu1 %v6954_v61 }
 0x70d   :  { %4374 = vmatmul.mubr.bf16.gmra.mrb[220].mxu1 %v4049_v46 }
 0x70e   :  { %v3956_v2 = vpop.f32.mrb[160].mxu0 }
 0x70f   :  { %v3958_v19 = vpop.f32.mrb[161].mxu0  ;;  %v3957_v12 = vadd.f32 %v3956_v2, %v8778_v10  ;;  %v6957_v2 = vld [vmem:[#allocation16 + $0x154] ss:$12 sps:$4 sm:$0xff]  }
 0x710   :  { %v3960_v32 = vpop.f32.mrb[162].mxu0  ;;  %v3959_v27 = vadd.f32 %v3958_v19, %v8781_v18  ;;  %5437 = vmatprep.subr.bf16.mxu0 %v6957_v2 }
 0x711   :  { %v3961_v1 = vadd.f32 %v3960_v32, %v8778_v10  ;;  %v3962_v48 = vpop.f32.mrb[163].mxu0  ;;  %5438 = vmatpush1.bf16.msra.mxu0 %v6955_v24 }
 0x712   :  { %v3963_v49 = vadd.f32 %v3962_v48, %v8781_v18 }
 0x713   :  { %v4051_v6 = vpack.c.bf16 %v3961_v1, %v3957_v12 }
 0x714   :  { %v4052_v30 = vpack.c.bf16 %v3963_v49, %v3959_v27 }
 0x716   :  { %4383 = vmatprep.mubr.bf16.mxu1 %v4052_v30 }
 0x717   :  { %4384 = vmatmul.mubr.bf16.gmra.mrb[224].mxu1 %v4051_v6 }
 0x719   :  { %v3966_v17 = vpop.f32.mrb[164].mxu0 }
 0x71a   :  { %v3968_v0 = vpop.f32.mrb[165].mxu0  ;;  %v3967_v11 = vadd.f32 %v3966_v17, %v8778_v10 }
 0x71b   :  { %v3970_v9 = vpop.f32.mrb[166].mxu0  ;;  %v3969_v7 = vadd.f32 %v3968_v0, %v8781_v18 }
 0x71c   :  { %v3971_v51 = vadd.f32 %v3970_v9, %v8778_v10  ;;  %v3972_v26 = vpop.f32.mrb[167].mxu0  ;;  %v6958_v9 = vld [vmem:[#allocation16 + $0x168] ss:$12 sps:$4 sm:$0xff]  }
 0x71d   :  { %v3973_v39 = vadd.f32 %v3972_v26, %v8781_v18 }
 0x71e   :  { %v4053_v45 = vpack.c.bf16 %v3971_v51, %v3967_v11  ;;  %v6960_v11 = vld [vmem:[#allocation16 + $0x16c] ss:$12 sps:$4 sm:$0xff]  }
 0x71f   :  { %v4054_v40 = vpack.c.bf16 %v3973_v39, %v3969_v7  ;;  %5439 = vmatprep.subr.bf16.mxu0 %v6960_v11 }
 0x720   :  { %5440 = vmatpush1.bf16.msra.mxu0 %v6958_v9 }
 0x721   :  { %4393 = vmatprep.mubr.bf16.mxu1 %v4054_v40 }
 0x722   :  { %4394 = vmatmul.mubr.bf16.gmra.mrb[228].mxu1 %v4053_v45 }
 0x723   :  { %v3976_v13 = vpop.f32.mrb[168].mxu0 }
 0x724   :  { %v3978_v44 = vpop.f32.mrb[169].mxu0  ;;  %v3977_v21 = vadd.f32 %v3976_v13, %v8778_v10 }
 0x725   :  { %v3980_v38 = vpop.f32.mrb[170].mxu0  ;;  %v3979_v15 = vadd.f32 %v3978_v44, %v8781_v18 }
 0x726   :  { %v3981_v5 = vadd.f32 %v3980_v38, %v8778_v10  ;;  %v3982_v50 = vpop.f32.mrb[171].mxu0 }
 0x727   :  { %v3983_v42 = vadd.f32 %v3982_v50, %v8781_v18 }
 0x728   :  { %v4055_v56 = vpack.c.bf16 %v3981_v5, %v3977_v21 }
 0x729   :  { %v4056_v29 = vpack.c.bf16 %v3983_v42, %v3979_v15 }
 0x72b   :  { %4403 = vmatprep.mubr.bf16.mxu1 %v4056_v29 }
 0x72c   :  { %4404 = vmatmul.mubr.bf16.gmra.mrb[232].mxu1 %v4055_v56 }
 0x72e   :  { %v3986_v20 = vpop.f32.mrb[172].mxu0 }
 0x72f   :  { %v3988_v53 = vpop.f32.mrb[173].mxu0  ;;  %v3987_v4 = vadd.f32 %v3986_v20, %v8778_v10 }
 0x730   :  { %v3990_v14 = vpop.f32.mrb[174].mxu0  ;;  %v3989_v35 = vadd.f32 %v3988_v53, %v8781_v18 }
 0x731   :  { %v3991_v28 = vadd.f32 %v3990_v14, %v8778_v10  ;;  %v3992_v25 = vpop.f32.mrb[175].mxu0  ;;  %v4099_v14 = vld [vmem:[%s9541_s14] sm:$0x3] }
 0x732   :  { %v3993_v16 = vadd.f32 %v3992_v25, %v8781_v18 }
 0x733   :  { %v4057_v60 = vpack.c.bf16 %v3991_v28, %v3987_v4  ;;  %v8851_v4 = vrot.slane %v4099_v14, %v7710_v3  ;;  %v8854_v28 = vrot.slane %v4099_v14, %v9559_v34 }
 0x734   :  { %v4058_v31 = vpack.c.bf16 %v3993_v16, %v3989_v35 }
 0x736   :  { %v3996_v37 = vpop.f32.mrb[176].mxu0  ;;  %4413 = vmatprep.mubr.bf16.mxu1 %v4058_v31 }
 0x737   :  { %v3998_v41 = vpop.f32.mrb[177].mxu0  ;;  %4414 = vmatmul.mubr.bf16.gmra.mrb[236].mxu1 %v4057_v60  ;;  %v3997_v63 = vadd.f32 %v3996_v37, %v8778_v10 }
 0x738   :  { %v4000_v33 = vpop.f32.mrb[178].mxu0  ;;  %v3999_v23 = vadd.f32 %v3998_v41, %v8781_v18 }
 0x739   :  { %v4001_v55 = vadd.f32 %v4000_v33, %v8778_v10  ;;  %v4002_v47 = vpop.f32.mrb[179].mxu0 }
 0x73a   :  { %v4003_v54 = vadd.f32 %v4002_v47, %v8781_v18 }
 0x73b   :  { %v4059_v36 = vpack.c.bf16 %v4001_v55, %v3997_v63 }
 0x73c   :  { %v4060_v52 = vpack.c.bf16 %v4003_v54, %v3999_v23 }
 0x73e   :  { %v4006_v46 = vpop.f32.mrb[180].mxu0  ;;  %4423 = vmatprep.mubr.bf16.mxu1 %v4060_v52 }
 0x73f   :  { %v4008_v19 = vpop.f32.mrb[181].mxu0  ;;  %4424 = vmatmul.mubr.bf16.gmra.mrb[240].mxu1 %v4059_v36  ;;  %v4007_v12 = vadd.f32 %v4006_v46, %v8778_v10 }
 0x740   :  { %v4010_v32 = vpop.f32.mrb[182].mxu0  ;;  %v4009_v27 = vadd.f32 %v4008_v19, %v8781_v18 }
 0x741   :  { %v4011_v1 = vadd.f32 %v4010_v32, %v8778_v10  ;;  %v4012_v48 = vpop.f32.mrb[183].mxu0 }
 0x742   :  { %v4013_v49 = vadd.f32 %v4012_v48, %v8781_v18 }
 0x743   :  { %v4061_v6 = vpack.c.bf16 %v4011_v1, %v4007_v12 }
 0x744   :  { %v4062_v30 = vpack.c.bf16 %v4013_v49, %v4009_v27 }
 0x746   :  { %v4016_v17 = vpop.f32.mrb[184].mxu0  ;;  %4433 = vmatprep.mubr.bf16.mxu1 %v4062_v30 }
 0x747   :  { %v4018_v0 = vpop.f32.mrb[185].mxu0  ;;  %4434 = vmatmul.mubr.bf16.gmra.mrb[244].mxu1 %v4061_v6  ;;  %v4017_v26 = vadd.f32 %v4016_v17, %v8778_v10 }
 0x748   :  { %v4020_v51 = vpop.f32.mrb[186].mxu0  ;;  %v4019_v45 = vadd.f32 %v4018_v0, %v8781_v18 }
 0x749   :  { %v4021_v7 = vadd.f32 %v4020_v51, %v8778_v10  ;;  %v4022_v39 = vpop.f32.mrb[187].mxu0 }
 0x74a   :  { %v4023_v40 = vadd.f32 %v4022_v39, %v8781_v18 }
 0x74b   :  { %v4063_v13 = vpack.c.bf16 %v4021_v7, %v4017_v26 }
 0x74c   :  { %v4064_v44 = vpack.c.bf16 %v4023_v40, %v4019_v45 }
 0x74e   :  { %v4026_v38 = vpop.f32.mrb[188].mxu0  ;;  %4443 = vmatprep.mubr.bf16.mxu1 %v4064_v44 }
 0x74f   :  { %v4028_v21 = vpop.f32.mrb[189].mxu0  ;;  %4444 = vmatmul.mubr.bf16.gmra.mrb[248].mxu1 %v4063_v13  ;;  %v4027_v50 = vadd.f32 %v4026_v38, %v8778_v10 }
 0x750   :  { %v4030_v5 = vpop.f32.mrb[190].mxu0  ;;  %v4029_v56 = vadd.f32 %v4028_v21, %v8781_v18 }
 0x751   :  { %v4031_v15 = vadd.f32 %v4030_v5, %v8778_v10  ;;  %v4032_v42 = vpop.f32.mrb[191].mxu0 }
 0x752   :  { %v4033_v29 = vadd.f32 %v4032_v42, %v8781_v18 }
 0x753   :  { %v4065_v20 = vpack.c.bf16 %v4031_v15, %v4027_v50 }
 0x754   :  { %v4066_v53 = vpack.c.bf16 %v4033_v29, %v4029_v56 }
 0x756   :  { %4453 = vmatprep.mubr.bf16.mxu1 %v4066_v53 }
 0x757   :  { %4454 = vmatmul.mubr.bf16.gmra.mrb[252].mxu1 %v4065_v20 }
 0x796   :  { %v4305_v10 = vpop.f32.mrb[192].mxu1 }
 0x797   :  { %v8857_v25 = vadd.f32 %v4305_v10, %v8851_v4  ;;  %v4307_v35 = vpop.f32.mrb[193].mxu1 }
 0x798   :  { %v8860_v18 = vadd.f32 %v4307_v35, %v8854_v28  ;;  %v4309_v16 = vpop.f32.mrb[194].mxu1 }
 0x799   :  { %v4464_v60 = vmul.f32 %v8857_v25, %v8857_v25  ;;  %v8865_v31 = vadd.f32 %v4309_v16, %v8851_v4  ;;  %v4311_v37 = vpop.f32.mrb[195].mxu1 }
 0x79a   :  { %v4465_v62 = vmul.f32 %v8860_v18, %v8860_v18  ;;  %v8870_v43 = vadd.f32 %v4311_v37, %v8854_v28 }
 0x79b   :  { %v4528_v41 = vmul.f32 %v4464_v60, %v8857_v25  ;;  %v4466_v57 = vmul.f32 %v8865_v31, %v8865_v31 }
 0x79c   :  { %v4529_v58 = vmul.f32 %v4465_v62, %v8860_v18  ;;  %v4467_v33 = vmul.f32 %v8870_v43, %v8870_v43 }
 0x79d   :  { %v4592_v22 = vmul.f32 0.044715, %v4528_v41  ;;  %v4530_v63 = vmul.f32 %v4466_v57, %v8865_v31 }
 0x79e   :  { %v4593_v55 = vmul.f32 0.044715, %v4529_v58  ;;  %v4531_v47 = vmul.f32 %v4467_v33, %v8870_v43 }
 0x79f   :  { %v4656_v23 = vadd.f32 %v4592_v22, %v8857_v25  ;;  %v4594_v54 = vmul.f32 0.044715, %v4530_v63 }
 0x7a0   :  { %v4657_v8 = vadd.f32 %v4593_v55, %v8860_v18  ;;  %v4595_v36 = vmul.f32 0.044715, %v4531_v47 }
 0x7a1   :  { %v4720_v52 = vmul.f32 0.7978846, %v4656_v23  ;;  %v4658_v59 = vadd.f32 %v4594_v54, %v8865_v31  ;;  %v4315_v61 = vpop.f32.mrb[196].mxu1 }
 0x7a2   :  { %v4721_v46 = vmul.f32 0.7978846, %v4657_v8  ;;  %v4659_v24 = vadd.f32 %v4595_v36, %v8870_v43  ;;  %v8885_v2 = vadd.f32 %v4315_v61, %v8851_v4  ;;  %v4317_v19 = vpop.f32.mrb[197].mxu1 }
 0x7a3   :  { %7089 = vtanh.f32 %v4720_v52  ;;  %v4722_v32 = vmul.f32 0.7978846, %v4658_v59  ;;  %v8888_v12 = vadd.f32 %v4317_v19, %v8854_v28  ;;  %v4319_v1 = vpop.f32.mrb[198].mxu1 }
 0x7a4   :  { %7091 = vtanh.f32 %v4721_v46  ;;  %v4723_v48 = vmul.f32 0.7978846, %v4659_v24  ;;  %v4468_v27 = vmul.f32 %v8885_v2, %v8885_v2  ;;  %v8893_v49 = vadd.f32 %v4319_v1, %v8851_v4  ;;  %v4321_v6 = vpop.f32.mrb[199].mxu1 }
 0x7a5   :  { %7093 = vtanh.f32 %v4722_v32  ;;  %v4469_v30 = vmul.f32 %v8888_v12, %v8888_v12  ;;  %v8898_v17 = vadd.f32 %v4321_v6, %v8854_v28 }
 0x7a6   :  { %7095 = vtanh.f32 %v4723_v48  ;;  %v4532_v0 = vmul.f32 %v4468_v27, %v8885_v2  ;;  %v4470_v9 = vmul.f32 %v8893_v49, %v8893_v49 }
 0x7a7   :  { %v4533_v11 = vmul.f32 %v4469_v30, %v8888_v12  ;;  %v4471_v51 = vmul.f32 %v8898_v17, %v8898_v17 }
 0x7a8   :  { %v4596_v26 = vmul.f32 0.044715, %v4532_v0  ;;  %v4534_v7 = vmul.f32 %v4470_v9, %v8893_v49 }
 0x7a9   :  { %v4597_v39 = vmul.f32 0.044715, %v4533_v11  ;;  %v4535_v45 = vmul.f32 %v4471_v51, %v8898_v17 }
 0x7aa   :  { %v4660_v40 = vadd.f32 %v4596_v26, %v8885_v2  ;;  %v4598_v13 = vmul.f32 0.044715, %v4534_v7 }
 0x7ab   :  { %v4661_v44 = vadd.f32 %v4597_v39, %v8888_v12  ;;  %v4599_v38 = vmul.f32 0.044715, %v4535_v45  ;;  %v4325_v21 = vpop.f32.mrb[200].mxu1 }
 0x7ac   :  { %v4724_v5 = vmul.f32 0.7978846, %v4660_v40  ;;  %v4662_v50 = vadd.f32 %v4598_v13, %v8893_v49  ;;  %v8912_v15 = vadd.f32 %v4325_v21, %v8851_v4  ;;  %v4327_v42 = vpop.f32.mrb[201].mxu1 }
 0x7ad   :  { %v7090_v56 = vpop.eup %7089  ;;  %v4725_v29 = vmul.f32 0.7978846, %v4661_v44  ;;  %v4663_v20 = vadd.f32 %v4599_v38, %v8898_v17  ;;  %v8916_v53 = vadd.f32 %v4327_v42, %v8854_v28  ;;  %v4329_v14 = vpop.f32.mrb[202].mxu1 }
 0x7ae   :  { %v7092_v10 = vpop.eup %7091  ;;  %v4848_v35 = vadd.f32 1.0, %v7090_v56  ;;  %v4726_v16 = vmul.f32 0.7978846, %v4662_v50  ;;  %v4472_v60 = vmul.f32 %v8912_v15, %v8912_v15  ;;  %v4331_v37 = vpop.f32.mrb[203].mxu1  ;;  %v8923_v58 = vadd.f32 %v4329_v14, %v8851_v4 }
 0x7af   :  { %v7094_v62 = vpop.eup %7093  ;;  %7097 = vtanh.f32 %v4725_v29  ;;  %v4727_v41 = vmul.f32 0.7978846, %v4663_v20  ;;  %v4473_v57 = vmul.f32 %v8916_v53, %v8916_v53  ;;  %v8930_v54 = vadd.f32 %v4331_v37, %v8854_v28 }
 0x7b0   :  { %v7096_v33 = vpop.eup %7095  ;;  %v4912_v22 = vmul.f32 0.5, %v4848_v35  ;;  %v4850_v63 = vadd.f32 1.0, %v7094_v62  ;;  %7099 = vtanh.f32 %v4724_v5  ;;  %v4536_v55 = vmul.f32 %v4472_v60, %v8912_v15 }
 0x7b1   :  { %7101 = vtanh.f32 %v4727_v41  ;;  %v4537_v47 = vmul.f32 %v4473_v57, %v8916_v53  ;;  %v4474_v23 = vmul.f32 %v8923_v58, %v8923_v58  ;;  %v4849_v52 = vadd.f32 1.0, %v7092_v10 }
 0x7b2   :  { %v4914_v8 = vmul.f32 0.5, %v4850_v63  ;;  %7103 = vtanh.f32 %v4726_v16  ;;  %v4600_v36 = vmul.f32 0.044715, %v4536_v55  ;;  %v4475_v46 = vmul.f32 %v8930_v54, %v8930_v54 }
 0x7b3   :  { %v4601_v59 = vmul.f32 0.044715, %v4537_v47  ;;  %v4538_v61 = vmul.f32 %v4474_v23, %v8923_v58  ;;  %v4851_v24 = vadd.f32 1.0, %v7096_v33  ;;  %v4976_v19 = vmul.f32 %v4912_v22, %v8857_v25 }
 0x7b4   :  { %v4978_v32 = vmul.f32 %v4914_v8, %v8865_v31  ;;  %v4664_v1 = vadd.f32 %v4600_v36, %v8912_v15  ;;  %v4913_v48 = vmul.f32 0.5, %v4849_v52  ;;  %v4539_v30 = vmul.f32 %v4475_v46, %v8930_v54 }
 0x7b5   :  { %v4665_v27 = vadd.f32 %v4601_v59, %v8916_v53  ;;  %v4602_v6 = vmul.f32 0.044715, %v4538_v61  ;;  %v4915_v0 = vmul.f32 0.5, %v4851_v24 }
 0x7b6   :  { %v5040_v9 = vpack.c.bf16 %v4978_v32, %v4976_v19  ;;  %v4728_v11 = vmul.f32 0.7978846, %v4664_v1  ;;  %v4335_v51 = vpop.f32.mrb[204].mxu1  ;;  %v4603_v39 = vmul.f32 0.044715, %v4539_v30  ;;  %v4977_v13 = vmul.f32 %v4913_v48, %v8860_v18 }
 0x7b7   :  { %v4729_v26 = vmul.f32 0.7978846, %v4665_v27  ;;  %v4666_v7 = vadd.f32 %v4602_v6, %v8923_v58  ;;  %v8942_v25 = vadd.f32 %v4335_v51, %v8851_v4  ;;  %v4337_v31 = vpop.f32.mrb[205].mxu1  ;;  %v4979_v44 = vmul.f32 %v4915_v0, %v8870_v43 }
 0x7b8   :  { %7105 = vtanh.f32 %v4728_v11  ;;  %v8945_v45 = vadd.f32 %v4337_v31, %v8854_v28  ;;  %v4339_v40 = vpop.f32.mrb[206].mxu1  ;;  %v4667_v5 = vadd.f32 %v4603_v39, %v8930_v54 }
 0x7b9   :  { %v7098_v38 = vpop.eup %7097  ;;  %7107 = vtanh.f32 %v4729_v26  ;;  %v4730_v21 = vmul.f32 0.7978846, %v4666_v7  ;;  %v4476_v50 = vmul.f32 %v8942_v25, %v8942_v25  ;;  %v4341_v42 = vpop.f32.mrb[207].mxu1  ;;  %v8955_v20 = vadd.f32 %v4339_v40, %v8851_v4 }
 0x7ba   :  { %v7100_v56 = vpop.eup %7099  ;;  %v4477_v29 = vmul.f32 %v8945_v45, %v8945_v45  ;;  %v8958_v18 = vadd.f32 %v4341_v42, %v8854_v28  ;;  %v5041_v43 = vpack.c.bf16 %v4979_v44, %v4977_v13  ;;  %v4731_v10 = vmul.f32 0.7978846, %v4667_v5 }
 0x7bb   :  { %v7102_v14 = vpop.eup %7101  ;;  %7109 = vtanh.f32 %v4730_v21  ;;  %v4540_v35 = vmul.f32 %v4476_v50, %v8942_v25  ;;  %v4853_v16 = vadd.f32 1.0, %v7098_v38  ;;  %v4478_v62 = vmul.f32 %v8955_v20, %v8955_v20 }
 0x7bc   :  { %v7104_v60 = vpop.eup %7103  ;;  %v4541_v37 = vmul.f32 %v4477_v29, %v8945_v45  ;;  %v4479_v41 = vmul.f32 %v8958_v18, %v8958_v18  ;;  %5441 = vmatprep.mubr.bf16.mxu0 %v5041_v43  ;;  %5634 = vmatprep.mubr.bf16.mxu1 %v5041_v43  ;;  %v4855_v57 = vadd.f32 1.0, %v7102_v14  ;;  %7111 = vtanh.f32 %v4731_v10 }
 0x7bd   :  { %v4604_v33 = vmul.f32 0.044715, %v4540_v35  ;;  %5442 = vmatmul.mubr.bf16.vlgmr.msra.gmra.mrb[192].mxu0 %v5040_v9  ;;  %5635 = vmatmul.mubr.bf16.vlgmr.msra.gmra.mrb[0].mxu1 %v5040_v9  ;;  %v4917_v22 = vmul.f32 0.5, %v4853_v16  ;;  %v4852_v63 = vadd.f32 1.0, %v7100_v56  ;;  %v4542_v47 = vmul.f32 %v4478_v62, %v8955_v20 }
 0x7be   :  { %v4605_v55 = vmul.f32 0.044715, %v4541_v37  ;;  %v4543_v23 = vmul.f32 %v4479_v41, %v8958_v18  ;;  %v4919_v8 = vmul.f32 0.5, %v4855_v57  ;;  %v4854_v59 = vadd.f32 1.0, %v7104_v60 }
 0x7bf   :  { %v4668_v36 = vadd.f32 %v4604_v33, %v8942_v25  ;;  %v4981_v52 = vmul.f32 %v4917_v22, %v8888_v12  ;;  %v4916_v61 = vmul.f32 0.5, %v4852_v63  ;;  %v4606_v24 = vmul.f32 0.044715, %v4542_v47 }
 0x7c0   :  { %v4669_v46 = vadd.f32 %v4605_v55, %v8945_v45  ;;  %v4607_v19 = vmul.f32 0.044715, %v4543_v23  ;;  %v4345_v32 = vpop.f32.mrb[208].mxu1  ;;  %v4983_v1 = vmul.f32 %v4919_v8, %v8898_v17  ;;  %v4918_v30 = vmul.f32 0.5, %v4854_v59 }
 0x7c1   :  { %v4732_v48 = vmul.f32 0.7978846, %v4668_v36  ;;  %v8973_v27 = vadd.f32 %v4345_v32, %v8851_v4  ;;  %v4347_v6 = vpop.f32.mrb[209].mxu1  ;;  %v4980_v0 = vmul.f32 %v4916_v61, %v8885_v2  ;;  %v4670_v12 = vadd.f32 %v4606_v24, %v8955_v20 }
 0x7c2   :  { %v7106_v9 = vpop.eup %7105  ;;  %v4733_v11 = vmul.f32 0.7978846, %v4669_v46  ;;  %v4671_v51 = vadd.f32 %v4607_v19, %v8958_v18  ;;  %v8979_v26 = vadd.f32 %v4347_v6, %v8854_v28  ;;  %v4349_v7 = vpop.f32.mrb[210].mxu1  ;;  %v5043_v2 = vpack.c.bf16 %v4983_v1, %v4981_v52 }
 0x7c3   :  { %v7108_v39 = vpop.eup %7107  ;;  %7113 = vtanh.f32 %v4732_v48  ;;  %v4480_v17 = vmul.f32 %v8973_v27, %v8973_v27  ;;  %v8984_v31 = vadd.f32 %v4349_v7, %v8851_v4  ;;  %v4351_v40 = vpop.f32.mrb[211].mxu1  ;;  %v4734_v13 = vmul.f32 0.7978846, %v4670_v12 }
 0x7c4   :  { %7115 = vtanh.f32 %v4733_v11  ;;  %v4735_v44 = vmul.f32 0.7978846, %v4671_v51  ;;  %v4481_v38 = vmul.f32 %v8979_v26, %v8979_v26  ;;  %v8992_v42 = vadd.f32 %v4351_v40, %v8854_v28  ;;  %5451 = vmatprep.mubr.bf16.mxu0 %v5043_v2  ;;  %5642 = vmatprep.mubr.bf16.mxu1 %v5043_v2 }
 0x7c5   :  { %v7110_v21 = vpop.eup %7109  ;;  %v4544_v5 = vmul.f32 %v4480_v17, %v8973_v27  ;;  %v4482_v50 = vmul.f32 %v8984_v31, %v8984_v31  ;;  %v4857_v56 = vadd.f32 1.0, %v7108_v39  ;;  %7117 = vtanh.f32 %v4734_v13 }
 0x7c6   :  { %v4545_v29 = vmul.f32 %v4481_v38, %v8979_v26  ;;  %v4982_v43 = vmul.f32 %v4918_v30, %v8893_v49  ;;  %v4856_v14 = vadd.f32 1.0, %v7106_v9  ;;  %v7112_v10 = vpop.eup %7111  ;;  %7119 = vtanh.f32 %v4735_v44 }
 0x7c7   :  { %v4608_v35 = vmul.f32 0.044715, %v4544_v5  ;;  %v4546_v16 = vmul.f32 %v4482_v50, %v8984_v31  ;;  %v4483_v60 = vmul.f32 %v8992_v42, %v8992_v42  ;;  %v4859_v41 = vadd.f32 1.0, %v7112_v10 }
 0x7c8   :  { %v4609_v37 = vmul.f32 0.044715, %v4545_v29  ;;  %v5042_v62 = vpack.c.bf16 %v4982_v43, %v4980_v0  ;;  %v4921_v57 = vmul.f32 0.5, %v4857_v56  ;;  %v4858_v55 = vadd.f32 1.0, %v7110_v21 }
 0x7c9   :  { %v4672_v33 = vadd.f32 %v4608_v35, %v8973_v27  ;;  %v4610_v22 = vmul.f32 0.044715, %v4546_v16  ;;  %v4547_v63 = vmul.f32 %v4483_v60, %v8992_v42  ;;  %v4923_v47 = vmul.f32 0.5, %v4859_v41 }
 0x7ca   :  { %v4673_v49 = vadd.f32 %v4609_v37, %v8979_v26  ;;  %5452 = vmatmul.mubr.bf16.gmra.mrb[196].mxu0 %v5042_v62  ;;  %5643 = vmatmul.mubr.bf16.gmra.mrb[4].mxu1 %v5042_v62  ;;  %v4985_v23 = vmul.f32 %v4921_v57, %v8916_v53  ;;  %v4920_v8 = vmul.f32 0.5, %v4856_v14  ;;  %v4922_v46 = vmul.f32 0.5, %v4858_v55 }
 0x7cb   :  { %v4736_v36 = vmul.f32 0.7978846, %v4672_v33  ;;  %v4674_v52 = vadd.f32 %v4610_v22, %v8984_v31  ;;  %v4611_v59 = vmul.f32 0.044715, %v4547_v63  ;;  %v4355_v61 = vpop.f32.mrb[212].mxu1  ;;  %v4987_v1 = vmul.f32 %v4923_v47, %v8930_v54 }
 0x7cc   :  { %v4737_v24 = vmul.f32 0.7978846, %v4673_v49  ;;  %v9005_v19 = vadd.f32 %v4355_v61, %v8851_v4  ;;  %v4357_v32 = vpop.f32.mrb[213].mxu1  ;;  %v4984_v48 = vmul.f32 %v4920_v8, %v8912_v15  ;;  %v4986_v44 = vmul.f32 %v4922_v46, %v8923_v58 }
 0x7cd   :  { %v7114_v6 = vpop.eup %7113  ;;  %7121 = vtanh.f32 %v4736_v36  ;;  %v4738_v30 = vmul.f32 0.7978846, %v4674_v52  ;;  %v4675_v53 = vadd.f32 %v4611_v59, %v8992_v42  ;;  %v9011_v0 = vadd.f32 %v4357_v32, %v8854_v28  ;;  %v4359_v9 = vpop.f32.mrb[214].mxu1 }
 0x7ce   :  { %v7116_v11 = vpop.eup %7115  ;;  %7123 = vtanh.f32 %v4737_v24  ;;  %v4484_v12 = vmul.f32 %v9005_v19, %v9005_v19  ;;  %v9016_v51 = vadd.f32 %v4359_v9, %v8851_v4  ;;  %v4361_v54 = vpop.f32.mrb[215].mxu1  ;;  %v5045_v7 = vpack.c.bf16 %v4987_v1, %v4985_v23 }
 0x7cf   :  { %7125 = vtanh.f32 %v4738_v30  ;;  %v4739_v15 = vmul.f32 0.7978846, %v4675_v53  ;;  %v4485_v39 = vmul.f32 %v9011_v0, %v9011_v0  ;;  %v9021_v17 = vadd.f32 %v4361_v54, %v8854_v28  ;;  %v7118_v40 = vpop.eup %7117 }
 0x7d0   :  { %v4548_v2 = vmul.f32 %v4484_v12, %v9005_v19  ;;  %v4486_v13 = vmul.f32 %v9016_v51, %v9016_v51  ;;  %5461 = vmatprep.mubr.bf16.mxu0 %v5045_v7  ;;  %5650 = vmatprep.mubr.bf16.mxu1 %v5045_v7  ;;  %v4861_v38 = vadd.f32 1.0, %v7116_v11  ;;  %v7120_v21 = vpop.eup %7119  ;;  %v4860_v56 = vadd.f32 1.0, %v7114_v6 }
 0x7d1   :  { %7127 = vtanh.f32 %v4739_v15  ;;  %v4549_v5 = vmul.f32 %v4485_v39, %v9011_v0  ;;  %v4487_v50 = vmul.f32 %v9021_v17, %v9021_v17  ;;  %v5044_v14 = vpack.c.bf16 %v4986_v44, %v4984_v48 }
 0x7d2   :  { %v4612_v29 = vmul.f32 0.044715, %v4548_v2  ;;  %v4550_v43 = vmul.f32 %v4486_v13, %v9016_v51  ;;  %v4863_v10 = vadd.f32 1.0, %v7120_v21  ;;  %v4925_v60 = vmul.f32 0.5, %v4861_v38 }
 0x7d3   :  { %v4613_v35 = vmul.f32 0.044715, %v4549_v5  ;;  %v4551_v16 = vmul.f32 %v4487_v50, %v9021_v17  ;;  %v4862_v37 = vadd.f32 1.0, %v7118_v40  ;;  %5462 = vmatmul.mubr.bf16.gmra.mrb[200].mxu0 %v5044_v14  ;;  %5651 = vmatmul.mubr.bf16.gmra.mrb[8].mxu1 %v5044_v14  ;;  %v4924_v57 = vmul.f32 0.5, %v4860_v56 }
 0x7d4   :  { %v4676_v58 = vadd.f32 %v4612_v29, %v9005_v19  ;;  %v4614_v62 = vmul.f32 0.044715, %v4550_v43  ;;  %v4927_v41 = vmul.f32 0.5, %v4863_v10  ;;  %v4989_v55 = vmul.f32 %v4925_v60, %v8945_v45 }
 0x7d5   :  { %v4677_v33 = vadd.f32 %v4613_v35, %v9011_v0  ;;  %v4615_v22 = vmul.f32 0.044715, %v4551_v16  ;;  %v4365_v63 = vpop.f32.mrb[216].mxu1  ;;  %v4926_v49 = vmul.f32 0.5, %v4862_v37  ;;  %v4988_v45 = vmul.f32 %v4924_v57, %v8942_v25 }
 0x7d6   :  { %v4740_v47 = vmul.f32 0.7978846, %v4676_v58  ;;  %v4678_v23 = vadd.f32 %v4614_v62, %v9016_v51  ;;  %v9037_v8 = vadd.f32 %v4365_v63, %v8851_v4  ;;  %v4367_v36 = vpop.f32.mrb[217].mxu1  ;;  %v4991_v52 = vmul.f32 %v4927_v41, %v8958_v18 }
 0x7d7   :  { %v7122_v59 = vpop.eup %7121  ;;  %v4741_v61 = vmul.f32 0.7978846, %v4677_v33  ;;  %v4679_v46 = vadd.f32 %v4615_v22, %v9021_v17  ;;  %v9042_v24 = vadd.f32 %v4367_v36, %v8854_v28  ;;  %v4369_v32 = vpop.f32.mrb[218].mxu1  ;;  %v4990_v2 = vmul.f32 %v4926_v49, %v8955_v20 }
 0x7d8   :  { %v7124_v1 = vpop.eup %7123  ;;  %7129 = vtanh.f32 %v4740_v47  ;;  %v4742_v48 = vmul.f32 0.7978846, %v4678_v23  ;;  %v4488_v6 = vmul.f32 %v9037_v8, %v9037_v8  ;;  %v9048_v30 = vadd.f32 %v4369_v32, %v8851_v4  ;;  %v4371_v18 = vpop.f32.mrb[219].mxu1 }
 0x7d9   :  { %v7126_v53 = vpop.eup %7125  ;;  %7131 = vtanh.f32 %v4741_v61  ;;  %v4743_v9 = vmul.f32 0.7978846, %v4679_v46  ;;  %v4489_v11 = vmul.f32 %v9042_v24, %v9042_v24  ;;  %v9053_v12 = vadd.f32 %v4371_v18, %v8854_v28 }
 0x7da   :  { %7133 = vtanh.f32 %v4742_v48  ;;  %v4552_v25 = vmul.f32 %v4488_v6, %v9037_v8  ;;  %v4490_v54 = vmul.f32 %v9048_v30, %v9048_v30  ;;  %v5047_v7 = vpack.c.bf16 %v4991_v52, %v4989_v55 }
 0x7db   :  { %v7128_v15 = vpop.eup %7127  ;;  %7135 = vtanh.f32 %v4743_v9  ;;  %v4553_v39 = vmul.f32 %v4489_v11, %v9042_v24  ;;  %v4491_v40 = vmul.f32 %v9053_v12, %v9053_v12  ;;  %v4865_v38 = vadd.f32 1.0, %v7124_v1 }
 0x7dc   :  { %v4616_v13 = vmul.f32 0.044715, %v4552_v25  ;;  %v4554_v44 = vmul.f32 %v4490_v54, %v9048_v30  ;;  %5471 = vmatprep.mubr.bf16.mxu0 %v5047_v7  ;;  %5658 = vmatprep.mubr.bf16.mxu1 %v5047_v7  ;;  %v4867_v21 = vadd.f32 1.0, %v7128_v15  ;;  %v5046_v56 = vpack.c.bf16 %v4990_v2, %v4988_v45 }
 0x7dd   :  { %v4617_v5 = vmul.f32 0.044715, %v4553_v39  ;;  %v4555_v50 = vmul.f32 %v4491_v40, %v9053_v12  ;;  %v4864_v29 = vadd.f32 1.0, %v7122_v59  ;;  %v4929_v10 = vmul.f32 0.5, %v4865_v38 }
 0x7de   :  { %v4680_v43 = vadd.f32 %v4616_v13, %v9037_v8  ;;  %v4618_v14 = vmul.f32 0.044715, %v4554_v44  ;;  %v4931_v35 = vmul.f32 0.5, %v4867_v21  ;;  %5472 = vmatmul.mubr.bf16.gmra.mrb[204].mxu0 %v5046_v56  ;;  %5659 = vmatmul.mubr.bf16.gmra.mrb[12].mxu1 %v5046_v56  ;;  %v4866_v60 = vadd.f32 1.0, %v7126_v53 }
 0x7df   :  { %v4681_v16 = vadd.f32 %v4617_v5, %v9042_v24  ;;  %v4619_v20 = vmul.f32 0.044715, %v4555_v50  ;;  %v4928_v37 = vmul.f32 0.5, %v4864_v29  ;;  %v4993_v57 = vmul.f32 %v4929_v10, %v8979_v26 }
 0x7e0   :  { %v4744_v58 = vmul.f32 0.7978846, %v4680_v43  ;;  %v4682_v62 = vadd.f32 %v4618_v14, %v9048_v30  ;;  %v4375_v41 = vpop.f32.mrb[220].mxu1  ;;  %v4995_v33 = vmul.f32 %v4931_v35, %v8992_v42  ;;  %v4930_v47 = vmul.f32 0.5, %v4866_v60 }
 0x7e1   :  { %v4745_v22 = vmul.f32 0.7978846, %v4681_v16  ;;  %v4683_v63 = vadd.f32 %v4619_v20, %v9053_v12  ;;  %v9071_v55 = vadd.f32 %v4375_v41, %v8851_v4  ;;  %v4377_v49 = vpop.f32.mrb[221].mxu1  ;;  %v4992_v18 = vmul.f32 %v4928_v37, %v8973_v27 }
 0x7e2   :  { %v7130_v23 = vpop.eup %7129  ;;  %7137 = vtanh.f32 %v4744_v58  ;;  %v4746_v36 = vmul.f32 0.7978846, %v4682_v62  ;;  %v9074_v52 = vadd.f32 %v4377_v49, %v8854_v28  ;;  %v4379_v59 = vpop.f32.mrb[222].mxu1  ;;  %v5049_v61 = vpack.c.bf16 %v4995_v33, %v4993_v57 }
 0x7e3   :  { %v7132_v46 = vpop.eup %7131  ;;  %7139 = vtanh.f32 %v4745_v22  ;;  %v4747_v26 = vmul.f32 0.7978846, %v4683_v63  ;;  %v4492_v42 = vmul.f32 %v9071_v55, %v9071_v55  ;;  %v9079_v32 = vadd.f32 %v4379_v59, %v8851_v4  ;;  %v4381_v45 = vpop.f32.mrb[223].mxu1 }
 0x7e4   :  { %v7134_v1 = vpop.eup %7133  ;;  %7141 = vtanh.f32 %v4746_v36  ;;  %v4493_v48 = vmul.f32 %v9074_v52, %v9074_v52  ;;  %v9084_v6 = vadd.f32 %v4381_v45, %v8854_v28  ;;  %5481 = vmatprep.mubr.bf16.mxu0 %v5049_v61  ;;  %5666 = vmatprep.mubr.bf16.mxu1 %v5049_v61  ;;  %v4994_v25 = vmul.f32 %v4930_v47, %v8984_v31 }
 0x7e5   :  { %v7136_v53 = vpop.eup %7135  ;;  %7143 = vtanh.f32 %v4747_v26  ;;  %v4556_v9 = vmul.f32 %v4492_v42, %v9071_v55  ;;  %v4494_v11 = vmul.f32 %v9079_v32, %v9079_v32  ;;  %v4869_v15 = vadd.f32 1.0, %v7132_v46 }
 0x7e6   :  { %v4557_v54 = vmul.f32 %v4493_v48, %v9074_v52  ;;  %v4495_v7 = vmul.f32 %v9084_v6, %v9084_v6  ;;  %v4871_v39 = vadd.f32 1.0, %v7136_v53  ;;  %v5048_v27 = vpack.c.bf16 %v4994_v25, %v4992_v18 }
 0x7e7   :  { %v4620_v40 = vmul.f32 0.044715, %v4556_v9  ;;  %v4558_v2 = vmul.f32 %v4494_v11, %v9079_v32  ;;  %v4868_v13 = vadd.f32 1.0, %v7130_v23  ;;  %v4933_v21 = vmul.f32 0.5, %v4869_v15 }
 0x7e8   :  { %v4621_v44 = vmul.f32 0.044715, %v4557_v54  ;;  %v4559_v38 = vmul.f32 %v4495_v7, %v9084_v6  ;;  %v4935_v5 = vmul.f32 0.5, %v4871_v39  ;;  %5482 = vmatmul.mubr.bf16.gmra.mrb[208].mxu0 %v5048_v27  ;;  %5667 = vmatmul.mubr.bf16.gmra.mrb[16].mxu1 %v5048_v27  ;;  %v4870_v56 = vadd.f32 1.0, %v7134_v1 }
 0x7e9   :  { %v4684_v50 = vadd.f32 %v4620_v40, %v9071_v55  ;;  %v4622_v31 = vmul.f32 0.044715, %v4558_v2  ;;  %v4932_v29 = vmul.f32 0.5, %v4868_v13  ;;  %v4997_v35 = vmul.f32 %v4933_v21, %v9011_v0 }
 0x7ea   :  { %v4685_v43 = vadd.f32 %v4621_v44, %v9074_v52  ;;  %v4623_v14 = vmul.f32 0.044715, %v4559_v38  ;;  %v4385_v10 = vpop.f32.mrb[224].mxu1  ;;  %v4999_v16 = vmul.f32 %v4935_v5, %v9021_v17  ;;  %v4934_v62 = vmul.f32 0.5, %v4870_v56 }
 0x7eb   :  { %v4748_v20 = vmul.f32 0.7978846, %v4684_v50  ;;  %v4686_v60 = vadd.f32 %v4622_v31, %v9079_v32  ;;  %v9102_v37 = vadd.f32 %v4385_v10, %v8851_v4  ;;  %v4387_v58 = vpop.f32.mrb[225].mxu1  ;;  %v4996_v48 = vmul.f32 %v4932_v29, %v9005_v19 }
 0x7ec   :  { %v7138_v41 = vpop.eup %7137  ;;  %v4749_v57 = vmul.f32 0.7978846, %v4685_v43  ;;  %v4687_v33 = vadd.f32 %v4623_v14, %v9084_v6  ;;  %v9106_v22 = vadd.f32 %v4387_v58, %v8854_v28  ;;  %v4389_v63 = vpop.f32.mrb[226].mxu1  ;;  %v5051_v49 = vpack.c.bf16 %v4999_v16, %v4997_v35 }
 0x7ed   :  { %v7140_v0 = vpop.eup %7139  ;;  %7145 = vtanh.f32 %v4748_v20  ;;  %v4750_v17 = vmul.f32 0.7978846, %v4686_v60  ;;  %v4496_v47 = vmul.f32 %v9102_v37, %v9102_v37  ;;  %v9111_v23 = vadd.f32 %v4389_v63, %v8851_v4  ;;  %v4391_v36 = vpop.f32.mrb[227].mxu1 }
 0x7ee   :  { %v7142_v59 = vpop.eup %7141  ;;  %7147 = vtanh.f32 %v4749_v57  ;;  %v4751_v61 = vmul.f32 0.7978846, %v4687_v33  ;;  %v4497_v46 = vmul.f32 %v9106_v22, %v9106_v22  ;;  %v9116_v26 = vadd.f32 %v4391_v36, %v8854_v28  ;;  %5491 = vmatprep.mubr.bf16.mxu0 %v5051_v49  ;;  %5674 = vmatprep.mubr.bf16.mxu1 %v5051_v49 }
 0x7ef   :  { %v7144_v42 = vpop.eup %7143  ;;  %7149 = vtanh.f32 %v4750_v17  ;;  %v4560_v45 = vmul.f32 %v4496_v47, %v9102_v37  ;;  %v4498_v1 = vmul.f32 %v9111_v23, %v9111_v23  ;;  %v4998_v9 = vmul.f32 %v4934_v62, %v9016_v51 }
 0x7f0   :  { %7151 = vtanh.f32 %v4751_v61  ;;  %v4561_v18 = vmul.f32 %v4497_v46, %v9106_v22  ;;  %v4499_v53 = vmul.f32 %v9116_v26, %v9116_v26  ;;  %v4873_v54 = vadd.f32 1.0, %v7140_v0 }
 0x7f1   :  { %v4624_v11 = vmul.f32 0.044715, %v4560_v45  ;;  %v4562_v25 = vmul.f32 %v4498_v1, %v9111_v23  ;;  %v4875_v7 = vadd.f32 1.0, %v7144_v42  ;;  %v5050_v40 = vpack.c.bf16 %v4998_v9, %v4996_v48 }
 0x7f2   :  { %v4625_v15 = vmul.f32 0.044715, %v4561_v18  ;;  %v4563_v39 = vmul.f32 %v4499_v53, %v9116_v26  ;;  %v4872_v2 = vadd.f32 1.0, %v7138_v41  ;;  %v4937_v13 = vmul.f32 0.5, %v4873_v54 }
 0x7f3   :  { %v4688_v19 = vadd.f32 %v4624_v11, %v9102_v37  ;;  %v4626_v27 = vmul.f32 0.044715, %v4562_v25  ;;  %v4939_v44 = vmul.f32 0.5, %v4875_v7  ;;  %5492 = vmatmul.mubr.bf16.gmra.mrb[212].mxu0 %v5050_v40  ;;  %5675 = vmatmul.mubr.bf16.gmra.mrb[20].mxu1 %v5050_v40  ;;  %v4874_v51 = vadd.f32 1.0, %v7142_v59 }
 0x7f4   :  { %v4689_v38 = vadd.f32 %v4625_v15, %v9106_v22  ;;  %v4627_v21 = vmul.f32 0.044715, %v4563_v39  ;;  %v4936_v5 = vmul.f32 0.5, %v4872_v2  ;;  %v5001_v29 = vmul.f32 %v4937_v13, %v9042_v24 }
 0x7f5   :  { %v4752_v50 = vmul.f32 0.7978846, %v4688_v19  ;;  %v4690_v31 = vadd.f32 %v4626_v27, %v9111_v23  ;;  %v4395_v56 = vpop.f32.mrb[228].mxu1  ;;  %v5003_v43 = vmul.f32 %v4939_v44, %v9053_v12  ;;  %v4938_v20 = vmul.f32 0.5, %v4874_v51 }
 0x7f6   :  { %v4753_v14 = vmul.f32 0.7978846, %v4689_v38  ;;  %v4691_v10 = vadd.f32 %v4627_v21, %v9116_v26  ;;  %v9135_v35 = vadd.f32 %v4395_v56, %v8851_v4  ;;  %v4397_v16 = vpop.f32.mrb[229].mxu1  ;;  %v5000_v36 = vmul.f32 %v4936_v5, %v9037_v8 }
 0x7f7   :  { %v7146_v60 = vpop.eup %7145  ;;  %7153 = vtanh.f32 %v4752_v50  ;;  %v4754_v58 = vmul.f32 0.7978846, %v4690_v31  ;;  %v9138_v62 = vadd.f32 %v4397_v16, %v8854_v28  ;;  %v4399_v41 = vpop.f32.mrb[230].mxu1  ;;  %v5053_v57 = vpack.c.bf16 %v5003_v43, %v5001_v29 }
 0x7f8   :  { %v7148_v33 = vpop.eup %7147  ;;  %7155 = vtanh.f32 %v4753_v14  ;;  %v4755_v24 = vmul.f32 0.7978846, %v4691_v10  ;;  %v4500_v12 = vmul.f32 %v9135_v35, %v9135_v35  ;;  %v9143_v63 = vadd.f32 %v4399_v41, %v8851_v4  ;;  %v4401_v49 = vpop.f32.mrb[231].mxu1 }
 0x7f9   :  { %v7150_v0 = vpop.eup %7149  ;;  %7157 = vtanh.f32 %v4754_v58  ;;  %v4501_v17 = vmul.f32 %v9138_v62, %v9138_v62  ;;  %v9148_v47 = vadd.f32 %v4401_v49, %v8854_v28  ;;  %5501 = vmatprep.mubr.bf16.mxu0 %v5053_v57  ;;  %5682 = vmatprep.mubr.bf16.mxu1 %v5053_v57  ;;  %v5002_v42 = vmul.f32 %v4938_v20, %v9048_v30 }
 0x7fa   :  { %v7152_v59 = vpop.eup %7151  ;;  %7159 = vtanh.f32 %v4755_v24  ;;  %v4564_v61 = vmul.f32 %v4500_v12, %v9135_v35  ;;  %v4502_v46 = vmul.f32 %v9143_v63, %v9143_v63  ;;  %v4877_v48 = vadd.f32 1.0, %v7148_v33 }
 0x7fb   :  { %v4565_v45 = vmul.f32 %v4501_v17, %v9138_v62  ;;  %v4503_v1 = vmul.f32 %v9148_v47, %v9148_v47  ;;  %v4879_v18 = vadd.f32 1.0, %v7152_v59  ;;  %v5052_v8 = vpack.c.bf16 %v5002_v42, %v5000_v36 }
 0x7fc   :  { %v4628_v53 = vmul.f32 0.044715, %v4564_v61  ;;  %v4566_v9 = vmul.f32 %v4502_v46, %v9143_v63  ;;  %v4876_v11 = vadd.f32 1.0, %v7146_v60  ;;  %v4941_v7 = vmul.f32 0.5, %v4877_v48 }
 0x7fd   :  { %v4629_v25 = vmul.f32 0.044715, %v4565_v45  ;;  %v4567_v54 = vmul.f32 %v4503_v1, %v9148_v47  ;;  %v4943_v15 = vmul.f32 0.5, %v4879_v18  ;;  %5502 = vmatmul.mubr.bf16.gmra.mrb[216].mxu0 %v5052_v8  ;;  %5683 = vmatmul.mubr.bf16.gmra.mrb[24].mxu1 %v5052_v8  ;;  %v4878_v40 = vadd.f32 1.0, %v7150_v0 }
 0x7fe   :  { %v4692_v39 = vadd.f32 %v4628_v53, %v9135_v35  ;;  %v4630_v30 = vmul.f32 0.044715, %v4566_v9  ;;  %v4940_v2 = vmul.f32 0.5, %v4876_v11  ;;  %v5005_v44 = vmul.f32 %v4941_v7, %v9074_v52 }
 0x7ff   :  { %v4693_v19 = vadd.f32 %v4629_v25, %v9138_v62  ;;  %v4631_v27 = vmul.f32 0.044715, %v4567_v54  ;;  %v4405_v13 = vpop.f32.mrb[232].mxu1  ;;  %v5007_v38 = vmul.f32 %v4943_v15, %v9084_v6  ;;  %v4942_v31 = vmul.f32 0.5, %v4878_v40 }
 0x800   :  { %v4756_v21 = vmul.f32 0.7978846, %v4692_v39  ;;  %v4694_v51 = vadd.f32 %v4630_v30, %v9143_v63  ;;  %v9166_v5 = vadd.f32 %v4405_v13, %v8851_v4  ;;  %v4407_v50 = vpop.f32.mrb[233].mxu1  ;;  %v5004_v17 = vmul.f32 %v4940_v2, %v9071_v55 }
 0x801   :  { %v7154_v56 = vpop.eup %7153  ;;  %v4757_v29 = vmul.f32 0.7978846, %v4693_v19  ;;  %v4695_v43 = vadd.f32 %v4631_v27, %v9148_v47  ;;  %v9170_v14 = vadd.f32 %v4407_v50, %v8854_v28  ;;  %v4409_v10 = vpop.f32.mrb[234].mxu1  ;;  %v5055_v16 = vpack.c.bf16 %v5007_v38, %v5005_v44 }
 0x802   :  { %v7156_v52 = vpop.eup %7155  ;;  %7161 = vtanh.f32 %v4756_v21  ;;  %v4758_v6 = vmul.f32 0.7978846, %v4694_v51  ;;  %v4504_v20 = vmul.f32 %v9166_v5, %v9166_v5  ;;  %v9175_v60 = vadd.f32 %v4409_v10, %v8851_v4  ;;  %v4411_v58 = vpop.f32.mrb[235].mxu1 }
 0x803   :  { %v7158_v41 = vpop.eup %7157  ;;  %7163 = vtanh.f32 %v4757_v29  ;;  %v4759_v57 = vmul.f32 0.7978846, %v4695_v43  ;;  %v4505_v33 = vmul.f32 %v9170_v14, %v9170_v14  ;;  %v9180_v24 = vadd.f32 %v4411_v58, %v8854_v28  ;;  %5511 = vmatprep.mubr.bf16.mxu0 %v5055_v16  ;;  %5690 = vmatprep.mubr.bf16.mxu1 %v5055_v16 }
 0x804   :  { %v7160_v12 = vpop.eup %7159  ;;  %7165 = vtanh.f32 %v4758_v6  ;;  %v4568_v49 = vmul.f32 %v4504_v20, %v9166_v5  ;;  %v4506_v0 = vmul.f32 %v9175_v60, %v9175_v60  ;;  %v5006_v61 = vmul.f32 %v4942_v31, %v9079_v32 }
 0x805   :  { %7167 = vtanh.f32 %v4759_v57  ;;  %v4569_v36 = vmul.f32 %v4505_v33, %v9170_v14  ;;  %v4507_v59 = vmul.f32 %v9180_v24, %v9180_v24  ;;  %v4881_v45 = vadd.f32 1.0, %v7156_v52 }
 0x806   :  { %v4632_v46 = vmul.f32 0.044715, %v4568_v49  ;;  %v4570_v42 = vmul.f32 %v4506_v0, %v9175_v60  ;;  %v4883_v1 = vadd.f32 1.0, %v7160_v12  ;;  %v5054_v53 = vpack.c.bf16 %v5006_v61, %v5004_v17 }
 0x807   :  { %v4633_v48 = vmul.f32 0.044715, %v4569_v36  ;;  %v4571_v18 = vmul.f32 %v4507_v59, %v9180_v24  ;;  %v4880_v9 = vadd.f32 1.0, %v7154_v56  ;;  %v4945_v11 = vmul.f32 0.5, %v4881_v45 }
 0x808   :  { %v4696_v55 = vadd.f32 %v4632_v46, %v9166_v5  ;;  %v4634_v8 = vmul.f32 0.044715, %v4570_v42  ;;  %v4947_v25 = vmul.f32 0.5, %v4883_v1  ;;  %5512 = vmatmul.mubr.bf16.gmra.mrb[220].mxu0 %v5054_v53  ;;  %5691 = vmatmul.mubr.bf16.gmra.mrb[28].mxu1 %v5054_v53  ;;  %v4882_v32 = vadd.f32 1.0, %v7158_v41 }
 0x809   :  { %v4697_v54 = vadd.f32 %v4633_v48, %v9170_v14  ;;  %v4635_v7 = vmul.f32 0.044715, %v4571_v18  ;;  %v4944_v15 = vmul.f32 0.5, %v4880_v9  ;;  %v5009_v2 = vmul.f32 %v4945_v11, %v9106_v22 }
 0x80a   :  { %v4760_v39 = vmul.f32 0.7978846, %v4696_v55  ;;  %v4698_v30 = vadd.f32 %v4634_v8, %v9175_v60  ;;  %v4415_v40 = vpop.f32.mrb[236].mxu1  ;;  %v5011_v19 = vmul.f32 %v4947_v25, %v9116_v26  ;;  %v4946_v21 = vmul.f32 0.5, %v4882_v32 }
 0x80b   :  { %v4761_v27 = vmul.f32 0.7978846, %v4697_v54  ;;  %v4699_v13 = vadd.f32 %v4635_v7, %v9180_v24  ;;  %v9199_v44 = vadd.f32 %v4415_v40, %v8851_v4  ;;  %v4417_v38 = vpop.f32.mrb[237].mxu1  ;;  %v5008_v58 = vmul.f32 %v4944_v15, %v9102_v37 }
 0x80c   :  { %v7162_v51 = vpop.eup %7161  ;;  %7169 = vtanh.f32 %v4760_v39  ;;  %v4762_v50 = vmul.f32 0.7978846, %v4698_v30  ;;  %v9202_v31 = vadd.f32 %v4417_v38, %v8854_v28  ;;  %v4419_v56 = vpop.f32.mrb[238].mxu1  ;;  %v5057_v29 = vpack.c.bf16 %v5011_v19, %v5009_v2 }
 0x80d   :  { %v7164_v43 = vpop.eup %7163  ;;  %7171 = vtanh.f32 %v4761_v27  ;;  %v4763_v22 = vmul.f32 0.7978846, %v4699_v13  ;;  %v4508_v26 = vmul.f32 %v9199_v44, %v9199_v44  ;;  %v9207_v10 = vadd.f32 %v4419_v56, %v8851_v4  ;;  %v4421_v16 = vpop.f32.mrb[239].mxu1 }
 0x80e   :  { %v7166_v52 = vpop.eup %7165  ;;  %7173 = vtanh.f32 %v4762_v50  ;;  %v4509_v6 = vmul.f32 %v9202_v31, %v9202_v31  ;;  %v9212_v20 = vadd.f32 %v4421_v16, %v8854_v28  ;;  %5521 = vmatprep.mubr.bf16.mxu0 %v5057_v29  ;;  %5698 = vmatprep.mubr.bf16.mxu1 %v5057_v29  ;;  %v5010_v12 = vmul.f32 %v4946_v21, %v9111_v23 }
 0x80f   :  { %v7168_v41 = vpop.eup %7167  ;;  %7175 = vtanh.f32 %v4763_v22  ;;  %v4572_v57 = vmul.f32 %v4508_v26, %v9199_v44  ;;  %v4510_v33 = vmul.f32 %v9207_v10, %v9207_v10  ;;  %v4885_v17 = vadd.f32 1.0, %v7164_v43 }
 0x810   :  { %v4573_v49 = vmul.f32 %v4509_v6, %v9202_v31  ;;  %v4511_v0 = vmul.f32 %v9212_v20, %v9212_v20  ;;  %v4887_v36 = vadd.f32 1.0, %v7168_v41  ;;  %v5056_v37 = vpack.c.bf16 %v5010_v12, %v5008_v58 }
 0x811   :  { %v4636_v59 = vmul.f32 0.044715, %v4572_v57  ;;  %v4574_v61 = vmul.f32 %v4510_v33, %v9207_v10  ;;  %v4884_v46 = vadd.f32 1.0, %v7162_v51  ;;  %v4949_v48 = vmul.f32 0.5, %v4885_v17 }
 0x812   :  { %v4637_v42 = vmul.f32 0.044715, %v4573_v49  ;;  %v4575_v45 = vmul.f32 %v4511_v0, %v9212_v20  ;;  %v4425_v1 = vpop.f32.mrb[240].mxu1  ;;  %v4951_v18 = vmul.f32 0.5, %v4887_v36  ;;  %5522 = vmatmul.mubr.bf16.gmra.mrb[224].mxu0 %v5056_v37  ;;  %5699 = vmatmul.mubr.bf16.gmra.mrb[32].mxu1 %v5056_v37  ;;  %v4886_v8 = vadd.f32 1.0, %v7166_v52 }
 0x813   :  { %v4700_v23 = vadd.f32 %v4636_v59, %v9199_v44  ;;  %v4638_v53 = vmul.f32 0.044715, %v4574_v61  ;;  %v9226_v9 = vadd.f32 %v4425_v1, %v8851_v4  ;;  %v4427_v55 = vpop.f32.mrb[241].mxu1  ;;  %v5013_v32 = vmul.f32 %v4949_v48, %v9138_v62 }
 0x814   :  { %v4701_v11 = vadd.f32 %v4637_v42, %v9202_v31  ;;  %v4639_v25 = vmul.f32 0.044715, %v4575_v45  ;;  %v9230_v54 = vadd.f32 %v4427_v55, %v8854_v28  ;;  %v4429_v7 = vpop.f32.mrb[242].mxu1  ;;  %v5015_v58 = vmul.f32 %v4951_v18, %v9148_v47 }
 0x815   :  { %v4764_v15 = vmul.f32 0.7978846, %v4700_v23  ;;  %v4702_v39 = vadd.f32 %v4638_v53, %v9207_v10  ;;  %v4512_v30 = vmul.f32 %v9226_v9, %v9226_v9  ;;  %v9237_v40 = vadd.f32 %v4429_v7, %v8851_v4  ;;  %v4431_v2 = vpop.f32.mrb[243].mxu1 }
 0x816   :  { %v9239_v19 = vpop.eup %7169  ;;  %v4765_v27 = vmul.f32 0.7978846, %v4701_v11  ;;  %v4703_v13 = vadd.f32 %v4639_v25, %v9212_v20  ;;  %v4513_v38 = vmul.f32 %v9230_v54, %v9230_v54  ;;  %v9245_v62 = vadd.f32 %v4431_v2, %v8854_v28 }
 0x817   :  { %v9247_v21 = vpop.eup %7171  ;;  %7177 = vtanh.f32 %v4764_v15  ;;  %v4766_v51 = vmul.f32 0.7978846, %v4702_v39  ;;  %v4576_v50 = vmul.f32 %v4512_v30, %v9226_v9  ;;  %v4514_v56 = vmul.f32 %v9237_v40, %v9237_v40 }
 0x818   :  { %v9252_v29 = vpop.eup %7173  ;;  %7179 = vtanh.f32 %v4765_v27  ;;  %v4767_v43 = vmul.f32 0.7978846, %v4703_v13  ;;  %v4577_v22 = vmul.f32 %v4513_v38, %v9230_v54  ;;  %v4515_v26 = vmul.f32 %v9245_v62, %v9245_v62 }
 0x819   :  { %v9257_v16 = vpop.eup %7175  ;;  %7181 = vtanh.f32 %v4766_v51  ;;  %v4640_v52 = vmul.f32 0.044715, %v4576_v50  ;;  %v4578_v6 = vmul.f32 %v4514_v56, %v9237_v40  ;;  %v4948_v12 = vmul.f32 0.5, %v4884_v46 }
 0x81a   :  { %7183 = vtanh.f32 %v4767_v43  ;;  %v4641_v41 = vmul.f32 0.044715, %v4577_v22  ;;  %v4579_v57 = vmul.f32 %v4515_v26, %v9245_v62  ;;  %v4435_v33 = vpop.f32.mrb[244].mxu1  ;;  %v5059_v59 = vpack.c.bf16 %v5015_v58, %v5013_v32 }
 0x81b   :  { %v4704_v49 = vadd.f32 %v4640_v52, %v9226_v9  ;;  %v4642_v0 = vmul.f32 0.044715, %v4578_v6  ;;  %v9264_v17 = vadd.f32 %v4435_v33, %v8851_v4  ;;  %v4437_v36 = vpop.f32.mrb[245].mxu1  ;;  %v4950_v45 = vmul.f32 0.5, %v4886_v8 }
 0x81c   :  { %v4705_v61 = vadd.f32 %v4641_v41, %v9230_v54  ;;  %v4643_v37 = vmul.f32 0.044715, %v4579_v57  ;;  %v9268_v42 = vadd.f32 %v4437_v36, %v8854_v28  ;;  %v4439_v47 = vpop.f32.mrb[246].mxu1  ;;  %5531 = vmatprep.mubr.bf16.mxu0 %v5059_v59  ;;  %5706 = vmatprep.mubr.bf16.mxu1 %v5059_v59  ;;  %v5012_v38 = vmul.f32 %v4948_v12, %v9135_v35 }
 0x81d   :  { %v4768_v1 = vmul.f32 0.7978846, %v4704_v49  ;;  %v4706_v48 = vadd.f32 %v4642_v0, %v9237_v40  ;;  %v4516_v46 = vmul.f32 %v9264_v17, %v9264_v17  ;;  %v9274_v18 = vadd.f32 %v4439_v47, %v8851_v4  ;;  %v4441_v23 = vpop.f32.mrb[247].mxu1 }
 0x81e   :  { %v4769_v53 = vmul.f32 0.7978846, %v4705_v61  ;;  %v4707_v55 = vadd.f32 %v4643_v37, %v9245_v62  ;;  %v4517_v11 = vmul.f32 %v9268_v42, %v9268_v42  ;;  %v9280_v8 = vadd.f32 %v4441_v23, %v8854_v28 }
 0x81f   :  { %7185 = vtanh.f32 %v4768_v1  ;;  %v4770_v25 = vmul.f32 0.7978846, %v4706_v48  ;;  %v4580_v7 = vmul.f32 %v4516_v46, %v9264_v17  ;;  %v4518_v32 = vmul.f32 %v9274_v18, %v9274_v18 }
 0x820   :  { %7187 = vtanh.f32 %v4769_v53  ;;  %v4771_v15 = vmul.f32 0.7978846, %v4707_v55  ;;  %v4581_v39 = vmul.f32 %v4517_v11, %v9268_v42  ;;  %v4519_v30 = vmul.f32 %v9280_v8, %v9280_v8 }
 0x821   :  { %v9288_v2 = vpop.eup %7177  ;;  %7189 = vtanh.f32 %v4770_v25  ;;  %v4644_v27 = vmul.f32 0.044715, %v4580_v7  ;;  %v4582_v13 = vmul.f32 %v4518_v32, %v9274_v18  ;;  %v5014_v43 = vmul.f32 %v4950_v45, %v9143_v63 }
 0x822   :  { %v9292_v51 = vpop.eup %7179  ;;  %7191 = vtanh.f32 %v4771_v15  ;;  %v4645_v50 = vmul.f32 0.044715, %v4581_v39  ;;  %v4583_v56 = vmul.f32 %v4519_v30, %v9280_v8  ;;  %v4445_v22 = vpop.f32.mrb[248].mxu1  ;;  %v4889_v35 = vadd.f32 1.0, %v9247_v21 }
 0x823   :  { %v9296_v26 = vpop.eup %7181  ;;  %v4708_v52 = vadd.f32 %v4644_v27, %v9264_v17  ;;  %v4646_v6 = vmul.f32 0.044715, %v4582_v13  ;;  %v9300_v58 = vadd.f32 %v4445_v22, %v8851_v4  ;;  %v4447_v41 = vpop.f32.mrb[249].mxu1  ;;  %v5058_v49 = vpack.c.bf16 %v5014_v43, %v5012_v38 }
 0x824   :  { %v9303_v57 = vpop.eup %7183  ;;  %v4709_v33 = vadd.f32 %v4645_v50, %v9268_v42  ;;  %v4647_v12 = vmul.f32 0.044715, %v4583_v56  ;;  %v9307_v63 = vadd.f32 %v4447_v41, %v8854_v28  ;;  %v4449_v0 = vpop.f32.mrb[250].mxu1  ;;  %v4891_v39 = vadd.f32 1.0, %v9257_v16 }
 0x825   :  { %v4772_v36 = vmul.f32 0.7978846, %v4708_v52  ;;  %v4710_v59 = vadd.f32 %v4646_v6, %v9274_v18  ;;  %v4520_v61 = vmul.f32 %v9300_v58, %v9300_v58  ;;  %v9313_v37 = vadd.f32 %v4449_v0, %v8851_v4  ;;  %v4451_v21 = vpop.f32.mrb[251].mxu1  ;;  %5532 = vmatmul.mubr.bf16.gmra.mrb[228].mxu0 %v5058_v49  ;;  %5707 = vmatmul.mubr.bf16.gmra.mrb[36].mxu1 %v5058_v49 }
 0x826   :  { %v4773_v47 = vmul.f32 0.7978846, %v4709_v33  ;;  %v4711_v45 = vadd.f32 %v4647_v12, %v9280_v8  ;;  %v4521_v1 = vmul.f32 %v9307_v63, %v9307_v63  ;;  %v9319_v48 = vadd.f32 %v4451_v21, %v8854_v28 }
 0x827   :  { %7193 = vtanh.f32 %v4772_v36  ;;  %v4774_v46 = vmul.f32 0.7978846, %v4710_v59  ;;  %v4584_v23 = vmul.f32 %v4520_v61, %v9300_v58  ;;  %v4522_v53 = vmul.f32 %v9313_v37, %v9313_v37 }
 0x828   :  { %7195 = vtanh.f32 %v4773_v47  ;;  %v4775_v55 = vmul.f32 0.7978846, %v4711_v45  ;;  %v4585_v11 = vmul.f32 %v4521_v1, %v9307_v63  ;;  %v4523_v25 = vmul.f32 %v9319_v48, %v9319_v48 }
 0x829   :  { %v9327_v7 = vpop.eup %7185  ;;  %7197 = vtanh.f32 %v4774_v46  ;;  %v4648_v32 = vmul.f32 0.044715, %v4584_v23  ;;  %v4586_v15 = vmul.f32 %v4522_v53, %v9313_v37  ;;  %v4953_v38 = vmul.f32 0.5, %v4889_v35 }
 0x82a   :  { %v9331_v30 = vpop.eup %7187  ;;  %7199 = vtanh.f32 %v4775_v55  ;;  %v4649_v27 = vmul.f32 0.044715, %v4585_v11  ;;  %v4587_v13 = vmul.f32 %v4523_v25, %v9319_v48  ;;  %v4455_v50 = vpop.f32.mrb[252].mxu1  ;;  %v4955_v52 = vmul.f32 0.5, %v4891_v39 }
 0x82b   :  { %v9334_v56 = vpop.eup %7189  ;;  %v4712_v43 = vadd.f32 %v4648_v32, %v9300_v58  ;;  %v4650_v22 = vmul.f32 0.044715, %v4586_v15  ;;  %v4888_v6 = vadd.f32 1.0, %v9239_v19  ;;  %v4457_v41 = vpop.f32.mrb[253].mxu1  ;;  %v5017_v49 = vmul.f32 %v4953_v38, %v9170_v14 }
 0x82c   :  { %v9338_v33 = vpop.eup %7191  ;;  %v4713_v16 = vadd.f32 %v4649_v27, %v9307_v63  ;;  %v4651_v12 = vmul.f32 0.044715, %v4587_v13  ;;  %v4890_v0 = vadd.f32 1.0, %v9252_v29  ;;  %v4459_v35 = vpop.f32.mrb[254].mxu1  ;;  %v5019_v61 = vmul.f32 %v4955_v52, %v9180_v24 }
 0x82d   :  { %v4776_v36 = vmul.f32 0.7978846, %v4712_v43  ;;  %v4714_v59 = vadd.f32 %v4650_v22, %v9313_v37  ;;  %v4952_v21 = vmul.f32 0.5, %v4888_v6  ;;  %v4461_v47 = vpop.f32.mrb[255].mxu1  ;;  %v9347_v46 = vadd.f32 %v4455_v50, %v8851_v4 }
 0x82e   :  { %v4777_v45 = vmul.f32 0.7978846, %v4713_v16  ;;  %v4715_v19 = vadd.f32 %v4651_v12, %v9319_v48  ;;  %v4954_v1 = vmul.f32 0.5, %v4890_v0  ;;  %v5061_v14 = vpack.c.bf16 %v5019_v61, %v5017_v49 }
 0x82f   :  { %7201 = vtanh.f32 %v4776_v36  ;;  %v4778_v23 = vmul.f32 0.7978846, %v4714_v59  ;;  %v5016_v29 = vmul.f32 %v4952_v21, %v9166_v5  ;;  %v4524_v24 = vmul.f32 %v9347_v46, %v9347_v46 }
 0x830   :  { %7203 = vtanh.f32 %v4777_v45  ;;  %v4779_v53 = vmul.f32 0.7978846, %v4715_v19  ;;  %v5018_v55 = vmul.f32 %v4954_v1, %v9175_v60  ;;  %5541 = vmatprep.mubr.bf16.mxu0 %v5061_v14  ;;  %5714 = vmatprep.mubr.bf16.mxu1 %v5061_v14  ;;  %v9356_v25 = vadd.f32 %v4457_v41, %v8854_v28 }
 0x831   :  { %v9353_v11 = vpop.eup %7193  ;;  %7205 = vtanh.f32 %v4778_v23  ;;  %v9359_v32 = vadd.f32 %v4459_v35, %v8851_v4  ;;  %v9362_v5 = vadd.f32 %v4461_v47, %v8854_v28  ;;  %v4588_v39 = vmul.f32 %v4524_v24, %v9347_v46 }
 0x832   :  { %v7196_v15 = vpop.eup %7195  ;;  %7207 = vtanh.f32 %v4779_v53  ;;  %v5060_v60 = vpack.c.bf16 %v5018_v55, %v5016_v29  ;;  %v4893_v27 = vadd.f32 1.0, %v9292_v51  ;;  %v4525_v38 = vmul.f32 %v9356_v25, %v9356_v25 }
 0x833   :  { %v7198_v13 = vpop.eup %7197  ;;  %v4526_v50 = vmul.f32 %v9359_v32, %v9359_v32  ;;  %v4527_v4 = vmul.f32 %v9362_v5, %v9362_v5  ;;  %v4895_v28 = vadd.f32 1.0, %v9303_v57  ;;  %v4652_v22 = vmul.f32 0.044715, %v4588_v39 }
 0x834   :  { %v7200_v43 = vpop.eup %7199  ;;  %5542 = vmatmul.mubr.bf16.gmra.mrb[232].mxu0 %v5060_v60  ;;  %5715 = vmatmul.mubr.bf16.gmra.mrb[40].mxu1 %v5060_v60  ;;  %v4957_v52 = vmul.f32 0.5, %v4893_v27  ;;  %v4892_v6 = vadd.f32 1.0, %v9288_v2  ;;  %v4894_v51 = vadd.f32 1.0, %v9296_v26  ;;  %v4589_v41 = vmul.f32 %v4525_v38, %v9356_v25 }
 0x835   :  { %v4590_v16 = vmul.f32 %v4526_v50, %v9359_v32  ;;  %v4591_v12 = vmul.f32 %v4527_v4, %v9362_v5  ;;  %v4959_v49 = vmul.f32 0.5, %v4895_v28  ;;  %v4716_v0 = vadd.f32 %v4652_v22, %v9347_v46 }
 0x836   :  { %v5021_v57 = vmul.f32 %v4957_v52, %v9202_v31  ;;  %v4956_v35 = vmul.f32 0.5, %v4892_v6  ;;  %v4958_v36 = vmul.f32 0.5, %v4894_v51  ;;  %v4653_v59 = vmul.f32 0.044715, %v4589_v41 }
 0x837   :  { %v4654_v61 = vmul.f32 0.044715, %v4590_v16  ;;  %v4655_v21 = vmul.f32 0.044715, %v4591_v12  ;;  %v5023_v2 = vmul.f32 %v4959_v49, %v9212_v20  ;;  %v4780_v47 = vmul.f32 0.7978846, %v4716_v0 }
 0x838   :  { %v5020_v26 = vmul.f32 %v4956_v35, %v9199_v44  ;;  %v5022_v45 = vmul.f32 %v4958_v36, %v9207_v10  ;;  %v4897_v19 = vadd.f32 1.0, %v9331_v30  ;;  %v4717_v23 = vadd.f32 %v4653_v59, %v9356_v25 }
 0x839   :  { %v7202_v1 = vpop.eup %7201  ;;  %v4718_v14 = vadd.f32 %v4654_v61, %v9359_v32  ;;  %v4719_v31 = vadd.f32 %v4655_v21, %v9362_v5  ;;  %v5063_v29 = vpack.c.bf16 %v5023_v2, %v5021_v57  ;;  %7209 = vtanh.f32 %v4780_v47 }
 0x83a   :  { %v7204_v53 = vpop.eup %7203  ;;  %v5062_v55 = vpack.c.bf16 %v5022_v45, %v5020_v26  ;;  %v4899_v20 = vadd.f32 1.0, %v9338_v33  ;;  %v4961_v24 = vmul.f32 0.5, %v4897_v19  ;;  %v4781_v44 = vmul.f32 0.7978846, %v4717_v23 }
 0x83b   :  { %v7206_v60 = vpop.eup %7205  ;;  %v4782_v39 = vmul.f32 0.7978846, %v4718_v14  ;;  %v4783_v10 = vmul.f32 0.7978846, %v4719_v31  ;;  %5551 = vmatprep.mubr.bf16.mxu0 %v5063_v29  ;;  %5722 = vmatprep.mubr.bf16.mxu1 %v5063_v29  ;;  %v4896_v50 = vadd.f32 1.0, %v9327_v7  ;;  %v4898_v4 = vadd.f32 1.0, %v9334_v56 }
 0x83c   :  { %v7208_v30 = vpop.eup %7207  ;;  %5552 = vmatmul.mubr.bf16.gmra.mrb[236].mxu0 %v5062_v55  ;;  %5723 = vmatmul.mubr.bf16.gmra.mrb[44].mxu1 %v5062_v55  ;;  %v4963_v27 = vmul.f32 0.5, %v4899_v20  ;;  %v5025_v38 = vmul.f32 %v4961_v24, %v9230_v54  ;;  %7211 = vtanh.f32 %v4781_v44  ;;  %v4901_v28 = vadd.f32 1.0, %v7196_v15 }
 0x83d   :  { %v4903_v33 = vadd.f32 1.0, %v7200_v43  ;;  %v4900_v22 = vadd.f32 1.0, %v9353_v11  ;;  %7213 = vtanh.f32 %v4782_v39  ;;  %v4960_v6 = vmul.f32 0.5, %v4896_v50 }
 0x83e   :  { %v5027_v52 = vmul.f32 %v4963_v27, %v9245_v62  ;;  %v4962_v51 = vmul.f32 0.5, %v4898_v4  ;;  %7215 = vtanh.f32 %v4783_v10  ;;  %v4965_v41 = vmul.f32 0.5, %v4901_v28  ;;  %v9561_v27 = vld [vmem:[#allocation24_spill] sm:$0xff] }
 0x83f   :  { %v4967_v16 = vmul.f32 0.5, %v4903_v33  ;;  %v4902_v12 = vadd.f32 1.0, %v7198_v13  ;;  %v5024_v54 = vmul.f32 %v4960_v6, %v9226_v9  ;;  %v4964_v56 = vmul.f32 0.5, %v4900_v22 }
 0x840   :  { %v5065_v49 = vpack.c.bf16 %v5027_v52, %v5025_v38  ;;  %v5026_v7 = vmul.f32 %v4962_v51, %v9237_v40  ;;  %v5029_v15 = vmul.f32 %v4965_v41, %v9268_v42  ;;  %v4905_v0 = vadd.f32 1.0, %v7204_v53 }
 0x841   :  { %v5031_v43 = vmul.f32 %v4967_v16, %v9280_v8  ;;  %v4966_v11 = vmul.f32 0.5, %v4902_v12  ;;  %v5028_v57 = vmul.f32 %v4964_v56, %v9264_v17  ;;  %v4907_v35 = vadd.f32 1.0, %v7208_v30  ;;  %v5136_v30 = vld [vmem:[%s9560_s29] sm:$0x7] }
 0x842   :  { %5561 = vmatprep.mubr.bf16.mxu0 %v5065_v49  ;;  %5730 = vmatprep.mubr.bf16.mxu1 %v5065_v49  ;;  %v5064_v62 = vpack.c.bf16 %v5026_v7, %v5024_v54  ;;  %v4904_v36 = vadd.f32 1.0, %v7202_v1  ;;  %v4969_v9 = vmul.f32 0.5, %v4905_v0  ;;  %v4906_v61 = vadd.f32 1.0, %v7206_v60 }
 0x843   :  { %v5067_v13 = vpack.c.bf16 %v5031_v43, %v5029_v15  ;;  %v5030_v59 = vmul.f32 %v4966_v11, %v9274_v18  ;;  %v7210_v40 = vpop.eup %7209  ;;  %v4971_v42 = vmul.f32 0.5, %v4907_v35 }
 0x844   :  { %5562 = vmatmul.mubr.bf16.gmra.mrb[240].mxu0 %v5064_v62  ;;  %5731 = vmatmul.mubr.bf16.gmra.mrb[48].mxu1 %v5064_v62  ;;  %v4968_v21 = vmul.f32 0.5, %v4904_v36  ;;  %v4970_v2 = vmul.f32 0.5, %v4906_v61  ;;  %v4908_v47 = vadd.f32 1.0, %v7210_v40  ;;  %v5033_v26 = vmul.f32 %v4969_v9, %v9307_v63 }
 0x845   :  { %5571 = vmatprep.mubr.bf16.mxu0 %v5067_v13  ;;  %5738 = vmatprep.mubr.bf16.mxu1 %v5067_v13  ;;  %v5066_v8 = vpack.c.bf16 %v5030_v59, %v5028_v57  ;;  %v5035_v17 = vmul.f32 %v4971_v42, %v9319_v48 }
 0x846   :  { %v7212_v45 = vpop.eup %7211  ;;  %v5032_v19 = vmul.f32 %v4968_v21, %v9300_v58  ;;  %v5034_v18 = vmul.f32 %v4970_v2, %v9313_v37  ;;  %v4972_v55 = vmul.f32 0.5, %v4908_v47 }
 0x847   :  { %v7214_v1 = vpop.eup %7213  ;;  %v5069_v23 = vpack.c.bf16 %v5035_v17, %v5033_v26  ;;  %v4909_v14 = vadd.f32 1.0, %v7212_v45 }
 0x848   :  { %v7216_v31 = vpop.eup %7215  ;;  %v5068_v29 = vpack.c.bf16 %v5034_v18, %v5032_v19  ;;  %v4910_v53 = vadd.f32 1.0, %v7214_v1  ;;  %v5036_v48 = vmul.f32 %v4972_v55, %v9347_v46  ;;  %v5148_v46 = vsub.s32 2, %v9561_v27 }
 0x849   :  { %v4911_v20 = vadd.f32 1.0, %v7216_v31  ;;  %v4973_v24 = vmul.f32 0.5, %v4909_v14 }
 0x84a   :  { %v4974_v60 = vmul.f32 0.5, %v4910_v53  ;;  %v9417_v50 = vrot.slane %v5136_v30, %v5148_v46 }
 0x84b   :  { %v4975_v63 = vmul.f32 0.5, %v4911_v20  ;;  %v5037_v37 = vmul.f32 %v4973_v24, %v9356_v25  ;;  %v9415_v25 = vrot.slane %v5136_v30, %v9559_v34 }
 0x84c   :  { %5572 = vmatmul.mubr.bf16.gmra.mrb[244].mxu0 %v5066_v8  ;;  %5739 = vmatmul.mubr.bf16.gmra.mrb[52].mxu1 %v5066_v8  ;;  %v5038_v58 = vmul.f32 %v4974_v60, %v9359_v32  ;;  %v9412_v32 = vrot.slane %v5136_v30, %v7710_v3 }
 0x84d   :  { %5581 = vmatprep.mubr.bf16.mxu0 %v5069_v23  ;;  %5746 = vmatprep.mubr.bf16.mxu1 %v5069_v23  ;;  %v5039_v44 = vmul.f32 %v4975_v63, %v9362_v5 }
 0x84e   :  { %v5070_v39 = vpack.c.bf16 %v5038_v58, %v5036_v48 }
 0x84f   :  { %v5071_v10 = vpack.c.bf16 %v5039_v44, %v5037_v37 }
 0x854   :  { %5582 = vmatmul.mubr.bf16.gmra.mrb[248].mxu0 %v5068_v29  ;;  %5747 = vmatmul.mubr.bf16.gmra.mrb[56].mxu1 %v5068_v29 }
 0x855   :  { %5591 = vmatprep.mubr.bf16.mxu0 %v5071_v10  ;;  %5754 = vmatprep.mubr.bf16.mxu1 %v5071_v10 }
 0x85c   :  { %5592 = vmatmul.mubr.bf16.gmra.mrb[252].mxu0 %v5070_v39  ;;  %5755 = vmatmul.mubr.bf16.gmra.mrb[60].mxu1 %v5070_v39 }
 0x890   :  { %v5443_v5 = vpop.f32.mrb[192].mxu0  ;;  %v6232_v38 = vpop.f32.mrb[0].mxu1 }
 0x891   :  { %v5444_v4 = vadd.f32 %v5443_v5, %v9412_v32  ;;  %v5445_v28 = vpop.f32.mrb[193].mxu0  ;;  %v6233_v33 = vpop.f32.mrb[1].mxu1 }
 0x892   :  { %v5446_v22 = vadd.f32 %v5445_v28, %v9415_v25  ;;  %v6234_v52 = vadd.f32 %v6233_v33, %v6232_v38  ;;  %v5447_v6 = vpop.f32.mrb[194].mxu0  ;;  %v6235_v51 = vpop.f32.mrb[2].mxu1 }
 0x893   :  { %5763 = vst [vmem:[#allocation17] sm:$0xff] %v5444_v4  ;;  %v5448_v3 = vadd.f32 %v5447_v6, %v9412_v32  ;;  %v5449_v41 = vpop.f32.mrb[195].mxu0  ;;  %v6236_v16 = vpop.f32.mrb[3].mxu1 }
 0x894   :  { %5764 = vst [vmem:[#allocation17 + $0x8] sm:$0xff] %v5446_v22  ;;  %v5637_v34 = vadd.f32 %v6234_v52, %v9417_v50  ;;  %v5450_v12 = vadd.f32 %v5449_v41, %v9415_v25  ;;  %v6237_v49 = vadd.f32 %v6236_v16, %v6235_v51 }
 0x895   :  { %5766 = vst [vmem:[#allocation17 + $0x18] sm:$0xff] %v5448_v3 }
 0x896   :  { %5765 = vst [vmem:[#allocation17 + $0x10] sm:$0xff] %v5637_v34  ;;  %5767 = vst [vmem:[#allocation17 + $0x20] sm:$0xff] %v5450_v12  ;;  %v5640_v54 = vadd.f32 %v6237_v49, %v9417_v50 }
 0x898   :  { %5768 = vst [vmem:[#allocation17 + $0x28] sm:$0xff] %v5640_v54 }
 0x89d   :  { %v5453_v7 = vpop.f32.mrb[196].mxu0  ;;  %v6238_v56 = vpop.f32.mrb[4].mxu1 }
 0x89e   :  { %v5454_v15 = vadd.f32 %v5453_v7, %v9412_v32  ;;  %v5455_v43 = vpop.f32.mrb[197].mxu0  ;;  %v6239_v11 = vpop.f32.mrb[5].mxu1 }
 0x89f   :  { %v5456_v0 = vadd.f32 %v5455_v43, %v9415_v25  ;;  %v6240_v62 = vadd.f32 %v6239_v11, %v6238_v56  ;;  %v5457_v57 = vpop.f32.mrb[198].mxu0  ;;  %v6241_v35 = vpop.f32.mrb[6].mxu1 }
 0x8a0   :  { %5769 = vst [vmem:[#allocation17 + $0x30] sm:$0xff] %v5454_v15  ;;  %v5458_v36 = vadd.f32 %v5457_v57, %v9412_v32  ;;  %v5459_v13 = vpop.f32.mrb[199].mxu0  ;;  %v6242_v59 = vpop.f32.mrb[7].mxu1 }
 0x8a1   :  { %5770 = vst [vmem:[#allocation17 + $0x38] sm:$0xff] %v5456_v0  ;;  %v5645_v9 = vadd.f32 %v6240_v62, %v9417_v50  ;;  %v5460_v61 = vadd.f32 %v5459_v13, %v9415_v25  ;;  %v6243_v40 = vadd.f32 %v6242_v59, %v6241_v35 }
 0x8a2   :  { %5772 = vst [vmem:[#allocation17 + $0x48] sm:$0xff] %v5458_v36 }
 0x8a3   :  { %5771 = vst [vmem:[#allocation17 + $0x40] sm:$0xff] %v5645_v9  ;;  %5773 = vst [vmem:[#allocation17 + $0x50] sm:$0xff] %v5460_v61  ;;  %v5648_v42 = vadd.f32 %v6243_v40, %v9417_v50 }
 0x8a5   :  { %5774 = vst [vmem:[#allocation17 + $0x58] sm:$0xff] %v5648_v42 }
 0x8a6   :  { %v5463_v21 = vpop.f32.mrb[200].mxu0  ;;  %v6244_v8 = vpop.f32.mrb[8].mxu1 }
 0x8a7   :  { %v5464_v2 = vadd.f32 %v5463_v21, %v9412_v32  ;;  %v5465_v47 = vpop.f32.mrb[201].mxu0  ;;  %v6245_v26 = vpop.f32.mrb[9].mxu1 }
 0x8a8   :  { %v5466_v17 = vadd.f32 %v5465_v47, %v9415_v25  ;;  %v6246_v45 = vadd.f32 %v6245_v26, %v6244_v8  ;;  %v5467_v19 = vpop.f32.mrb[202].mxu0  ;;  %v6247_v18 = vpop.f32.mrb[10].mxu1 }
 0x8a9   :  { %5775 = vst [vmem:[#allocation17 + $0x60] sm:$0xff] %v5464_v2  ;;  %v5468_v1 = vadd.f32 %v5467_v19, %v9412_v32  ;;  %v5469_v23 = vpop.f32.mrb[203].mxu0  ;;  %v6248_v14 = vpop.f32.mrb[11].mxu1 }
 0x8aa   :  { %5776 = vst [vmem:[#allocation17 + $0x68] sm:$0xff] %v5466_v17  ;;  %v5653_v31 = vadd.f32 %v6246_v45, %v9417_v50  ;;  %v5470_v29 = vadd.f32 %v5469_v23, %v9415_v25  ;;  %v6249_v53 = vadd.f32 %v6248_v14, %v6247_v18 }
 0x8ab   :  { %5778 = vst [vmem:[#allocation17 + $0x78] sm:$0xff] %v5468_v1 }
 0x8ac   :  { %5777 = vst [vmem:[#allocation17 + $0x70] sm:$0xff] %v5653_v31  ;;  %5779 = vst [vmem:[#allocation17 + $0x80] sm:$0xff] %v5470_v29  ;;  %v5656_v55 = vadd.f32 %v6249_v53, %v9417_v50 }
 0x8ae   :  { %5780 = vst [vmem:[#allocation17 + $0x88] sm:$0xff] %v5656_v55 }
 0x8b1   :  { %v5473_v20 = vpop.f32.mrb[204].mxu0  ;;  %v6250_v24 = vpop.f32.mrb[12].mxu1 }
 0x8b2   :  { %v5474_v60 = vadd.f32 %v5473_v20, %v9412_v32  ;;  %v5475_v63 = vpop.f32.mrb[205].mxu0  ;;  %v6251_v48 = vpop.f32.mrb[13].mxu1 }
 0x8b3   :  { %v5476_v58 = vadd.f32 %v5475_v63, %v9415_v25  ;;  %v6252_v37 = vadd.f32 %v6251_v48, %v6250_v24  ;;  %v5477_v44 = vpop.f32.mrb[206].mxu0  ;;  %v6253_v39 = vpop.f32.mrb[14].mxu1 }
 0x8b4   :  { %5781 = vst [vmem:[#allocation17 + $0x90] sm:$0xff] %v5474_v60  ;;  %v5478_v10 = vadd.f32 %v5477_v44, %v9412_v32  ;;  %v5479_v30 = vpop.f32.mrb[207].mxu0  ;;  %v6254_v27 = vpop.f32.mrb[15].mxu1 }
 0x8b5   :  { %5782 = vst [vmem:[#allocation17 + $0x98] sm:$0xff] %v5476_v58  ;;  %v5661_v46 = vadd.f32 %v6252_v37, %v9417_v50  ;;  %v5480_v5 = vadd.f32 %v5479_v30, %v9415_v25  ;;  %v6255_v38 = vadd.f32 %v6254_v27, %v6253_v39 }
 0x8b6   :  { %5784 = vst [vmem:[#allocation17 + $0xa8] sm:$0xff] %v5478_v10 }
 0x8b7   :  { %5783 = vst [vmem:[#allocation17 + $0xa0] sm:$0xff] %v5661_v46  ;;  %5785 = vst [vmem:[#allocation17 + $0xb0] sm:$0xff] %v5480_v5  ;;  %v5664_v4 = vadd.f32 %v6255_v38, %v9417_v50 }
 0x8b9   :  { %5786 = vst [vmem:[#allocation17 + $0xb8] sm:$0xff] %v5664_v4 }
 0x8bb   :  { %v5483_v28 = vpop.f32.mrb[208].mxu0  ;;  %v6256_v33 = vpop.f32.mrb[16].mxu1 }
 0x8bc   :  { %v5484_v22 = vadd.f32 %v5483_v28, %v9412_v32  ;;  %v5485_v52 = vpop.f32.mrb[209].mxu0  ;;  %v6257_v6 = vpop.f32.mrb[17].mxu1 }
 0x8bd   :  { %v5486_v51 = vadd.f32 %v5485_v52, %v9415_v25  ;;  %v6258_v3 = vadd.f32 %v6257_v6, %v6256_v33  ;;  %v5487_v41 = vpop.f32.mrb[210].mxu0  ;;  %v6259_v16 = vpop.f32.mrb[18].mxu1 }
 0x8be   :  { %5787 = vst [vmem:[#allocation17 + $0xc0] sm:$0xff] %v5484_v22  ;;  %v5488_v34 = vadd.f32 %v5487_v41, %v9412_v32  ;;  %v5489_v12 = vpop.f32.mrb[211].mxu0  ;;  %v6260_v49 = vpop.f32.mrb[19].mxu1 }
 0x8bf   :  { %5788 = vst [vmem:[#allocation17 + $0xc8] sm:$0xff] %v5486_v51  ;;  %v5669_v54 = vadd.f32 %v6258_v3, %v9417_v50  ;;  %v5490_v7 = vadd.f32 %v5489_v12, %v9415_v25  ;;  %v6261_v56 = vadd.f32 %v6260_v49, %v6259_v16 }
 0x8c0   :  { %5790 = vst [vmem:[#allocation17 + $0xd8] sm:$0xff] %v5488_v34 }
 0x8c1   :  { %5789 = vst [vmem:[#allocation17 + $0xd0] sm:$0xff] %v5669_v54  ;;  %5791 = vst [vmem:[#allocation17 + $0xe0] sm:$0xff] %v5490_v7  ;;  %v5672_v15 = vadd.f32 %v6261_v56, %v9417_v50 }
 0x8c3   :  { %5792 = vst [vmem:[#allocation17 + $0xe8] sm:$0xff] %v5672_v15 }
 0x8c6   :  { %v5493_v43 = vpop.f32.mrb[212].mxu0  ;;  %v6262_v11 = vpop.f32.mrb[20].mxu1 }
 0x8c7   :  { %v5494_v0 = vadd.f32 %v5493_v43, %v9412_v32  ;;  %v5495_v62 = vpop.f32.mrb[213].mxu0  ;;  %v6263_v57 = vpop.f32.mrb[21].mxu1 }
 0x8c8   :  { %v5496_v35 = vadd.f32 %v5495_v62, %v9415_v25  ;;  %v6264_v36 = vadd.f32 %v6263_v57, %v6262_v11  ;;  %v5497_v13 = vpop.f32.mrb[214].mxu0  ;;  %v6265_v59 = vpop.f32.mrb[22].mxu1 }
 0x8c9   :  { %5793 = vst [vmem:[#allocation17 + $0xf0] sm:$0xff] %v5494_v0  ;;  %v5498_v9 = vadd.f32 %v5497_v13, %v9412_v32  ;;  %v5499_v61 = vpop.f32.mrb[215].mxu0  ;;  %v6266_v40 = vpop.f32.mrb[23].mxu1 }
 0x8ca   :  { %5794 = vst [vmem:[#allocation17 + $0xf8] sm:$0xff] %v5496_v35  ;;  %v5677_v42 = vadd.f32 %v6264_v36, %v9417_v50  ;;  %v5500_v21 = vadd.f32 %v5499_v61, %v9415_v25  ;;  %v6267_v8 = vadd.f32 %v6266_v40, %v6265_v59 }
 0x8cb   :  { %5796 = vst [vmem:[#allocation17 + $0x108] sm:$0xff] %v5498_v9 }
 0x8cc   :  { %5795 = vst [vmem:[#allocation17 + $0x100] sm:$0xff] %v5677_v42  ;;  %5797 = vst [vmem:[#allocation17 + $0x110] sm:$0xff] %v5500_v21  ;;  %v5680_v2 = vadd.f32 %v6267_v8, %v9417_v50 }
 0x8ce   :  { %5798 = vst [vmem:[#allocation17 + $0x118] sm:$0xff] %v5680_v2 }
 0x8d0   :  { %v5503_v47 = vpop.f32.mrb[216].mxu0  ;;  %v6268_v26 = vpop.f32.mrb[24].mxu1 }
 0x8d1   :  { %v5504_v17 = vadd.f32 %v5503_v47, %v9412_v32  ;;  %v5505_v45 = vpop.f32.mrb[217].mxu0  ;;  %v6269_v19 = vpop.f32.mrb[25].mxu1 }
 0x8d2   :  { %v5506_v18 = vadd.f32 %v5505_v45, %v9415_v25  ;;  %v6270_v1 = vadd.f32 %v6269_v19, %v6268_v26  ;;  %v5507_v23 = vpop.f32.mrb[218].mxu0  ;;  %v6271_v14 = vpop.f32.mrb[26].mxu1 }
 0x8d3   :  { %5799 = vst [vmem:[#allocation17 + $0x120] sm:$0xff] %v5504_v17  ;;  %v5508_v31 = vadd.f32 %v5507_v23, %v9412_v32  ;;  %v5509_v29 = vpop.f32.mrb[219].mxu0  ;;  %v6272_v53 = vpop.f32.mrb[27].mxu1 }
 0x8d4   :  { %5800 = vst [vmem:[#allocation17 + $0x128] sm:$0xff] %v5506_v18  ;;  %v5685_v55 = vadd.f32 %v6270_v1, %v9417_v50  ;;  %v5510_v20 = vadd.f32 %v5509_v29, %v9415_v25  ;;  %v6273_v24 = vadd.f32 %v6272_v53, %v6271_v14 }
 0x8d5   :  { %5802 = vst [vmem:[#allocation17 + $0x138] sm:$0xff] %v5508_v31 }
 0x8d6   :  { %5801 = vst [vmem:[#allocation17 + $0x130] sm:$0xff] %v5685_v55  ;;  %5803 = vst [vmem:[#allocation17 + $0x140] sm:$0xff] %v5510_v20  ;;  %v5688_v60 = vadd.f32 %v6273_v24, %v9417_v50 }
 0x8d8   :  { %5804 = vst [vmem:[#allocation17 + $0x148] sm:$0xff] %v5688_v60 }
 0x8db   :  { %v5513_v63 = vpop.f32.mrb[220].mxu0  ;;  %v6274_v48 = vpop.f32.mrb[28].mxu1 }
 0x8dc   :  { %v5514_v58 = vadd.f32 %v5513_v63, %v9412_v32  ;;  %v5515_v37 = vpop.f32.mrb[221].mxu0  ;;  %v6275_v44 = vpop.f32.mrb[29].mxu1 }
 0x8dd   :  { %v5516_v39 = vadd.f32 %v5515_v37, %v9415_v25  ;;  %v6276_v10 = vadd.f32 %v6275_v44, %v6274_v48  ;;  %v5517_v30 = vpop.f32.mrb[222].mxu0  ;;  %v6277_v27 = vpop.f32.mrb[30].mxu1 }
 0x8de   :  { %5805 = vst [vmem:[#allocation17 + $0x150] sm:$0xff] %v5514_v58  ;;  %v5518_v46 = vadd.f32 %v5517_v30, %v9412_v32  ;;  %v5519_v5 = vpop.f32.mrb[223].mxu0  ;;  %v6278_v38 = vpop.f32.mrb[31].mxu1 }
 0x8df   :  { %5806 = vst [vmem:[#allocation17 + $0x158] sm:$0xff] %v5516_v39  ;;  %v5693_v4 = vadd.f32 %v6276_v10, %v9417_v50  ;;  %v5520_v28 = vadd.f32 %v5519_v5, %v9415_v25  ;;  %v6279_v33 = vadd.f32 %v6278_v38, %v6277_v27 }
 0x8e0   :  { %5808 = vst [vmem:[#allocation17 + $0x168] sm:$0xff] %v5518_v46 }
 0x8e1   :  { %5807 = vst [vmem:[#allocation17 + $0x160] sm:$0xff] %v5693_v4  ;;  %5809 = vst [vmem:[#allocation17 + $0x170] sm:$0xff] %v5520_v28  ;;  %v5696_v22 = vadd.f32 %v6279_v33, %v9417_v50 }
 0x8e3   :  { %5810 = vst [vmem:[#allocation17 + $0x178] sm:$0xff] %v5696_v22 }
 0x8e5   :  { %v5523_v52 = vpop.f32.mrb[224].mxu0  ;;  %v6280_v6 = vpop.f32.mrb[32].mxu1 }
 0x8e6   :  { %v5524_v51 = vadd.f32 %v5523_v52, %v9412_v32  ;;  %v5525_v3 = vpop.f32.mrb[225].mxu0  ;;  %v6281_v41 = vpop.f32.mrb[33].mxu1 }
 0x8e7   :  { %v5526_v16 = vadd.f32 %v5525_v3, %v9415_v25  ;;  %v6282_v34 = vadd.f32 %v6281_v41, %v6280_v6  ;;  %v5527_v12 = vpop.f32.mrb[226].mxu0  ;;  %v6283_v49 = vpop.f32.mrb[34].mxu1 }
 0x8e8   :  { %5811 = vst [vmem:[#allocation17 + $0x180] sm:$0xff] %v5524_v51  ;;  %v5528_v54 = vadd.f32 %v5527_v12, %v9412_v32  ;;  %v5529_v7 = vpop.f32.mrb[227].mxu0  ;;  %v6284_v56 = vpop.f32.mrb[35].mxu1 }
 0x8e9   :  { %5812 = vst [vmem:[#allocation17 + $0x188] sm:$0xff] %v5526_v16  ;;  %v5701_v15 = vadd.f32 %v6282_v34, %v9417_v50  ;;  %v5530_v43 = vadd.f32 %v5529_v7, %v9415_v25  ;;  %v6285_v11 = vadd.f32 %v6284_v56, %v6283_v49 }
 0x8ea   :  { %5814 = vst [vmem:[#allocation17 + $0x198] sm:$0xff] %v5528_v54 }
 0x8eb   :  { %5813 = vst [vmem:[#allocation17 + $0x190] sm:$0xff] %v5701_v15  ;;  %5815 = vst [vmem:[#allocation17 + $0x1a0] sm:$0xff] %v5530_v43  ;;  %v5704_v0 = vadd.f32 %v6285_v11, %v9417_v50 }
 0x8ed   :  { %5816 = vst [vmem:[#allocation17 + $0x1a8] sm:$0xff] %v5704_v0 }
 0x8f8   :  { %v5533_v62 = vpop.f32.mrb[228].mxu0  ;;  %v6286_v57 = vpop.f32.mrb[36].mxu1 }
 0x8f9   :  { %v5534_v35 = vadd.f32 %v5533_v62, %v9412_v32  ;;  %v5535_v36 = vpop.f32.mrb[229].mxu0  ;;  %v6287_v13 = vpop.f32.mrb[37].mxu1 }
 0x8fa   :  { %v5536_v59 = vadd.f32 %v5535_v36, %v9415_v25  ;;  %v6288_v9 = vadd.f32 %v6287_v13, %v6286_v57  ;;  %v5537_v61 = vpop.f32.mrb[230].mxu0  ;;  %v6289_v40 = vpop.f32.mrb[38].mxu1 }
 0x8fb   :  { %5817 = vst [vmem:[#allocation17 + $0x1b0] sm:$0xff] %v5534_v35  ;;  %v5538_v42 = vadd.f32 %v5537_v61, %v9412_v32  ;;  %v5539_v21 = vpop.f32.mrb[231].mxu0  ;;  %v6290_v8 = vpop.f32.mrb[39].mxu1 }
 0x8fc   :  { %5818 = vst [vmem:[#allocation17 + $0x1b8] sm:$0xff] %v5536_v59  ;;  %v5709_v2 = vadd.f32 %v6288_v9, %v9417_v50  ;;  %v5540_v47 = vadd.f32 %v5539_v21, %v9415_v25  ;;  %v6291_v26 = vadd.f32 %v6290_v8, %v6289_v40 }
 0x8fd   :  { %5820 = vst [vmem:[#allocation17 + $0x1c8] sm:$0xff] %v5538_v42 }
 0x8fe   :  { %5819 = vst [vmem:[#allocation17 + $0x1c0] sm:$0xff] %v5709_v2  ;;  %5821 = vst [vmem:[#allocation17 + $0x1d0] sm:$0xff] %v5540_v47  ;;  %v5712_v17 = vadd.f32 %v6291_v26, %v9417_v50 }
 0x900   :  { %5822 = vst [vmem:[#allocation17 + $0x1d8] sm:$0xff] %v5712_v17 }
 0x907   :  { %v5543_v45 = vpop.f32.mrb[232].mxu0  ;;  %v6292_v19 = vpop.f32.mrb[40].mxu1 }
 0x908   :  { %v5544_v18 = vadd.f32 %v5543_v45, %v9412_v32  ;;  %v5545_v1 = vpop.f32.mrb[233].mxu0  ;;  %v6293_v23 = vpop.f32.mrb[41].mxu1 }
 0x909   :  { %v5546_v14 = vadd.f32 %v5545_v1, %v9415_v25  ;;  %v6294_v31 = vadd.f32 %v6293_v23, %v6292_v19  ;;  %v5547_v29 = vpop.f32.mrb[234].mxu0  ;;  %v6295_v53 = vpop.f32.mrb[42].mxu1 }
 0x90a   :  { %5823 = vst [vmem:[#allocation17 + $0x1e0] sm:$0xff] %v5544_v18  ;;  %v5548_v55 = vadd.f32 %v5547_v29, %v9412_v32  ;;  %v5549_v20 = vpop.f32.mrb[235].mxu0  ;;  %v6296_v24 = vpop.f32.mrb[43].mxu1 }
 0x90b   :  { %5824 = vst [vmem:[#allocation17 + $0x1e8] sm:$0xff] %v5546_v14  ;;  %v5717_v60 = vadd.f32 %v6294_v31, %v9417_v50  ;;  %v5550_v63 = vadd.f32 %v5549_v20, %v9415_v25  ;;  %v6297_v48 = vadd.f32 %v6296_v24, %v6295_v53 }
 0x90c   :  { %5826 = vst [vmem:[#allocation17 + $0x1f8] sm:$0xff] %v5548_v55 }
 0x90d   :  { %5825 = vst [vmem:[#allocation17 + $0x1f0] sm:$0xff] %v5717_v60  ;;  %5827 = vst [vmem:[#allocation17 + $0x200] sm:$0xff] %v5550_v63  ;;  %v5720_v58 = vadd.f32 %v6297_v48, %v9417_v50 }
 0x90f   :  { %5828 = vst [vmem:[#allocation17 + $0x208] sm:$0xff] %v5720_v58  ;;  %v5553_v37 = vpop.f32.mrb[236].mxu0  ;;  %v6298_v44 = vpop.f32.mrb[44].mxu1 }
 0x910   :  { %v5554_v39 = vadd.f32 %v5553_v37, %v9412_v32  ;;  %v5555_v10 = vpop.f32.mrb[237].mxu0  ;;  %v6299_v30 = vpop.f32.mrb[45].mxu1 }
 0x911   :  { %v5556_v27 = vadd.f32 %v5555_v10, %v9415_v25  ;;  %v6300_v46 = vadd.f32 %v6299_v30, %v6298_v44  ;;  %v5557_v5 = vpop.f32.mrb[238].mxu0  ;;  %v6301_v38 = vpop.f32.mrb[46].mxu1 }
 0x912   :  { %5829 = vst [vmem:[#allocation17 + $0x210] sm:$0xff] %v5554_v39  ;;  %v5558_v4 = vadd.f32 %v5557_v5, %v9412_v32  ;;  %v5559_v28 = vpop.f32.mrb[239].mxu0  ;;  %v6302_v33 = vpop.f32.mrb[47].mxu1 }
 0x913   :  { %5830 = vst [vmem:[#allocation17 + $0x218] sm:$0xff] %v5556_v27  ;;  %v5725_v22 = vadd.f32 %v6300_v46, %v9417_v50  ;;  %v5560_v52 = vadd.f32 %v5559_v28, %v9415_v25  ;;  %v6303_v6 = vadd.f32 %v6302_v33, %v6301_v38 }
 0x914   :  { %5832 = vst [vmem:[#allocation17 + $0x228] sm:$0xff] %v5558_v4 }
 0x915   :  { %5831 = vst [vmem:[#allocation17 + $0x220] sm:$0xff] %v5725_v22  ;;  %5833 = vst [vmem:[#allocation17 + $0x230] sm:$0xff] %v5560_v52  ;;  %v5728_v51 = vadd.f32 %v6303_v6, %v9417_v50 }
 0x917   :  { %5834 = vst [vmem:[#allocation17 + $0x238] sm:$0xff] %v5728_v51  ;;  %v5563_v3 = vpop.f32.mrb[240].mxu0  ;;  %v6304_v41 = vpop.f32.mrb[48].mxu1 }
 0x918   :  { %v5564_v16 = vadd.f32 %v5563_v3, %v9412_v32  ;;  %v5565_v34 = vpop.f32.mrb[241].mxu0  ;;  %v6305_v12 = vpop.f32.mrb[49].mxu1 }
 0x919   :  { %v5566_v49 = vadd.f32 %v5565_v34, %v9415_v25  ;;  %v6306_v54 = vadd.f32 %v6305_v12, %v6304_v41  ;;  %v5567_v7 = vpop.f32.mrb[242].mxu0  ;;  %v6307_v56 = vpop.f32.mrb[50].mxu1 }
 0x91a   :  { %5835 = vst [vmem:[#allocation17 + $0x240] sm:$0xff] %v5564_v16  ;;  %v5568_v15 = vadd.f32 %v5567_v7, %v9412_v32  ;;  %v5569_v43 = vpop.f32.mrb[243].mxu0  ;;  %v6308_v11 = vpop.f32.mrb[51].mxu1 }
 0x91b   :  { %5836 = vst [vmem:[#allocation17 + $0x248] sm:$0xff] %v5566_v49  ;;  %v5733_v0 = vadd.f32 %v6306_v54, %v9417_v50  ;;  %v5570_v62 = vadd.f32 %v5569_v43, %v9415_v25  ;;  %v6309_v57 = vadd.f32 %v6308_v11, %v6307_v56 }
 0x91c   :  { %5838 = vst [vmem:[#allocation17 + $0x258] sm:$0xff] %v5568_v15 }
 0x91d   :  { %5837 = vst [vmem:[#allocation17 + $0x250] sm:$0xff] %v5733_v0  ;;  %5839 = vst [vmem:[#allocation17 + $0x260] sm:$0xff] %v5570_v62  ;;  %v5736_v35 = vadd.f32 %v6309_v57, %v9417_v50 }
 0x91f   :  { %5840 = vst [vmem:[#allocation17 + $0x268] sm:$0xff] %v5736_v35  ;;  %v5573_v36 = vpop.f32.mrb[244].mxu0  ;;  %v6310_v13 = vpop.f32.mrb[52].mxu1 }
 0x920   :  { %v5574_v59 = vadd.f32 %v5573_v36, %v9412_v32  ;;  %v5575_v9 = vpop.f32.mrb[245].mxu0  ;;  %v6311_v61 = vpop.f32.mrb[53].mxu1 }
 0x921   :  { %v5576_v40 = vadd.f32 %v5575_v9, %v9415_v25  ;;  %v6312_v42 = vadd.f32 %v6311_v61, %v6310_v13  ;;  %v5577_v21 = vpop.f32.mrb[246].mxu0  ;;  %v6313_v8 = vpop.f32.mrb[54].mxu1 }
 0x922   :  { %5841 = vst [vmem:[#allocation17 + $0x270] sm:$0xff] %v5574_v59  ;;  %v5578_v2 = vadd.f32 %v5577_v21, %v9412_v32  ;;  %v5579_v47 = vpop.f32.mrb[247].mxu0  ;;  %v6314_v26 = vpop.f32.mrb[55].mxu1 }
 0x923   :  { %5842 = vst [vmem:[#allocation17 + $0x278] sm:$0xff] %v5576_v40  ;;  %v5741_v17 = vadd.f32 %v6312_v42, %v9417_v50  ;;  %v5580_v45 = vadd.f32 %v5579_v47, %v9415_v25  ;;  %v6315_v19 = vadd.f32 %v6314_v26, %v6313_v8 }
 0x924   :  { %5844 = vst [vmem:[#allocation17 + $0x288] sm:$0xff] %v5578_v2 }
 0x925   :  { %5843 = vst [vmem:[#allocation17 + $0x280] sm:$0xff] %v5741_v17  ;;  %5845 = vst [vmem:[#allocation17 + $0x290] sm:$0xff] %v5580_v45  ;;  %v5744_v18 = vadd.f32 %v6315_v19, %v9417_v50 }
 0x927   :  { %5846 = vst [vmem:[#allocation17 + $0x298] sm:$0xff] %v5744_v18  ;;  %v5583_v1 = vpop.f32.mrb[248].mxu0  ;;  %v6316_v23 = vpop.f32.mrb[56].mxu1 }
 0x928   :  { %v5584_v14 = vadd.f32 %v5583_v1, %v9412_v32  ;;  %v5585_v31 = vpop.f32.mrb[249].mxu0  ;;  %v6317_v29 = vpop.f32.mrb[57].mxu1 }
 0x929   :  { %v5586_v53 = vadd.f32 %v5585_v31, %v9415_v25  ;;  %v6318_v55 = vadd.f32 %v6317_v29, %v6316_v23  ;;  %v5587_v20 = vpop.f32.mrb[250].mxu0  ;;  %v6319_v24 = vpop.f32.mrb[58].mxu1 }
 0x92a   :  { %5847 = vst [vmem:[#allocation17 + $0x2a0] sm:$0xff] %v5584_v14  ;;  %v5588_v60 = vadd.f32 %v5587_v20, %v9412_v32  ;;  %v5589_v63 = vpop.f32.mrb[251].mxu0  ;;  %v6320_v48 = vpop.f32.mrb[59].mxu1 }
 0x92b   :  { %5848 = vst [vmem:[#allocation17 + $0x2a8] sm:$0xff] %v5586_v53  ;;  %v5749_v58 = vadd.f32 %v6318_v55, %v9417_v50  ;;  %v5590_v37 = vadd.f32 %v5589_v63, %v9415_v25  ;;  %v6321_v44 = vadd.f32 %v6320_v48, %v6319_v24 }
 0x92c   :  { %5850 = vst [vmem:[#allocation17 + $0x2b8] sm:$0xff] %v5588_v60 }
 0x92d   :  { %5849 = vst [vmem:[#allocation17 + $0x2b0] sm:$0xff] %v5749_v58  ;;  %5851 = vst [vmem:[#allocation17 + $0x2c0] sm:$0xff] %v5590_v37  ;;  %v5752_v39 = vadd.f32 %v6321_v44, %v9417_v50 }
 0x92f   :  { %5852 = vst [vmem:[#allocation17 + $0x2c8] sm:$0xff] %v5752_v39  ;;  %v5593_v10 = vpop.f32.mrb[252].mxu0  ;;  %v6322_v30 = vpop.f32.mrb[60].mxu1 }
 0x930   :  { %v5594_v27 = vadd.f32 %v5593_v10, %v9412_v32  ;;  %v5595_v46 = vpop.f32.mrb[253].mxu0  ;;  %v6323_v5 = vpop.f32.mrb[61].mxu1 }
 0x931   :  { %v5596_v38 = vadd.f32 %v5595_v46, %v9415_v25  ;;  %v6324_v4 = vadd.f32 %v6323_v5, %v6322_v30  ;;  %v5597_v28 = vpop.f32.mrb[254].mxu0  ;;  %v6325_v33 = vpop.f32.mrb[62].mxu1 }
 0x932   :  { %5853 = vst [vmem:[#allocation17 + $0x2d0] sm:$0xff] %v5594_v27  ;;  %v5598_v22 = vadd.f32 %v5597_v28, %v9412_v32  ;;  %v5599_v52 = vpop.f32.mrb[255].mxu0  ;;  %v6326_v6 = vpop.f32.mrb[63].mxu1 }
 0x933   :  { %5854 = vst [vmem:[#allocation17 + $0x2d8] sm:$0xff] %v5596_v38  ;;  %v5757_v51 = vadd.f32 %v6324_v4, %v9417_v50  ;;  %v5600_v3 = vadd.f32 %v5599_v52, %v9415_v25  ;;  %v6327_v41 = vadd.f32 %v6326_v6, %v6325_v33 }
 0x934   :  { %5856 = vst [vmem:[#allocation17 + $0x2e8] sm:$0xff] %v5598_v22 }
 0x935   :  { %5855 = vst [vmem:[#allocation17 + $0x2e0] sm:$0xff] %v5757_v51  ;;  %5857 = vst [vmem:[#allocation17 + $0x2f0] sm:$0xff] %v5600_v3  ;;  %v5760_v16 = vadd.f32 %v6327_v41, %v9417_v50 }
 0x937   :  { %5858 = vst [vmem:[#allocation17 + $0x2f8] sm:$0xff] %v5760_v16 }
 0x938   :  { %7426 = shalt.err (!%p7423_p6)
}
 0x939   :  { %s9562_s25 = sld [smem:[#allocation29_spill]] }
 0x93f   :  { %s7427_s3 = scalar_lea.hbm %s9562_s25, 12288 }
 0x940   :  { %p7428_p7 = scmp.ne.s32.totalorder %s9562_s25, %s7427_s3  ;;  %p7431_p8 = scmp.lt.u32.totalorder %s7427_s3, %s9562_s25 }
 0x942   :  { %p7433_p9 = pnand %p7431_p8, %p7428_p7 }
 0x944   :  { %7436 = shalt.err (!%p7433_p9)
}
 0x945   :  { %s7464_s17 = smov 384   ;;  %s7465_s11 = smov 24  }
 0x946   :  { %5870 = dma.vmem_to_hbm [thread:$0]  %s5865_s7, 12288, %s9562_s25, [#allocation4], %s7464_s17, %s7464_s17, %s7465_s11  }
 0x947   :  { %7447 = dma.done.wait [#allocation4], 12288  }
 0x948   :  { %7448 = vsyncadd [#allocation4], 4294955008 }
 0x949   :  { %5874 = vsyncpa [#allocation3], 1 }
 0x94a   :  { %5875 = vsyncpa [#allocation6], 1 }
 0x94b   :  { %5876 = vsyncpa [#allocation9], 1 }
 0x94c   :  { %5877 = vsyncpa [#allocation12], 1 }
 0x94d   :  { %5878 = vsyncpa [#allocation15], 1 }
 0x94e   :  { %5879 = vsyncpa [#allocation4], 1 }

</bundles_post_ra>
